<compile_context>
chip_gen: v7x
topology: tpu7x:2x2x1
jax: 0.10.0
libtpu: 0.0.40
codegen_flags: <defaults>
</compile_context>

<pallas_src>
import jax
import jax.numpy as jnp
from jax.experimental import pallas as pl
from jax.experimental.pallas import tpu as pltpu


# ----------------------------- Pallas kernels ------------------------------


def _conv_stage_kernel(p1_ref, w1_ref, b1_ref, w2_ref, b2_ref, o_ref,
                       a1_s, a2_s):
    # p1_ref: (1, 676, 9) f32   im2col rows of one 28x28 image (26x26 positions)
    # w1_ref: (9, 32) f32       conv1 taps;  b1_ref: (1, 32) f32
    # w2_ref: (9, 32, 64) f32   conv2 taps;  b2_ref: (1, 64) f32
    # o_ref : (1, 12, 12, 64) f32  pooled output
    # a1_s  : VMEM (676, 32) f32   conv1 activation, rows p = 26*i + j
    # a2_s  : VMEM (622, 64) f32   conv2 activation, rows p = 26*i + j (j<24 valid)

    # ---- conv1 + ReLU: one (676, 9) @ (9, 32) MXU matmul --------------------
    a1 = jnp.dot(p1_ref[0], w1_ref[...], preferred_element_type=jnp.float32)
    a1_s[...] = jnp.maximum(a1 + b1_ref[...], 0.0)

    # ---- conv2 + ReLU: 9 shifted-slice matmuls accumulated in VMEM ----------
    # For tap (kh, kw) the needed rows of a1 are p + 26*kh + kw; rows whose
    # width index j >= 24 produce garbage that the pool below never reads.
    acc = jnp.dot(a1_s[pl.ds(0, 622), :], w2_ref[0],
                  preferred_element_type=jnp.float32)
    for t in range(1, 9):
        kh, kw = t // 3, t % 3
        lhs = a1_s[pl.ds(kh * 26 + kw, 622), :]              # (622, 32)
        acc = acc + jnp.dot(lhs, w2_ref[t],
                            preferred_element_type=jnp.float32)
    a2_s[...] = jnp.maximum(acc + b2_ref[...], 0.0)          # (622, 64)

    # ---- 2x2 max pool: 4 strided slices per output row block ---------------
    # a2 rows are p = 26*i + j; pooled(io, jo) = max over rows
    #   {52*io + 2*jo, +1, +26, +27}.
    for io in range(12):
        base = 52 * io
        p00 = a2_s[pl.ds(base, 12, stride=2), :]              # (12, 64)
        p01 = a2_s[pl.ds(base + 1, 12, stride=2), :]
        p10 = a2_s[pl.ds(base + 26, 12, stride=2), :]
        p11 = a2_s[pl.ds(base + 27, 12, stride=2), :]
        o_ref[0, io] = jnp.maximum(jnp.maximum(p00, p01),
                                   jnp.maximum(p10, p11))


def _fc_head_kernel(x_ref, w1_ref, b1_ref, w2_ref, b2_ref, o_ref):
    # x_ref : (B, 9216) f32     flattened pooled activations (whole batch = M)
    # w1_ref: (9216, 128) bf16  fc1 weight (bf16 halves the biggest DMA)
    # b1_ref: (1, 128) f32
    # w2_ref: (128, 10) f32     fc2 weight (tiny, fused -> no N=10-only kernel)
    # b2_ref: (1, 10) f32
    # o_ref : (B, 10) f32       log-probabilities
    x = x_ref[...].astype(jnp.bfloat16)                       # MXU-native bf16
    h = jnp.dot(x, w1_ref[...], preferred_element_type=jnp.float32)
    h = jnp.maximum(h + b1_ref[...], 0.0)                     # (B, 128) f32
    logits = jnp.dot(h, w2_ref[...],
                     preferred_element_type=jnp.float32) + b2_ref[...]
    m = jnp.max(logits, axis=-1, keepdims=True)
    s = logits - m
    lse = jnp.log(jnp.sum(jnp.exp(s), axis=-1, keepdims=True))
    o_ref[...] = (s - lse).astype(o_ref.dtype)


# ------------------------------ kernel wrappers -----------------------------


def conv_stage(p1, w1, b1, w2, b2):
    """p1: (B, 676, 9) f32 im2col rows.  Returns pooled (B, 12, 12, 64) f32."""
    B = p1.shape[0]
    return pl.pallas_call(
        _conv_stage_kernel,
        out_shape=jax.ShapeDtypeStruct((B, 12, 12, 64), jnp.float32),
        grid=(B,),
        in_specs=[
            pl.BlockSpec((1, 676, 9), lambda b: (b, 0, 0)),
            pl.BlockSpec((9, 32), lambda b: (0, 0)),
            pl.BlockSpec((1, 32), lambda b: (0, 0)),
            pl.BlockSpec((9, 32, 64), lambda b: (0, 0, 0)),
            pl.BlockSpec((1, 64), lambda b: (0, 0)),
        ],
        out_specs=pl.BlockSpec((1, 12, 12, 64), lambda b: (b, 0, 0, 0)),
        scratch_shapes=[
            pltpu.VMEM((676, 32), jnp.float32),   # conv1 activation
            pltpu.VMEM((622, 64), jnp.float32),   # conv2 activation
        ],
        compiler_params=pltpu.CompilerParams(
            dimension_semantics=("parallel",),    # >=2 steps -> both TCs on v7x
        ),
    )(p1, w1, b1, w2, b2)


def fc_head(xf, w1, b1, w2, b2):
    """xf: (B, 9216) f32.  Returns log-probs (B, 10) f32."""
    B = xf.shape[0]
    # NOTE: for large B the M dimension should be tiled into >=2 blocks (v7x
    # TC sharding); with tiny B a single step is optimal and B*fewer GEMVs.
    return pl.pallas_call(
        _fc_head_kernel,
        out_shape=jax.ShapeDtypeStruct((B, 10), jnp.float32),
        grid=(1,),
        in_specs=[
            pl.BlockSpec((B, 9216), lambda i: (0, 0)),
            pl.BlockSpec((9216, 128), lambda i: (0, 0)),
            pl.BlockSpec((1, 128), lambda i: (0, 0)),
            pl.BlockSpec((128, 10), lambda i: (0, 0)),
            pl.BlockSpec((1, 10), lambda i: (0, 0)),
        ],
        out_specs=pl.BlockSpec((B, 10), lambda i: (0, 0)),
        compiler_params=pltpu.CompilerParams(
            dimension_semantics=("arbitrary",),
        ),
    )(xf, w1, b1, w2, b2)


# ------------------------------- parameters --------------------------------


def init_params(key):
    """Deterministic synthetic parameters matching the PyTorch module shapes."""
    ks = jax.random.split(key, 8)
    # PyTorch-layout parameters (as nn.Conv2d / nn.Linear store them).
    w1_pt = jax.random.normal(ks[0], (32, 1, 3, 3), jnp.float32) * 0.10
    b1 = jax.random.normal(ks[1], (32,), jnp.float32) * 0.10
    w2_pt = jax.random.normal(ks[2], (64, 32, 3, 3), jnp.float32) * 0.05
    b2 = jax.random.normal(ks[3], (64,), jnp.float32) * 0.05
    wfc1_pt = jax.random.normal(ks[4], (128, 9216), jnp.float32) * 0.01
    bfc1 = jax.random.normal(ks[5], (128,), jnp.float32) * 0.01
    wfc2_pt = jax.random.normal(ks[6], (10, 128), jnp.float32) * 0.05
    bfc2 = jax.random.normal(ks[7], (10,), jnp.float32) * 0.05

    # Conv weights in tap-stacked matmul form (tap index t = kh*3 + kw).
    w1m = jnp.transpose(w1_pt[:, 0, :, :], (1, 2, 0)).reshape(9, 32)      # (9, 32)
    w2s = jnp.transpose(w2_pt, (2, 3, 1, 0)).reshape(9, 32, 64)           # (9, 32, 64)

    # fc1: torch flattens NCHW -> column index c*144 + i*12 + j.
    # Our pooled flatten order is i*(12*64) + j*64 + c; permute columns.
    ii, jj, cc = jnp.meshgrid(
        jnp.arange(12), jnp.arange(12), jnp.arange(64), indexing="ij"
    )
    perm = (cc * 144 + ii * 12 + jj).reshape(-1)      # ours-index -> torch-index
    wfc1 = wfc1_pt[:, perm].T.astype(jnp.bfloat16)    # (9216, 128) bf16
    wfc2 = wfc2_pt.T                                  # (128, 10) f32

    return dict(
        w1m=w1m, b1=b1.reshape(1, 32),
        w2s=w2s, b2=b2.reshape(1, 64),
        wfc1=wfc1, bfc1=bfc1.reshape(1, 128),
        wfc2=wfc2, bfc2=bfc2.reshape(1, 10),
    )


# --------------------------------- forward ----------------------------------


@jax.jit
def net_forward(x, params):
    """x: (B, 1, 28, 28) float32 (NCHW, as PyTorch) -> log-probs (B, 10)."""
    B = x.shape[0]
    img = x[:, 0, :, :]                                            # (B, 28, 28)

    # conv1 im2col rows (cheap XLA glue, ~24 KB/image); tap order t = kh*3+kw.
    p1 = jnp.stack(
        [img[:, kh:kh + 26, kw:kw + 26] for kh in range(3) for kw in range(3)],
        axis=-1,
    ).reshape(B, 26 * 26, 9)                                       # (B, 676, 9)

    # conv1 + ReLU + conv2 + ReLU + maxpool, fully fused per image.
    pooled = conv_stage(p1, params["w1m"], params["b1"],
                        params["w2s"], params["b2"])               # (B, 12, 12, 64)

    # dropout1 / dropout2: identity in inference mode.

    # flatten (free metadata reshape) + fc1 + ReLU + fc2 + log_softmax, fused.
    xf = pooled.reshape(B, 12 * 12 * 64)                           # (B, 9216)
    return fc_head(xf, params["wfc1"], params["bfc1"],
                   params["wfc2"], params["bfc2"])                 # (B, 10)


# ----------------------------------- main ------------------------------------


if __name__ == "__main__":
    key = jax.random.PRNGKey(0)
    pkey, xkey = jax.random.split(key)
    params = init_params(pkey)

    # 28x28 single-channel input is required by fc1 (9216 = 64 * 12 * 12).
    x = jax.random.normal(xkey, (2, 1, 28, 28), jnp.float32)

    out = jax.block_until_ready(net_forward(x, params))

    assert out.shape == (2, 10)
    assert bool(jnp.all(jnp.isfinite(out)))
    # log_softmax rows must exponentiate-sum to ~1.
    assert bool(jnp.allclose(jnp.sum(jnp.exp(out), axis=1), 1.0, atol=1e-4))

    print("KERNEL_OK")
</pallas_src>

<mosaic_0001>
module attributes {stable_mosaic.version = 11 : i64} {
  func.func @_conv_stage_kernel(%arg0: i32, %arg1: memref<1x676x9xf32, #tpu.memory_space<vmem>>, %arg2: memref<9x32xf32, #tpu.memory_space<vmem>>, %arg3: memref<1x32xf32, #tpu.memory_space<vmem>>, %arg4: memref<9x32x64xf32, #tpu.memory_space<vmem>>, %arg5: memref<1x64xf32, #tpu.memory_space<vmem>>, %arg6: memref<1x12x12x64xf32, #tpu.memory_space<vmem>>, %arg7: memref<676x32xf32, #tpu.memory_space<vmem>>, %arg8: memref<622x64xf32, #tpu.memory_space<vmem>>) attributes {dimension_semantics = [#tpu.dimension_semantics<parallel>], iteration_bounds = array<i64: 2>, scalar_prefetch = 0 : i64, scratch_operands = 2 : i64, tpu.core_type = #tpu.core_type<tc>, window_params = [{transform_indices = @transform_0, window_bounds = array<i64: 1, 676, 9>}, {pipeline_mode = #tpu.pipeline_mode<synchronous>, transform_indices = @transform_1, window_bounds = array<i64: 9, 32>}, {pipeline_mode = #tpu.pipeline_mode<synchronous>, transform_indices = @transform_2, window_bounds = array<i64: 1, 32>}, {pipeline_mode = #tpu.pipeline_mode<synchronous>, transform_indices = @transform_3, window_bounds = array<i64: 9, 32, 64>}, {pipeline_mode = #tpu.pipeline_mode<synchronous>, transform_indices = @transform_4, window_bounds = array<i64: 1, 64>}, {transform_indices = @transform_5, window_bounds = array<i64: 1, 12, 12, 64>}]} {
    %c0 = arith.constant 0 : index
    %c0_0 = arith.constant 0 : index
    %c0_1 = arith.constant 0 : index
    %0 = vector.load %arg1[%c0, %c0_0, %c0_1] : memref<1x676x9xf32, #tpu.memory_space<vmem>>, vector<1x676x9xf32>
    %1 = vector.shape_cast %0 : vector<1x676x9xf32> to vector<676x9xf32>
    %c0_2 = arith.constant 0 : index
    %c0_3 = arith.constant 0 : index
    %2 = vector.load %arg2[%c0_2, %c0_3] : memref<9x32xf32, #tpu.memory_space<vmem>>, vector<9x32xf32>
    %cst = arith.constant dense<0.000000e+00> : vector<676x32xf32>
    %3 = tpu.matmul %1, %2, %cst {dimension_numbers = #tpu.dot_dimension_numbers<[1], [0], [0], [1], [0, 0, 1, 1], [], []>} : vector<676x9xf32>, vector<9x32xf32>, vector<676x32xf32> -> vector<676x32xf32>
    %c0_4 = arith.constant 0 : index
    %c0_5 = arith.constant 0 : index
    %4 = vector.load %arg3[%c0_4, %c0_5] : memref<1x32xf32, #tpu.memory_space<vmem>>, vector<1x32xf32>
    %5 = vector.broadcast %4 : vector<1x32xf32> to vector<676x32xf32>
    %6 = arith.addf %3, %5 : vector<676x32xf32>
    %cst_6 = arith.constant 0.000000e+00 : f32
    %7 = vector.broadcast %cst_6 : f32 to vector<676x32xf32>
    %8 = arith.maximumf %6, %7 : vector<676x32xf32>
    %c0_7 = arith.constant 0 : index
    %c0_8 = arith.constant 0 : index
    %9 = vector.load %arg7[%c0_7, %c0_8] : memref<676x32xf32, #tpu.memory_space<vmem>>, vector<676x32xf32>
    tpu.vector_store %arg7[%c0_7, %c0_8], %8 {strides = array<i32>} : memref<676x32xf32, #tpu.memory_space<vmem>>, vector<676x32xf32>,
    %c0_9 = arith.constant 0 : index
    %c0_10 = arith.constant 0 : index
    %10 = vector.load %arg7[%c0_9, %c0_10] : memref<676x32xf32, #tpu.memory_space<vmem>>, vector<622x32xf32>
    %c0_11 = arith.constant 0 : index
    %c0_12 = arith.constant 0 : index
    %c0_13 = arith.constant 0 : index
    %11 = vector.load %arg4[%c0_11, %c0_12, %c0_13] : memref<9x32x64xf32, #tpu.memory_space<vmem>>, vector<1x32x64xf32>
    %12 = vector.shape_cast %11 : vector<1x32x64xf32> to vector<32x64xf32>
    %cst_14 = arith.constant dense<0.000000e+00> : vector<622x64xf32>
    %13 = tpu.matmul %10, %12, %cst_14 {dimension_numbers = #tpu.dot_dimension_numbers<[1], [0], [0], [1], [0, 0, 1, 1], [], []>} : vector<622x32xf32>, vector<32x64xf32>, vector<622x64xf32> -> vector<622x64xf32>
    %c1 = arith.constant 1 : index
    %c0_15 = arith.constant 0 : index
    %14 = vector.load %arg7[%c1, %c0_15] : memref<676x32xf32, #tpu.memory_space<vmem>>, vector<622x32xf32>
    %c1_16 = arith.constant 1 : index
    %c0_17 = arith.constant 0 : index
    %c0_18 = arith.constant 0 : index
    %15 = vector.load %arg4[%c1_16, %c0_17, %c0_18] : memref<9x32x64xf32, #tpu.memory_space<vmem>>, vector<1x32x64xf32>
    %16 = vector.shape_cast %15 : vector<1x32x64xf32> to vector<32x64xf32>
    %cst_19 = arith.constant dense<0.000000e+00> : vector<622x64xf32>
    %17 = tpu.matmul %14, %16, %cst_19 {dimension_numbers = #tpu.dot_dimension_numbers<[1], [0], [0], [1], [0, 0, 1, 1], [], []>} : vector<622x32xf32>, vector<32x64xf32>, vector<622x64xf32> -> vector<622x64xf32>
    %18 = arith.addf %13, %17 : vector<622x64xf32>
    %c2 = arith.constant 2 : index
    %c0_20 = arith.constant 0 : index
    %19 = vector.load %arg7[%c2, %c0_20] : memref<676x32xf32, #tpu.memory_space<vmem>>, vector<622x32xf32>
    %c2_21 = arith.constant 2 : index
    %c0_22 = arith.constant 0 : index
    %c0_23 = arith.constant 0 : index
    %20 = vector.load %arg4[%c2_21, %c0_22, %c0_23] : memref<9x32x64xf32, #tpu.memory_space<vmem>>, vector<1x32x64xf32>
    %21 = vector.shape_cast %20 : vector<1x32x64xf32> to vector<32x64xf32>
    %cst_24 = arith.constant dense<0.000000e+00> : vector<622x64xf32>
    %22 = tpu.matmul %19, %21, %cst_24 {dimension_numbers = #tpu.dot_dimension_numbers<[1], [0], [0], [1], [0, 0, 1, 1], [], []>} : vector<622x32xf32>, vector<32x64xf32>, vector<622x64xf32> -> vector<622x64xf32>
    %23 = arith.addf %18, %22 : vector<622x64xf32>
    %c26 = arith.constant 26 : index
    %c0_25 = arith.constant 0 : index
    %24 = vector.load %arg7[%c26, %c0_25] : memref<676x32xf32, #tpu.memory_space<vmem>>, vector<622x32xf32>
    %c3 = arith.constant 3 : index
    %c0_26 = arith.constant 0 : index
    %c0_27 = arith.constant 0 : index
    %25 = vector.load %arg4[%c3, %c0_26, %c0_27] : memref<9x32x64xf32, #tpu.memory_space<vmem>>, vector<1x32x64xf32>
    %26 = vector.shape_cast %25 : vector<1x32x64xf32> to vector<32x64xf32>
    %cst_28 = arith.constant dense<0.000000e+00> : vector<622x64xf32>
    %27 = tpu.matmul %24, %26, %cst_28 {dimension_numbers = #tpu.dot_dimension_numbers<[1], [0], [0], [1], [0, 0, 1, 1], [], []>} : vector<622x32xf32>, vector<32x64xf32>, vector<622x64xf32> -> vector<622x64xf32>
    %28 = arith.addf %23, %27 : vector<622x64xf32>
    %c27 = arith.constant 27 : index
    %c0_29 = arith.constant 0 : index
    %29 = vector.load %arg7[%c27, %c0_29] : memref<676x32xf32, #tpu.memory_space<vmem>>, vector<622x32xf32>
    %c4 = arith.constant 4 : index
    %c0_30 = arith.constant 0 : index
    %c0_31 = arith.constant 0 : index
    %30 = vector.load %arg4[%c4, %c0_30, %c0_31] : memref<9x32x64xf32, #tpu.memory_space<vmem>>, vector<1x32x64xf32>
    %31 = vector.shape_cast %30 : vector<1x32x64xf32> to vector<32x64xf32>
    %cst_32 = arith.constant dense<0.000000e+00> : vector<622x64xf32>
    %32 = tpu.matmul %29, %31, %cst_32 {dimension_numbers = #tpu.dot_dimension_numbers<[1], [0], [0], [1], [0, 0, 1, 1], [], []>} : vector<622x32xf32>, vector<32x64xf32>, vector<622x64xf32> -> vector<622x64xf32>
    %33 = arith.addf %28, %32 : vector<622x64xf32>
    %c28 = arith.constant 28 : index
    %c0_33 = arith.constant 0 : index
    %34 = vector.load %arg7[%c28, %c0_33] : memref<676x32xf32, #tpu.memory_space<vmem>>, vector<622x32xf32>
    %c5 = arith.constant 5 : index
    %c0_34 = arith.constant 0 : index
    %c0_35 = arith.constant 0 : index
    %35 = vector.load %arg4[%c5, %c0_34, %c0_35] : memref<9x32x64xf32, #tpu.memory_space<vmem>>, vector<1x32x64xf32>
    %36 = vector.shape_cast %35 : vector<1x32x64xf32> to vector<32x64xf32>
    %cst_36 = arith.constant dense<0.000000e+00> : vector<622x64xf32>
    %37 = tpu.matmul %34, %36, %cst_36 {dimension_numbers = #tpu.dot_dimension_numbers<[1], [0], [0], [1], [0, 0, 1, 1], [], []>} : vector<622x32xf32>, vector<32x64xf32>, vector<622x64xf32> -> vector<622x64xf32>
    %38 = arith.addf %33, %37 : vector<622x64xf32>
    %c52 = arith.constant 52 : index
    %c0_37 = arith.constant 0 : index
    %39 = vector.load %arg7[%c52, %c0_37] : memref<676x32xf32, #tpu.memory_space<vmem>>, vector<622x32xf32>
    %c6 = arith.constant 6 : index
    %c0_38 = arith.constant 0 : index
    %c0_39 = arith.constant 0 : index
    %40 = vector.load %arg4[%c6, %c0_38, %c0_39] : memref<9x32x64xf32, #tpu.memory_space<vmem>>, vector<1x32x64xf32>
    %41 = vector.shape_cast %40 : vector<1x32x64xf32> to vector<32x64xf32>
    %cst_40 = arith.constant dense<0.000000e+00> : vector<622x64xf32>
    %42 = tpu.matmul %39, %41, %cst_40 {dimension_numbers = #tpu.dot_dimension_numbers<[1], [0], [0], [1], [0, 0, 1, 1], [], []>} : vector<622x32xf32>, vector<32x64xf32>, vector<622x64xf32> -> vector<622x64xf32>
    %43 = arith.addf %38, %42 : vector<622x64xf32>
    %c53 = arith.constant 53 : index
    %c0_41 = arith.constant 0 : index
    %44 = vector.load %arg7[%c53, %c0_41] : memref<676x32xf32, #tpu.memory_space<vmem>>, vector<622x32xf32>
    %c7 = arith.constant 7 : index
    %c0_42 = arith.constant 0 : index
    %c0_43 = arith.constant 0 : index
    %45 = vector.load %arg4[%c7, %c0_42, %c0_43] : memref<9x32x64xf32, #tpu.memory_space<vmem>>, vector<1x32x64xf32>
    %46 = vector.shape_cast %45 : vector<1x32x64xf32> to vector<32x64xf32>
    %cst_44 = arith.constant dense<0.000000e+00> : vector<622x64xf32>
    %47 = tpu.matmul %44, %46, %cst_44 {dimension_numbers = #tpu.dot_dimension_numbers<[1], [0], [0], [1], [0, 0, 1, 1], [], []>} : vector<622x32xf32>, vector<32x64xf32>, vector<622x64xf32> -> vector<622x64xf32>
    %48 = arith.addf %43, %47 : vector<622x64xf32>
    %c54 = arith.constant 54 : index
    %c0_45 = arith.constant 0 : index
    %49 = vector.load %arg7[%c54, %c0_45] : memref<676x32xf32, #tpu.memory_space<vmem>>, vector<622x32xf32>
    %c8 = arith.constant 8 : index
    %c0_46 = arith.constant 0 : index
    %c0_47 = arith.constant 0 : index
    %50 = vector.load %arg4[%c8, %c0_46, %c0_47] : memref<9x32x64xf32, #tpu.memory_space<vmem>>, vector<1x32x64xf32>
    %51 = vector.shape_cast %50 : vector<1x32x64xf32> to vector<32x64xf32>
    %cst_48 = arith.constant dense<0.000000e+00> : vector<622x64xf32>
    %52 = tpu.matmul %49, %51, %cst_48 {dimension_numbers = #tpu.dot_dimension_numbers<[1], [0], [0], [1], [0, 0, 1, 1], [], []>} : vector<622x32xf32>, vector<32x64xf32>, vector<622x64xf32> -> vector<622x64xf32>
    %53 = arith.addf %48, %52 : vector<622x64xf32>
    %c0_49 = arith.constant 0 : index
    %c0_50 = arith.constant 0 : index
    %54 = vector.load %arg5[%c0_49, %c0_50] : memref<1x64xf32, #tpu.memory_space<vmem>>, vector<1x64xf32>
    %55 = vector.broadcast %54 : vector<1x64xf32> to vector<622x64xf32>
    %56 = arith.addf %53, %55 : vector<622x64xf32>
    %cst_51 = arith.constant 0.000000e+00 : f32
    %57 = vector.broadcast %cst_51 : f32 to vector<622x64xf32>
    %58 = arith.maximumf %56, %57 : vector<622x64xf32>
    %c0_52 = arith.constant 0 : index
    %c0_53 = arith.constant 0 : index
    %59 = vector.load %arg8[%c0_52, %c0_53] : memref<622x64xf32, #tpu.memory_space<vmem>>, vector<622x64xf32>
    tpu.vector_store %arg8[%c0_52, %c0_53], %58 {strides = array<i32>} : memref<622x64xf32, #tpu.memory_space<vmem>>, vector<622x64xf32>,
    %c0_54 = arith.constant 0 : index
    %c0_55 = arith.constant 0 : index
    %60 = tpu.strided_load %arg8[%c0_54, %c0_55] {strides = array<i32: 2, 1>} : memref<622x64xf32, #tpu.memory_space<vmem>>, vector<12x64xf32>
    %c1_56 = arith.constant 1 : index
    %c0_57 = arith.constant 0 : index
    %61 = tpu.strided_load %arg8[%c1_56, %c0_57] {strides = array<i32: 2, 1>} : memref<622x64xf32, #tpu.memory_space<vmem>>, vector<12x64xf32>
    %c26_58 = arith.constant 26 : index
    %c0_59 = arith.constant 0 : index
    %62 = tpu.strided_load %arg8[%c26_58, %c0_59] {strides = array<i32: 2, 1>} : memref<622x64xf32, #tpu.memory_space<vmem>>, vector<12x64xf32>
    %c27_60 = arith.constant 27 : index
    %c0_61 = arith.constant 0 : index
    %63 = tpu.strided_load %arg8[%c27_60, %c0_61] {strides = array<i32: 2, 1>} : memref<622x64xf32, #tpu.memory_space<vmem>>, vector<12x64xf32>
    %64 = arith.maximumf %60, %61 : vector<12x64xf32>
    %65 = arith.maximumf %62, %63 : vector<12x64xf32>
    %66 = arith.maximumf %64, %65 : vector<12x64xf32>
    %c0_62 = arith.constant 0 : index
    %c0_63 = arith.constant 0 : index
    %c0_64 = arith.constant 0 : index
    %c0_65 = arith.constant 0 : index
    %67 = vector.load %arg6[%c0_62, %c0_63, %c0_64, %c0_65] : memref<1x12x12x64xf32, #tpu.memory_space<vmem>>, vector<1x1x12x64xf32>
    %68 = vector.shape_cast %67 : vector<1x1x12x64xf32> to vector<12x64xf32>
    %69 = vector.shape_cast %66 : vector<12x64xf32> to vector<1x1x12x64xf32>
    tpu.vector_store %arg6[%c0_62, %c0_63, %c0_64, %c0_65], %69 {strides = array<i32>} : memref<1x12x12x64xf32, #tpu.memory_space<vmem>>, vector<1x1x12x64xf32>,
    %c52_66 = arith.constant 52 : index
    %c0_67 = arith.constant 0 : index
    %70 = tpu.strided_load %arg8[%c52_66, %c0_67] {strides = array<i32: 2, 1>} : memref<622x64xf32, #tpu.memory_space<vmem>>, vector<12x64xf32>
    %c53_68 = arith.constant 53 : index
    %c0_69 = arith.constant 0 : index
    %71 = tpu.strided_load %arg8[%c53_68, %c0_69] {strides = array<i32: 2, 1>} : memref<622x64xf32, #tpu.memory_space<vmem>>, vector<12x64xf32>
    %c78 = arith.constant 78 : index
    %c0_70 = arith.constant 0 : index
    %72 = tpu.strided_load %arg8[%c78, %c0_70] {strides = array<i32: 2, 1>} : memref<622x64xf32, #tpu.memory_space<vmem>>, vector<12x64xf32>
    %c79 = arith.constant 79 : index
    %c0_71 = arith.constant 0 : index
    %73 = tpu.strided_load %arg8[%c79, %c0_71] {strides = array<i32: 2, 1>} : memref<622x64xf32, #tpu.memory_space<vmem>>, vector<12x64xf32>
    %74 = arith.maximumf %70, %71 : vector<12x64xf32>
    %75 = arith.maximumf %72, %73 : vector<12x64xf32>
    %76 = arith.maximumf %74, %75 : vector<12x64xf32>
    %c0_72 = arith.constant 0 : index
    %c1_73 = arith.constant 1 : index
    %c0_74 = arith.constant 0 : index
    %c0_75 = arith.constant 0 : index
    %77 = vector.load %arg6[%c0_72, %c1_73, %c0_74, %c0_75] : memref<1x12x12x64xf32, #tpu.memory_space<vmem>>, vector<1x1x12x64xf32>
    %78 = vector.shape_cast %77 : vector<1x1x12x64xf32> to vector<12x64xf32>
    %79 = vector.shape_cast %76 : vector<12x64xf32> to vector<1x1x12x64xf32>
    tpu.vector_store %arg6[%c0_72, %c1_73, %c0_74, %c0_75], %79 {strides = array<i32>} : memref<1x12x12x64xf32, #tpu.memory_space<vmem>>, vector<1x1x12x64xf32>,
    %c104 = arith.constant 104 : index
    %c0_76 = arith.constant 0 : index
    %80 = tpu.strided_load %arg8[%c104, %c0_76] {strides = array<i32: 2, 1>} : memref<622x64xf32, #tpu.memory_space<vmem>>, vector<12x64xf32>
    %c105 = arith.constant 105 : index
    %c0_77 = arith.constant 0 : index
    %81 = tpu.strided_load %arg8[%c105, %c0_77] {strides = array<i32: 2, 1>} : memref<622x64xf32, #tpu.memory_space<vmem>>, vector<12x64xf32>
    %c130 = arith.constant 130 : index
    %c0_78 = arith.constant 0 : index
    %82 = tpu.strided_load %arg8[%c130, %c0_78] {strides = array<i32: 2, 1>} : memref<622x64xf32, #tpu.memory_space<vmem>>, vector<12x64xf32>
    %c131 = arith.constant 131 : index
    %c0_79 = arith.constant 0 : index
    %83 = tpu.strided_load %arg8[%c131, %c0_79] {strides = array<i32: 2, 1>} : memref<622x64xf32, #tpu.memory_space<vmem>>, vector<12x64xf32>
    %84 = arith.maximumf %80, %81 : vector<12x64xf32>
    %85 = arith.maximumf %82, %83 : vector<12x64xf32>
    %86 = arith.maximumf %84, %85 : vector<12x64xf32>
    %c0_80 = arith.constant 0 : index
    %c2_81 = arith.constant 2 : index
    %c0_82 = arith.constant 0 : index
    %c0_83 = arith.constant 0 : index
    %87 = vector.load %arg6[%c0_80, %c2_81, %c0_82, %c0_83] : memref<1x12x12x64xf32, #tpu.memory_space<vmem>>, vector<1x1x12x64xf32>
    %88 = vector.shape_cast %87 : vector<1x1x12x64xf32> to vector<12x64xf32>
    %89 = vector.shape_cast %86 : vector<12x64xf32> to vector<1x1x12x64xf32>
    tpu.vector_store %arg6[%c0_80, %c2_81, %c0_82, %c0_83], %89 {strides = array<i32>} : memref<1x12x12x64xf32, #tpu.memory_space<vmem>>, vector<1x1x12x64xf32>,
    %c156 = arith.constant 156 : index
    %c0_84 = arith.constant 0 : index
    %90 = tpu.strided_load %arg8[%c156, %c0_84] {strides = array<i32: 2, 1>} : memref<622x64xf32, #tpu.memory_space<vmem>>, vector<12x64xf32>
    %c157 = arith.constant 157 : index
    %c0_85 = arith.constant 0 : index
    %91 = tpu.strided_load %arg8[%c157, %c0_85] {strides = array<i32: 2, 1>} : memref<622x64xf32, #tpu.memory_space<vmem>>, vector<12x64xf32>
    %c182 = arith.constant 182 : index
    %c0_86 = arith.constant 0 : index
    %92 = tpu.strided_load %arg8[%c182, %c0_86] {strides = array<i32: 2, 1>} : memref<622x64xf32, #tpu.memory_space<vmem>>, vector<12x64xf32>
    %c183 = arith.constant 183 : index
    %c0_87 = arith.constant 0 : index
    %93 = tpu.strided_load %arg8[%c183, %c0_87] {strides = array<i32: 2, 1>} : memref<622x64xf32, #tpu.memory_space<vmem>>, vector<12x64xf32>
    %94 = arith.maximumf %90, %91 : vector<12x64xf32>
    %95 = arith.maximumf %92, %93 : vector<12x64xf32>
    %96 = arith.maximumf %94, %95 : vector<12x64xf32>
    %c0_88 = arith.constant 0 : index
    %c3_89 = arith.constant 3 : index
    %c0_90 = arith.constant 0 : index
    %c0_91 = arith.constant 0 : index
    %97 = vector.load %arg6[%c0_88, %c3_89, %c0_90, %c0_91] : memref<1x12x12x64xf32, #tpu.memory_space<vmem>>, vector<1x1x12x64xf32>
    %98 = vector.shape_cast %97 : vector<1x1x12x64xf32> to vector<12x64xf32>
    %99 = vector.shape_cast %96 : vector<12x64xf32> to vector<1x1x12x64xf32>
    tpu.vector_store %arg6[%c0_88, %c3_89, %c0_90, %c0_91], %99 {strides = array<i32>} : memref<1x12x12x64xf32, #tpu.memory_space<vmem>>, vector<1x1x12x64xf32>,
    %c208 = arith.constant 208 : index
    %c0_92 = arith.constant 0 : index
    %100 = tpu.strided_load %arg8[%c208, %c0_92] {strides = array<i32: 2, 1>} : memref<622x64xf32, #tpu.memory_space<vmem>>, vector<12x64xf32>
    %c209 = arith.constant 209 : index
    %c0_93 = arith.constant 0 : index
    %101 = tpu.strided_load %arg8[%c209, %c0_93] {strides = array<i32: 2, 1>} : memref<622x64xf32, #tpu.memory_space<vmem>>, vector<12x64xf32>
    %c234 = arith.constant 234 : index
    %c0_94 = arith.constant 0 : index
    %102 = tpu.strided_load %arg8[%c234, %c0_94] {strides = array<i32: 2, 1>} : memref<622x64xf32, #tpu.memory_space<vmem>>, vector<12x64xf32>
    %c235 = arith.constant 235 : index
    %c0_95 = arith.constant 0 : index
    %103 = tpu.strided_load %arg8[%c235, %c0_95] {strides = array<i32: 2, 1>} : memref<622x64xf32, #tpu.memory_space<vmem>>, vector<12x64xf32>
    %104 = arith.maximumf %100, %101 : vector<12x64xf32>
    %105 = arith.maximumf %102, %103 : vector<12x64xf32>
    %106 = arith.maximumf %104, %105 : vector<12x64xf32>
    %c0_96 = arith.constant 0 : index
    %c4_97 = arith.constant 4 : index
    %c0_98 = arith.constant 0 : index
    %c0_99 = arith.constant 0 : index
    %107 = vector.load %arg6[%c0_96, %c4_97, %c0_98, %c0_99] : memref<1x12x12x64xf32, #tpu.memory_space<vmem>>, vector<1x1x12x64xf32>
    %108 = vector.shape_cast %107 : vector<1x1x12x64xf32> to vector<12x64xf32>
    %109 = vector.shape_cast %106 : vector<12x64xf32> to vector<1x1x12x64xf32>
    tpu.vector_store %arg6[%c0_96, %c4_97, %c0_98, %c0_99], %109 {strides = array<i32>} : memref<1x12x12x64xf32, #tpu.memory_space<vmem>>, vector<1x1x12x64xf32>,
    %c260 = arith.constant 260 : index
    %c0_100 = arith.constant 0 : index
    %110 = tpu.strided_load %arg8[%c260, %c0_100] {strides = array<i32: 2, 1>} : memref<622x64xf32, #tpu.memory_space<vmem>>, vector<12x64xf32>
    %c261 = arith.constant 261 : index
    %c0_101 = arith.constant 0 : index
    %111 = tpu.strided_load %arg8[%c261, %c0_101] {strides = array<i32: 2, 1>} : memref<622x64xf32, #tpu.memory_space<vmem>>, vector<12x64xf32>
    %c286 = arith.constant 286 : index
    %c0_102 = arith.constant 0 : index
    %112 = tpu.strided_load %arg8[%c286, %c0_102] {strides = array<i32: 2, 1>} : memref<622x64xf32, #tpu.memory_space<vmem>>, vector<12x64xf32>
    %c287 = arith.constant 287 : index
    %c0_103 = arith.constant 0 : index
    %113 = tpu.strided_load %arg8[%c287, %c0_103] {strides = array<i32: 2, 1>} : memref<622x64xf32, #tpu.memory_space<vmem>>, vector<12x64xf32>
    %114 = arith.maximumf %110, %111 : vector<12x64xf32>
    %115 = arith.maximumf %112, %113 : vector<12x64xf32>
    %116 = arith.maximumf %114, %115 : vector<12x64xf32>
    %c0_104 = arith.constant 0 : index
    %c5_105 = arith.constant 5 : index
    %c0_106 = arith.constant 0 : index
    %c0_107 = arith.constant 0 : index
    %117 = vector.load %arg6[%c0_104, %c5_105, %c0_106, %c0_107] : memref<1x12x12x64xf32, #tpu.memory_space<vmem>>, vector<1x1x12x64xf32>
    %118 = vector.shape_cast %117 : vector<1x1x12x64xf32> to vector<12x64xf32>
    %119 = vector.shape_cast %116 : vector<12x64xf32> to vector<1x1x12x64xf32>
    tpu.vector_store %arg6[%c0_104, %c5_105, %c0_106, %c0_107], %119 {strides = array<i32>} : memref<1x12x12x64xf32, #tpu.memory_space<vmem>>, vector<1x1x12x64xf32>,
    %c312 = arith.constant 312 : index
    %c0_108 = arith.constant 0 : index
    %120 = tpu.strided_load %arg8[%c312, %c0_108] {strides = array<i32: 2, 1>} : memref<622x64xf32, #tpu.memory_space<vmem>>, vector<12x64xf32>
    %c313 = arith.constant 313 : index
    %c0_109 = arith.constant 0 : index
    %121 = tpu.strided_load %arg8[%c313, %c0_109] {strides = array<i32: 2, 1>} : memref<622x64xf32, #tpu.memory_space<vmem>>, vector<12x64xf32>
    %c338 = arith.constant 338 : index
    %c0_110 = arith.constant 0 : index
    %122 = tpu.strided_load %arg8[%c338, %c0_110] {strides = array<i32: 2, 1>} : memref<622x64xf32, #tpu.memory_space<vmem>>, vector<12x64xf32>
    %c339 = arith.constant 339 : index
    %c0_111 = arith.constant 0 : index
    %123 = tpu.strided_load %arg8[%c339, %c0_111] {strides = array<i32: 2, 1>} : memref<622x64xf32, #tpu.memory_space<vmem>>, vector<12x64xf32>
    %124 = arith.maximumf %120, %121 : vector<12x64xf32>
    %125 = arith.maximumf %122, %123 : vector<12x64xf32>
    %126 = arith.maximumf %124, %125 : vector<12x64xf32>
    %c0_112 = arith.constant 0 : index
    %c6_113 = arith.constant 6 : index
    %c0_114 = arith.constant 0 : index
    %c0_115 = arith.constant 0 : index
    %127 = vector.load %arg6[%c0_112, %c6_113, %c0_114, %c0_115] : memref<1x12x12x64xf32, #tpu.memory_space<vmem>>, vector<1x1x12x64xf32>
    %128 = vector.shape_cast %127 : vector<1x1x12x64xf32> to vector<12x64xf32>
    %129 = vector.shape_cast %126 : vector<12x64xf32> to vector<1x1x12x64xf32>
    tpu.vector_store %arg6[%c0_112, %c6_113, %c0_114, %c0_115], %129 {strides = array<i32>} : memref<1x12x12x64xf32, #tpu.memory_space<vmem>>, vector<1x1x12x64xf32>,
    %c364 = arith.constant 364 : index
    %c0_116 = arith.constant 0 : index
    %130 = tpu.strided_load %arg8[%c364, %c0_116] {strides = array<i32: 2, 1>} : memref<622x64xf32, #tpu.memory_space<vmem>>, vector<12x64xf32>
    %c365 = arith.constant 365 : index
    %c0_117 = arith.constant 0 : index
    %131 = tpu.strided_load %arg8[%c365, %c0_117] {strides = array<i32: 2, 1>} : memref<622x64xf32, #tpu.memory_space<vmem>>, vector<12x64xf32>
    %c390 = arith.constant 390 : index
    %c0_118 = arith.constant 0 : index
    %132 = tpu.strided_load %arg8[%c390, %c0_118] {strides = array<i32: 2, 1>} : memref<622x64xf32, #tpu.memory_space<vmem>>, vector<12x64xf32>
    %c391 = arith.constant 391 : index
    %c0_119 = arith.constant 0 : index
    %133 = tpu.strided_load %arg8[%c391, %c0_119] {strides = array<i32: 2, 1>} : memref<622x64xf32, #tpu.memory_space<vmem>>, vector<12x64xf32>
    %134 = arith.maximumf %130, %131 : vector<12x64xf32>
    %135 = arith.maximumf %132, %133 : vector<12x64xf32>
    %136 = arith.maximumf %134, %135 : vector<12x64xf32>
    %c0_120 = arith.constant 0 : index
    %c7_121 = arith.constant 7 : index
    %c0_122 = arith.constant 0 : index
    %c0_123 = arith.constant 0 : index
    %137 = vector.load %arg6[%c0_120, %c7_121, %c0_122, %c0_123] : memref<1x12x12x64xf32, #tpu.memory_space<vmem>>, vector<1x1x12x64xf32>
    %138 = vector.shape_cast %137 : vector<1x1x12x64xf32> to vector<12x64xf32>
    %139 = vector.shape_cast %136 : vector<12x64xf32> to vector<1x1x12x64xf32>
    tpu.vector_store %arg6[%c0_120, %c7_121, %c0_122, %c0_123], %139 {strides = array<i32>} : memref<1x12x12x64xf32, #tpu.memory_space<vmem>>, vector<1x1x12x64xf32>,
    %c416 = arith.constant 416 : index
    %c0_124 = arith.constant 0 : index
    %140 = tpu.strided_load %arg8[%c416, %c0_124] {strides = array<i32: 2, 1>} : memref<622x64xf32, #tpu.memory_space<vmem>>, vector<12x64xf32>
    %c417 = arith.constant 417 : index
    %c0_125 = arith.constant 0 : index
    %141 = tpu.strided_load %arg8[%c417, %c0_125] {strides = array<i32: 2, 1>} : memref<622x64xf32, #tpu.memory_space<vmem>>, vector<12x64xf32>
    %c442 = arith.constant 442 : index
    %c0_126 = arith.constant 0 : index
    %142 = tpu.strided_load %arg8[%c442, %c0_126] {strides = array<i32: 2, 1>} : memref<622x64xf32, #tpu.memory_space<vmem>>, vector<12x64xf32>
    %c443 = arith.constant 443 : index
    %c0_127 = arith.constant 0 : index
    %143 = tpu.strided_load %arg8[%c443, %c0_127] {strides = array<i32: 2, 1>} : memref<622x64xf32, #tpu.memory_space<vmem>>, vector<12x64xf32>
    %144 = arith.maximumf %140, %141 : vector<12x64xf32>
    %145 = arith.maximumf %142, %143 : vector<12x64xf32>
    %146 = arith.maximumf %144, %145 : vector<12x64xf32>
    %c0_128 = arith.constant 0 : index
    %c8_129 = arith.constant 8 : index
    %c0_130 = arith.constant 0 : index
    %c0_131 = arith.constant 0 : index
    %147 = vector.load %arg6[%c0_128, %c8_129, %c0_130, %c0_131] : memref<1x12x12x64xf32, #tpu.memory_space<vmem>>, vector<1x1x12x64xf32>
    %148 = vector.shape_cast %147 : vector<1x1x12x64xf32> to vector<12x64xf32>
    %149 = vector.shape_cast %146 : vector<12x64xf32> to vector<1x1x12x64xf32>
    tpu.vector_store %arg6[%c0_128, %c8_129, %c0_130, %c0_131], %149 {strides = array<i32>} : memref<1x12x12x64xf32, #tpu.memory_space<vmem>>, vector<1x1x12x64xf32>,
    %c468 = arith.constant 468 : index
    %c0_132 = arith.constant 0 : index
    %150 = tpu.strided_load %arg8[%c468, %c0_132] {strides = array<i32: 2, 1>} : memref<622x64xf32, #tpu.memory_space<vmem>>, vector<12x64xf32>
    %c469 = arith.constant 469 : index
    %c0_133 = arith.constant 0 : index
    %151 = tpu.strided_load %arg8[%c469, %c0_133] {strides = array<i32: 2, 1>} : memref<622x64xf32, #tpu.memory_space<vmem>>, vector<12x64xf32>
    %c494 = arith.constant 494 : index
    %c0_134 = arith.constant 0 : index
    %152 = tpu.strided_load %arg8[%c494, %c0_134] {strides = array<i32: 2, 1>} : memref<622x64xf32, #tpu.memory_space<vmem>>, vector<12x64xf32>
    %c495 = arith.constant 495 : index
    %c0_135 = arith.constant 0 : index
    %153 = tpu.strided_load %arg8[%c495, %c0_135] {strides = array<i32: 2, 1>} : memref<622x64xf32, #tpu.memory_space<vmem>>, vector<12x64xf32>
    %154 = arith.maximumf %150, %151 : vector<12x64xf32>
    %155 = arith.maximumf %152, %153 : vector<12x64xf32>
    %156 = arith.maximumf %154, %155 : vector<12x64xf32>
    %c0_136 = arith.constant 0 : index
    %c9 = arith.constant 9 : index
    %c0_137 = arith.constant 0 : index
    %c0_138 = arith.constant 0 : index
    %157 = vector.load %arg6[%c0_136, %c9, %c0_137, %c0_138] : memref<1x12x12x64xf32, #tpu.memory_space<vmem>>, vector<1x1x12x64xf32>
    %158 = vector.shape_cast %157 : vector<1x1x12x64xf32> to vector<12x64xf32>
    %159 = vector.shape_cast %156 : vector<12x64xf32> to vector<1x1x12x64xf32>
    tpu.vector_store %arg6[%c0_136, %c9, %c0_137, %c0_138], %159 {strides = array<i32>} : memref<1x12x12x64xf32, #tpu.memory_space<vmem>>, vector<1x1x12x64xf32>,
    %c520 = arith.constant 520 : index
    %c0_139 = arith.constant 0 : index
    %160 = tpu.strided_load %arg8[%c520, %c0_139] {strides = array<i32: 2, 1>} : memref<622x64xf32, #tpu.memory_space<vmem>>, vector<12x64xf32>
    %c521 = arith.constant 521 : index
    %c0_140 = arith.constant 0 : index
    %161 = tpu.strided_load %arg8[%c521, %c0_140] {strides = array<i32: 2, 1>} : memref<622x64xf32, #tpu.memory_space<vmem>>, vector<12x64xf32>
    %c546 = arith.constant 546 : index
    %c0_141 = arith.constant 0 : index
    %162 = tpu.strided_load %arg8[%c546, %c0_141] {strides = array<i32: 2, 1>} : memref<622x64xf32, #tpu.memory_space<vmem>>, vector<12x64xf32>
    %c547 = arith.constant 547 : index
    %c0_142 = arith.constant 0 : index
    %163 = tpu.strided_load %arg8[%c547, %c0_142] {strides = array<i32: 2, 1>} : memref<622x64xf32, #tpu.memory_space<vmem>>, vector<12x64xf32>
    %164 = arith.maximumf %160, %161 : vector<12x64xf32>
    %165 = arith.maximumf %162, %163 : vector<12x64xf32>
    %166 = arith.maximumf %164, %165 : vector<12x64xf32>
    %c0_143 = arith.constant 0 : index
    %c10 = arith.constant 10 : index
    %c0_144 = arith.constant 0 : index
    %c0_145 = arith.constant 0 : index
    %167 = vector.load %arg6[%c0_143, %c10, %c0_144, %c0_145] : memref<1x12x12x64xf32, #tpu.memory_space<vmem>>, vector<1x1x12x64xf32>
    %168 = vector.shape_cast %167 : vector<1x1x12x64xf32> to vector<12x64xf32>
    %169 = vector.shape_cast %166 : vector<12x64xf32> to vector<1x1x12x64xf32>
    tpu.vector_store %arg6[%c0_143, %c10, %c0_144, %c0_145], %169 {strides = array<i32>} : memref<1x12x12x64xf32, #tpu.memory_space<vmem>>, vector<1x1x12x64xf32>,
    %c572 = arith.constant 572 : index
    %c0_146 = arith.constant 0 : index
    %170 = tpu.strided_load %arg8[%c572, %c0_146] {strides = array<i32: 2, 1>} : memref<622x64xf32, #tpu.memory_space<vmem>>, vector<12x64xf32>
    %c573 = arith.constant 573 : index
    %c0_147 = arith.constant 0 : index
    %171 = tpu.strided_load %arg8[%c573, %c0_147] {strides = array<i32: 2, 1>} : memref<622x64xf32, #tpu.memory_space<vmem>>, vector<12x64xf32>
    %c598 = arith.constant 598 : index
    %c0_148 = arith.constant 0 : index
    %172 = tpu.strided_load %arg8[%c598, %c0_148] {strides = array<i32: 2, 1>} : memref<622x64xf32, #tpu.memory_space<vmem>>, vector<12x64xf32>
    %c599 = arith.constant 599 : index
    %c0_149 = arith.constant 0 : index
    %173 = tpu.strided_load %arg8[%c599, %c0_149] {strides = array<i32: 2, 1>} : memref<622x64xf32, #tpu.memory_space<vmem>>, vector<12x64xf32>
    %174 = arith.maximumf %170, %171 : vector<12x64xf32>
    %175 = arith.maximumf %172, %173 : vector<12x64xf32>
    %176 = arith.maximumf %174, %175 : vector<12x64xf32>
    %c0_150 = arith.constant 0 : index
    %c11 = arith.constant 11 : index
    %c0_151 = arith.constant 0 : index
    %c0_152 = arith.constant 0 : index
    %177 = vector.load %arg6[%c0_150, %c11, %c0_151, %c0_152] : memref<1x12x12x64xf32, #tpu.memory_space<vmem>>, vector<1x1x12x64xf32>
    %178 = vector.shape_cast %177 : vector<1x1x12x64xf32> to vector<12x64xf32>
    %179 = vector.shape_cast %176 : vector<12x64xf32> to vector<1x1x12x64xf32>
    tpu.vector_store %arg6[%c0_150, %c11, %c0_151, %c0_152], %179 {strides = array<i32>} : memref<1x12x12x64xf32, #tpu.memory_space<vmem>>, vector<1x1x12x64xf32>,
    return
  }
  func.func @transform_0(%arg0: i32) -> (i32, i32, i32) {
    %c0_i32 = arith.constant 0 : i32
    %c0_i32_0 = arith.constant 0 : i32
    %c0_i32_1 = arith.constant 0 : i32
    return %arg0, %c0_i32, %c0_i32_0 : i32, i32, i32
  }
  func.func @transform_1(%arg0: i32) -> (i32, i32) {
    %c0_i32 = arith.constant 0 : i32
    %c0_i32_0 = arith.constant 0 : i32
    %c0_i32_1 = arith.constant 0 : i32
    return %c0_i32, %c0_i32_0 : i32, i32
  }
  func.func @transform_2(%arg0: i32) -> (i32, i32) {
    %c0_i32 = arith.constant 0 : i32
    %c0_i32_0 = arith.constant 0 : i32
    %c0_i32_1 = arith.constant 0 : i32
    return %c0_i32, %c0_i32_0 : i32, i32
  }
  func.func @transform_3(%arg0: i32) -> (i32, i32, i32) {
    %c0_i32 = arith.constant 0 : i32
    %c0_i32_0 = arith.constant 0 : i32
    %c0_i32_1 = arith.constant 0 : i32
    %c0_i32_2 = arith.constant 0 : i32
    return %c0_i32, %c0_i32_0, %c0_i32_1 : i32, i32, i32
  }
  func.func @transform_4(%arg0: i32) -> (i32, i32) {
    %c0_i32 = arith.constant 0 : i32
    %c0_i32_0 = arith.constant 0 : i32
    %c0_i32_1 = arith.constant 0 : i32
    return %c0_i32, %c0_i32_0 : i32, i32
  }
  func.func @transform_5(%arg0: i32) -> (i32, i32, i32, i32) {
    %c0_i32 = arith.constant 0 : i32
    %c0_i32_0 = arith.constant 0 : i32
    %c0_i32_1 = arith.constant 0 : i32
    %c0_i32_2 = arith.constant 0 : i32
    return %arg0, %c0_i32, %c0_i32_0, %c0_i32_1 : i32, i32, i32, i32
  }
}

module attributes {stable_mosaic.version = 11 : i64} {
  func.func @_fc_head_kernel(%arg0: i32, %arg1: memref<2x9216xf32, #tpu.memory_space<vmem>>, %arg2: memref<9216x128xbf16, #tpu.memory_space<vmem>>, %arg3: memref<1x128xf32, #tpu.memory_space<vmem>>, %arg4: memref<128x10xf32, #tpu.memory_space<vmem>>, %arg5: memref<1x10xf32, #tpu.memory_space<vmem>>, %arg6: memref<2x10xf32, #tpu.memory_space<vmem>>) attributes {dimension_semantics = [#tpu.dimension_semantics<arbitrary>], iteration_bounds = array<i64: 1>, scalar_prefetch = 0 : i64, scratch_operands = 0 : i64, tpu.core_type = #tpu.core_type<tc>, window_params = [{pipeline_mode = #tpu.pipeline_mode<synchronous>, transform_indices = @transform_0, window_bounds = array<i64: 2, 9216>}, {pipeline_mode = #tpu.pipeline_mode<synchronous>, transform_indices = @transform_1, window_bounds = array<i64: 9216, 128>}, {pipeline_mode = #tpu.pipeline_mode<synchronous>, transform_indices = @transform_2, window_bounds = array<i64: 1, 128>}, {pipeline_mode = #tpu.pipeline_mode<synchronous>, transform_indices = @transform_3, window_bounds = array<i64: 128, 10>}, {pipeline_mode = #tpu.pipeline_mode<synchronous>, transform_indices = @transform_4, window_bounds = array<i64: 1, 10>}, {pipeline_mode = #tpu.pipeline_mode<synchronous>, transform_indices = @transform_5, window_bounds = array<i64: 2, 10>}]} {
    %c0 = arith.constant 0 : index
    %c0_0 = arith.constant 0 : index
    %0 = vector.load %arg1[%c0, %c0_0] : memref<2x9216xf32, #tpu.memory_space<vmem>>, vector<2x9216xf32>
    %1 = arith.truncf %0 : vector<2x9216xf32> to vector<2x9216xbf16>
    %c0_1 = arith.constant 0 : index
    %c0_2 = arith.constant 0 : index
    %2 = vector.load %arg2[%c0_1, %c0_2] : memref<9216x128xbf16, #tpu.memory_space<vmem>>, vector<9216x128xbf16>
    %cst = arith.constant dense<0.000000e+00> : vector<2x128xf32>
    %3 = tpu.matmul %1, %2, %cst {dimension_numbers = #tpu.dot_dimension_numbers<[1], [0], [0], [1], [0, 0, 1, 1], [], []>} : vector<2x9216xbf16>, vector<9216x128xbf16>, vector<2x128xf32> -> vector<2x128xf32>
    %c0_3 = arith.constant 0 : index
    %c0_4 = arith.constant 0 : index
    %4 = vector.load %arg3[%c0_3, %c0_4] : memref<1x128xf32, #tpu.memory_space<vmem>>, vector<1x128xf32>
    %5 = vector.broadcast %4 : vector<1x128xf32> to vector<2x128xf32>
    %6 = arith.addf %3, %5 : vector<2x128xf32>
    %cst_5 = arith.constant 0.000000e+00 : f32
    %7 = vector.broadcast %cst_5 : f32 to vector<2x128xf32>
    %8 = arith.maximumf %6, %7 : vector<2x128xf32>
    %c0_6 = arith.constant 0 : index
    %c0_7 = arith.constant 0 : index
    %9 = vector.load %arg4[%c0_6, %c0_7] : memref<128x10xf32, #tpu.memory_space<vmem>>, vector<128x10xf32>
    %cst_8 = arith.constant dense<0.000000e+00> : vector<2x10xf32>
    %10 = tpu.matmul %8, %9, %cst_8 {dimension_numbers = #tpu.dot_dimension_numbers<[1], [0], [0], [1], [0, 0, 1, 1], [], []>} : vector<2x128xf32>, vector<128x10xf32>, vector<2x10xf32> -> vector<2x10xf32>
    %c0_9 = arith.constant 0 : index
    %c0_10 = arith.constant 0 : index
    %11 = vector.load %arg5[%c0_9, %c0_10] : memref<1x10xf32, #tpu.memory_space<vmem>>, vector<1x10xf32>
    %12 = vector.broadcast %11 : vector<1x10xf32> to vector<2x10xf32>
    %13 = arith.addf %10, %12 : vector<2x10xf32>
    %cst_11 = arith.constant dense<0xFF800000> : vector<2xf32>
    %14 = vector.multi_reduction <maximumf>, %13, %cst_11 [1] : vector<2x10xf32> to vector<2xf32>
    %15 = vector.shape_cast %14 : vector<2xf32> to vector<2x1xf32>
    %16 = vector.broadcast %15 : vector<2x1xf32> to vector<2x10xf32>
    %17 = arith.subf %13, %16 : vector<2x10xf32>
    %18 = math.exp %17 : vector<2x10xf32>
    %cst_12 = arith.constant dense<0.000000e+00> : vector<2xf32>
    %19 = vector.multi_reduction <add>, %18, %cst_12 [1] : vector<2x10xf32> to vector<2xf32>
    %20 = vector.shape_cast %19 : vector<2xf32> to vector<2x1xf32>
    %21 = math.log %20 : vector<2x1xf32>
    %22 = vector.broadcast %21 : vector<2x1xf32> to vector<2x10xf32>
    %23 = arith.subf %17, %22 : vector<2x10xf32>
    %c0_13 = arith.constant 0 : index
    %c0_14 = arith.constant 0 : index
    %24 = vector.load %arg6[%c0_13, %c0_14] : memref<2x10xf32, #tpu.memory_space<vmem>>, vector<2x10xf32>
    tpu.vector_store %arg6[%c0_13, %c0_14], %23 {strides = array<i32>} : memref<2x10xf32, #tpu.memory_space<vmem>>, vector<2x10xf32>,
    return
  }
  func.func @transform_0(%arg0: i32) -> (i32, i32) {
    %c0_i32 = arith.constant 0 : i32
    %c0_i32_0 = arith.constant 0 : i32
    %c0_i32_1 = arith.constant 0 : i32
    return %c0_i32, %c0_i32_0 : i32, i32
  }
  func.func @transform_1(%arg0: i32) -> (i32, i32) {
    %c0_i32 = arith.constant 0 : i32
    %c0_i32_0 = arith.constant 0 : i32
    %c0_i32_1 = arith.constant 0 : i32
    return %c0_i32, %c0_i32_0 : i32, i32
  }
  func.func @transform_2(%arg0: i32) -> (i32, i32) {
    %c0_i32 = arith.constant 0 : i32
    %c0_i32_0 = arith.constant 0 : i32
    %c0_i32_1 = arith.constant 0 : i32
    return %c0_i32, %c0_i32_0 : i32, i32
  }
  func.func @transform_3(%arg0: i32) -> (i32, i32) {
    %c0_i32 = arith.constant 0 : i32
    %c0_i32_0 = arith.constant 0 : i32
    %c0_i32_1 = arith.constant 0 : i32
    return %c0_i32, %c0_i32_0 : i32, i32
  }
  func.func @transform_4(%arg0: i32) -> (i32, i32) {
    %c0_i32 = arith.constant 0 : i32
    %c0_i32_0 = arith.constant 0 : i32
    %c0_i32_1 = arith.constant 0 : i32
    return %c0_i32, %c0_i32_0 : i32, i32
  }
  func.func @transform_5(%arg0: i32) -> (i32, i32) {
    %c0_i32 = arith.constant 0 : i32
    %c0_i32_0 = arith.constant 0 : i32
    %c0_i32_1 = arith.constant 0 : i32
    return %c0_i32, %c0_i32_0 : i32, i32
  }
}

</mosaic_0001>

<bundles_post_ra>
// kernel: net_forward.2
= control target key start
LH: loop header
LB: loop body
LE: loop exit
PB: predicated region body
PF: predicated region fallthrough
CT: control target
= control target key end

     0   :  { %10 = vsyncpa [#allocation5], 0  ;;  %s15698_s0 = inlined_call_operand.vmem [shape: f32[2,676,9], index: 0, kind: input, shape index: {}]   ;;  %s15699_s1 = inlined_call_operand.hbm [shape: f32[9,32], index: 1, kind: input, shape index: {}]   ;;  %s15700_s2 = inlined_call_operand.hbm [shape: f32[1,32], index: 2, kind: input, shape index: {}]   ;;  %s15701_s3 = inlined_call_operand.vmem [shape: f32[9,32,64], index: 3, kind: input, shape index: {}]   ;;  %s15702_s4 = inlined_call_operand.hbm [shape: f32[1,64], index: 4, kind: input, shape index: {}]   ;;  %s15703_s5 = inlined_call_operand.vmem [shape: f32[2,12,12,64], index: 5, kind: output, shape index: {}]  }
   0x1   :  { %11 = vsyncpa [#allocation7], 0  ;;  %s13363_s18 = smov 0  }
   0x2 LB: > { %s13324_s19 = smov [#allocation6]   ;;  %s13369_s21 = sadd.s32 4294967295, %s13322_s18   ;;  %s13322_s18 = sphi %s13363_s18, %s17_s18  }
   0x3   : > { %s184_s20 = sshll.u32 %s13324_s19, 4  ;;  %p9404_p0 = scmp.ge.s32.totalorder %s13322_s18, 1  ;;  %s185_s20 = int_to_ptr.vmem [resolvable:$true] %s184_s20 }
   0x4   : > { %p158_p1 = scmp.lt.s32.totalorder %s13322_s18, 3  ;;  %p15704_p2 = scmp.eq.s32.totalorder %s13369_s21, 0 }
   0x5   : > { %s13325_s23 = smov [#allocation4]   ;;  %s13326_s26 = smov [#allocation8]  }
   0x6   : > { %p13374_p3 = pnand %p9404_p0, %p158_p1  ;;  %s170_s24 = sshll.u32 %s13325_s23, 4  ;;  %s13386_s24 = int_to_ptr.vmem [resolvable:$true] %s170_s24 }
   0x7   : > { %s198_s27 = sshll.u32 %s13326_s26, 4  ;;  %s13224_s30 = scalar_lea.hbm %s15700_s2, 16  ;;  %s13388_s27 = int_to_ptr.vmem [resolvable:$true] %s198_s27 }
   0x8   : > { %s15752_s22 = scalar_select %p13374_p3, 1, 0 }
   0x9   : > { %p13188_p4 = pneg %p13374_p3  ;;  %p13225_p6 = scmp.ne.s32.totalorder %s15700_s2, %s13224_s30 }
   0xa   : > { %p13231_p10 = scmp.lt.u32.totalorder %s13224_s30, %s15700_s2 }
   0xb   : > { %p13382_p5 = pnand %p15704_p2, %p13188_p4 }
   0xd   : > { %p13398_p7 = pneg %p13382_p5 }
   0xf   : > { %p13227_p8 = pnand %p13398_p7, %p13225_p6 }
  0x11   : > { %p13228_p9 = pneg %p13227_p8 }
  0x13   : > { %p13233_p11 = pnand %p13231_p10, %p13228_p9 }
  0x15   : > { %13236 = shalt.err (!%p13233_p11)
}
  0x16   : > { %s13237_s11 = scalar_lea.vmem %s185_s20, 16  ;;  %s13244_s12 = scalar_lea.vmem %s185_s20, 32 }
  0x17   : > { %p13238_p12 = scmp.ne.s32.totalorder %s185_s20, %s13237_s11  ;;  %p13245_p1 = scmp.lt.s32.totalorder %s185_s20, %s185_s20 }
  0x18   : > { %p13246_p4 = scmp.lt.s32.totalorder %s13244_s12, %s13237_s11 }
  0x19   : > { %p13240_p13 = pnand %p13238_p12, %p13398_p7 }
  0x1a   : > { %p13247_p2 = por %p13246_p4, %p13245_p1 }
  0x1b   : > { %p13241_p0 = pneg %p13240_p13 }
  0x1d   : > { %p13248_p3 = pnand %p13247_p2, %p13241_p0 }
  0x1f   : > { %13251 = shalt.err (!%p13248_p3)
}
  0x20   : > { %13194 = dma.hbm_to_vmem [thread:$0]  (!%p13382_p5), %s15700_s2, 16, %s185_s20, [#allocation7]  }
  0x21   : > { %s13252_s17 = scalar_lea.hbm %s15699_s1, 256 }
  0x22   : > { %p13253_p6 = scmp.ne.s32.totalorder %s15699_s1, %s13252_s17  ;;  %p13259_p2 = scmp.lt.u32.totalorder %s13252_s17, %s15699_s1 }
  0x24   : > { %p13255_p8 = pnand %p13253_p6, %p13398_p7 }
  0x26   : > { %p13256_p9 = pneg %p13255_p8 }
  0x28   : > { %p13261_p3 = pnand %p13259_p2, %p13256_p9 }
  0x2a   : > { %13264 = shalt.err (!%p13261_p3)
}
  0x2b   : > { %s13265_s20 = scalar_lea.vmem %s13386_s24, 256  ;;  %p13273_p13 = scmp.lt.s32.totalorder %s13386_s24, %s13386_s24 }
  0x2c   : > { %p13266_p10 = scmp.ne.s32.totalorder %s13386_s24, %s13265_s20  ;;  %p13274_p0 = scmp.lt.s32.totalorder %s13265_s20, %s13265_s20 }
  0x2e   : > { %p13268_p11 = pnand %p13266_p10, %p13398_p7  ;;  %p13275_p1 = por %p13274_p0, %p13273_p13 }
  0x30   : > { %p13269_p12 = pneg %p13268_p11 }
  0x32   : > { %p13276_p4 = pnand %p13275_p1, %p13269_p12 }
  0x34   : > { %13279 = shalt.err (!%p13276_p4)
}
  0x35   : > { %s13327_s29 = smov 128   ;;  %s13328_s30 = smov 8  }
  0x36   : > { %13191 = dma.hbm_to_vmem [thread:$0]  (!%p13382_p5), %s15699_s1, 256, %s13386_s24, [#allocation5], %s13327_s29, %s13327_s29, %s13328_s30  }
  0x37   : > { %s13280_s11 = scalar_lea.hbm %s15702_s4, 16 }
  0x38   : > { %p13281_p6 = scmp.ne.s32.totalorder %s15702_s4, %s13280_s11  ;;  %p13287_p2 = scmp.lt.u32.totalorder %s13280_s11, %s15702_s4 }
  0x3a   : > { %p13283_p8 = pnand %p13281_p6, %p13398_p7 }
  0x3c   : > { %p13284_p9 = pneg %p13283_p8 }
  0x3e   : > { %p13289_p3 = pnand %p13287_p2, %p13284_p9 }
  0x40   : > { %13292 = shalt.err (!%p13289_p3)
}
  0x41   : > { %s13293_s24 = scalar_lea.vmem %s13388_s27, 16  ;;  %s13300_s16 = scalar_lea.vmem %s13388_s27, 32 }
  0x42   : > { %p13294_p10 = scmp.ne.s32.totalorder %s13388_s27, %s13293_s24  ;;  %p13301_p13 = scmp.lt.s32.totalorder %s13388_s27, %s13388_s27 }
  0x43   : > { %p13302_p0 = scmp.lt.s32.totalorder %s13300_s16, %s13293_s24 }
  0x44   : > { %p13296_p11 = pnand %p13294_p10, %p13398_p7 }
  0x45   : > { %p13303_p1 = por %p13302_p0, %p13301_p13 }
  0x46   : > { %p13297_p12 = pneg %p13296_p11 }
  0x48   : > { %p13304_p4 = pnand %p13303_p1, %p13297_p12 }
  0x4a   : > { %13307 = shalt.err (!%p13304_p4)
}
  0x4b   : > { %13197 = dma.hbm_to_vmem [thread:$0]  (!%p13382_p5), %s15702_s4, 16, %s13388_s27, [#allocation7]  }
  0x4c   : > { %p15755_p6 = scmp.ne.s32.totalorder %s15752_s22, 0 }
  0x4e   : > { %219 = sbr.rel (%p15755_p6) target bundleno = 1657 (0x679), region = 40 }
  0x55   : > { %p15756_p7 = scmp.eq.s32.totalorder %s13369_s21, 0 }
  0x57   : > { %13313 = dma.done.wait (%p15756_p7), [#allocation5], 256   ;;  %p15757_p8 = pmov %p15756_p7 }
  0x58   : > { %p15758_p9 = pmov %p15756_p7 }
  0x59   : > { %13315 = vsyncadd (%p15757_p8), [#allocation5], 4294967040 }
  0x5a   : > { %13317 = dma.done.wait (%p15758_p9), [#allocation7], 32   ;;  %p15759_p2 = pmov %p15756_p7 }
  0x5b   : > { %v13329_v0 = vmov 0.0|0.0   ;;  %p255_p5 = scmp.lt.s32.totalorder %s13369_s21, 1  ;;  %vm13330_vm0 = vmmov 0   ;;  %v13331_v1 = vmov 0.0   ;;  %vm615_vm1 = vcmask 1040384   ;;  %v350_v2 = vld [vmem:[#allocation4] sm:$0xff] }
  0x5c   : > { %13319 = vsyncadd (%p15759_p2), [#allocation7], 4294967264  ;;  %12470 = vmatprep.subr.bf16.mxu0 %v13329_v0  ;;  %11090 = vmatprep.mubr.msk.f32.mxu0 %vm13330_vm0, %v13331_v1  ;;  %v351_v3 = vld [vmem:[#allocation4 + $0x8] sm:$0x1]  ;;  %vm13332_vm2 = vmmov 1   ;;  %vm359_vm4 = vcmask 72704  }
  0x5d   : > { %s15907_s21 = smov (!%p255_p5, %s13369_s21), 1  ;;  %vm12472_vm3 = vmpackc.low %vm615_vm1, %vm13332_vm2  ;;  %v12471_v4 = vpack.c.bf16 %v351_v3, %v350_v2  ;;  %v9502_v57 = vld [vmem:[%s15701_s3 + $0x20] sm:$0xff]  ;;  %v9503_v58 = vld [vmem:[%s15701_s3 + $0x28] sm:$0xff]  ;;  %vm1194_vm5 = vcmask 261120   ;;  %vm1279_vm6 = vcmask 257024   ;;  %vm8937_vm7 = vcmask 523264  }
  0x5e   : > { %s13174_s22 = smul.u32 680, %s15907_s21  ;;  %v12474_v59 = vpack.c.bf16 %v9503_v58, %v9502_v57  ;;  %v9504_v61 = vld [vmem:[%s15701_s3 + $0x30] sm:$0xff]  ;;  %v9505_v62 = vld [vmem:[%s15701_s3 + $0x38] sm:$0xff]  ;;  %v13705_v0 = vld [vmem:[#allocation6] ss:$0 sm:$0xff]  ;;  %vm9039_vm8 = vcmask 519168  }
  0x5f   : > { %12473 = vmatpush3.bf16.msk.msra.mxu0 %vm12472_vm3, %v12471_v4  ;;  %v12478_v63 = vpack.c.bf16 %v9505_v62, %v9504_v61  ;;  %s13175_s20 = smul.u32 192, %s15907_s21  ;;  %vm9015_vm9 = vcmask 521216  }
  0x60   : > { %s13481_s8 = scalar_lea.vmem %s15698_s0, %s13174_s22  ;;  %12475 = vmatprep.subr.bf16.mxu0 %v12474_v59 }
  0x61   : > { %v265_v5 = vld [vmem:[%s13481_s8] sm:$0xff]  ;;  %v266_v6 = vld [vmem:[%s13481_s8 + $0x8] sm:$0xff]  ;;  %v267_v7 = vld [vmem:[%s13481_s8 + $0x10] sm:$0xff]  ;;  %s15454_s30 = scalar_lea.vmem %s15703_s5, %s13175_s20 }
  0x62   : > { %11091 = vmatmul.mubr.msk.f32.vlgmr.msra.gmra.mrb[0].mxu0 %vm359_vm4, %v265_v5  ;;  %v268_v8 = vld [vmem:[%s13481_s8 + $0x18] sm:$0xff]  ;;  %v269_v9 = vld [vmem:[%s13481_s8 + $0x20] sm:$0xff]  ;;  %v270_v10 = vld [vmem:[%s13481_s8 + $0x28] sm:$0xff] }
  0x63   : > { %11093 = vmatprep.mubr.msk.f32.mxu0 %vm13330_vm0, %v13331_v1  ;;  %v271_v11 = vld [vmem:[%s13481_s8 + $0x30] sm:$0xff]  ;;  %v272_v12 = vld [vmem:[%s13481_s8 + $0x38] sm:$0xff]  ;;  %v273_v13 = vld [vmem:[%s13481_s8 + $0x40] sm:$0xff]  ;;  %12477 = vmatpush3.bf16.msra.mxu0 %v12474_v59 }
  0x64   : > { %v274_v14 = vld [vmem:[%s13481_s8 + $0x48] sm:$0xff]  ;;  %v275_v15 = vld [vmem:[%s13481_s8 + $0x50] sm:$0xff]  ;;  %v276_v16 = vld [vmem:[%s13481_s8 + $0x58] sm:$0xff]  ;;  %12479 = vmatprep.subr.bf16.mxu0 %v12478_v63 }
  0x65   : > { %v277_v17 = vld [vmem:[%s13481_s8 + $0x60] sm:$0xff]  ;;  %v278_v18 = vld [vmem:[%s13481_s8 + $0x68] sm:$0xff]  ;;  %v279_v19 = vld [vmem:[%s13481_s8 + $0x70] sm:$0xff] }
  0x66   : > { %11094 = vmatmul.mubr.msk.f32.gmra.mrb[2].mxu0 %vm359_vm4, %v266_v6  ;;  %v280_v20 = vld [vmem:[%s13481_s8 + $0x78] sm:$0xff]  ;;  %v281_v21 = vld [vmem:[%s13481_s8 + $0x80] sm:$0xff]  ;;  %v282_v22 = vld [vmem:[%s13481_s8 + $0x88] sm:$0xff] }
  0x67   : > { %11096 = vmatprep.mubr.msk.f32.mxu0 %vm13330_vm0, %v13331_v1  ;;  %v283_v23 = vld [vmem:[%s13481_s8 + $0x90] sm:$0xff]  ;;  %v284_v24 = vld [vmem:[%s13481_s8 + $0x98] sm:$0xff]  ;;  %v285_v25 = vld [vmem:[%s13481_s8 + $0xa0] sm:$0xff]  ;;  %12481 = vmatpush3.bf16.msra.mxu0 %v12478_v63 }
  0x68   : > { %v286_v26 = vld [vmem:[%s13481_s8 + $0xa8] sm:$0xff]  ;;  %v287_v27 = vld [vmem:[%s13481_s8 + $0xb0] sm:$0xff]  ;;  %v288_v28 = vld [vmem:[%s13481_s8 + $0xb8] sm:$0xff] }
  0x69   : > { %v289_v29 = vld [vmem:[%s13481_s8 + $0xc0] sm:$0xff]  ;;  %v290_v30 = vld [vmem:[%s13481_s8 + $0xc8] sm:$0xff]  ;;  %v291_v31 = vld [vmem:[%s13481_s8 + $0xd0] sm:$0xff] }
  0x6a   : > { %11097 = vmatmul.mubr.msk.f32.gmra.mrb[4].mxu0 %vm359_vm4, %v267_v7  ;;  %v292_v32 = vld [vmem:[%s13481_s8 + $0xd8] sm:$0xff]  ;;  %v293_v33 = vld [vmem:[%s13481_s8 + $0xe0] sm:$0xff]  ;;  %v294_v34 = vld [vmem:[%s13481_s8 + $0xe8] sm:$0xff] }
  0x6b   : > { %11099 = vmatprep.mubr.msk.f32.mxu0 %vm13330_vm0, %v13331_v1  ;;  %v295_v35 = vld [vmem:[%s13481_s8 + $0xf0] sm:$0xff]  ;;  %v296_v36 = vld [vmem:[%s13481_s8 + $0xf8] sm:$0xff]  ;;  %v297_v37 = vld [vmem:[%s13481_s8 + $0x100] sm:$0xff] }
  0x6c   : > { %v298_v38 = vld [vmem:[%s13481_s8 + $0x108] sm:$0xff]  ;;  %v299_v39 = vld [vmem:[%s13481_s8 + $0x110] sm:$0xff]  ;;  %v300_v40 = vld [vmem:[%s13481_s8 + $0x118] sm:$0xff] }
  0x6d   : > { %v301_v41 = vld [vmem:[%s13481_s8 + $0x120] sm:$0xff]  ;;  %v302_v42 = vld [vmem:[%s13481_s8 + $0x128] sm:$0xff]  ;;  %v303_v43 = vld [vmem:[%s13481_s8 + $0x130] sm:$0xff] }
  0x6e   : > { %11100 = vmatmul.mubr.msk.f32.gmra.mrb[6].mxu0 %vm359_vm4, %v268_v8  ;;  %v304_v44 = vld [vmem:[%s13481_s8 + $0x138] sm:$0xff]  ;;  %v305_v45 = vld [vmem:[%s13481_s8 + $0x140] sm:$0xff]  ;;  %v306_v46 = vld [vmem:[%s13481_s8 + $0x148] sm:$0xff] }
  0x6f   : > { %11102 = vmatprep.mubr.msk.f32.mxu0 %vm13330_vm0, %v13331_v1  ;;  %v307_v47 = vld [vmem:[%s13481_s8 + $0x150] sm:$0xff]  ;;  %v308_v48 = vld [vmem:[%s13481_s8 + $0x158] sm:$0xff]  ;;  %v309_v49 = vld [vmem:[%s13481_s8 + $0x160] sm:$0xff] }
  0x70   : > { %v310_v50 = vld [vmem:[%s13481_s8 + $0x168] sm:$0xff]  ;;  %v311_v51 = vld [vmem:[%s13481_s8 + $0x170] sm:$0xff]  ;;  %v312_v52 = vld [vmem:[%s13481_s8 + $0x178] sm:$0xff] }
  0x71   : > { %v313_v53 = vld [vmem:[%s13481_s8 + $0x180] sm:$0xff]  ;;  %v314_v54 = vld [vmem:[%s13481_s8 + $0x188] sm:$0xff]  ;;  %v315_v55 = vld [vmem:[%s13481_s8 + $0x190] sm:$0xff] }
  0x72   : > { %11103 = vmatmul.mubr.msk.f32.gmra.mrb[8].mxu0 %vm359_vm4, %v269_v9  ;;  %v316_v56 = vld [vmem:[%s13481_s8 + $0x198] sm:$0xff]  ;;  %v317_v60 = vld [vmem:[%s13481_s8 + $0x1a0] sm:$0xff]  ;;  %v318_v2 = vld [vmem:[%s13481_s8 + $0x1a8] sm:$0xff] }
  0x73   : > { %11105 = vmatprep.mubr.msk.f32.mxu0 %vm13330_vm0, %v13331_v1  ;;  %v319_v6 = vld [vmem:[%s13481_s8 + $0x1b0] sm:$0xff]  ;;  %v328_v57 = vld [vmem:[%s13481_s8 + $0x1f8] sm:$0xff]  ;;  %v329_v62 = vld [vmem:[%s13481_s8 + $0x200] sm:$0xff] }
  0x76   : > { %11106 = vmatmul.mubr.msk.f32.gmra.mrb[10].mxu0 %vm359_vm4, %v270_v10 }
  0x77   : > { %11108 = vmatprep.mubr.msk.f32.mxu0 %vm13330_vm0, %v13331_v1 }
  0x7a   : > { %11109 = vmatmul.mubr.msk.f32.gmra.mrb[12].mxu0 %vm359_vm4, %v271_v11  ;;  %v320_v11 = vld [vmem:[%s13481_s8 + $0x1b8] sm:$0xff] }
  0x7b   : > { %11111 = vmatprep.mubr.msk.f32.mxu0 %vm13330_vm0, %v13331_v1 }
  0x7e   : > { %11112 = vmatmul.mubr.msk.f32.gmra.mrb[14].mxu0 %vm359_vm4, %v272_v12 }
  0x7f   : > { %11114 = vmatprep.mubr.msk.f32.mxu0 %vm13330_vm0, %v13331_v1 }
  0x82   : > { %11115 = vmatmul.mubr.msk.f32.gmra.mrb[16].mxu0 %vm359_vm4, %v273_v13 }
  0x83   : > { %11117 = vmatprep.mubr.msk.f32.mxu0 %vm13330_vm0, %v13331_v1 }
  0x86   : > { %11118 = vmatmul.mubr.msk.f32.gmra.mrb[18].mxu0 %vm359_vm4, %v274_v14 }
  0x87   : > { %11120 = vmatprep.mubr.msk.f32.mxu0 %vm13330_vm0, %v13331_v1 }
  0x8a   : > { %11121 = vmatmul.mubr.msk.f32.gmra.mrb[20].mxu0 %vm359_vm4, %v275_v15 }
  0x8b   : > { %11123 = vmatprep.mubr.msk.f32.mxu0 %vm13330_vm0, %v13331_v1 }
  0x8e   : > { %11124 = vmatmul.mubr.msk.f32.gmra.mrb[22].mxu0 %vm359_vm4, %v276_v16  ;;  %v321_v16 = vld [vmem:[%s13481_s8 + $0x1c0] sm:$0xff] }
  0x8f   : > { %11126 = vmatprep.mubr.msk.f32.mxu0 %vm13330_vm0, %v13331_v1 }
  0x92   : > { %11127 = vmatmul.mubr.msk.f32.gmra.mrb[24].mxu0 %vm359_vm4, %v277_v17 }
  0x93   : > { %11129 = vmatprep.mubr.msk.f32.mxu0 %vm13330_vm0, %v13331_v1 }
  0x96   : > { %11130 = vmatmul.mubr.msk.f32.gmra.mrb[26].mxu0 %vm359_vm4, %v278_v18 }
  0x97   : > { %11132 = vmatprep.mubr.msk.f32.mxu0 %vm13330_vm0, %v13331_v1 }
  0x9a   : > { %11133 = vmatmul.mubr.msk.f32.gmra.mrb[28].mxu0 %vm359_vm4, %v279_v19 }
  0x9b   : > { %11135 = vmatprep.mubr.msk.f32.mxu0 %vm13330_vm0, %v13331_v1 }
  0x9e   : > { %11136 = vmatmul.mubr.msk.f32.gmra.mrb[30].mxu0 %vm359_vm4, %v280_v20 }
  0x9f   : > { %11138 = vmatprep.mubr.msk.f32.mxu0 %vm13330_vm0, %v13331_v1 }
  0xa2   : > { %11139 = vmatmul.mubr.msk.f32.gmra.mrb[32].mxu0 %vm359_vm4, %v281_v21  ;;  %v322_v21 = vld [vmem:[%s13481_s8 + $0x1c8] sm:$0xff] }
  0xa3   : > { %11141 = vmatprep.mubr.msk.f32.mxu0 %vm13330_vm0, %v13331_v1 }
  0xa6   : > { %11142 = vmatmul.mubr.msk.f32.gmra.mrb[34].mxu0 %vm359_vm4, %v282_v22 }
  0xa7   : > { %11144 = vmatprep.mubr.msk.f32.mxu0 %vm13330_vm0, %v13331_v1 }
  0xaa   : > { %11145 = vmatmul.mubr.msk.f32.gmra.mrb[36].mxu0 %vm359_vm4, %v283_v23 }
  0xab   : > { %11147 = vmatprep.mubr.msk.f32.mxu0 %vm13330_vm0, %v13331_v1 }
  0xae   : > { %11148 = vmatmul.mubr.msk.f32.gmra.mrb[38].mxu0 %vm359_vm4, %v284_v24 }
  0xaf   : > { %11150 = vmatprep.mubr.msk.f32.mxu0 %vm13330_vm0, %v13331_v1 }
  0xb2   : > { %11151 = vmatmul.mubr.msk.f32.gmra.mrb[40].mxu0 %vm359_vm4, %v285_v25 }
  0xb3   : > { %11153 = vmatprep.mubr.msk.f32.mxu0 %vm13330_vm0, %v13331_v1 }
  0xb6   : > { %11154 = vmatmul.mubr.msk.f32.gmra.mrb[42].mxu0 %vm359_vm4, %v286_v26  ;;  %v323_v26 = vld [vmem:[%s13481_s8 + $0x1d0] sm:$0xff] }
  0xb7   : > { %11156 = vmatprep.mubr.msk.f32.mxu0 %vm13330_vm0, %v13331_v1 }
  0xba   : > { %11157 = vmatmul.mubr.msk.f32.gmra.mrb[44].mxu0 %vm359_vm4, %v287_v27 }
  0xbb   : > { %11159 = vmatprep.mubr.msk.f32.mxu0 %vm13330_vm0, %v13331_v1 }
  0xbe   : > { %11160 = vmatmul.mubr.msk.f32.gmra.mrb[46].mxu0 %vm359_vm4, %v288_v28 }
  0xbf   : > { %11162 = vmatprep.mubr.msk.f32.mxu0 %vm13330_vm0, %v13331_v1 }
  0xc2   : > { %11163 = vmatmul.mubr.msk.f32.gmra.mrb[48].mxu0 %vm359_vm4, %v289_v29 }
  0xc3   : > { %11165 = vmatprep.mubr.msk.f32.mxu0 %vm13330_vm0, %v13331_v1 }
  0xc6   : > { %11166 = vmatmul.mubr.msk.f32.gmra.mrb[50].mxu0 %vm359_vm4, %v290_v30 }
  0xc7   : > { %11168 = vmatprep.mubr.msk.f32.mxu0 %vm13330_vm0, %v13331_v1 }
  0xca   : > { %11169 = vmatmul.mubr.msk.f32.gmra.mrb[52].mxu0 %vm359_vm4, %v291_v31  ;;  %v324_v31 = vld [vmem:[%s13481_s8 + $0x1d8] sm:$0xff] }
  0xcb   : > { %11171 = vmatprep.mubr.msk.f32.mxu0 %vm13330_vm0, %v13331_v1 }
  0xce   : > { %11172 = vmatmul.mubr.msk.f32.gmra.mrb[54].mxu0 %vm359_vm4, %v292_v32  ;;  %v9744_v32 = vld [vmem:[%s15701_s3 + $0x60] sm:$0xff] }
  0xcf   : > { %11174 = vmatprep.mubr.msk.f32.mxu0 %vm13330_vm0, %v13331_v1 }
  0xd2   : > { %11175 = vmatmul.mubr.msk.f32.gmra.mrb[56].mxu0 %vm359_vm4, %v293_v33  ;;  %v9745_v33 = vld [vmem:[%s15701_s3 + $0x68] sm:$0xff] }
  0xd3   : > { %11177 = vmatprep.mubr.msk.f32.mxu0 %vm13330_vm0, %v13331_v1 }
  0xd6   : > { %11178 = vmatmul.mubr.msk.f32.gmra.mrb[58].mxu0 %vm359_vm4, %v294_v34 }
  0xd7   : > { %11180 = vmatprep.mubr.msk.f32.mxu0 %vm13330_vm0, %v13331_v1 }
  0xda   : > { %11181 = vmatmul.mubr.msk.f32.gmra.mrb[60].mxu0 %vm359_vm4, %v295_v35  ;;  %v13751_v35 = vpack.c.bf16 %v9745_v33, %v9744_v32 }
  0xdb   : > { %11183 = vmatprep.mubr.msk.f32.mxu0 %vm13330_vm0, %v13331_v1 }
  0xdc   : > { %12546 = vmatprep.subr.bf16.mxu1 %v13751_v35 }
  0xdd   : > { %12548 = vmatpush3.bf16.msra.mxu1 %v13751_v35 }
  0xde   : > { %11184 = vmatmul.mubr.msk.f32.gmra.mrb[62].mxu0 %vm359_vm4, %v296_v36 }
  0xdf   : > { %11186 = vmatprep.mubr.msk.f32.mxu0 %vm13330_vm0, %v13331_v1 }
  0xe2   : > { %11187 = vmatmul.mubr.msk.f32.gmra.mrb[64].mxu0 %vm359_vm4, %v297_v37 }
  0xe3   : > { %11189 = vmatprep.mubr.msk.f32.mxu0 %vm13330_vm0, %v13331_v1 }
  0xe6   : > { %11190 = vmatmul.mubr.msk.f32.gmra.mrb[66].mxu0 %vm359_vm4, %v298_v38 }
  0xe7   : > { %11192 = vmatprep.mubr.msk.f32.mxu0 %vm13330_vm0, %v13331_v1 }
  0xea   : > { %11193 = vmatmul.mubr.msk.f32.gmra.mrb[68].mxu0 %vm359_vm4, %v299_v39  ;;  %v325_v39 = vld [vmem:[%s13481_s8 + $0x1e0] sm:$0xff] }
  0xeb   : > { %11195 = vmatprep.mubr.msk.f32.mxu0 %vm13330_vm0, %v13331_v1 }
  0xee   : > { %11196 = vmatmul.mubr.msk.f32.gmra.mrb[70].mxu0 %vm359_vm4, %v300_v40  ;;  %v9746_v40 = vld [vmem:[%s15701_s3 + $0x70] sm:$0xff] }
  0xef   : > { %11198 = vmatprep.mubr.msk.f32.mxu0 %vm13330_vm0, %v13331_v1 }
  0xf2   : > { %11199 = vmatmul.mubr.msk.f32.gmra.mrb[72].mxu0 %vm359_vm4, %v301_v41  ;;  %v9747_v41 = vld [vmem:[%s15701_s3 + $0x78] sm:$0xff] }
  0xf3   : > { %11201 = vmatprep.mubr.msk.f32.mxu0 %vm13330_vm0, %v13331_v1 }
  0xf6   : > { %11202 = vmatmul.mubr.msk.f32.gmra.mrb[74].mxu0 %vm359_vm4, %v302_v42 }
  0xf7   : > { %11204 = vmatprep.mubr.msk.f32.mxu0 %vm13330_vm0, %v13331_v1 }
  0xfa   : > { %11205 = vmatmul.mubr.msk.f32.gmra.mrb[76].mxu0 %vm359_vm4, %v303_v43  ;;  %v13767_v43 = vpack.c.bf16 %v9747_v41, %v9746_v40  ;;  %v337_v41 = vld [vmem:[%s13481_s8 + $0x240] sm:$0xff] }
  0xfb   : > { %11207 = vmatprep.mubr.msk.f32.mxu0 %vm13330_vm0, %v13331_v1 }
  0xfc   : > { %12547 = vmatprep.subr.bf16.mxu1 %v13767_v43 }
  0xfd   : > { %12549 = vmatpush3.bf16.msra.mxu1 %v13767_v43 }
  0xfe   : > { %11208 = vmatmul.mubr.msk.f32.gmra.mrb[78].mxu0 %vm359_vm4, %v304_v44 }
  0xff   : > { %11210 = vmatprep.mubr.msk.f32.mxu0 %vm13330_vm0, %v13331_v1 }
 0x102   : > { %11211 = vmatmul.mubr.msk.f32.gmra.mrb[80].mxu0 %vm359_vm4, %v305_v45 }
 0x103   : > { %11213 = vmatprep.mubr.msk.f32.mxu0 %vm13330_vm0, %v13331_v1 }
 0x106   : > { %11214 = vmatmul.mubr.msk.f32.gmra.mrb[82].mxu0 %vm359_vm4, %v306_v46 }
 0x107   : > { %11216 = vmatprep.mubr.msk.f32.mxu0 %vm13330_vm0, %v13331_v1 }
 0x10a   : > { %11217 = vmatmul.mubr.msk.f32.gmra.mrb[84].mxu0 %vm359_vm4, %v307_v47  ;;  %v326_v47 = vld [vmem:[%s13481_s8 + $0x1e8] sm:$0xff] }
 0x10b   : > { %11219 = vmatprep.mubr.msk.f32.mxu0 %vm13330_vm0, %v13331_v1 }
 0x10e   : > { %11220 = vmatmul.mubr.msk.f32.gmra.mrb[86].mxu0 %vm359_vm4, %v308_v48 }
 0x10f   : > { %11222 = vmatprep.mubr.msk.f32.mxu0 %vm13330_vm0, %v13331_v1 }
 0x112   : > { %11223 = vmatmul.mubr.msk.f32.gmra.mrb[88].mxu0 %vm359_vm4, %v309_v49 }
 0x113   : > { %11225 = vmatprep.mubr.msk.f32.mxu0 %vm13330_vm0, %v13331_v1 }
 0x116   : > { %11226 = vmatmul.mubr.msk.f32.gmra.mrb[90].mxu0 %vm359_vm4, %v310_v50 }
 0x117   : > { %11228 = vmatprep.mubr.msk.f32.mxu0 %vm13330_vm0, %v13331_v1 }
 0x11a   : > { %11229 = vmatmul.mubr.msk.f32.gmra.mrb[92].mxu0 %vm359_vm4, %v311_v51 }
 0x11b   : > { %11231 = vmatprep.mubr.msk.f32.mxu0 %vm13330_vm0, %v13331_v1 }
 0x11e   : > { %11232 = vmatmul.mubr.msk.f32.gmra.mrb[94].mxu0 %vm359_vm4, %v312_v52  ;;  %v327_v52 = vld [vmem:[%s13481_s8 + $0x1f0] sm:$0xff] }
 0x11f   : > { %11234 = vmatprep.mubr.msk.f32.mxu0 %vm13330_vm0, %v13331_v1 }
 0x122   : > { %11235 = vmatmul.mubr.msk.f32.gmra.mrb[96].mxu0 %vm359_vm4, %v313_v53 }
 0x123   : > { %11237 = vmatprep.mubr.msk.f32.mxu0 %vm13330_vm0, %v13331_v1 }
 0x126   : > { %11238 = vmatmul.mubr.msk.f32.gmra.mrb[98].mxu0 %vm359_vm4, %v314_v54 }
 0x127   : > { %11240 = vmatprep.mubr.msk.f32.mxu0 %vm13330_vm0, %v13331_v1 }
 0x12a   : > { %11241 = vmatmul.mubr.msk.f32.gmra.mrb[100].mxu0 %vm359_vm4, %v315_v55 }
 0x12b   : > { %11243 = vmatprep.mubr.msk.f32.mxu0 %vm13330_vm0, %v13331_v1 }
 0x12e   : > { %11244 = vmatmul.mubr.msk.f32.gmra.mrb[102].mxu0 %vm359_vm4, %v316_v56 }
 0x12f   : > { %11246 = vmatprep.mubr.msk.f32.mxu0 %vm13330_vm0, %v13331_v1 }
 0x132   : > { %11247 = vmatmul.mubr.msk.f32.gmra.mrb[104].mxu0 %vm359_vm4, %v317_v60 }
 0x133   : > { %11249 = vmatprep.mubr.msk.f32.mxu0 %vm13330_vm0, %v13331_v1 }
 0x135   : > { %v685_v3 = vpop.f32.mrb[0].mxu0 }
 0x136   : > { %v686_v4 = vadd.f32 %v13705_v0, %v685_v3  ;;  %v11092_v5 = vpop.f32.mrb[1].mxu0  ;;  %11250 = vmatmul.mubr.msk.f32.gmra.mrb[106].mxu0 %vm359_vm4, %v318_v2 }
 0x137   : > { %11252 = vmatprep.mubr.msk.f32.mxu0 %vm13330_vm0, %v13331_v1  ;;  %v330_v5 = vld [vmem:[%s13481_s8 + $0x208] sm:$0xff] }
 0x138   : > { %v1109_v7 = vmax.f32 %v686_v4, 0.0 }
 0x139   : > { %v690_v8 = vpop.f32.mrb[2].mxu0 }
 0x13a   : > { %1195 = vst.msk [vmem:[#allocation2] sm:$0xff] %vm1194_vm5, %v1109_v7  ;;  %v691_v9 = vadd.f32 %v13705_v0, %v690_v8  ;;  %v11095_v10 = vpop.f32.mrb[3].mxu0  ;;  %11253 = vmatmul.mubr.msk.f32.gmra.mrb[108].mxu0 %vm359_vm4, %v319_v6 }
 0x13b   : > { %11255 = vmatprep.mubr.msk.f32.mxu0 %vm13330_vm0, %v13331_v1  ;;  %v331_v10 = vld [vmem:[%s13481_s8 + $0x210] sm:$0xff] }
 0x13c   : > { %v1110_v12 = vmax.f32 %v691_v9, 0.0 }
 0x13d   : > { %v695_v13 = vpop.f32.mrb[4].mxu0 }
 0x13e   : > { %1196 = vst.msk [vmem:[#allocation2 + $0x8] sm:$0xff] %vm1194_vm5, %v1110_v12  ;;  %v696_v14 = vadd.f32 %v13705_v0, %v695_v13  ;;  %v11098_v15 = vpop.f32.mrb[5].mxu0  ;;  %11256 = vmatmul.mubr.msk.f32.gmra.mrb[110].mxu0 %vm359_vm4, %v320_v11 }
 0x13f   : > { %11258 = vmatprep.mubr.msk.f32.mxu0 %vm13330_vm0, %v13331_v1  ;;  %v332_v15 = vld [vmem:[%s13481_s8 + $0x218] sm:$0xff] }
 0x140   : > { %v1111_v17 = vmax.f32 %v696_v14, 0.0 }
 0x141   : > { %v700_v18 = vpop.f32.mrb[6].mxu0 }
 0x142   : > { %1197 = vst.msk [vmem:[#allocation2 + $0x10] sm:$0xff] %vm1194_vm5, %v1111_v17  ;;  %v701_v19 = vadd.f32 %v13705_v0, %v700_v18  ;;  %v11101_v20 = vpop.f32.mrb[7].mxu0  ;;  %11259 = vmatmul.mubr.msk.f32.gmra.mrb[112].mxu0 %vm359_vm4, %v321_v16 }
 0x143   : > { %11261 = vmatprep.mubr.msk.f32.mxu0 %vm13330_vm0, %v13331_v1  ;;  %v333_v20 = vld [vmem:[%s13481_s8 + $0x220] sm:$0xff] }
 0x144   : > { %v1112_v22 = vmax.f32 %v701_v19, 0.0 }
 0x145   : > { %v705_v23 = vpop.f32.mrb[8].mxu0 }
 0x146   : > { %1198 = vst.msk [vmem:[#allocation2 + $0x18] sm:$0xff] %vm1194_vm5, %v1112_v22  ;;  %v706_v24 = vadd.f32 %v13705_v0, %v705_v23  ;;  %v11104_v25 = vpop.f32.mrb[9].mxu0  ;;  %11262 = vmatmul.mubr.msk.f32.gmra.mrb[114].mxu0 %vm359_vm4, %v322_v21 }
 0x147   : > { %11264 = vmatprep.mubr.msk.f32.mxu0 %vm13330_vm0, %v13331_v1  ;;  %v334_v25 = vld [vmem:[%s13481_s8 + $0x228] sm:$0xff] }
 0x148   : > { %v1113_v27 = vmax.f32 %v706_v24, 0.0 }
 0x149   : > { %v710_v28 = vpop.f32.mrb[10].mxu0 }
 0x14a   : > { %1199 = vst.msk [vmem:[#allocation2 + $0x20] sm:$0xff] %vm1194_vm5, %v1113_v27  ;;  %v711_v29 = vadd.f32 %v13705_v0, %v710_v28  ;;  %v11107_v30 = vpop.f32.mrb[11].mxu0  ;;  %11265 = vmatmul.mubr.msk.f32.gmra.mrb[116].mxu0 %vm359_vm4, %v323_v26 }
 0x14b   : > { %11267 = vmatprep.mubr.msk.f32.mxu0 %vm13330_vm0, %v13331_v1  ;;  %v335_v30 = vld [vmem:[%s13481_s8 + $0x230] sm:$0xff] }
 0x14c   : > { %v1114_v34 = vmax.f32 %v711_v29, 0.0 }
 0x14d   : > { %v715_v36 = vpop.f32.mrb[12].mxu0 }
 0x14e   : > { %1200 = vst.msk [vmem:[#allocation2 + $0x28] sm:$0xff] %vm1194_vm5, %v1114_v34  ;;  %v716_v37 = vadd.f32 %v13705_v0, %v715_v36  ;;  %v11110_v38 = vpop.f32.mrb[13].mxu0  ;;  %11268 = vmatmul.mubr.msk.f32.gmra.mrb[118].mxu0 %vm359_vm4, %v324_v31  ;;  %v336_v36 = vld [vmem:[%s13481_s8 + $0x238] sm:$0xff] }
 0x14f   : > { %11270 = vmatprep.mubr.msk.f32.mxu0 %vm13330_vm0, %v13331_v1 }
 0x150   : > { %v1115_v42 = vmax.f32 %v716_v37, 0.0 }
 0x151   : > { %v720_v44 = vpop.f32.mrb[14].mxu0 }
 0x152   : > { %1201 = vst.msk [vmem:[#allocation2 + $0x30] sm:$0xff] %vm1194_vm5, %v1115_v42  ;;  %v721_v45 = vadd.f32 %v13705_v0, %v720_v44  ;;  %v11113_v46 = vpop.f32.mrb[15].mxu0  ;;  %11271 = vmatmul.mubr.msk.f32.gmra.mrb[120].mxu0 %vm359_vm4, %v325_v39 }
 0x153   : > { %11273 = vmatprep.mubr.msk.f32.mxu0 %vm13330_vm0, %v13331_v1 }
 0x154   : > { %v1116_v48 = vmax.f32 %v721_v45, 0.0 }
 0x155   : > { %v725_v49 = vpop.f32.mrb[16].mxu0 }
 0x156   : > { %1202 = vst.msk [vmem:[#allocation2 + $0x38] sm:$0xff] %vm1194_vm5, %v1116_v48  ;;  %v726_v50 = vadd.f32 %v13705_v0, %v725_v49  ;;  %v11116_v51 = vpop.f32.mrb[17].mxu0  ;;  %11274 = vmatmul.mubr.msk.f32.gmra.mrb[122].mxu0 %vm359_vm4, %v326_v47  ;;  %v338_v47 = vld [vmem:[%s13481_s8 + $0x248] sm:$0xff] }
 0x157   : > { %11276 = vmatprep.mubr.msk.f32.mxu0 %vm13330_vm0, %v13331_v1 }
 0x158   : > { %v1117_v53 = vmax.f32 %v726_v50, 0.0 }
 0x159   : > { %v730_v54 = vpop.f32.mrb[18].mxu0 }
 0x15a   : > { %1203 = vst.msk [vmem:[#allocation2 + $0x40] sm:$0xff] %vm1194_vm5, %v1117_v53  ;;  %v731_v55 = vadd.f32 %v13705_v0, %v730_v54  ;;  %v11119_v56 = vpop.f32.mrb[19].mxu0  ;;  %11277 = vmatmul.mubr.msk.f32.gmra.mrb[124].mxu0 %vm359_vm4, %v327_v52  ;;  %v339_v52 = vld [vmem:[%s13481_s8 + $0x250] sm:$0xff] }
 0x15b   : > { %11279 = vmatprep.mubr.msk.f32.mxu0 %vm13330_vm0, %v13331_v1 }
 0x15c   : > { %v1118_v58 = vmax.f32 %v731_v55, 0.0 }
 0x15d   : > { %v735_v59 = vpop.f32.mrb[20].mxu0 }
 0x15e   : > { %1204 = vst.msk [vmem:[#allocation2 + $0x48] sm:$0xff] %vm1194_vm5, %v1118_v58  ;;  %v736_v60 = vadd.f32 %v13705_v0, %v735_v59  ;;  %v11122_v61 = vpop.f32.mrb[21].mxu0  ;;  %11280 = vmatmul.mubr.msk.f32.gmra.mrb[126].mxu0 %vm359_vm4, %v328_v57  ;;  %v340_v57 = vld [vmem:[%s13481_s8 + $0x258] sm:$0xff] }
 0x15f   : > { %11282 = vmatprep.mubr.msk.f32.mxu0 %vm13330_vm0, %v13331_v1 }
 0x160   : > { %v1119_v63 = vmax.f32 %v736_v60, 0.0 }
 0x161   : > { %v740_v2 = vpop.f32.mrb[22].mxu0 }
 0x162   : > { %1205 = vst.msk [vmem:[#allocation2 + $0x50] sm:$0xff] %vm1194_vm5, %v1119_v63  ;;  %v741_v3 = vadd.f32 %v13705_v0, %v740_v2  ;;  %v11125_v4 = vpop.f32.mrb[23].mxu0  ;;  %11283 = vmatmul.mubr.msk.f32.gmra.mrb[128].mxu0 %vm359_vm4, %v329_v62  ;;  %v341_v62 = vld [vmem:[%s13481_s8 + $0x260] sm:$0xff] }
 0x163   : > { %11285 = vmatprep.mubr.msk.f32.mxu0 %vm13330_vm0, %v13331_v1 }
 0x164   : > { %v1120_v6 = vmax.f32 %v741_v3, 0.0 }
 0x165   : > { %v745_v7 = vpop.f32.mrb[24].mxu0 }
 0x166   : > { %1206 = vst.msk [vmem:[#allocation2 + $0x58] sm:$0xff] %vm1194_vm5, %v1120_v6  ;;  %v746_v8 = vadd.f32 %v13705_v0, %v745_v7  ;;  %v11128_v9 = vpop.f32.mrb[25].mxu0  ;;  %11286 = vmatmul.mubr.msk.f32.gmra.mrb[130].mxu0 %vm359_vm4, %v330_v5  ;;  %v342_v5 = vld [vmem:[%s13481_s8 + $0x268] sm:$0xff] }
 0x167   : > { %11288 = vmatprep.mubr.msk.f32.mxu0 %vm13330_vm0, %v13331_v1 }
 0x168   : > { %v1121_v11 = vmax.f32 %v746_v8, 0.0 }
 0x169   : > { %v750_v12 = vpop.f32.mrb[26].mxu0 }
 0x16a   : > { %1207 = vst.msk [vmem:[#allocation2 + $0x60] sm:$0xff] %vm1194_vm5, %v1121_v11  ;;  %v751_v13 = vadd.f32 %v13705_v0, %v750_v12  ;;  %v11131_v14 = vpop.f32.mrb[27].mxu0  ;;  %11289 = vmatmul.mubr.msk.f32.gmra.mrb[132].mxu0 %vm359_vm4, %v331_v10  ;;  %v343_v10 = vld [vmem:[%s13481_s8 + $0x270] sm:$0xff] }
 0x16b   : > { %11291 = vmatprep.mubr.msk.f32.mxu0 %vm13330_vm0, %v13331_v1 }
 0x16c   : > { %v1122_v16 = vmax.f32 %v751_v13, 0.0 }
 0x16d   : > { %v755_v17 = vpop.f32.mrb[28].mxu0 }
 0x16e   : > { %1208 = vst.msk [vmem:[#allocation2 + $0x68] sm:$0xff] %vm1194_vm5, %v1122_v16  ;;  %v756_v18 = vadd.f32 %v13705_v0, %v755_v17  ;;  %v11134_v19 = vpop.f32.mrb[29].mxu0  ;;  %11292 = vmatmul.mubr.msk.f32.gmra.mrb[134].mxu0 %vm359_vm4, %v332_v15  ;;  %v344_v15 = vld [vmem:[%s13481_s8 + $0x278] sm:$0xff] }
 0x16f   : > { %11294 = vmatprep.mubr.msk.f32.mxu0 %vm13330_vm0, %v13331_v1 }
 0x170   : > { %v1123_v21 = vmax.f32 %v756_v18, 0.0 }
 0x171   : > { %v760_v22 = vpop.f32.mrb[30].mxu0 }
 0x172   : > { %1209 = vst.msk [vmem:[#allocation2 + $0x70] sm:$0xff] %vm1194_vm5, %v1123_v21  ;;  %v761_v23 = vadd.f32 %v13705_v0, %v760_v22  ;;  %v11137_v24 = vpop.f32.mrb[31].mxu0  ;;  %11295 = vmatmul.mubr.msk.f32.gmra.mrb[136].mxu0 %vm359_vm4, %v333_v20  ;;  %v345_v20 = vld [vmem:[%s13481_s8 + $0x280] sm:$0xff] }
 0x173   : > { %11297 = vmatprep.mubr.msk.f32.mxu0 %vm13330_vm0, %v13331_v1 }
 0x174   : > { %v1124_v26 = vmax.f32 %v761_v23, 0.0 }
 0x175   : > { %v765_v27 = vpop.f32.mrb[32].mxu0 }
 0x176   : > { %1210 = vst.msk [vmem:[#allocation2 + $0x78] sm:$0xff] %vm1194_vm5, %v1124_v26  ;;  %v766_v28 = vadd.f32 %v13705_v0, %v765_v27  ;;  %v11140_v29 = vpop.f32.mrb[33].mxu0  ;;  %11298 = vmatmul.mubr.msk.f32.gmra.mrb[138].mxu0 %vm359_vm4, %v334_v25  ;;  %v346_v25 = vld [vmem:[%s13481_s8 + $0x288] sm:$0xff] }
 0x177   : > { %11300 = vmatprep.mubr.msk.f32.mxu0 %vm13330_vm0, %v13331_v1 }
 0x178   : > { %v1125_v31 = vmax.f32 %v766_v28, 0.0 }
 0x179   : > { %v770_v32 = vpop.f32.mrb[34].mxu0 }
 0x17a   : > { %1211 = vst.msk [vmem:[#allocation2 + $0x80] sm:$0xff] %vm1194_vm5, %v1125_v31  ;;  %v771_v33 = vadd.f32 %v13705_v0, %v770_v32  ;;  %v11143_v34 = vpop.f32.mrb[35].mxu0  ;;  %11301 = vmatmul.mubr.msk.f32.gmra.mrb[140].mxu0 %vm359_vm4, %v335_v30  ;;  %v347_v30 = vld [vmem:[%s13481_s8 + $0x290] sm:$0xff] }
 0x17b   : > { %11303 = vmatprep.mubr.msk.f32.mxu0 %vm13330_vm0, %v13331_v1 }
 0x17c   : > { %v1126_v37 = vmax.f32 %v771_v33, 0.0 }
 0x17d   : > { %v775_v38 = vpop.f32.mrb[36].mxu0 }
 0x17e   : > { %1212 = vst.msk [vmem:[#allocation2 + $0x88] sm:$0xff] %vm1194_vm5, %v1126_v37  ;;  %v776_v39 = vadd.f32 %v13705_v0, %v775_v38  ;;  %v11146_v40 = vpop.f32.mrb[37].mxu0  ;;  %11304 = vmatmul.mubr.msk.f32.gmra.mrb[142].mxu0 %vm359_vm4, %v336_v36  ;;  %v348_v36 = vld [vmem:[%s13481_s8 + $0x298] sm:$0xff] }
 0x17f   : > { %11306 = vmatprep.mubr.msk.f32.mxu0 %vm13330_vm0, %v13331_v1 }
 0x180   : > { %v1127_v42 = vmax.f32 %v776_v39, 0.0 }
 0x181   : > { %v780_v44 = vpop.f32.mrb[38].mxu0 }
 0x182   : > { %1213 = vst.msk [vmem:[#allocation2 + $0x90] sm:$0xff] %vm1194_vm5, %v1127_v42  ;;  %v781_v45 = vadd.f32 %v13705_v0, %v780_v44  ;;  %v11149_v46 = vpop.f32.mrb[39].mxu0  ;;  %11307 = vmatmul.mubr.msk.f32.gmra.mrb[144].mxu0 %vm359_vm4, %v337_v41  ;;  %v9826_v41 = vld [vmem:[%s15701_s3 + $0x80] sm:$0xff]  ;;  %v9827_v42 = vld [vmem:[%s15701_s3 + $0x88] sm:$0xff] }
 0x183   : > { %11309 = vmatprep.mubr.msk.f32.mxu0 %vm13330_vm0, %v13331_v1  ;;  %v349_v44 = vld [vmem:[%s13481_s8 + $0x2a0] sm:$0xf] }
 0x184   : > { %v1128_v48 = vmax.f32 %v781_v45, 0.0  ;;  %v13921_v45 = vpack.c.bf16 %v9827_v42, %v9826_v41 }
 0x185   : > { %v785_v49 = vpop.f32.mrb[40].mxu0 }
 0x186   : > { %1214 = vst.msk [vmem:[#allocation2 + $0x98] sm:$0xff] %vm1194_vm5, %v1128_v48  ;;  %v786_v50 = vadd.f32 %v13705_v0, %v785_v49  ;;  %v11152_v51 = vpop.f32.mrb[41].mxu0  ;;  %11310 = vmatmul.mubr.msk.f32.gmra.mrb[146].mxu0 %vm359_vm4, %v338_v47  ;;  %12507 = vmatprep.subr.bf16.mxu1 %v13921_v45 }
 0x187   : > { %11312 = vmatprep.mubr.msk.f32.mxu0 %vm13330_vm0, %v13331_v1 }
 0x188   : > { %v1129_v53 = vmax.f32 %v786_v50, 0.0  ;;  %v1363_v50 = vld [vmem:[#allocation2 + $0x1] sm:$0xff] }
 0x189   : > { %v790_v54 = vpop.f32.mrb[42].mxu0 }
 0x18a   : > { %1215 = vst.msk [vmem:[#allocation2 + $0xa0] sm:$0xff] %vm1194_vm5, %v1129_v53  ;;  %v791_v55 = vadd.f32 %v13705_v0, %v790_v54  ;;  %v11155_v56 = vpop.f32.mrb[43].mxu0  ;;  %11313 = vmatmul.mubr.msk.f32.gmra.mrb[148].mxu0 %vm359_vm4, %v339_v52 }
 0x18b   : > { %11315 = vmatprep.mubr.msk.f32.mxu0 %vm13330_vm0, %v13331_v1 }
 0x18c   : > { %v1130_v58 = vmax.f32 %v791_v55, 0.0  ;;  %v1365_v55 = vld [vmem:[#allocation2 + $0x11] sm:$0xff] }
 0x18d   : > { %v795_v59 = vpop.f32.mrb[44].mxu0 }
 0x18e   : > { %1216 = vst.msk [vmem:[#allocation2 + $0xa8] sm:$0xff] %vm1194_vm5, %v1130_v58  ;;  %v796_v60 = vadd.f32 %v13705_v0, %v795_v59  ;;  %v11158_v61 = vpop.f32.mrb[45].mxu0  ;;  %11316 = vmatmul.mubr.msk.f32.gmra.mrb[150].mxu0 %vm359_vm4, %v340_v57  ;;  %v1366_v58 = vld [vmem:[#allocation2 + $0x19] sm:$0xff] }
 0x18f   : > { %11318 = vmatprep.mubr.msk.f32.mxu0 %vm13330_vm0, %v13331_v1  ;;  %v1367_v61 = vld [vmem:[#allocation2 + $0x21] sm:$0xff] }
 0x190   : > { %v1131_v63 = vmax.f32 %v796_v60, 0.0 }
 0x191   : > { %v800_v2 = vpop.f32.mrb[46].mxu0 }
 0x192   : > { %1217 = vst.msk [vmem:[#allocation2 + $0xb0] sm:$0xff] %vm1194_vm5, %v1131_v63  ;;  %v801_v3 = vadd.f32 %v13705_v0, %v800_v2  ;;  %v11161_v4 = vpop.f32.mrb[47].mxu0  ;;  %11319 = vmatmul.mubr.msk.f32.gmra.mrb[152].mxu0 %vm359_vm4, %v341_v62  ;;  %v1368_v2 = vld [vmem:[#allocation2 + $0x29] sm:$0xff] }
 0x193   : > { %11321 = vmatprep.mubr.msk.f32.mxu0 %vm13330_vm0, %v13331_v1 }
 0x194   : > { %v1132_v6 = vmax.f32 %v801_v3, 0.0 }
 0x195   : > { %v805_v7 = vpop.f32.mrb[48].mxu0 }
 0x196   : > { %1218 = vst.msk [vmem:[#allocation2 + $0xb8] sm:$0xff] %vm1194_vm5, %v1132_v6  ;;  %v806_v8 = vadd.f32 %v13705_v0, %v805_v7  ;;  %v11164_v9 = vpop.f32.mrb[49].mxu0  ;;  %11322 = vmatmul.mubr.msk.f32.gmra.mrb[154].mxu0 %vm359_vm4, %v342_v5  ;;  %v1369_v5 = vld [vmem:[#allocation2 + $0x31] sm:$0xff] }
 0x197   : > { %11324 = vmatprep.mubr.msk.f32.mxu0 %vm13330_vm0, %v13331_v1 }
 0x198   : > { %v1133_v11 = vmax.f32 %v806_v8, 0.0  ;;  %v1370_v8 = vld [vmem:[#allocation2 + $0x39] sm:$0xff] }
 0x199   : > { %v810_v12 = vpop.f32.mrb[50].mxu0 }
 0x19a   : > { %1219 = vst.msk [vmem:[#allocation2 + $0xc0] sm:$0xff] %vm1194_vm5, %v1133_v11  ;;  %v811_v13 = vadd.f32 %v13705_v0, %v810_v12  ;;  %v11167_v14 = vpop.f32.mrb[51].mxu0  ;;  %11325 = vmatmul.mubr.msk.f32.gmra.mrb[156].mxu0 %vm359_vm4, %v343_v10  ;;  %v1371_v11 = vld [vmem:[#allocation2 + $0x41] sm:$0xff] }
 0x19b   : > { %11327 = vmatprep.mubr.msk.f32.mxu0 %vm13330_vm0, %v13331_v1  ;;  %v1372_v14 = vld [vmem:[#allocation2 + $0x49] sm:$0xff] }
 0x19c   : > { %v1134_v16 = vmax.f32 %v811_v13, 0.0 }
 0x19d   : > { %v815_v17 = vpop.f32.mrb[52].mxu0 }
 0x19e   : > { %1220 = vst.msk [vmem:[#allocation2 + $0xc8] sm:$0xff] %vm1194_vm5, %v1134_v16  ;;  %v816_v18 = vadd.f32 %v13705_v0, %v815_v17  ;;  %v11170_v19 = vpop.f32.mrb[53].mxu0  ;;  %11328 = vmatmul.mubr.msk.f32.gmra.mrb[158].mxu0 %vm359_vm4, %v344_v15  ;;  %v1373_v17 = vld [vmem:[#allocation2 + $0x51] sm:$0xff] }
 0x19f   : > { %11330 = vmatprep.mubr.msk.f32.mxu0 %vm13330_vm0, %v13331_v1 }
 0x1a0   : > { %v1135_v21 = vmax.f32 %v816_v18, 0.0 }
 0x1a1   : > { %v820_v22 = vpop.f32.mrb[54].mxu0 }
 0x1a2   : > { %1221 = vst.msk [vmem:[#allocation2 + $0xd0] sm:$0xff] %vm1194_vm5, %v1135_v21  ;;  %v821_v23 = vadd.f32 %v13705_v0, %v820_v22  ;;  %v11173_v24 = vpop.f32.mrb[55].mxu0  ;;  %11331 = vmatmul.mubr.msk.f32.gmra.mrb[160].mxu0 %vm359_vm4, %v345_v20  ;;  %v1374_v20 = vld [vmem:[#allocation2 + $0x59] sm:$0xff] }
 0x1a3   : > { %11333 = vmatprep.mubr.msk.f32.mxu0 %vm13330_vm0, %v13331_v1 }
 0x1a4   : > { %v1136_v26 = vmax.f32 %v821_v23, 0.0  ;;  %v1375_v23 = vld [vmem:[#allocation2 + $0x61] sm:$0xff] }
 0x1a5   : > { %v825_v27 = vpop.f32.mrb[56].mxu0 }
 0x1a6   : > { %1222 = vst.msk [vmem:[#allocation2 + $0xd8] sm:$0xff] %vm1194_vm5, %v1136_v26  ;;  %v826_v28 = vadd.f32 %v13705_v0, %v825_v27  ;;  %v11176_v29 = vpop.f32.mrb[57].mxu0  ;;  %11334 = vmatmul.mubr.msk.f32.gmra.mrb[162].mxu0 %vm359_vm4, %v346_v25  ;;  %v1376_v26 = vld [vmem:[#allocation2 + $0x69] sm:$0xff] }
 0x1a7   : > { %11336 = vmatprep.mubr.msk.f32.mxu0 %vm13330_vm0, %v13331_v1  ;;  %v1377_v29 = vld [vmem:[#allocation2 + $0x71] sm:$0xff] }
 0x1a8   : > { %v1137_v31 = vmax.f32 %v826_v28, 0.0 }
 0x1a9   : > { %v830_v32 = vpop.f32.mrb[58].mxu0 }
 0x1aa   : > { %1223 = vst.msk [vmem:[#allocation2 + $0xe0] sm:$0xff] %vm1194_vm5, %v1137_v31  ;;  %v831_v33 = vadd.f32 %v13705_v0, %v830_v32  ;;  %v11179_v34 = vpop.f32.mrb[59].mxu0  ;;  %11337 = vmatmul.mubr.msk.f32.gmra.mrb[164].mxu0 %vm359_vm4, %v347_v30  ;;  %v1378_v32 = vld [vmem:[#allocation2 + $0x79] sm:$0xff] }
 0x1ab   : > { %11339 = vmatprep.mubr.msk.f32.mxu0 %vm13330_vm0, %v13331_v1 }
 0x1ac   : > { %v1138_v37 = vmax.f32 %v831_v33, 0.0 }
 0x1ad   : > { %v835_v38 = vpop.f32.mrb[60].mxu0 }
 0x1ae   : > { %1224 = vst.msk [vmem:[#allocation2 + $0xe8] sm:$0xff] %vm1194_vm5, %v1138_v37  ;;  %v836_v39 = vadd.f32 %v13705_v0, %v835_v38  ;;  %v11182_v40 = vpop.f32.mrb[61].mxu0  ;;  %11340 = vmatmul.mubr.msk.f32.gmra.mrb[166].mxu0 %vm359_vm4, %v348_v36  ;;  %v1379_v37 = vld [vmem:[#allocation2 + $0x81] sm:$0xff] }
 0x1af   : > { %11342 = vmatprep.mubr.msk.f32.mxu0 %vm13330_vm0, %v13331_v1  ;;  %v1364_v1 = vld [vmem:[#allocation2 + $0x9] sm:$0xff] }
 0x1b0   : > { %v1139_v46 = vmax.f32 %v836_v39, 0.0  ;;  %v1380_v40 = vld [vmem:[#allocation2 + $0x89] sm:$0xff] }
 0x1b1   : > { %v840_v47 = vpop.f32.mrb[62].mxu0 }
 0x1b2   : > { %1225 = vst.msk [vmem:[#allocation2 + $0xf0] sm:$0xff] %vm1194_vm5, %v1139_v46  ;;  %v841_v48 = vadd.f32 %v13705_v0, %v840_v47  ;;  %v11185_v49 = vpop.f32.mrb[63].mxu0  ;;  %11343 = vmatmul.mubr.msk.f32.gmra.mrb[168].mxu0 %vm359_vm4, %v349_v44  ;;  %v1381_v46 = vld [vmem:[#allocation2 + $0x91] sm:$0xff] }
 0x1b3   : > { %11353 = vmatprep.mubr.msk.f32.mxu0 %vm1194_vm5, %v1363_v50  ;;  %v1382_v49 = vld [vmem:[#allocation2 + $0x99] sm:$0xff] }
 0x1b4   : > { %v1140_v51 = vmax.f32 %v841_v48, 0.0 }
 0x1b5   : > { %v845_v52 = vpop.f32.mrb[64].mxu0 }
 0x1b6   : > { %1226 = vst.msk [vmem:[#allocation2 + $0xf8] sm:$0xff] %vm1194_vm5, %v1140_v51  ;;  %v846_v53 = vadd.f32 %v13705_v0, %v845_v52  ;;  %v11188_v54 = vpop.f32.mrb[65].mxu0  ;;  %11354 = vmatmul.mubr.msk.f32.vlgmr.msra.gmra.mrb[170].mxu0 %vm1194_vm5, %v1364_v1  ;;  %v1383_v1 = vld [vmem:[#allocation2 + $0xa1] sm:$0xff] }
 0x1b7   : > { %11356 = vmatprep.mubr.msk.f32.mxu0 %vm1194_vm5, %v1365_v55 }
 0x1b8   : > { %v1141_v56 = vmax.f32 %v846_v53, 0.0  ;;  %v9828_v53 = vld [vmem:[%s15701_s3 + $0x90] sm:$0xff] }
 0x1b9   : > { %v850_v57 = vpop.f32.mrb[66].mxu0 }
 0x1ba   : > { %1227 = vst.msk [vmem:[#allocation2 + $0x100] sm:$0xff] %vm1194_vm5, %v1141_v56  ;;  %v851_v59 = vadd.f32 %v13705_v0, %v850_v57  ;;  %v11191_v60 = vpop.f32.mrb[67].mxu0  ;;  %11357 = vmatmul.mubr.msk.f32.gmra.mrb[172].mxu0 %vm1194_vm5, %v1366_v58  ;;  %v1384_v57 = vld [vmem:[#allocation2 + $0xa9] sm:$0xff] }
 0x1bb   : > { %11359 = vmatprep.mubr.msk.f32.mxu0 %vm1194_vm5, %v1367_v61  ;;  %v1385_v61 = vld [vmem:[#allocation2 + $0xb1] sm:$0xff] }
 0x1bc   : > { %v1142_v62 = vmax.f32 %v851_v59, 0.0 }
 0x1bd   : > { %v855_v63 = vpop.f32.mrb[68].mxu0 }
 0x1be   : > { %1228 = vst.msk [vmem:[#allocation2 + $0x108] sm:$0xff] %vm1194_vm5, %v1142_v62  ;;  %v856_v3 = vadd.f32 %v13705_v0, %v855_v63  ;;  %v11194_v4 = vpop.f32.mrb[69].mxu0  ;;  %11360 = vmatmul.mubr.msk.f32.gmra.mrb[174].mxu0 %vm1194_vm5, %v1368_v2  ;;  %v1386_v2 = vld [vmem:[#allocation2 + $0xb9] sm:$0xff] }
 0x1bf   : > { %11362 = vmatprep.mubr.msk.f32.mxu0 %vm1194_vm5, %v1369_v5 }
 0x1c0   : > { %v1143_v6 = vmax.f32 %v856_v3, 0.0 }
 0x1c1   : > { %v860_v7 = vpop.f32.mrb[70].mxu0 }
 0x1c2   : > { %1229 = vst.msk [vmem:[#allocation2 + $0x110] sm:$0xff] %vm1194_vm5, %v1143_v6  ;;  %v861_v9 = vadd.f32 %v13705_v0, %v860_v7  ;;  %v11197_v10 = vpop.f32.mrb[71].mxu0  ;;  %11363 = vmatmul.mubr.msk.f32.gmra.mrb[176].mxu0 %vm1194_vm5, %v1370_v8  ;;  %v1387_v6 = vld [vmem:[#allocation2 + $0xc1] sm:$0xff] }
 0x1c3   : > { %11365 = vmatprep.mubr.msk.f32.mxu0 %vm1194_vm5, %v1371_v11 }
 0x1c4   : > { %v1144_v12 = vmax.f32 %v861_v9, 0.0  ;;  %v1388_v9 = vld [vmem:[#allocation2 + $0xc9] sm:$0xff] }
 0x1c5   : > { %v865_v13 = vpop.f32.mrb[72].mxu0 }
 0x1c6   : > { %1230 = vst.msk [vmem:[#allocation2 + $0x118] sm:$0xff] %vm1194_vm5, %v1144_v12  ;;  %v866_v15 = vadd.f32 %v13705_v0, %v865_v13  ;;  %v11200_v16 = vpop.f32.mrb[73].mxu0  ;;  %11366 = vmatmul.mubr.msk.f32.gmra.mrb[178].mxu0 %vm1194_vm5, %v1372_v14  ;;  %v1389_v13 = vld [vmem:[#allocation2 + $0xd1] sm:$0xff] }
 0x1c7   : > { %11368 = vmatprep.mubr.msk.f32.mxu0 %vm1194_vm5, %v1373_v17  ;;  %v1390_v16 = vld [vmem:[#allocation2 + $0xd9] sm:$0xff] }
 0x1c8   : > { %v1145_v18 = vmax.f32 %v866_v15, 0.0 }
 0x1c9   : > { %v870_v19 = vpop.f32.mrb[74].mxu0 }
 0x1ca   : > { %1231 = vst.msk [vmem:[#allocation2 + $0x120] sm:$0xff] %vm1194_vm5, %v1145_v18  ;;  %v871_v21 = vadd.f32 %v13705_v0, %v870_v19  ;;  %v11203_v22 = vpop.f32.mrb[75].mxu0  ;;  %11369 = vmatmul.mubr.msk.f32.gmra.mrb[180].mxu0 %vm1194_vm5, %v1374_v20  ;;  %v1391_v20 = vld [vmem:[#allocation2 + $0xe1] sm:$0xff] }
 0x1cb   : > { %11371 = vmatprep.mubr.msk.f32.mxu0 %vm1194_vm5, %v1375_v23  ;;  %v1392_v23 = vld [vmem:[#allocation2 + $0xe9] sm:$0xff] }
 0x1cc   : > { %v1146_v24 = vmax.f32 %v871_v21, 0.0 }
 0x1cd   : > { %v875_v25 = vpop.f32.mrb[76].mxu0 }
 0x1ce   : > { %1232 = vst.msk [vmem:[#allocation2 + $0x128] sm:$0xff] %vm1194_vm5, %v1146_v24  ;;  %v876_v27 = vadd.f32 %v13705_v0, %v875_v25  ;;  %v11206_v28 = vpop.f32.mrb[77].mxu0  ;;  %11372 = vmatmul.mubr.msk.f32.gmra.mrb[182].mxu0 %vm1194_vm5, %v1376_v26 }
 0x1cf   : > { %11374 = vmatprep.mubr.msk.f32.mxu0 %vm1194_vm5, %v1377_v29  ;;  %v1359_v29 = vld [vmem:[%s15701_s3] sm:$0xff] }
 0x1d0   : > { %v1147_v30 = vmax.f32 %v876_v27, 0.0  ;;  %v1393_v27 = vld [vmem:[#allocation2 + $0xf1] sm:$0xff] }
 0x1d1   : > { %v880_v31 = vpop.f32.mrb[78].mxu0  ;;  %v3706_v33 = vld [vmem:[#allocation2 + $0x11a] sm:$0xff] }
 0x1d2   : > { %1233 = vst.msk [vmem:[#allocation2 + $0x130] sm:$0xff] %vm1194_vm5, %v1147_v30  ;;  %v881_v34 = vadd.f32 %v13705_v0, %v880_v31  ;;  %v11209_v36 = vpop.f32.mrb[79].mxu0  ;;  %11375 = vmatmul.mubr.msk.f32.gmra.mrb[184].mxu0 %vm1194_vm5, %v1378_v32  ;;  %11776 = vmatprep.mubr.msk.f32.mxu1 %vm1194_vm5, %v3706_v33  ;;  %v1360_v30 = vld [vmem:[%s15701_s3 + $0x8] sm:$0xff]  ;;  %v1394_v32 = vld [vmem:[#allocation2 + $0xf9] sm:$0xff] }
 0x1d3   : > { %11377 = vmatprep.mubr.msk.f32.mxu0 %vm1194_vm5, %v1379_v37 }
 0x1d4   : > { %v1148_v38 = vmax.f32 %v881_v34, 0.0  ;;  %v12482_v34 = vpack.c.bf16 %v1360_v30, %v1359_v29 }
 0x1d5   : > { %v885_v39 = vpop.f32.mrb[80].mxu0  ;;  %v3707_v41 = vld [vmem:[#allocation2 + $0x122] sm:$0xff] }
 0x1d6   : > { %1234 = vst.msk [vmem:[#allocation2 + $0x138] sm:$0xff] %vm1194_vm5, %v1148_v38  ;;  %v886_v42 = vadd.f32 %v13705_v0, %v885_v39  ;;  %v11212_v44 = vpop.f32.mrb[81].mxu0  ;;  %11378 = vmatmul.mubr.msk.f32.gmra.mrb[186].mxu0 %vm1194_vm5, %v1380_v40  ;;  %11777 = vmatmul.mubr.msk.f32.vlgmr.msra.gmra.mrb[0].mxu1 %vm1194_vm5, %v3707_v41  ;;  %v1395_v38 = vld [vmem:[#allocation2 + $0x101] sm:$0xff]  ;;  %v1361_v40 = vld [vmem:[%s15701_s3 + $0x10] sm:$0xff]  ;;  %v1362_v41 = vld [vmem:[%s15701_s3 + $0x18] sm:$0xff] }
 0x1d7   : > { %11380 = vmatprep.mubr.msk.f32.mxu0 %vm1194_vm5, %v1381_v46  ;;  %12509 = vmatpush3.bf16.msra.mxu1 %v13921_v45  ;;  %v9829_v45 = vld [vmem:[%s15701_s3 + $0x98] sm:$0xff]  ;;  %v1396_v44 = vld [vmem:[#allocation2 + $0x109] sm:$0xff] }
 0x1d8   : > { %v1149_v47 = vmax.f32 %v886_v42, 0.0  ;;  %v12510_v54 = vpack.c.bf16 %v9829_v45, %v9828_v53  ;;  %12483 = vmatprep.subr.bf16.mxu0 %v12482_v34 }
 0x1d9   : > { %v890_v48 = vpop.f32.mrb[82].mxu0  ;;  %v3708_v50 = vld [vmem:[#allocation2 + $0x12a] sm:$0xff]  ;;  %12485 = vmatpush3.bf16.msra.mxu0 %v12482_v34 }
 0x1da   : > { %1235 = vst.msk [vmem:[#allocation2 + $0x140] sm:$0xff] %vm1194_vm5, %v1149_v47  ;;  %v891_v51 = vadd.f32 %v13705_v0, %v890_v48  ;;  %v11215_v52 = vpop.f32.mrb[83].mxu0  ;;  %11381 = vmatmul.mubr.msk.f32.gmra.mrb[188].mxu0 %vm1194_vm5, %v1382_v49  ;;  %11779 = vmatprep.mubr.msk.f32.mxu1 %vm1194_vm5, %v3708_v50  ;;  %v12486_v47 = vpack.c.bf16 %v1362_v41, %v1361_v40  ;;  %v1397_v50 = vld [vmem:[#allocation2 + $0x111] sm:$0xff] }
 0x1db   : > { %11383 = vmatprep.mubr.msk.f32.mxu0 %vm1194_vm5, %v1383_v1  ;;  %12511 = vmatprep.subr.bf16.mxu1 %v12510_v54  ;;  %v1398_v1 = vld [vmem:[#allocation2 + $0x119] sm:$0xff] }
 0x1dc   : > { %v1150_v55 = vmax.f32 %v891_v51, 0.0  ;;  %12513 = vmatpush3.bf16.msra.mxu1 %v12510_v54  ;;  %12487 = vmatprep.subr.bf16.mxu0 %v12486_v47 }
 0x1dd   : > { %v895_v56 = vpop.f32.mrb[84].mxu0  ;;  %v3709_v58 = vld [vmem:[#allocation2 + $0x132] sm:$0xff]  ;;  %12489 = vmatpush3.bf16.msra.mxu0 %v12486_v47 }
 0x1de   : > { %1236 = vst.msk [vmem:[#allocation2 + $0x148] sm:$0xff] %vm1194_vm5, %v1150_v55  ;;  %v896_v59 = vadd.f32 %v13705_v0, %v895_v56  ;;  %v11218_v60 = vpop.f32.mrb[85].mxu0  ;;  %11384 = vmatmul.mubr.msk.f32.gmra.mrb[190].mxu0 %vm1194_vm5, %v1384_v57  ;;  %11780 = vmatmul.mubr.msk.f32.gmra.mrb[2].mxu1 %vm1194_vm5, %v3709_v58  ;;  %v1399_v55 = vld [vmem:[#allocation2 + $0x121] sm:$0xff]  ;;  %v1400_v58 = vld [vmem:[#allocation2 + $0x129] sm:$0xff] }
 0x1df   : > { %11386 = vmatprep.mubr.msk.f32.mxu0 %vm1194_vm5, %v1385_v61 }
 0x1e0   : > { %v1151_v62 = vmax.f32 %v896_v59, 0.0 }
 0x1e1   : > { %v900_v63 = vpop.f32.mrb[86].mxu0  ;;  %v3710_v3 = vld [vmem:[#allocation2 + $0x13a] sm:$0xff] }
 0x1e2   : > { %1237 = vst.msk [vmem:[#allocation2 + $0x150] sm:$0xff] %vm1194_vm5, %v1151_v62  ;;  %v901_v4 = vadd.f32 %v13705_v0, %v900_v63  ;;  %v11221_v5 = vpop.f32.mrb[87].mxu0  ;;  %11387 = vmatmul.mubr.msk.f32.gmra.mrb[192].mxu0 %vm1194_vm5, %v1386_v2  ;;  %11782 = vmatprep.mubr.msk.f32.mxu1 %vm1194_vm5, %v3710_v3  ;;  %v1401_v62 = vld [vmem:[#allocation2 + $0x131] sm:$0xff]  ;;  %v1402_v3 = vld [vmem:[#allocation2 + $0x139] sm:$0xff] }
 0x1e3   : > { %11389 = vmatprep.mubr.msk.f32.mxu0 %vm1194_vm5, %v1387_v6 }
 0x1e4   : > { %v1152_v7 = vmax.f32 %v901_v4, 0.0 }
 0x1e5   : > { %v905_v8 = vpop.f32.mrb[88].mxu0  ;;  %v3711_v10 = vld [vmem:[#allocation2 + $0x142] sm:$0xff] }
 0x1e6   : > { %1238 = vst.msk [vmem:[#allocation2 + $0x158] sm:$0xff] %vm1194_vm5, %v1152_v7  ;;  %v906_v11 = vadd.f32 %v13705_v0, %v905_v8  ;;  %v11224_v12 = vpop.f32.mrb[89].mxu0  ;;  %11390 = vmatmul.mubr.msk.f32.gmra.mrb[194].mxu0 %vm1194_vm5, %v1388_v9  ;;  %11783 = vmatmul.mubr.msk.f32.gmra.mrb[4].mxu1 %vm1194_vm5, %v3711_v10  ;;  %v1403_v7 = vld [vmem:[#allocation2 + $0x141] sm:$0xff] }
 0x1e7   : > { %11392 = vmatprep.mubr.msk.f32.mxu0 %vm1194_vm5, %v1389_v13  ;;  %v9908_v9 = vld [vmem:[%s15701_s3 + $0xa0] sm:$0xff]  ;;  %v9909_v10 = vld [vmem:[%s15701_s3 + $0xa8] sm:$0xff] }
 0x1e8   : > { %v1153_v14 = vmax.f32 %v906_v11, 0.0 }
 0x1e9   : > { %v910_v15 = vpop.f32.mrb[90].mxu0  ;;  %v3712_v17 = vld [vmem:[#allocation2 + $0x14a] sm:$0xff] }
 0x1ea   : > { %1239 = vst.msk [vmem:[#allocation2 + $0x160] sm:$0xff] %vm1194_vm5, %v1153_v14  ;;  %v911_v18 = vadd.f32 %v13705_v0, %v910_v15  ;;  %v11227_v19 = vpop.f32.mrb[91].mxu0  ;;  %11393 = vmatmul.mubr.msk.f32.gmra.mrb[196].mxu0 %vm1194_vm5, %v1390_v16  ;;  %11785 = vmatprep.mubr.msk.f32.mxu1 %vm1194_vm5, %v3712_v17  ;;  %v1404_v12 = vld [vmem:[#allocation2 + $0x149] sm:$0xff]  ;;  %v14046_v14 = vpack.c.bf16 %v9909_v10, %v9908_v9 }
 0x1eb   : > { %11395 = vmatprep.mubr.msk.f32.mxu0 %vm1194_vm5, %v1391_v20 }
 0x1ec   : > { %v1154_v21 = vmax.f32 %v911_v18, 0.0  ;;  %12515 = vmatprep.subr.bf16.mxu1 %v14046_v14 }
 0x1ed   : > { %v915_v22 = vpop.f32.mrb[92].mxu0  ;;  %v3713_v24 = vld [vmem:[#allocation2 + $0x152] sm:$0xff] }
 0x1ee   : > { %1240 = vst.msk [vmem:[#allocation2 + $0x168] sm:$0xff] %vm1194_vm5, %v1154_v21  ;;  %v916_v25 = vadd.f32 %v13705_v0, %v915_v22  ;;  %v11230_v26 = vpop.f32.mrb[93].mxu0  ;;  %11396 = vmatmul.mubr.msk.f32.gmra.mrb[198].mxu0 %vm1194_vm5, %v1392_v23  ;;  %11786 = vmatmul.mubr.msk.f32.gmra.mrb[6].mxu1 %vm1194_vm5, %v3713_v24  ;;  %v1405_v17 = vld [vmem:[#allocation2 + $0x151] sm:$0xff]  ;;  %v14055_v22 = vld [vmem:[#allocation6] ss:$0 sm:$0xff] }
 0x1ef   : > { %11398 = vmatprep.mubr.msk.f32.mxu0 %vm1194_vm5, %v1393_v27 }
 0x1f0   : > { %v1155_v28 = vmax.f32 %v916_v25, 0.0 }
 0x1f1   : > { %v920_v31 = vpop.f32.mrb[94].mxu0  ;;  %v3714_v33 = vld [vmem:[#allocation2 + $0x15a] sm:$0xff] }
 0x1f2   : > { %1241 = vst.msk [vmem:[#allocation2 + $0x170] sm:$0xff] %vm1194_vm5, %v1155_v28  ;;  %v921_v36 = vadd.f32 %v13705_v0, %v920_v31  ;;  %v11233_v37 = vpop.f32.mrb[95].mxu0  ;;  %11399 = vmatmul.mubr.msk.f32.gmra.mrb[200].mxu0 %vm1194_vm5, %v1394_v32  ;;  %11788 = vmatprep.mubr.msk.f32.mxu1 %vm1194_vm5, %v3714_v33  ;;  %v1406_v20 = vld [vmem:[#allocation2 + $0x159] sm:$0xff] }
 0x1f3   : > { %11401 = vmatprep.mubr.msk.f32.mxu0 %vm1194_vm5, %v1395_v38 }
 0x1f4   : > { %v1156_v39 = vmax.f32 %v921_v36, 0.0 }
 0x1f5   : > { %v925_v42 = vpop.f32.mrb[96].mxu0  ;;  %v3715_v46 = vld [vmem:[#allocation2 + $0x162] sm:$0xff] }
 0x1f6   : > { %1242 = vst.msk [vmem:[#allocation2 + $0x178] sm:$0xff] %vm1194_vm5, %v1156_v39  ;;  %v926_v48 = vadd.f32 %v13705_v0, %v925_v42  ;;  %v11236_v49 = vpop.f32.mrb[97].mxu0  ;;  %11402 = vmatmul.mubr.msk.f32.gmra.mrb[202].mxu0 %vm1194_vm5, %v1396_v44  ;;  %11789 = vmatmul.mubr.msk.f32.gmra.mrb[8].mxu1 %vm1194_vm5, %v3715_v46  ;;  %v1407_v24 = vld [vmem:[#allocation2 + $0x161] sm:$0xff] }
 0x1f7   : > { %11404 = vmatprep.mubr.msk.f32.mxu0 %vm1194_vm5, %v1397_v50 }
 0x1f8   : > { %v1157_v51 = vmax.f32 %v926_v48, 0.0 }
 0x1f9   : > { %v930_v52 = vpop.f32.mrb[98].mxu0  ;;  %v3716_v53 = vld [vmem:[#allocation2 + $0x16a] sm:$0xff] }
 0x1fa   : > { %1243 = vst.msk [vmem:[#allocation2 + $0x180] sm:$0xff] %vm1194_vm5, %v1157_v51  ;;  %v931_v45 = vadd.f32 %v13705_v0, %v930_v52  ;;  %v11239_v54 = vpop.f32.mrb[99].mxu0  ;;  %11405 = vmatmul.mubr.msk.f32.gmra.mrb[204].mxu0 %vm1194_vm5, %v1398_v1  ;;  %11791 = vmatprep.mubr.msk.f32.mxu1 %vm1194_vm5, %v3716_v53  ;;  %v1408_v27 = vld [vmem:[#allocation2 + $0x169] sm:$0xff] }
 0x1fb   : > { %11407 = vmatprep.mubr.msk.f32.mxu0 %vm1194_vm5, %v1399_v55 }
 0x1fc   : > { %v1158_v56 = vmax.f32 %v931_v45, 0.0 }
 0x1fd   : > { %v935_v57 = vpop.f32.mrb[100].mxu0  ;;  %v3717_v59 = vld [vmem:[#allocation2 + $0x172] sm:$0xff] }
 0x1fe   : > { %1244 = vst.msk [vmem:[#allocation2 + $0x188] sm:$0xff] %vm1194_vm5, %v1158_v56  ;;  %v936_v60 = vadd.f32 %v13705_v0, %v935_v57  ;;  %v11242_v61 = vpop.f32.mrb[101].mxu0  ;;  %11408 = vmatmul.mubr.msk.f32.gmra.mrb[206].mxu0 %vm1194_vm5, %v1400_v58  ;;  %11792 = vmatmul.mubr.msk.f32.gmra.mrb[10].mxu1 %vm1194_vm5, %v3717_v59  ;;  %v1409_v31 = vld [vmem:[#allocation2 + $0x171] sm:$0xff] }
 0x1ff   : > { %11410 = vmatprep.mubr.msk.f32.mxu0 %vm1194_vm5, %v1401_v62 }
 0x200   : > { %v1159_v63 = vmax.f32 %v936_v60, 0.0 }
 0x201   : > { %v940_v2 = vpop.f32.mrb[102].mxu0  ;;  %v3718_v4 = vld [vmem:[#allocation2 + $0x17a] sm:$0xff] }
 0x202   : > { %1245 = vst.msk [vmem:[#allocation2 + $0x190] sm:$0xff] %vm1194_vm5, %v1159_v63  ;;  %v941_v5 = vadd.f32 %v13705_v0, %v940_v2  ;;  %v11245_v6 = vpop.f32.mrb[103].mxu0  ;;  %11411 = vmatmul.mubr.msk.f32.gmra.mrb[208].mxu0 %vm1194_vm5, %v1402_v3  ;;  %11794 = vmatprep.mubr.msk.f32.mxu1 %vm1194_vm5, %v3718_v4  ;;  %v1410_v34 = vld [vmem:[#allocation2 + $0x179] sm:$0xff] }
 0x203   : > { %11413 = vmatprep.mubr.msk.f32.mxu0 %vm1194_vm5, %v1403_v7 }
 0x204   : > { %v1160_v8 = vmax.f32 %v941_v5, 0.0 }
 0x205   : > { %v945_v11 = vpop.f32.mrb[104].mxu0  ;;  %v3719_v13 = vld [vmem:[#allocation2 + $0x182] sm:$0xff] }
 0x206   : > { %1246 = vst.msk [vmem:[#allocation2 + $0x198] sm:$0xff] %vm1194_vm5, %v1160_v8  ;;  %v946_v15 = vadd.f32 %v13705_v0, %v945_v11  ;;  %v11248_v16 = vpop.f32.mrb[105].mxu0  ;;  %11414 = vmatmul.mubr.msk.f32.gmra.mrb[210].mxu0 %vm1194_vm5, %v1404_v12  ;;  %11795 = vmatmul.mubr.msk.f32.gmra.mrb[12].mxu1 %vm1194_vm5, %v3719_v13  ;;  %v1411_v39 = vld [vmem:[#allocation2 + $0x181] sm:$0xff] }
 0x207   : > { %11416 = vmatprep.mubr.msk.f32.mxu0 %vm1194_vm5, %v1405_v17 }
 0x208   : > { %v1161_v18 = vmax.f32 %v946_v15, 0.0 }
 0x209   : > { %v950_v19 = vpop.f32.mrb[106].mxu0  ;;  %v3720_v21 = vld [vmem:[#allocation2 + $0x18a] sm:$0xff] }
 0x20a   : > { %1247 = vst.msk [vmem:[#allocation2 + $0x1a0] sm:$0xff] %vm1194_vm5, %v1161_v18  ;;  %v951_v0 = vadd.f32 %v14055_v22, %v950_v19  ;;  %v11251_v23 = vpop.f32.mrb[107].mxu0  ;;  %11417 = vmatmul.mubr.msk.f32.gmra.mrb[212].mxu0 %vm1194_vm5, %v1406_v20  ;;  %11797 = vmatprep.mubr.msk.f32.mxu1 %vm1194_vm5, %v3720_v21  ;;  %v1412_v42 = vld [vmem:[#allocation2 + $0x189] sm:$0xff] }
 0x20b   : > { %11419 = vmatprep.mubr.msk.f32.mxu0 %vm1194_vm5, %v1407_v24 }
 0x20c   : > { %v1162_v25 = vmax.f32 %v951_v0, 0.0 }
 0x20d   : > { %v955_v26 = vpop.f32.mrb[108].mxu0  ;;  %v3721_v28 = vld [vmem:[#allocation2 + $0x192] sm:$0xff] }
 0x20e   : > { %1248 = vst.msk [vmem:[#allocation2 + $0x1a8] sm:$0xff] %vm1194_vm5, %v1162_v25  ;;  %v956_v29 = vadd.f32 %v14055_v22, %v955_v26  ;;  %v11254_v30 = vpop.f32.mrb[109].mxu0  ;;  %11420 = vmatmul.mubr.msk.f32.gmra.mrb[214].mxu0 %vm1194_vm5, %v1408_v27  ;;  %11798 = vmatmul.mubr.msk.f32.gmra.mrb[14].mxu1 %vm1194_vm5, %v3721_v28  ;;  %v1413_v48 = vld [vmem:[#allocation2 + $0x191] sm:$0xff] }
 0x20f   : > { %11422 = vmatprep.mubr.msk.f32.mxu0 %vm1194_vm5, %v1409_v31 }
 0x210   : > { %v1163_v32 = vmax.f32 %v956_v29, 0.0 }
 0x211   : > { %v960_v33 = vpop.f32.mrb[110].mxu0  ;;  %v3722_v36 = vld [vmem:[#allocation2 + $0x19a] sm:$0xff] }
 0x212   : > { %1249 = vst.msk [vmem:[#allocation2 + $0x1b0] sm:$0xff] %vm1194_vm5, %v1163_v32  ;;  %v961_v37 = vadd.f32 %v14055_v22, %v960_v33  ;;  %v11257_v38 = vpop.f32.mrb[111].mxu0  ;;  %11423 = vmatmul.mubr.msk.f32.gmra.mrb[216].mxu0 %vm1194_vm5, %v1410_v34  ;;  %11800 = vmatprep.mubr.msk.f32.mxu1 %vm1194_vm5, %v3722_v36  ;;  %v1414_v51 = vld [vmem:[#allocation2 + $0x199] sm:$0xff] }
 0x213   : > { %11425 = vmatprep.mubr.msk.f32.mxu0 %vm1194_vm5, %v1411_v39 }
 0x214   : > { %v1164_v40 = vmax.f32 %v961_v37, 0.0 }
 0x215   : > { %v965_v41 = vpop.f32.mrb[112].mxu0  ;;  %v3723_v44 = vld [vmem:[#allocation2 + $0x1a2] sm:$0xff] }
 0x216   : > { %1250 = vst.msk [vmem:[#allocation2 + $0x1b8] sm:$0xff] %vm1194_vm5, %v1164_v40  ;;  %v966_v46 = vadd.f32 %v14055_v22, %v965_v41  ;;  %v11260_v47 = vpop.f32.mrb[113].mxu0  ;;  %11426 = vmatmul.mubr.msk.f32.gmra.mrb[218].mxu0 %vm1194_vm5, %v1412_v42  ;;  %11801 = vmatmul.mubr.msk.f32.gmra.mrb[16].mxu1 %vm1194_vm5, %v3723_v44  ;;  %v1415_v45 = vld [vmem:[#allocation2 + $0x1a1] sm:$0xff] }
 0x217   : > { %11428 = vmatprep.mubr.msk.f32.mxu0 %vm1194_vm5, %v1413_v48 }
 0x218   : > { %v1165_v49 = vmax.f32 %v966_v46, 0.0 }
 0x219   : > { %v970_v50 = vpop.f32.mrb[114].mxu0  ;;  %v3724_v52 = vld [vmem:[#allocation2 + $0x1aa] sm:$0xff] }
 0x21a   : > { %1251 = vst.msk [vmem:[#allocation2 + $0x1c0] sm:$0xff] %vm1194_vm5, %v1165_v49  ;;  %v971_v1 = vadd.f32 %v14055_v22, %v970_v50  ;;  %v11263_v53 = vpop.f32.mrb[115].mxu0  ;;  %11429 = vmatmul.mubr.msk.f32.gmra.mrb[220].mxu0 %vm1194_vm5, %v1414_v51  ;;  %11803 = vmatprep.mubr.msk.f32.mxu1 %vm1194_vm5, %v3724_v52  ;;  %v1416_v56 = vld [vmem:[#allocation2 + $0x1a9] sm:$0xff] }
 0x21b   : > { %11431 = vmatprep.mubr.msk.f32.mxu0 %vm1194_vm5, %v1415_v45 }
 0x21c   : > { %v1166_v54 = vmax.f32 %v971_v1, 0.0 }
 0x21d   : > { %v975_v55 = vpop.f32.mrb[116].mxu0  ;;  %v3725_v57 = vld [vmem:[#allocation2 + $0x1b2] sm:$0xff] }
 0x21e   : > { %v1417_v58 = vld [vmem:[#allocation2 + $0x1b1] sm:$0xff]  ;;  %1252 = vst.msk [vmem:[#allocation2 + $0x1c8] sm:$0xff] %vm1194_vm5, %v1166_v54  ;;  %v976_v59 = vadd.f32 %v14055_v22, %v975_v55  ;;  %v11266_v60 = vpop.f32.mrb[117].mxu0  ;;  %11432 = vmatmul.mubr.msk.f32.gmra.mrb[222].mxu0 %vm1194_vm5, %v1416_v56  ;;  %11804 = vmatmul.mubr.msk.f32.gmra.mrb[18].mxu1 %vm1194_vm5, %v3725_v57 }
 0x21f   : > { %11434 = vmatprep.mubr.msk.f32.mxu0 %vm1194_vm5, %v1417_v58 }
 0x220   : > { %v1167_v61 = vmax.f32 %v976_v59, 0.0 }
 0x221   : > { %v980_v62 = vpop.f32.mrb[118].mxu0  ;;  %v1418_v63 = vld [vmem:[#allocation2 + $0x1b9] sm:$0xff] }
 0x222   : > { %v3726_v2 = vld [vmem:[#allocation2 + $0x1ba] sm:$0xff]  ;;  %1253 = vst.msk [vmem:[#allocation2 + $0x1d0] sm:$0xff] %vm1194_vm5, %v1167_v61  ;;  %v981_v3 = vadd.f32 %v14055_v22, %v980_v62  ;;  %v11269_v4 = vpop.f32.mrb[119].mxu0  ;;  %11435 = vmatmul.mubr.msk.f32.gmra.mrb[224].mxu0 %vm1194_vm5, %v1418_v63 }
 0x223   : > { %11806 = vmatprep.mubr.msk.f32.mxu1 %vm1194_vm5, %v3726_v2 }
 0x224   : > { %v1168_v5 = vmax.f32 %v981_v3, 0.0 }
 0x225   : > { %v985_v6 = vpop.f32.mrb[120].mxu0  ;;  %v1419_v7 = vld [vmem:[#allocation2 + $0x1c1] sm:$0xff] }
 0x226   : > { %v3727_v8 = vld [vmem:[#allocation2 + $0x1c2] sm:$0xff]  ;;  %1254 = vst.msk [vmem:[#allocation2 + $0x1d8] sm:$0xff] %vm1194_vm5, %v1168_v5  ;;  %v986_v9 = vadd.f32 %v14055_v22, %v985_v6  ;;  %v11272_v10 = vpop.f32.mrb[121].mxu0  ;;  %11437 = vmatprep.mubr.msk.f32.mxu0 %vm1194_vm5, %v1419_v7 }
 0x227   : > { %11807 = vmatmul.mubr.msk.f32.gmra.mrb[20].mxu1 %vm1194_vm5, %v3727_v8 }
 0x228   : > { %v1169_v11 = vmax.f32 %v986_v9, 0.0 }
 0x229   : > { %v990_v12 = vpop.f32.mrb[122].mxu0  ;;  %v1420_v13 = vld [vmem:[#allocation2 + $0x1c9] sm:$0xff] }
 0x22a   : > { %v3728_v15 = vld [vmem:[#allocation2 + $0x1ca] sm:$0xff]  ;;  %1255 = vst.msk [vmem:[#allocation2 + $0x1e0] sm:$0xff] %vm1194_vm5, %v1169_v11  ;;  %v991_v16 = vadd.f32 %v14055_v22, %v990_v12  ;;  %v11275_v17 = vpop.f32.mrb[123].mxu0  ;;  %11438 = vmatmul.mubr.msk.f32.gmra.mrb[226].mxu0 %vm1194_vm5, %v1420_v13 }
 0x22b   : > { %11809 = vmatprep.mubr.msk.f32.mxu1 %vm1194_vm5, %v3728_v15 }
 0x22c   : > { %v1170_v18 = vmax.f32 %v991_v16, 0.0 }
 0x22d   : > { %v995_v19 = vpop.f32.mrb[124].mxu0  ;;  %v1421_v20 = vld [vmem:[#allocation2 + $0x1d1] sm:$0xff] }
 0x22e   : > { %v3729_v21 = vld [vmem:[#allocation2 + $0x1d2] sm:$0xff]  ;;  %1256 = vst.msk [vmem:[#allocation2 + $0x1e8] sm:$0xff] %vm1194_vm5, %v1170_v18  ;;  %v996_v0 = vadd.f32 %v14055_v22, %v995_v19  ;;  %v11278_v23 = vpop.f32.mrb[125].mxu0  ;;  %11440 = vmatprep.mubr.msk.f32.mxu0 %vm1194_vm5, %v1421_v20 }
 0x22f   : > { %11810 = vmatmul.mubr.msk.f32.gmra.mrb[22].mxu1 %vm1194_vm5, %v3729_v21 }
 0x230   : > { %v1171_v24 = vmax.f32 %v996_v0, 0.0 }
 0x231   : > { %v1000_v25 = vpop.f32.mrb[126].mxu0  ;;  %v1422_v26 = vld [vmem:[#allocation2 + $0x1d9] sm:$0xff] }
 0x232   : > { %v3730_v27 = vld [vmem:[#allocation2 + $0x1da] sm:$0xff]  ;;  %1257 = vst.msk [vmem:[#allocation2 + $0x1f0] sm:$0xff] %vm1194_vm5, %v1171_v24  ;;  %v1001_v28 = vadd.f32 %v14055_v22, %v1000_v25  ;;  %v11281_v29 = vpop.f32.mrb[127].mxu0  ;;  %11441 = vmatmul.mubr.msk.f32.gmra.mrb[228].mxu0 %vm1194_vm5, %v1422_v26 }
 0x233   : > { %11812 = vmatprep.mubr.msk.f32.mxu1 %vm1194_vm5, %v3730_v27 }
 0x234   : > { %v1172_v30 = vmax.f32 %v1001_v28, 0.0 }
 0x235   : > { %v1005_v31 = vpop.f32.mrb[128].mxu0  ;;  %v1423_v32 = vld [vmem:[#allocation2 + $0x1e1] sm:$0xff] }
 0x236   : > { %v3731_v33 = vld [vmem:[#allocation2 + $0x1e2] sm:$0xff]  ;;  %1258 = vst.msk [vmem:[#allocation2 + $0x1f8] sm:$0xff] %vm1194_vm5, %v1172_v30  ;;  %v1006_v34 = vadd.f32 %v14055_v22, %v1005_v31  ;;  %v11284_v36 = vpop.f32.mrb[129].mxu0  ;;  %11443 = vmatprep.mubr.msk.f32.mxu0 %vm1194_vm5, %v1423_v32 }
 0x237   : > { %11813 = vmatmul.mubr.msk.f32.gmra.mrb[24].mxu1 %vm1194_vm5, %v3731_v33 }
 0x238   : > { %v1173_v37 = vmax.f32 %v1006_v34, 0.0 }
 0x239   : > { %v1010_v38 = vpop.f32.mrb[130].mxu0  ;;  %v1424_v39 = vld [vmem:[#allocation2 + $0x1e9] sm:$0xff] }
 0x23a   : > { %v3732_v40 = vld [vmem:[#allocation2 + $0x1ea] sm:$0xff]  ;;  %1259 = vst.msk [vmem:[#allocation2 + $0x200] sm:$0xff] %vm1194_vm5, %v1173_v37  ;;  %v1011_v41 = vadd.f32 %v14055_v22, %v1010_v38  ;;  %v11287_v42 = vpop.f32.mrb[131].mxu0  ;;  %11444 = vmatmul.mubr.msk.f32.gmra.mrb[230].mxu0 %vm1194_vm5, %v1424_v39 }
 0x23b   : > { %11815 = vmatprep.mubr.msk.f32.mxu1 %vm1194_vm5, %v3732_v40 }
 0x23c   : > { %v1174_v44 = vmax.f32 %v1011_v41, 0.0 }
 0x23d   : > { %v1015_v46 = vpop.f32.mrb[132].mxu0  ;;  %v1425_v47 = vld [vmem:[#allocation2 + $0x1f1] sm:$0xff] }
 0x23e   : > { %v3733_v48 = vld [vmem:[#allocation2 + $0x1f2] sm:$0xff]  ;;  %1260 = vst.msk [vmem:[#allocation2 + $0x208] sm:$0xff] %vm1194_vm5, %v1174_v44  ;;  %v1016_v49 = vadd.f32 %v14055_v22, %v1015_v46  ;;  %v11290_v50 = vpop.f32.mrb[133].mxu0  ;;  %11446 = vmatprep.mubr.msk.f32.mxu0 %vm1194_vm5, %v1425_v47 }
 0x23f   : > { %11816 = vmatmul.mubr.msk.f32.gmra.mrb[26].mxu1 %vm1194_vm5, %v3733_v48 }
 0x240   : > { %v1175_v51 = vmax.f32 %v1016_v49, 0.0 }
 0x241   : > { %v1020_v52 = vpop.f32.mrb[134].mxu0  ;;  %v1426_v1 = vld [vmem:[#allocation2 + $0x1f9] sm:$0xff] }
 0x242   : > { %v3734_v53 = vld [vmem:[#allocation2 + $0x1fa] sm:$0xff]  ;;  %1261 = vst.msk [vmem:[#allocation2 + $0x210] sm:$0xff] %vm1194_vm5, %v1175_v51  ;;  %v1021_v45 = vadd.f32 %v14055_v22, %v1020_v52  ;;  %v11293_v54 = vpop.f32.mrb[135].mxu0  ;;  %11447 = vmatmul.mubr.msk.f32.gmra.mrb[232].mxu0 %vm1194_vm5, %v1426_v1 }
 0x243   : > { %11818 = vmatprep.mubr.msk.f32.mxu1 %vm1194_vm5, %v3734_v53 }
 0x244   : > { %v1176_v55 = vmax.f32 %v1021_v45, 0.0 }
 0x245   : > { %v1025_v56 = vpop.f32.mrb[136].mxu0  ;;  %v1427_v57 = vld [vmem:[#allocation2 + $0x201] sm:$0xff] }
 0x246   : > { %v3735_v58 = vld [vmem:[#allocation2 + $0x202] sm:$0xff]  ;;  %1262 = vst.msk [vmem:[#allocation2 + $0x218] sm:$0xff] %vm1194_vm5, %v1176_v55  ;;  %v1026_v59 = vadd.f32 %v14055_v22, %v1025_v56  ;;  %v11296_v60 = vpop.f32.mrb[137].mxu0  ;;  %11449 = vmatprep.mubr.msk.f32.mxu0 %vm1194_vm5, %v1427_v57 }
 0x247   : > { %11819 = vmatmul.mubr.msk.f32.gmra.mrb[28].mxu1 %vm1194_vm5, %v3735_v58 }
 0x248   : > { %v1177_v61 = vmax.f32 %v1026_v59, 0.0 }
 0x249   : > { %v1030_v62 = vpop.f32.mrb[138].mxu0  ;;  %v1428_v63 = vld [vmem:[#allocation2 + $0x209] sm:$0xff] }
 0x24a   : > { %v3736_v2 = vld [vmem:[#allocation2 + $0x20a] sm:$0xff]  ;;  %1263 = vst.msk [vmem:[#allocation2 + $0x220] sm:$0xff] %vm1194_vm5, %v1177_v61  ;;  %v1031_v3 = vadd.f32 %v14055_v22, %v1030_v62  ;;  %v11299_v4 = vpop.f32.mrb[139].mxu0  ;;  %11450 = vmatmul.mubr.msk.f32.gmra.mrb[234].mxu0 %vm1194_vm5, %v1428_v63 }
 0x24b   : > { %11821 = vmatprep.mubr.msk.f32.mxu1 %vm1194_vm5, %v3736_v2 }
 0x24c   : > { %v1178_v5 = vmax.f32 %v1031_v3, 0.0 }
 0x24d   : > { %v1035_v6 = vpop.f32.mrb[140].mxu0  ;;  %v1429_v7 = vld [vmem:[#allocation2 + $0x211] sm:$0xff] }
 0x24e   : > { %v3737_v8 = vld [vmem:[#allocation2 + $0x212] sm:$0xff]  ;;  %1264 = vst.msk [vmem:[#allocation2 + $0x228] sm:$0xff] %vm1194_vm5, %v1178_v5  ;;  %v1036_v9 = vadd.f32 %v14055_v22, %v1035_v6  ;;  %v11302_v10 = vpop.f32.mrb[141].mxu0  ;;  %11452 = vmatprep.mubr.msk.f32.mxu0 %vm1194_vm5, %v1429_v7 }
 0x24f   : > { %11822 = vmatmul.mubr.msk.f32.gmra.mrb[30].mxu1 %vm1194_vm5, %v3737_v8 }
 0x250   : > { %v1179_v11 = vmax.f32 %v1036_v9, 0.0 }
 0x251   : > { %v1040_v12 = vpop.f32.mrb[142].mxu0  ;;  %v1430_v13 = vld [vmem:[#allocation2 + $0x219] sm:$0xff] }
 0x252   : > { %v3738_v15 = vld [vmem:[#allocation2 + $0x21a] sm:$0xff]  ;;  %1265 = vst.msk [vmem:[#allocation2 + $0x230] sm:$0xff] %vm1194_vm5, %v1179_v11  ;;  %v1041_v16 = vadd.f32 %v14055_v22, %v1040_v12  ;;  %v11305_v17 = vpop.f32.mrb[143].mxu0  ;;  %11453 = vmatmul.mubr.msk.f32.gmra.mrb[236].mxu0 %vm1194_vm5, %v1430_v13 }
 0x253   : > { %11824 = vmatprep.mubr.msk.f32.mxu1 %vm1194_vm5, %v3738_v15  ;;  %v1281_v12 = vld [vmem:[#allocation2] sm:$0xff] }
 0x254   : > { %v1180_v18 = vmax.f32 %v1041_v16, 0.0 }
 0x255   : > { %v1045_v19 = vpop.f32.mrb[144].mxu0  ;;  %v1431_v20 = vld [vmem:[#allocation2 + $0x221] sm:$0xff] }
 0x256   : > { %v3739_v21 = vld [vmem:[#allocation2 + $0x222] sm:$0xff]  ;;  %1266 = vst.msk [vmem:[#allocation2 + $0x238] sm:$0xff] %vm1194_vm5, %v1180_v18  ;;  %v1046_v0 = vadd.f32 %v14055_v22, %v1045_v19  ;;  %v11308_v23 = vpop.f32.mrb[145].mxu0  ;;  %11455 = vmatprep.mubr.msk.f32.mxu0 %vm1194_vm5, %v1431_v20  ;;  %v1283_v20 = vld [vmem:[#allocation2 + $0x10] sm:$0xff] }
 0x257   : > { %11825 = vmatmul.mubr.msk.f32.gmra.mrb[32].mxu1 %vm1194_vm5, %v3739_v21  ;;  %v1282_v18 = vld [vmem:[#allocation2 + $0x8] sm:$0xff]  ;;  %v1284_v23 = vld [vmem:[#allocation2 + $0x18] sm:$0xff] }
 0x258   : > { %v1181_v24 = vmax.f32 %v1046_v0, 0.0 }
 0x259   : > { %v1050_v25 = vpop.f32.mrb[146].mxu0  ;;  %v1432_v26 = vld [vmem:[#allocation2 + $0x229] sm:$0xff] }
 0x25a   : > { %v3740_v27 = vld [vmem:[#allocation2 + $0x22a] sm:$0xff]  ;;  %1267 = vst.msk [vmem:[#allocation2 + $0x240] sm:$0xff] %vm1194_vm5, %v1181_v24  ;;  %v1051_v28 = vadd.f32 %v14055_v22, %v1050_v25  ;;  %v11311_v29 = vpop.f32.mrb[147].mxu0  ;;  %11456 = vmatmul.mubr.msk.f32.gmra.mrb[238].mxu0 %vm1194_vm5, %v1432_v26  ;;  %v1285_v24 = vld [vmem:[#allocation2 + $0x20] sm:$0xff] }
 0x25b   : > { %11827 = vmatprep.mubr.msk.f32.mxu1 %vm1194_vm5, %v3740_v27  ;;  %v1286_v27 = vld [vmem:[#allocation2 + $0x28] sm:$0xff]  ;;  %v9911_v29 = vld [vmem:[%s15701_s3 + $0xb8] sm:$0xff] }
 0x25c   : > { %v1182_v30 = vmax.f32 %v1051_v28, 0.0  ;;  %v9910_v28 = vld [vmem:[%s15701_s3 + $0xb0] sm:$0xff] }
 0x25d   : > { %v1055_v31 = vpop.f32.mrb[148].mxu0  ;;  %v1433_v32 = vld [vmem:[#allocation2 + $0x231] sm:$0xff] }
 0x25e   : > { %v3741_v33 = vld [vmem:[#allocation2 + $0x232] sm:$0xff]  ;;  %1268 = vst.msk [vmem:[#allocation2 + $0x248] sm:$0xff] %vm1194_vm5, %v1182_v30  ;;  %v1056_v34 = vadd.f32 %v14055_v22, %v1055_v31  ;;  %v11314_v36 = vpop.f32.mrb[149].mxu0  ;;  %11458 = vmatprep.mubr.msk.f32.mxu0 %vm1194_vm5, %v1433_v32  ;;  %v4524_v31 = vld [vmem:[#allocation2 + $0x1b] sm:$0xff]  ;;  %v12518_v32 = vpack.c.bf16 %v9911_v29, %v9910_v28  ;;  %v1310_v28 = vld [vmem:[#allocation2 + $0xe8] sm:$0xff] }
 0x25f   : > { %11828 = vmatmul.mubr.msk.f32.gmra.mrb[34].mxu1 %vm1194_vm5, %v3741_v33  ;;  %v1287_v30 = vld [vmem:[#allocation2 + $0x30] sm:$0xff]  ;;  %v1288_v33 = vld [vmem:[#allocation2 + $0x38] sm:$0xff]  ;;  %v1289_v36 = vld [vmem:[#allocation2 + $0x40] sm:$0xff] }
 0x260   : > { %v1183_v37 = vmax.f32 %v1056_v34, 0.0  ;;  %v4525_v34 = vld [vmem:[#allocation2 + $0x23] sm:$0xff]  ;;  %v4547_v29 = vld [vmem:[#allocation2 + $0xd3] sm:$0xff] }
 0x261   : > { %v1060_v38 = vpop.f32.mrb[150].mxu0  ;;  %v1434_v39 = vld [vmem:[#allocation2 + $0x239] sm:$0xff] }
 0x262   : > { %v3742_v40 = vld [vmem:[#allocation2 + $0x23a] sm:$0xff]  ;;  %1269 = vst.msk [vmem:[#allocation2 + $0x250] sm:$0xff] %vm1194_vm5, %v1183_v37  ;;  %v1061_v41 = vadd.f32 %v14055_v22, %v1060_v38  ;;  %v11317_v42 = vpop.f32.mrb[151].mxu0  ;;  %11459 = vmatmul.mubr.msk.f32.gmra.mrb[240].mxu0 %vm1194_vm5, %v1434_v39  ;;  %v4526_v37 = vld [vmem:[#allocation2 + $0x2b] sm:$0xff] }
 0x263   : > { %11830 = vmatprep.mubr.msk.f32.mxu1 %vm1194_vm5, %v3742_v40  ;;  %v1290_v38 = vld [vmem:[#allocation2 + $0x48] sm:$0xff]  ;;  %v4527_v39 = vld [vmem:[#allocation2 + $0x33] sm:$0xff] }
 0x264   : > { %v1184_v44 = vmax.f32 %v1061_v41, 0.0  ;;  %v1291_v40 = vld [vmem:[#allocation2 + $0x50] sm:$0xff]  ;;  %v4528_v41 = vld [vmem:[#allocation2 + $0x3b] sm:$0xff]  ;;  %v9663_v42 = vld [vmem:[%s15701_s3 + $0x48] sm:$0xff] }
 0x265   : > { %v1065_v46 = vpop.f32.mrb[152].mxu0  ;;  %v1435_v47 = vld [vmem:[#allocation2 + $0x241] sm:$0xff] }
 0x266   : > { %v3743_v48 = vld [vmem:[#allocation2 + $0x242] sm:$0xff]  ;;  %1270 = vst.msk [vmem:[#allocation2 + $0x258] sm:$0xff] %vm1194_vm5, %v1184_v44  ;;  %v1066_v49 = vadd.f32 %v14055_v22, %v1065_v46  ;;  %v11320_v50 = vpop.f32.mrb[153].mxu0  ;;  %11461 = vmatprep.mubr.msk.f32.mxu0 %vm1194_vm5, %v1435_v47  ;;  %v1292_v44 = vld [vmem:[#allocation2 + $0x58] sm:$0xff] }
 0x267   : > { %11831 = vmatmul.mubr.msk.f32.gmra.mrb[36].mxu1 %vm1194_vm5, %v3743_v48  ;;  %v4529_v46 = vld [vmem:[#allocation2 + $0x43] sm:$0xff] }
 0x268   : > { %v1185_v51 = vmax.f32 %v1066_v49, 0.0  ;;  %v1293_v48 = vld [vmem:[#allocation2 + $0x60] sm:$0xff]  ;;  %v4530_v49 = vld [vmem:[#allocation2 + $0x4b] sm:$0xff] }
 0x269   : > { %v1070_v52 = vpop.f32.mrb[154].mxu0  ;;  %v1436_v1 = vld [vmem:[#allocation2 + $0x249] sm:$0xff] }
 0x26a   : > { %v3744_v53 = vld [vmem:[#allocation2 + $0x24a] sm:$0xff]  ;;  %1271 = vst.msk [vmem:[#allocation2 + $0x260] sm:$0xff] %vm1194_vm5, %v1185_v51  ;;  %v1071_v45 = vadd.f32 %v14055_v22, %v1070_v52  ;;  %v11323_v54 = vpop.f32.mrb[155].mxu0  ;;  %11462 = vmatmul.mubr.msk.f32.gmra.mrb[242].mxu0 %vm1194_vm5, %v1436_v1  ;;  %v9665_v1 = vld [vmem:[%s15701_s3 + $0x58] sm:$0xff] }
 0x26b   : > { %11833 = vmatprep.mubr.msk.f32.mxu1 %vm1194_vm5, %v3744_v53  ;;  %v9664_v52 = vld [vmem:[%s15701_s3 + $0x50] sm:$0xff] }
 0x26c   : > { %v1186_v55 = vmax.f32 %v1071_v45, 0.0  ;;  %v1294_v45 = vld [vmem:[#allocation2 + $0x68] sm:$0xff]  ;;  %v4531_v54 = vld [vmem:[#allocation2 + $0x53] sm:$0xff] }
 0x26d   : > { %v1075_v56 = vpop.f32.mrb[156].mxu0  ;;  %v1437_v57 = vld [vmem:[#allocation2 + $0x251] sm:$0xff] }
 0x26e   : > { %v3745_v58 = vld [vmem:[#allocation2 + $0x252] sm:$0xff]  ;;  %1272 = vst.msk [vmem:[#allocation2 + $0x268] sm:$0xff] %vm1194_vm5, %v1186_v55  ;;  %v1076_v59 = vadd.f32 %v14055_v22, %v1075_v56  ;;  %v11326_v60 = vpop.f32.mrb[157].mxu0  ;;  %11464 = vmatprep.mubr.msk.f32.mxu0 %vm1194_vm5, %v1437_v57  ;;  %v12494_v55 = vpack.c.bf16 %v9665_v1, %v9664_v52  ;;  %v4532_v57 = vld [vmem:[#allocation2 + $0x5b] sm:$0xff] }
 0x26f   : > { %11834 = vmatmul.mubr.msk.f32.gmra.mrb[38].mxu1 %vm1194_vm5, %v3745_v58  ;;  %v1295_v56 = vld [vmem:[#allocation2 + $0x70] sm:$0xff]  ;;  %v1296_v58 = vld [vmem:[#allocation2 + $0x78] sm:$0xff]  ;;  %v1297_v60 = vld [vmem:[#allocation2 + $0x80] sm:$0xff] }
 0x270   : > { %v1187_v61 = vmax.f32 %v1076_v59, 0.0  ;;  %v4533_v59 = vld [vmem:[#allocation2 + $0x63] sm:$0xff]  ;;  %v4558_v1 = vld [vmem:[#allocation2 + $0x12b] sm:$0xff] }
 0x271   : > { %v1080_v62 = vpop.f32.mrb[158].mxu0  ;;  %v1438_v63 = vld [vmem:[#allocation2 + $0x259] sm:$0xff] }
 0x272   : > { %v3746_v2 = vld [vmem:[#allocation2 + $0x25a] sm:$0xff]  ;;  %1273 = vst.msk [vmem:[#allocation2 + $0x270] sm:$0xff] %vm1194_vm5, %v1187_v61  ;;  %v1081_v3 = vadd.f32 %v14055_v22, %v1080_v62  ;;  %v11329_v4 = vpop.f32.mrb[159].mxu0  ;;  %11465 = vmatmul.mubr.msk.f32.gmra.mrb[244].mxu0 %vm1194_vm5, %v1438_v63  ;;  %v4534_v61 = vld [vmem:[#allocation2 + $0x6b] sm:$0xff] }
 0x273   : > { %11836 = vmatprep.mubr.msk.f32.mxu1 %vm1194_vm5, %v3746_v2  ;;  %v1298_v62 = vld [vmem:[#allocation2 + $0x88] sm:$0xff]  ;;  %v4535_v63 = vld [vmem:[#allocation2 + $0x73] sm:$0xff]  ;;  %v1321_v52 = vld [vmem:[#allocation2 + $0x140] sm:$0xff] }
 0x274   : > { %v1188_v5 = vmax.f32 %v1081_v3, 0.0  ;;  %v1299_v2 = vld [vmem:[#allocation2 + $0x90] sm:$0xff]  ;;  %v4536_v3 = vld [vmem:[#allocation2 + $0x7b] sm:$0xff] }
 0x275   : > { %v1085_v6 = vpop.f32.mrb[160].mxu0  ;;  %v1439_v7 = vld [vmem:[#allocation2 + $0x261] sm:$0xff]  ;;  %v1440_v9 = vld [vmem:[#allocation2 + $0x269] sm:$0x3f]  ;;  %v1300_v4 = vld [vmem:[#allocation2 + $0x98] sm:$0xff] }
 0x276   : > { %v3747_v8 = vld [vmem:[#allocation2 + $0x262] sm:$0xff]  ;;  %1274 = vst.msk [vmem:[#allocation2 + $0x278] sm:$0xff] %vm1194_vm5, %v1188_v5  ;;  %v1086_v10 = vadd.f32 %v14055_v22, %v1085_v6  ;;  %v11332_v11 = vpop.f32.mrb[161].mxu0  ;;  %11467 = vmatprep.mubr.msk.f32.mxu0 %vm1194_vm5, %v1439_v7  ;;  %v4538_v7 = vld [vmem:[#allocation2 + $0x8b] sm:$0xff] }
 0x277   : > { %11837 = vmatmul.mubr.msk.f32.gmra.mrb[40].mxu1 %vm1194_vm5, %v3747_v8  ;;  %11468 = vmatmul.mubr.msk.f32.gmra.mrb[246].mxu0 %vm1194_vm5, %v1440_v9  ;;  %v4537_v5 = vld [vmem:[#allocation2 + $0x83] sm:$0xff] }
 0x278   : > { %v1189_v13 = vmax.f32 %v1086_v10, 0.0  ;;  %11478 = vmatprep.mubr.msk.f32.mxu0 %vm1194_vm5, %v1281_v12  ;;  %v1301_v6 = vld [vmem:[#allocation2 + $0xa0] sm:$0xff]  ;;  %v9991_v9 = vld [vmem:[%s15701_s3 + $0xc8] sm:$0xff]  ;;  %v4539_v12 = vld [vmem:[#allocation2 + $0x93] sm:$0xff] }
 0x279   : > { %v1090_v15 = vpop.f32.mrb[162].mxu0  ;;  %v3748_v16 = vld [vmem:[#allocation2 + $0x26a] sm:$0xff]  ;;  %v9990_v8 = vld [vmem:[%s15701_s3 + $0xc0] sm:$0xff] }
 0x27a   : > { %1275 = vst.msk [vmem:[#allocation2 + $0x280] sm:$0xff] %vm1194_vm5, %v1189_v13  ;;  %v1091_v17 = vadd.f32 %v14055_v22, %v1090_v15  ;;  %11839 = vmatprep.mubr.msk.f32.mxu1 %vm1194_vm5, %v3748_v16  ;;  %v11335_v19 = vpop.f32.mrb[163].mxu0  ;;  %v14246_v10 = vpack.c.bf16 %v9991_v9, %v9990_v8  ;;  %v1302_v11 = vld [vmem:[#allocation2 + $0xa8] sm:$0xff]  ;;  %v1303_v13 = vld [vmem:[#allocation2 + $0xb0] sm:$0xff]  ;;  %v4540_v15 = vld [vmem:[#allocation2 + $0x9b] sm:$0xff] }
 0x27b   : > { %11479 = vmatmul.mubr.msk.f32.vlgmr.msra.gmra.mrb[170].mxu0 %vm1194_vm5, %v1282_v18  ;;  %v1304_v16 = vld [vmem:[#allocation2 + $0xb8] sm:$0xff]  ;;  %v1305_v18 = vld [vmem:[#allocation2 + $0xc0] sm:$0xff]  ;;  %v4542_v19 = vld [vmem:[#allocation2 + $0xab] sm:$0xff] }
 0x27c   : > { %v1190_v21 = vmax.f32 %v1091_v17, 0.0  ;;  %11481 = vmatprep.mubr.msk.f32.mxu0 %vm1194_vm5, %v1283_v20  ;;  %v4541_v17 = vld [vmem:[#allocation2 + $0xa3] sm:$0xff]  ;;  %v4568_v8 = vld [vmem:[#allocation2 + $0x17b] sm:$0xff] }
 0x27d   : > { %v3749_v0 = vld [vmem:[#allocation2 + $0x272] sm:$0xff]  ;;  %v1095_v50 = vpop.f32.mrb[164].mxu0  ;;  %v1306_v20 = vld [vmem:[#allocation2 + $0xc8] sm:$0xff] }
 0x27e   : > { %1276 = vst.msk [vmem:[#allocation2 + $0x288] sm:$0xff] %vm1194_vm5, %v1190_v21  ;;  %11840 = vmatmul.mubr.msk.f32.gmra.mrb[42].mxu1 %vm1194_vm5, %v3749_v0  ;;  %v1096_v51 = vadd.f32 %v14055_v22, %v1095_v50  ;;  %v11338_v53 = vpop.f32.mrb[165].mxu0  ;;  %v4543_v21 = vld [vmem:[#allocation2 + $0xb3] sm:$0xff] }
 0x27f   : > { %11482 = vmatmul.mubr.msk.f32.gmra.mrb[172].mxu0 %vm1194_vm5, %v1284_v23  ;;  %v1307_v0 = vld [vmem:[#allocation2 + $0xd0] sm:$0xff]  ;;  %v4544_v23 = vld [vmem:[#allocation2 + $0xbb] sm:$0xff]  ;;  %v1322_v53 = vld [vmem:[#allocation2 + $0x148] sm:$0xff] }
 0x280   : > { %11484 = vmatprep.mubr.msk.f32.mxu0 %vm1194_vm5, %v1285_v24  ;;  %v1191_v22 = vmax.f32 %v1096_v51, 0.0  ;;  %v1308_v24 = vld [vmem:[#allocation2 + $0xd8] sm:$0xff]  ;;  %v4557_v51 = vld [vmem:[#allocation2 + $0x123] sm:$0xff] }
 0x281   : > { %v3750_v25 = vld [vmem:[#allocation2 + $0x27a] sm:$0xff]  ;;  %v3751_v26 = vld [vmem:[#allocation2 + $0x282] sm:$0x3f] }
 0x282   : > { %11842 = vmatprep.mubr.msk.f32.mxu1 %vm1194_vm5, %v3750_v25  ;;  %1277 = vst.msk [vmem:[#allocation2 + $0x290] sm:$0xff] %vm1194_vm5, %v1191_v22  ;;  %v4545_v25 = vld [vmem:[#allocation2 + $0xc3] sm:$0xff]  ;;  %v1320_v50 = vld [vmem:[#allocation2 + $0x138] sm:$0xff] }
 0x283   : > { %11485 = vmatmul.mubr.msk.f32.gmra.mrb[174].mxu0 %vm1194_vm5, %v1286_v27  ;;  %11843 = vmatmul.mubr.msk.f32.gmra.mrb[44].mxu1 %vm1194_vm5, %v3751_v26  ;;  %v1309_v26 = vld [vmem:[#allocation2 + $0xe0] sm:$0xff]  ;;  %v4546_v27 = vld [vmem:[#allocation2 + $0xcb] sm:$0xff]  ;;  %v1332_v9 = vld [vmem:[#allocation2 + $0x198] sm:$0xff] }
 0x284   : > { %11487 = vmatprep.mubr.msk.f32.mxu0 %vm1194_vm5, %v1287_v30  ;;  %11853 = vmatprep.mubr.msk.f32.mxu1 %vm1194_vm5, %v4524_v31  ;;  %v1311_v30 = vld [vmem:[#allocation2 + $0xf0] sm:$0xff]  ;;  %v4548_v31 = vld [vmem:[#allocation2 + $0xdb] sm:$0xff] }
 0x285   : > { %v1325_v22 = vld [vmem:[#allocation2 + $0x160] sm:$0xff] }
 0x287   : > { %11488 = vmatmul.mubr.msk.f32.gmra.mrb[176].mxu0 %vm1194_vm5, %v1288_v33  ;;  %11854 = vmatmul.mubr.msk.f32.vlgmr.msra.gmra.mrb[46].mxu1 %vm1194_vm5, %v4525_v34  ;;  %v4549_v33 = vld [vmem:[#allocation2 + $0xe3] sm:$0xff] }
 0x288   : > { %12517 = vmatpush3.bf16.msra.mxu1 %v14046_v14  ;;  %11490 = vmatprep.mubr.msk.f32.mxu0 %vm1194_vm5, %v1289_v36  ;;  %v9662_v14 = vld [vmem:[%s15701_s3 + $0x40] sm:$0xff]  ;;  %v4550_v36 = vld [vmem:[#allocation2 + $0xeb] sm:$0xff] }
 0x289   : > { %11856 = vmatprep.mubr.msk.f32.mxu1 %vm1194_vm5, %v4526_v37  ;;  %12519 = vmatprep.subr.bf16.mxu1 %v12518_v32  ;;  %v12490_v47 = vpack.c.bf16 %v9663_v42, %v9662_v14  ;;  %v1313_v34 = vld [vmem:[#allocation2 + $0x100] sm:$0xff]  ;;  %v1314_v37 = vld [vmem:[#allocation2 + $0x108] sm:$0xff] }
 0x28a   : > { %v4553_v14 = vld [vmem:[#allocation2 + $0x103] sm:$0xff] }
 0x28b   : > { %11491 = vmatmul.mubr.msk.f32.gmra.mrb[178].mxu0 %vm1194_vm5, %v1290_v38  ;;  %11857 = vmatmul.mubr.msk.f32.gmra.mrb[48].mxu1 %vm1194_vm5, %v4527_v39  ;;  %v4551_v38 = vld [vmem:[#allocation2 + $0xf3] sm:$0xff]  ;;  %v1317_v42 = vld [vmem:[#allocation2 + $0x120] sm:$0xff] }
 0x28c   : > { %11493 = vmatprep.mubr.msk.f32.mxu0 %vm1194_vm5, %v1291_v40  ;;  %11859 = vmatprep.mubr.msk.f32.mxu1 %vm1194_vm5, %v4528_v41  ;;  %v1315_v39 = vld [vmem:[#allocation2 + $0x110] sm:$0xff]  ;;  %v4552_v40 = vld [vmem:[#allocation2 + $0xfb] sm:$0xff] }
 0x28d   : > { %12521 = vmatpush3.bf16.msra.mxu1 %v12518_v32  ;;  %12491 = vmatprep.subr.bf16.mxu0 %v12490_v47  ;;  %v1312_v32 = vld [vmem:[#allocation2 + $0xf8] sm:$0xff] }
 0x28e   : > { %12493 = vmatpush3.bf16.msra.mxu0 %v12490_v47  ;;  %12523 = vmatprep.subr.bf16.mxu1 %v14246_v10  ;;  %v1316_v41 = vld [vmem:[#allocation2 + $0x118] sm:$0xff] }
 0x28f   : > { %11494 = vmatmul.mubr.msk.f32.gmra.mrb[180].mxu0 %vm1194_vm5, %v1292_v44  ;;  %11860 = vmatmul.mubr.msk.f32.gmra.mrb[50].mxu1 %vm1194_vm5, %v4529_v46  ;;  %v4554_v44 = vld [vmem:[#allocation2 + $0x10b] sm:$0xff]  ;;  %v4555_v47 = vld [vmem:[#allocation2 + $0x113] sm:$0xff] }
 0x290   : > { %11496 = vmatprep.mubr.msk.f32.mxu0 %vm1194_vm5, %v1293_v48  ;;  %11862 = vmatprep.mubr.msk.f32.mxu1 %vm1194_vm5, %v4530_v49  ;;  %v1318_v46 = vld [vmem:[#allocation2 + $0x128] sm:$0xff]  ;;  %v1319_v48 = vld [vmem:[#allocation2 + $0x130] sm:$0xff]  ;;  %v4556_v49 = vld [vmem:[#allocation2 + $0x11b] sm:$0xff] }
 0x291   : > { %12495 = vmatprep.subr.bf16.mxu0 %v12494_v55 }
 0x292   : > { %12497 = vmatpush3.bf16.msra.mxu0 %v12494_v55  ;;  %v4560_v55 = vld [vmem:[#allocation2 + $0x13b] sm:$0xff] }
 0x293   : > { %11497 = vmatmul.mubr.msk.f32.gmra.mrb[182].mxu0 %vm1194_vm5, %v1294_v45  ;;  %11863 = vmatmul.mubr.msk.f32.gmra.mrb[52].mxu1 %vm1194_vm5, %v4531_v54  ;;  %v4559_v45 = vld [vmem:[#allocation2 + $0x133] sm:$0xff] }
 0x294   : > { %11499 = vmatprep.mubr.msk.f32.mxu0 %vm1194_vm5, %v1295_v56  ;;  %11865 = vmatprep.mubr.msk.f32.mxu1 %vm1194_vm5, %v4532_v57  ;;  %v1323_v54 = vld [vmem:[#allocation2 + $0x150] sm:$0xff]  ;;  %v1324_v56 = vld [vmem:[#allocation2 + $0x158] sm:$0xff]  ;;  %v4561_v57 = vld [vmem:[#allocation2 + $0x143] sm:$0xff] }
 0x295   : > { %12499 = vmatprep.subr.bf16.mxu0 %v13751_v35 }
 0x297   : > { %11500 = vmatmul.mubr.msk.f32.gmra.mrb[184].mxu0 %vm1194_vm5, %v1296_v58  ;;  %11866 = vmatmul.mubr.msk.f32.gmra.mrb[54].mxu1 %vm1194_vm5, %v4533_v59  ;;  %v4562_v58 = vld [vmem:[#allocation2 + $0x14b] sm:$0xff] }
 0x298   : > { %11502 = vmatprep.mubr.msk.f32.mxu0 %vm1194_vm5, %v1297_v60  ;;  %11868 = vmatprep.mubr.msk.f32.mxu1 %vm1194_vm5, %v4534_v61  ;;  %v1326_v59 = vld [vmem:[#allocation2 + $0x168] sm:$0xff]  ;;  %v4563_v60 = vld [vmem:[#allocation2 + $0x153] sm:$0xff] }
 0x299   : > { %v1327_v61 = vld [vmem:[#allocation2 + $0x170] sm:$0xff] }
 0x29b   : > { %11503 = vmatmul.mubr.msk.f32.gmra.mrb[186].mxu0 %vm1194_vm5, %v1298_v62  ;;  %11869 = vmatmul.mubr.msk.f32.gmra.mrb[56].mxu1 %vm1194_vm5, %v4535_v63  ;;  %v4564_v62 = vld [vmem:[#allocation2 + $0x15b] sm:$0xff] }
 0x29c   : > { %11505 = vmatprep.mubr.msk.f32.mxu0 %vm1194_vm5, %v1299_v2  ;;  %11871 = vmatprep.mubr.msk.f32.mxu1 %vm1194_vm5, %v4536_v3  ;;  %v1328_v63 = vld [vmem:[#allocation2 + $0x178] sm:$0xff]  ;;  %v4565_v2 = vld [vmem:[#allocation2 + $0x163] sm:$0xff] }
 0x29d   : > { %v1329_v3 = vld [vmem:[#allocation2 + $0x180] sm:$0xff] }
 0x29f   : > { %11506 = vmatmul.mubr.msk.f32.gmra.mrb[188].mxu0 %vm1194_vm5, %v1300_v4  ;;  %11872 = vmatmul.mubr.msk.f32.gmra.mrb[58].mxu1 %vm1194_vm5, %v4537_v5  ;;  %v4566_v4 = vld [vmem:[#allocation2 + $0x16b] sm:$0xff] }
 0x2a0   : > { %11508 = vmatprep.mubr.msk.f32.mxu0 %vm1194_vm5, %v1301_v6  ;;  %11874 = vmatprep.mubr.msk.f32.mxu1 %vm1194_vm5, %v4538_v7  ;;  %v1330_v5 = vld [vmem:[#allocation2 + $0x188] sm:$0xff]  ;;  %v4567_v6 = vld [vmem:[#allocation2 + $0x173] sm:$0xff] }
 0x2a1   : > { %v1331_v7 = vld [vmem:[#allocation2 + $0x190] sm:$0xff] }
 0x2a3   : > { %11509 = vmatmul.mubr.msk.f32.gmra.mrb[190].mxu0 %vm1194_vm5, %v1302_v11  ;;  %11875 = vmatmul.mubr.msk.f32.gmra.mrb[60].mxu1 %vm1194_vm5, %v4539_v12  ;;  %v4569_v11 = vld [vmem:[#allocation2 + $0x183] sm:$0xff] }
 0x2a4   : > { %11511 = vmatprep.mubr.msk.f32.mxu0 %vm1194_vm5, %v1303_v13  ;;  %11877 = vmatprep.mubr.msk.f32.mxu1 %vm1194_vm5, %v4540_v15  ;;  %v1333_v12 = vld [vmem:[#allocation2 + $0x1a0] sm:$0xff]  ;;  %v4570_v13 = vld [vmem:[#allocation2 + $0x18b] sm:$0xff] }
 0x2a5   : > { %v1334_v15 = vld [vmem:[#allocation2 + $0x1a8] sm:$0xff] }
 0x2a7   : > { %11512 = vmatmul.mubr.msk.f32.gmra.mrb[192].mxu0 %vm1194_vm5, %v1304_v16  ;;  %11878 = vmatmul.mubr.msk.f32.gmra.mrb[62].mxu1 %vm1194_vm5, %v4541_v17  ;;  %v4571_v16 = vld [vmem:[#allocation2 + $0x193] sm:$0xff] }
 0x2a8   : > { %11514 = vmatprep.mubr.msk.f32.mxu0 %vm1194_vm5, %v1305_v18  ;;  %11880 = vmatprep.mubr.msk.f32.mxu1 %vm1194_vm5, %v4542_v19  ;;  %v1335_v17 = vld [vmem:[#allocation2 + $0x1b0] sm:$0xff]  ;;  %v4572_v18 = vld [vmem:[#allocation2 + $0x19b] sm:$0xff] }
 0x2a9   : > { %v1336_v19 = vld [vmem:[#allocation2 + $0x1b8] sm:$0xff] }
 0x2ab   : > { %11515 = vmatmul.mubr.msk.f32.gmra.mrb[194].mxu0 %vm1194_vm5, %v1306_v20  ;;  %11881 = vmatmul.mubr.msk.f32.gmra.mrb[64].mxu1 %vm1194_vm5, %v4543_v21  ;;  %v4573_v20 = vld [vmem:[#allocation2 + $0x1a3] sm:$0xff] }
 0x2ac   : > { %11517 = vmatprep.mubr.msk.f32.mxu0 %vm1194_vm5, %v1307_v0  ;;  %11883 = vmatprep.mubr.msk.f32.mxu1 %vm1194_vm5, %v4544_v23  ;;  %v1337_v21 = vld [vmem:[#allocation2 + $0x1c0] sm:$0xff]  ;;  %v4574_v0 = vld [vmem:[#allocation2 + $0x1ab] sm:$0xff] }
 0x2ad   : > { %v1338_v23 = vld [vmem:[#allocation2 + $0x1c8] sm:$0xff] }
 0x2af   : > { %11518 = vmatmul.mubr.msk.f32.gmra.mrb[196].mxu0 %vm1194_vm5, %v1308_v24  ;;  %11884 = vmatmul.mubr.msk.f32.gmra.mrb[66].mxu1 %vm1194_vm5, %v4545_v25  ;;  %v4575_v24 = vld [vmem:[#allocation2 + $0x1b3] sm:$0xff] }
 0x2b0   : > { %11520 = vmatprep.mubr.msk.f32.mxu0 %vm1194_vm5, %v1309_v26  ;;  %11886 = vmatprep.mubr.msk.f32.mxu1 %vm1194_vm5, %v4546_v27  ;;  %v1339_v25 = vld [vmem:[#allocation2 + $0x1d0] sm:$0xff]  ;;  %v4576_v26 = vld [vmem:[#allocation2 + $0x1bb] sm:$0xff] }
 0x2b1   : > { %v1340_v27 = vld [vmem:[#allocation2 + $0x1d8] sm:$0xff] }
 0x2b3   : > { %11521 = vmatmul.mubr.msk.f32.gmra.mrb[198].mxu0 %vm1194_vm5, %v1310_v28  ;;  %11887 = vmatmul.mubr.msk.f32.gmra.mrb[68].mxu1 %vm1194_vm5, %v4547_v29  ;;  %v4577_v28 = vld [vmem:[#allocation2 + $0x1c3] sm:$0xff] }
 0x2b4   : > { %11523 = vmatprep.mubr.msk.f32.mxu0 %vm1194_vm5, %v1311_v30  ;;  %11889 = vmatprep.mubr.msk.f32.mxu1 %vm1194_vm5, %v4548_v31  ;;  %v1341_v29 = vld [vmem:[#allocation2 + $0x1e0] sm:$0xff]  ;;  %v4578_v30 = vld [vmem:[#allocation2 + $0x1cb] sm:$0xff] }
 0x2b5   : > { %v1342_v31 = vld [vmem:[#allocation2 + $0x1e8] sm:$0xff] }
 0x2b7   : > { %11524 = vmatmul.mubr.msk.f32.gmra.mrb[200].mxu0 %vm1194_vm5, %v1312_v32  ;;  %11890 = vmatmul.mubr.msk.f32.gmra.mrb[70].mxu1 %vm1194_vm5, %v4549_v33  ;;  %v4579_v32 = vld [vmem:[#allocation2 + $0x1d3] sm:$0xff] }
 0x2b8   : > { %11526 = vmatprep.mubr.msk.f32.mxu0 %vm1194_vm5, %v1313_v34  ;;  %11892 = vmatprep.mubr.msk.f32.mxu1 %vm1194_vm5, %v4550_v36  ;;  %v1343_v33 = vld [vmem:[#allocation2 + $0x1f0] sm:$0xff]  ;;  %v4580_v34 = vld [vmem:[#allocation2 + $0x1db] sm:$0xff] }
 0x2b9   : > { %v1344_v36 = vld [vmem:[#allocation2 + $0x1f8] sm:$0xff] }
 0x2bb   : > { %11527 = vmatmul.mubr.msk.f32.gmra.mrb[202].mxu0 %vm1194_vm5, %v1314_v37  ;;  %11893 = vmatmul.mubr.msk.f32.gmra.mrb[72].mxu1 %vm1194_vm5, %v4551_v38  ;;  %v4581_v37 = vld [vmem:[#allocation2 + $0x1e3] sm:$0xff] }
 0x2bc   : > { %11529 = vmatprep.mubr.msk.f32.mxu0 %vm1194_vm5, %v1315_v39  ;;  %11895 = vmatprep.mubr.msk.f32.mxu1 %vm1194_vm5, %v4552_v40  ;;  %v1345_v38 = vld [vmem:[#allocation2 + $0x200] sm:$0xff]  ;;  %v4582_v39 = vld [vmem:[#allocation2 + $0x1eb] sm:$0xff] }
 0x2bd   : > { %v1346_v40 = vld [vmem:[#allocation2 + $0x208] sm:$0xff] }
 0x2bf   : > { %11530 = vmatmul.mubr.msk.f32.gmra.mrb[204].mxu0 %vm1194_vm5, %v1316_v41  ;;  %11896 = vmatmul.mubr.msk.f32.gmra.mrb[74].mxu1 %vm1194_vm5, %v4553_v14  ;;  %v4583_v41 = vld [vmem:[#allocation2 + $0x1f3] sm:$0xff] }
 0x2c0   : > { %11532 = vmatprep.mubr.msk.f32.mxu0 %vm1194_vm5, %v1317_v42  ;;  %11898 = vmatprep.mubr.msk.f32.mxu1 %vm1194_vm5, %v4554_v44  ;;  %v1347_v14 = vld [vmem:[#allocation2 + $0x210] sm:$0xff]  ;;  %v4584_v42 = vld [vmem:[#allocation2 + $0x1fb] sm:$0xff] }
 0x2c1   : > { %v1348_v44 = vld [vmem:[#allocation2 + $0x218] sm:$0xff] }
 0x2c3   : > { %11533 = vmatmul.mubr.msk.f32.gmra.mrb[206].mxu0 %vm1194_vm5, %v1318_v46  ;;  %11899 = vmatmul.mubr.msk.f32.gmra.mrb[76].mxu1 %vm1194_vm5, %v4555_v47  ;;  %v4585_v46 = vld [vmem:[#allocation2 + $0x203] sm:$0xff] }
 0x2c4   : > { %11535 = vmatprep.mubr.msk.f32.mxu0 %vm1194_vm5, %v1319_v48  ;;  %11901 = vmatprep.mubr.msk.f32.mxu1 %vm1194_vm5, %v4556_v49  ;;  %v1349_v47 = vld [vmem:[#allocation2 + $0x220] sm:$0xff]  ;;  %v4586_v48 = vld [vmem:[#allocation2 + $0x20b] sm:$0xff] }
 0x2c5   : > { %v1350_v49 = vld [vmem:[#allocation2 + $0x228] sm:$0xff] }
 0x2c7   : > { %11536 = vmatmul.mubr.msk.f32.gmra.mrb[208].mxu0 %vm1194_vm5, %v1320_v50  ;;  %11902 = vmatmul.mubr.msk.f32.gmra.mrb[0].mxu1 %vm1194_vm5, %v4557_v51  ;;  %v4587_v50 = vld [vmem:[#allocation2 + $0x213] sm:$0xff] }
 0x2c8   : > { %11538 = vmatprep.mubr.msk.f32.mxu0 %vm1194_vm5, %v1321_v52  ;;  %11904 = vmatprep.mubr.msk.f32.mxu1 %vm1194_vm5, %v4558_v1  ;;  %v1351_v51 = vld [vmem:[#allocation2 + $0x230] sm:$0xff]  ;;  %v4588_v52 = vld [vmem:[#allocation2 + $0x21b] sm:$0xff] }
 0x2c9   : > { %v1352_v1 = vld [vmem:[#allocation2 + $0x238] sm:$0xff] }
 0x2cb   : > { %11539 = vmatmul.mubr.msk.f32.gmra.mrb[210].mxu0 %vm1194_vm5, %v1322_v53  ;;  %11905 = vmatmul.mubr.msk.f32.gmra.mrb[2].mxu1 %vm1194_vm5, %v4559_v45  ;;  %v4589_v53 = vld [vmem:[#allocation2 + $0x223] sm:$0xff] }
 0x2cc   : > { %11541 = vmatprep.mubr.msk.f32.mxu0 %vm1194_vm5, %v1323_v54  ;;  %11907 = vmatprep.mubr.msk.f32.mxu1 %vm1194_vm5, %v4560_v55  ;;  %v1353_v45 = vld [vmem:[#allocation2 + $0x240] sm:$0xff]  ;;  %v4590_v54 = vld [vmem:[#allocation2 + $0x22b] sm:$0xff] }
 0x2cd   : > { %v1354_v55 = vld [vmem:[#allocation2 + $0x248] sm:$0xff] }
 0x2cf   : > { %11542 = vmatmul.mubr.msk.f32.gmra.mrb[212].mxu0 %vm1194_vm5, %v1324_v56  ;;  %11908 = vmatmul.mubr.msk.f32.gmra.mrb[4].mxu1 %vm1194_vm5, %v4561_v57  ;;  %v4591_v56 = vld [vmem:[#allocation2 + $0x233] sm:$0xff] }
 0x2d0   : > { %11544 = vmatprep.mubr.msk.f32.mxu0 %vm1194_vm5, %v1325_v22  ;;  %11910 = vmatprep.mubr.msk.f32.mxu1 %vm1194_vm5, %v4562_v58  ;;  %v1355_v57 = vld [vmem:[#allocation2 + $0x250] sm:$0xff]  ;;  %v4592_v22 = vld [vmem:[#allocation2 + $0x23b] sm:$0xff] }
 0x2d1   : > { %v1356_v58 = vld [vmem:[#allocation2 + $0x258] sm:$0xff] }
 0x2d3   : > { %11545 = vmatmul.mubr.msk.f32.gmra.mrb[214].mxu0 %vm1194_vm5, %v1326_v59  ;;  %11911 = vmatmul.mubr.msk.f32.gmra.mrb[6].mxu1 %vm1194_vm5, %v4563_v60  ;;  %v4593_v59 = vld [vmem:[#allocation2 + $0x243] sm:$0xff] }
 0x2d4   : > { %11547 = vmatprep.mubr.msk.f32.mxu0 %vm1194_vm5, %v1327_v61  ;;  %11913 = vmatprep.mubr.msk.f32.mxu1 %vm1194_vm5, %v4564_v62  ;;  %v1357_v60 = vld [vmem:[#allocation2 + $0x260] sm:$0xff]  ;;  %v4594_v61 = vld [vmem:[#allocation2 + $0x24b] sm:$0xff] }
 0x2d5   : > { %v1358_v62 = vld [vmem:[#allocation2 + $0x268] sm:$0x3f] }
 0x2d7   : > { %11548 = vmatmul.mubr.msk.f32.gmra.mrb[216].mxu0 %vm1194_vm5, %v1328_v63  ;;  %11914 = vmatmul.mubr.msk.f32.gmra.mrb[8].mxu1 %vm1194_vm5, %v4565_v2  ;;  %v4595_v63 = vld [vmem:[#allocation2 + $0x253] sm:$0xff]  ;;  %v2824_v2 = vld [vmem:[#allocation2 + $0x2] sm:$0xff] }
 0x2d8   : > { %11550 = vmatprep.mubr.msk.f32.mxu0 %vm1194_vm5, %v1329_v3  ;;  %11916 = vmatprep.mubr.msk.f32.mxu1 %vm1194_vm5, %v4566_v4  ;;  %v4596_v3 = vld [vmem:[#allocation2 + $0x25b] sm:$0xff]  ;;  %v2825_v4 = vld [vmem:[#allocation2 + $0xa] sm:$0xff] }
 0x2db   : > { %11551 = vmatmul.mubr.msk.f32.gmra.mrb[218].mxu0 %vm1194_vm5, %v1330_v5  ;;  %11917 = vmatmul.mubr.msk.f32.gmra.mrb[10].mxu1 %vm1194_vm5, %v4567_v6  ;;  %v4597_v5 = vld [vmem:[#allocation2 + $0x263] sm:$0xff]  ;;  %v2826_v6 = vld [vmem:[#allocation2 + $0x12] sm:$0xff] }
 0x2dc   : > { %11553 = vmatprep.mubr.msk.f32.mxu0 %vm1194_vm5, %v1331_v7  ;;  %11919 = vmatprep.mubr.msk.f32.mxu1 %vm1194_vm5, %v4568_v8  ;;  %v4598_v7 = vld [vmem:[#allocation2 + $0x26b] sm:$0xff]  ;;  %v14370_v8 = vld [vmem:[#allocation2 + $0x1a] sm:$0xff] }
 0x2df   : > { %11554 = vmatmul.mubr.msk.f32.gmra.mrb[220].mxu0 %vm1194_vm5, %v1332_v9  ;;  %11920 = vmatmul.mubr.msk.f32.gmra.mrb[12].mxu1 %vm1194_vm5, %v4569_v11  ;;  %v4599_v9 = vld [vmem:[#allocation2 + $0x273] sm:$0xff]  ;;  %v14376_v11 = vld [vmem:[#allocation2 + $0x22] sm:$0xff] }
 0x2e0   : > { %11556 = vmatprep.mubr.msk.f32.mxu0 %vm1194_vm5, %v1333_v12  ;;  %11922 = vmatprep.mubr.msk.f32.mxu1 %vm1194_vm5, %v4570_v13  ;;  %v4600_v12 = vld [vmem:[#allocation2 + $0x27b] sm:$0xff]  ;;  %v14381_v13 = vld [vmem:[#allocation2 + $0x2a] sm:$0xff] }
 0x2e3   : > { %11557 = vmatmul.mubr.msk.f32.gmra.mrb[222].mxu0 %vm1194_vm5, %v1334_v15  ;;  %11923 = vmatmul.mubr.msk.f32.gmra.mrb[14].mxu1 %vm1194_vm5, %v4571_v16  ;;  %v9992_v15 = vld [vmem:[%s15701_s3 + $0xd0] sm:$0xff]  ;;  %v9993_v16 = vld [vmem:[%s15701_s3 + $0xd8] sm:$0xff] }
 0x2e4   : > { %11559 = vmatprep.mubr.msk.f32.mxu0 %vm1194_vm5, %v1335_v17  ;;  %11925 = vmatprep.mubr.msk.f32.mxu1 %vm1194_vm5, %v4572_v18  ;;  %v14393_v17 = vld [vmem:[#allocation2 + $0x32] sm:$0xff]  ;;  %v5374_v18 = vld [vmem:[#allocation2 + $0x1c] sm:$0xff] }
 0x2e7   : > { %11560 = vmatmul.mubr.msk.f32.gmra.mrb[224].mxu0 %vm1194_vm5, %v1336_v19  ;;  %11926 = vmatmul.mubr.msk.f32.gmra.mrb[16].mxu1 %vm1194_vm5, %v4573_v20  ;;  %v14398_v19 = vld [vmem:[#allocation2 + $0x3a] sm:$0xff]  ;;  %v5375_v20 = vld [vmem:[#allocation2 + $0x24] sm:$0xff] }
 0x2e8   : > { %11562 = vmatprep.mubr.msk.f32.mxu0 %vm1194_vm5, %v1337_v21  ;;  %11928 = vmatprep.mubr.msk.f32.mxu1 %vm1194_vm5, %v4574_v0  ;;  %v14403_v21 = vld [vmem:[#allocation2 + $0x42] sm:$0xff]  ;;  %v5376_v0 = vld [vmem:[#allocation2 + $0x2c] sm:$0xff] }
 0x2eb   : > { %11563 = vmatmul.mubr.msk.f32.gmra.mrb[226].mxu0 %vm1194_vm5, %v1338_v23  ;;  %11929 = vmatmul.mubr.msk.f32.gmra.mrb[18].mxu1 %vm1194_vm5, %v4575_v24  ;;  %v14409_v23 = vld [vmem:[#allocation2 + $0x4a] sm:$0xff]  ;;  %v14411_v24 = vld [vmem:[#allocation2 + $0x34] sm:$0xff] }
 0x2ec   : > { %11565 = vmatprep.mubr.msk.f32.mxu0 %vm1194_vm5, %v1339_v25  ;;  %11931 = vmatprep.mubr.msk.f32.mxu1 %vm1194_vm5, %v4576_v26  ;;  %v14417_v25 = vld [vmem:[#allocation2 + $0x52] sm:$0xff]  ;;  %v14425_v26 = vld [vmem:[#allocation2 + $0x5a] sm:$0xff] }
 0x2ef   : > { %11566 = vmatmul.mubr.msk.f32.gmra.mrb[228].mxu0 %vm1194_vm5, %v1340_v27  ;;  %11932 = vmatmul.mubr.msk.f32.gmra.mrb[20].mxu1 %vm1194_vm5, %v4577_v28  ;;  %v14427_v27 = vld [vmem:[#allocation2 + $0x44] sm:$0xff] }
 0x2f0   : > { %11568 = vmatprep.mubr.msk.f32.mxu0 %vm1194_vm5, %v1341_v29  ;;  %11934 = vmatprep.mubr.msk.f32.mxu1 %vm1194_vm5, %v4578_v30  ;;  %v14433_v28 = vld [vmem:[#allocation2 + $0x62] sm:$0xff]  ;;  %v14435_v29 = vld [vmem:[#allocation2 + $0x4c] sm:$0xff] }
 0x2f1   : > { %v14441_v30 = vld [vmem:[#allocation2 + $0x6a] sm:$0xff] }
 0x2f3   : > { %11569 = vmatmul.mubr.msk.f32.gmra.mrb[230].mxu0 %vm1194_vm5, %v1342_v31  ;;  %11935 = vmatmul.mubr.msk.f32.gmra.mrb[22].mxu1 %vm1194_vm5, %v4579_v32  ;;  %v14443_v31 = vld [vmem:[#allocation2 + $0x54] sm:$0xff] }
 0x2f4   : > { %11571 = vmatprep.mubr.msk.f32.mxu0 %vm1194_vm5, %v1343_v33  ;;  %11937 = vmatprep.mubr.msk.f32.mxu1 %vm1194_vm5, %v4580_v34  ;;  %v14449_v32 = vld [vmem:[#allocation2 + $0x72] sm:$0xff]  ;;  %v14451_v33 = vld [vmem:[#allocation2 + $0x5c] sm:$0xff] }
 0x2f5   : > { %v14457_v34 = vld [vmem:[#allocation2 + $0x7a] sm:$0xff] }
 0x2f7   : > { %11572 = vmatmul.mubr.msk.f32.gmra.mrb[232].mxu0 %vm1194_vm5, %v1344_v36  ;;  %11938 = vmatmul.mubr.msk.f32.gmra.mrb[24].mxu1 %vm1194_vm5, %v4581_v37  ;;  %v14459_v36 = vld [vmem:[#allocation2 + $0x64] sm:$0xff] }
 0x2f8   : > { %11574 = vmatprep.mubr.msk.f32.mxu0 %vm1194_vm5, %v1345_v38  ;;  %11940 = vmatprep.mubr.msk.f32.mxu1 %vm1194_vm5, %v4582_v39  ;;  %v14465_v37 = vld [vmem:[#allocation2 + $0x82] sm:$0xff]  ;;  %v14467_v38 = vld [vmem:[#allocation2 + $0x6c] sm:$0xff] }
 0x2f9   : > { %v14473_v39 = vld [vmem:[#allocation2 + $0x8a] sm:$0xff] }
 0x2fb   : > { %11575 = vmatmul.mubr.msk.f32.gmra.mrb[234].mxu0 %vm1194_vm5, %v1346_v40  ;;  %11941 = vmatmul.mubr.msk.f32.gmra.mrb[26].mxu1 %vm1194_vm5, %v4583_v41  ;;  %v14475_v40 = vld [vmem:[#allocation2 + $0x74] sm:$0xff] }
 0x2fc   : > { %11577 = vmatprep.mubr.msk.f32.mxu0 %vm1194_vm5, %v1347_v14  ;;  %11943 = vmatprep.mubr.msk.f32.mxu1 %vm1194_vm5, %v4584_v42  ;;  %v14481_v41 = vld [vmem:[#allocation2 + $0x92] sm:$0xff]  ;;  %v14483_v14 = vld [vmem:[#allocation2 + $0x7c] sm:$0xff] }
 0x2fd   : > { %v14489_v42 = vld [vmem:[#allocation2 + $0x9a] sm:$0xff] }
 0x2ff   : > { %11578 = vmatmul.mubr.msk.f32.gmra.mrb[236].mxu0 %vm1194_vm5, %v1348_v44  ;;  %11944 = vmatmul.mubr.msk.f32.gmra.mrb[28].mxu1 %vm1194_vm5, %v4585_v46  ;;  %v14491_v44 = vld [vmem:[#allocation2 + $0x84] sm:$0xff] }
 0x300   : > { %11580 = vmatprep.mubr.msk.f32.mxu0 %vm1194_vm5, %v1349_v47  ;;  %11946 = vmatprep.mubr.msk.f32.mxu1 %vm1194_vm5, %v4586_v48  ;;  %v14497_v46 = vld [vmem:[#allocation2 + $0xa2] sm:$0xff]  ;;  %v14499_v47 = vld [vmem:[#allocation2 + $0x8c] sm:$0xff] }
 0x301   : > { %v10072_v48 = vld [vmem:[%s15701_s3 + $0xe0] sm:$0xff] }
 0x303   : > { %11581 = vmatmul.mubr.msk.f32.gmra.mrb[238].mxu0 %vm1194_vm5, %v1350_v49  ;;  %11947 = vmatmul.mubr.msk.f32.gmra.mrb[30].mxu1 %vm1194_vm5, %v4587_v50  ;;  %v10073_v49 = vld [vmem:[%s15701_s3 + $0xe8] sm:$0xff] }
 0x304   : > { %11583 = vmatprep.mubr.msk.f32.mxu0 %vm1194_vm5, %v1351_v51  ;;  %11949 = vmatprep.mubr.msk.f32.mxu1 %vm1194_vm5, %v4588_v52  ;;  %v14511_v50 = vpack.c.bf16 %v10073_v49, %v10072_v48  ;;  %v14513_v51 = vld [vmem:[#allocation2 + $0xaa] sm:$0xff]  ;;  %v14515_v52 = vld [vmem:[#allocation2 + $0x94] sm:$0xff] }
 0x305   : > { %v14631_v48 = vld [vmem:[#allocation2 + $0x10c] sm:$0xff] }
 0x306   : > { %15768 = vst [vmem:[#allocation19_spill] sm:$0xff] %v14631_v48  ;;  %v2861_v49 = vld [vmem:[#allocation2 + $0x12a] sm:$0xff] }
 0x307   : > { %11584 = vmatmul.mubr.msk.f32.gmra.mrb[240].mxu0 %vm1194_vm5, %v1352_v1  ;;  %11950 = vmatmul.mubr.msk.f32.gmra.mrb[32].mxu1 %vm1194_vm5, %v4589_v53  ;;  %v14521_v1 = vld [vmem:[#allocation2 + $0xb2] sm:$0xff]  ;;  %v14523_v53 = vld [vmem:[#allocation2 + $0x9c] sm:$0xff] }
 0x308   : > { %11586 = vmatprep.mubr.msk.f32.mxu0 %vm1194_vm5, %v1353_v45  ;;  %11952 = vmatprep.mubr.msk.f32.mxu1 %vm1194_vm5, %v4590_v54  ;;  %v14530_v45 = vld [vmem:[#allocation2 + $0xba] sm:$0xff]  ;;  %v14532_v54 = vld [vmem:[#allocation2 + $0xa4] sm:$0xff] }
 0x30b   : > { %11587 = vmatmul.mubr.msk.f32.gmra.mrb[242].mxu0 %vm1194_vm5, %v1354_v55  ;;  %11953 = vmatmul.mubr.msk.f32.gmra.mrb[34].mxu1 %vm1194_vm5, %v4591_v56  ;;  %v14538_v55 = vld [vmem:[#allocation2 + $0xc2] sm:$0xff]  ;;  %v14540_v56 = vld [vmem:[#allocation2 + $0xac] sm:$0xff] }
 0x30c   : > { %11589 = vmatprep.mubr.msk.f32.mxu0 %vm1194_vm5, %v1355_v57  ;;  %11955 = vmatprep.mubr.msk.f32.mxu1 %vm1194_vm5, %v4592_v22  ;;  %v14546_v57 = vld [vmem:[#allocation2 + $0xca] sm:$0xff]  ;;  %v14548_v22 = vld [vmem:[#allocation2 + $0xb4] sm:$0xff] }
 0x30f   : > { %11590 = vmatmul.mubr.msk.f32.gmra.mrb[244].mxu0 %vm1194_vm5, %v1356_v58  ;;  %11956 = vmatmul.mubr.msk.f32.gmra.mrb[36].mxu1 %vm1194_vm5, %v4593_v59  ;;  %v14554_v58 = vld [vmem:[#allocation2 + $0xd2] sm:$0xff]  ;;  %v14556_v59 = vld [vmem:[#allocation2 + $0xbc] sm:$0xff] }
 0x310   : > { %11592 = vmatprep.mubr.msk.f32.mxu0 %vm1194_vm5, %v1357_v60  ;;  %11958 = vmatprep.mubr.msk.f32.mxu1 %vm1194_vm5, %v4594_v61  ;;  %v14562_v60 = vld [vmem:[#allocation2 + $0xda] sm:$0xff]  ;;  %v14564_v61 = vld [vmem:[#allocation2 + $0xc4] sm:$0xff] }
 0x313   : > { %11593 = vmatmul.mubr.msk.f32.gmra.mrb[246].mxu0 %vm1194_vm5, %v1358_v62  ;;  %11959 = vmatmul.mubr.msk.f32.gmra.mrb[38].mxu1 %vm1194_vm5, %v4595_v63  ;;  %v14570_v62 = vld [vmem:[#allocation2 + $0xe2] sm:$0xff]  ;;  %v14572_v63 = vld [vmem:[#allocation2 + $0xcc] sm:$0xff] }
 0x314   : > { %11603 = vmatprep.mubr.msk.f32.mxu0 %vm1194_vm5, %v2824_v2  ;;  %11961 = vmatprep.mubr.msk.f32.mxu1 %vm1194_vm5, %v4596_v3  ;;  %v14578_v2 = vld [vmem:[#allocation2 + $0xea] sm:$0xff]  ;;  %v14580_v3 = vld [vmem:[#allocation2 + $0xd4] sm:$0xff] }
 0x317   : > { %11604 = vmatmul.mubr.msk.f32.vlgmr.msra.gmra.mrb[170].mxu0 %vm1194_vm5, %v2825_v4  ;;  %11962 = vmatmul.mubr.msk.f32.gmra.mrb[40].mxu1 %vm1194_vm5, %v4597_v5  ;;  %v14586_v4 = vld [vmem:[#allocation2 + $0xf2] sm:$0xff]  ;;  %v14588_v5 = vld [vmem:[#allocation2 + $0xdc] sm:$0xff] }
 0x318   : > { %11606 = vmatprep.mubr.msk.f32.mxu0 %vm1194_vm5, %v2826_v6  ;;  %11964 = vmatprep.mubr.msk.f32.mxu1 %vm1194_vm5, %v4598_v7  ;;  %v14594_v6 = vld [vmem:[#allocation2 + $0xfa] sm:$0xff]  ;;  %v14596_v7 = vld [vmem:[#allocation2 + $0xe4] sm:$0xff] }
 0x319   : > { %12501 = vmatpush3.bf16.msra.mxu0 %v13751_v35  ;;  %v4601_v35 = vld [vmem:[#allocation2 + $0x283] sm:$0x3f]  ;;  %15760 = vst [vmem:[#allocation11_spill] sm:$0xff] %v14596_v7 }
 0x31a   : > { %12503 = vmatprep.subr.bf16.mxu0 %v13767_v43 }
 0x31b   : > { %11607 = vmatmul.mubr.msk.f32.gmra.mrb[172].mxu0 %vm1194_vm5, %v14370_v8  ;;  %11965 = vmatmul.mubr.msk.f32.gmra.mrb[42].mxu1 %vm1194_vm5, %v4599_v9  ;;  %v14602_v9 = vld [vmem:[#allocation2 + $0x102] sm:$0xff] }
 0x31c   : > { %11609 = vmatprep.mubr.msk.f32.mxu0 %vm1194_vm5, %v14376_v11  ;;  %11967 = vmatprep.mubr.msk.f32.mxu1 %vm1194_vm5, %v4600_v12  ;;  %15761 = vst [vmem:[#allocation12_spill] sm:$0xff] %v14602_v9  ;;  %v14604_v12 = vld [vmem:[#allocation2 + $0xec] sm:$0xff] }
 0x31d   : > { %12505 = vmatpush3.bf16.msra.mxu0 %v13767_v43  ;;  %v12526_v43 = vpack.c.bf16 %v9993_v16, %v9992_v15  ;;  %15762 = vst [vmem:[#allocation13_spill] sm:$0xff] %v14604_v12  ;;  %v14612_v15 = vld [vmem:[#allocation2 + $0xf4] sm:$0xff] }
 0x31e   : > { %15764 = vst [vmem:[#allocation15_spill] sm:$0xff] %v14612_v15  ;;  %v14618_v16 = vld [vmem:[#allocation2 + $0x112] sm:$0xff] }
 0x31f   : > { %11610 = vmatmul.mubr.msk.f32.gmra.mrb[174].mxu0 %vm1194_vm5, %v14381_v13  ;;  %11968 = vmatmul.mubr.msk.f32.gmra.mrb[44].mxu1 %vm1194_vm5, %v4601_v35  ;;  %v14610_v35 = vld [vmem:[#allocation2 + $0x10a] sm:$0xff]  ;;  %15765 = vst [vmem:[#allocation16_spill] sm:$0xff] %v14618_v16 }
 0x320   : > { %11612 = vmatprep.mubr.msk.f32.mxu0 %vm1194_vm5, %v14393_v17  ;;  %11978 = vmatprep.mubr.msk.f32.mxu1 %vm1194_vm5, %v5374_v18  ;;  %15763 = vst [vmem:[#allocation14_spill] sm:$0xff] %v14610_v35  ;;  %v14620_v18 = vld [vmem:[#allocation2 + $0xfc] sm:$0xff] }
 0x321   : > { %15766 = vst [vmem:[#allocation17_spill] sm:$0xff] %v14620_v18 }
 0x323   : > { %11613 = vmatmul.mubr.msk.f32.gmra.mrb[176].mxu0 %vm1194_vm5, %v14398_v19  ;;  %11979 = vmatmul.mubr.msk.f32.vlgmr.msra.gmra.mrb[46].mxu1 %vm1194_vm5, %v5375_v20  ;;  %v14626_v20 = vld [vmem:[#allocation2 + $0x104] sm:$0xff] }
 0x324   : > { %12525 = vmatpush3.bf16.msra.mxu1 %v14246_v10  ;;  %11615 = vmatprep.mubr.msk.f32.mxu0 %vm1194_vm5, %v14403_v21  ;;  %v14419_v10 = vld [vmem:[#allocation2 + $0x3c] sm:$0xff]  ;;  %15767 = vst [vmem:[#allocation18_spill] sm:$0xff] %v14626_v20 }
 0x325   : > { %11981 = vmatprep.mubr.msk.f32.mxu1 %vm1194_vm5, %v5376_v0  ;;  %12527 = vmatprep.subr.bf16.mxu1 %v12526_v43  ;;  %v2860_v0 = vld [vmem:[#allocation2 + $0x122] sm:$0xff] }
 0x327   : > { %11616 = vmatmul.mubr.msk.f32.gmra.mrb[178].mxu0 %vm1194_vm5, %v14409_v23  ;;  %11982 = vmatmul.mubr.msk.f32.gmra.mrb[48].mxu1 %vm1194_vm5, %v14411_v24 }
 0x328   : > { %11618 = vmatprep.mubr.msk.f32.mxu0 %vm1194_vm5, %v14417_v25  ;;  %11984 = vmatprep.mubr.msk.f32.mxu1 %vm1194_vm5, %v14419_v10 }
 0x329   : > { %12529 = vmatpush3.bf16.msra.mxu1 %v12526_v43  ;;  %v2859_v43 = vld [vmem:[#allocation2 + $0x11a] sm:$0xff] }
 0x32a   : > { %12531 = vmatprep.subr.bf16.mxu1 %v14511_v50 }
 0x32b   : > { %11619 = vmatmul.mubr.msk.f32.gmra.mrb[180].mxu0 %vm1194_vm5, %v14425_v26  ;;  %11985 = vmatmul.mubr.msk.f32.gmra.mrb[50].mxu1 %vm1194_vm5, %v14427_v27 }
 0x32c   : > { %11621 = vmatprep.mubr.msk.f32.mxu0 %vm1194_vm5, %v14433_v28  ;;  %11987 = vmatprep.mubr.msk.f32.mxu1 %vm1194_vm5, %v14435_v29 }
 0x32f   : > { %11622 = vmatmul.mubr.msk.f32.gmra.mrb[182].mxu0 %vm1194_vm5, %v14441_v30  ;;  %11988 = vmatmul.mubr.msk.f32.gmra.mrb[52].mxu1 %vm1194_vm5, %v14443_v31 }
 0x330   : > { %11624 = vmatprep.mubr.msk.f32.mxu0 %vm1194_vm5, %v14449_v32  ;;  %11990 = vmatprep.mubr.msk.f32.mxu1 %vm1194_vm5, %v14451_v33 }
 0x333   : > { %11625 = vmatmul.mubr.msk.f32.gmra.mrb[184].mxu0 %vm1194_vm5, %v14457_v34  ;;  %11991 = vmatmul.mubr.msk.f32.gmra.mrb[54].mxu1 %vm1194_vm5, %v14459_v36 }
 0x334   : > { %11627 = vmatprep.mubr.msk.f32.mxu0 %vm1194_vm5, %v14465_v37  ;;  %11993 = vmatprep.mubr.msk.f32.mxu1 %vm1194_vm5, %v14467_v38 }
 0x337   : > { %11628 = vmatmul.mubr.msk.f32.gmra.mrb[186].mxu0 %vm1194_vm5, %v14473_v39  ;;  %11994 = vmatmul.mubr.msk.f32.gmra.mrb[56].mxu1 %vm1194_vm5, %v14475_v40 }
 0x338   : > { %11630 = vmatprep.mubr.msk.f32.mxu0 %vm1194_vm5, %v14481_v41  ;;  %11996 = vmatprep.mubr.msk.f32.mxu1 %vm1194_vm5, %v14483_v14 }
 0x33b   : > { %11631 = vmatmul.mubr.msk.f32.gmra.mrb[188].mxu0 %vm1194_vm5, %v14489_v42  ;;  %11997 = vmatmul.mubr.msk.f32.gmra.mrb[58].mxu1 %vm1194_vm5, %v14491_v44 }
 0x33c   : > { %11633 = vmatprep.mubr.msk.f32.mxu0 %vm1194_vm5, %v14497_v46  ;;  %11999 = vmatprep.mubr.msk.f32.mxu1 %vm1194_vm5, %v14499_v47 }
 0x33f   : > { %11634 = vmatmul.mubr.msk.f32.gmra.mrb[190].mxu0 %vm1194_vm5, %v14513_v51  ;;  %12000 = vmatmul.mubr.msk.f32.gmra.mrb[60].mxu1 %vm1194_vm5, %v14515_v52 }
 0x340   : > { %11636 = vmatprep.mubr.msk.f32.mxu0 %vm1194_vm5, %v14521_v1  ;;  %12002 = vmatprep.mubr.msk.f32.mxu1 %vm1194_vm5, %v14523_v53 }
 0x343   : > { %11637 = vmatmul.mubr.msk.f32.gmra.mrb[192].mxu0 %vm1194_vm5, %v14530_v45  ;;  %12003 = vmatmul.mubr.msk.f32.gmra.mrb[62].mxu1 %vm1194_vm5, %v14532_v54 }
 0x344   : > { %11639 = vmatprep.mubr.msk.f32.mxu0 %vm1194_vm5, %v14538_v55  ;;  %12005 = vmatprep.mubr.msk.f32.mxu1 %vm1194_vm5, %v14540_v56 }
 0x347   : > { %11640 = vmatmul.mubr.msk.f32.gmra.mrb[194].mxu0 %vm1194_vm5, %v14546_v57  ;;  %12006 = vmatmul.mubr.msk.f32.gmra.mrb[64].mxu1 %vm1194_vm5, %v14548_v22 }
 0x348   : > { %11642 = vmatprep.mubr.msk.f32.mxu0 %vm1194_vm5, %v14554_v58  ;;  %12008 = vmatprep.mubr.msk.f32.mxu1 %vm1194_vm5, %v14556_v59 }
 0x34b   : > { %11643 = vmatmul.mubr.msk.f32.gmra.mrb[196].mxu0 %vm1194_vm5, %v14562_v60  ;;  %12009 = vmatmul.mubr.msk.f32.gmra.mrb[66].mxu1 %vm1194_vm5, %v14564_v61 }
 0x34c   : > { %11645 = vmatprep.mubr.msk.f32.mxu0 %vm1194_vm5, %v14570_v62  ;;  %12011 = vmatprep.mubr.msk.f32.mxu1 %vm1194_vm5, %v14572_v63 }
 0x34f   : > { %11646 = vmatmul.mubr.msk.f32.gmra.mrb[198].mxu0 %vm1194_vm5, %v14578_v2  ;;  %12012 = vmatmul.mubr.msk.f32.gmra.mrb[68].mxu1 %vm1194_vm5, %v14580_v3 }
 0x350   : > { %11648 = vmatprep.mubr.msk.f32.mxu0 %vm1194_vm5, %v14586_v4  ;;  %12014 = vmatprep.mubr.msk.f32.mxu1 %vm1194_vm5, %v14588_v5 }
 0x353   : > { %11649 = vmatmul.mubr.msk.f32.gmra.mrb[200].mxu0 %vm1194_vm5, %v14594_v6  ;;  %12015 = vmatmul.mubr.msk.f32.gmra.mrb[70].mxu1 %vm1194_vm5, %v14596_v7 }
 0x354   : > { %11651 = vmatprep.mubr.msk.f32.mxu0 %vm1194_vm5, %v14602_v9  ;;  %12017 = vmatprep.mubr.msk.f32.mxu1 %vm1194_vm5, %v14604_v12  ;;  %v14816_v12 = vld [vmem:[#allocation2 + $0x234] sm:$0xff] }
 0x355   : > { %15805 = vst [vmem:[#allocation56_spill] sm:$0xff] %v14816_v12 }
 0x357   : > { %11652 = vmatmul.mubr.msk.f32.gmra.mrb[202].mxu0 %vm1194_vm5, %v14610_v35  ;;  %12018 = vmatmul.mubr.msk.f32.gmra.mrb[72].mxu1 %vm1194_vm5, %v14612_v15  ;;  %v2897_v35 = vld [vmem:[#allocation2 + $0x24a] sm:$0xff] }
 0x358   : > { %11654 = vmatprep.mubr.msk.f32.mxu0 %vm1194_vm5, %v14618_v16  ;;  %12020 = vmatprep.mubr.msk.f32.mxu1 %vm1194_vm5, %v14620_v18  ;;  %v14636_v16 = vld [vmem:[#allocation2 + $0x114] sm:$0xff]  ;;  %v14641_v18 = vld [vmem:[#allocation2 + $0x11c] sm:$0xff] }
 0x359   : > { %15769 = vst [vmem:[#allocation20_spill] sm:$0xff] %v14636_v16  ;;  %15770 = vst [vmem:[#allocation21_spill] sm:$0xff] %v14641_v18 }
 0x35b   : > { %11655 = vmatmul.mubr.msk.f32.gmra.mrb[204].mxu0 %vm1194_vm5, %v2859_v43  ;;  %12021 = vmatmul.mubr.msk.f32.gmra.mrb[74].mxu1 %vm1194_vm5, %v14626_v20  ;;  %v2862_v43 = vld [vmem:[#allocation2 + $0x132] sm:$0xff]  ;;  %v14646_v20 = vld [vmem:[#allocation2 + $0x124] sm:$0xff] }
 0x35c   : > { %11657 = vmatprep.mubr.msk.f32.mxu0 %vm1194_vm5, %v2860_v0  ;;  %12023 = vmatprep.mubr.msk.f32.mxu1 %vm1194_vm5, %v14631_v48  ;;  %v2863_v0 = vld [vmem:[#allocation2 + $0x13a] sm:$0xff]  ;;  %15771 = vst [vmem:[#allocation22_spill] sm:$0xff] %v14646_v20  ;;  %v14651_v48 = vld [vmem:[#allocation2 + $0x12c] sm:$0xff] }
 0x35d   : > { %15772 = vst [vmem:[#allocation23_spill] sm:$0xff] %v14651_v48 }
 0x35f   : > { %11658 = vmatmul.mubr.msk.f32.gmra.mrb[206].mxu0 %vm1194_vm5, %v2861_v49  ;;  %12024 = vmatmul.mubr.msk.f32.gmra.mrb[76].mxu1 %vm1194_vm5, %v14636_v16  ;;  %v2864_v49 = vld [vmem:[#allocation2 + $0x142] sm:$0xff]  ;;  %v14656_v16 = vld [vmem:[#allocation2 + $0x134] sm:$0xff] }
 0x360   : > { %11660 = vmatprep.mubr.msk.f32.mxu0 %vm1194_vm5, %v2862_v43  ;;  %12026 = vmatprep.mubr.msk.f32.mxu1 %vm1194_vm5, %v14641_v18  ;;  %v2865_v43 = vld [vmem:[#allocation2 + $0x14a] sm:$0xff]  ;;  %15773 = vst [vmem:[#allocation24_spill] sm:$0xff] %v14656_v16  ;;  %v14661_v18 = vld [vmem:[#allocation2 + $0x13c] sm:$0xff] }
 0x361   : > { %15774 = vst [vmem:[#allocation25_spill] sm:$0xff] %v14661_v18 }
 0x363   : > { %11661 = vmatmul.mubr.msk.f32.gmra.mrb[208].mxu0 %vm1194_vm5, %v2863_v0  ;;  %12027 = vmatmul.mubr.msk.f32.gmra.mrb[0].mxu1 %vm1194_vm5, %v14646_v20  ;;  %v2866_v0 = vld [vmem:[#allocation2 + $0x152] sm:$0xff]  ;;  %v14666_v20 = vld [vmem:[#allocation2 + $0x144] sm:$0xff] }
 0x364   : > { %11663 = vmatprep.mubr.msk.f32.mxu0 %vm1194_vm5, %v2864_v49  ;;  %12029 = vmatprep.mubr.msk.f32.mxu1 %vm1194_vm5, %v14651_v48  ;;  %v2867_v49 = vld [vmem:[#allocation2 + $0x15a] sm:$0xff]  ;;  %15775 = vst [vmem:[#allocation26_spill] sm:$0xff] %v14666_v20  ;;  %v14671_v48 = vld [vmem:[#allocation2 + $0x14c] sm:$0xff] }
 0x365   : > { %15776 = vst [vmem:[#allocation27_spill] sm:$0xff] %v14671_v48 }
 0x367   : > { %11664 = vmatmul.mubr.msk.f32.gmra.mrb[210].mxu0 %vm1194_vm5, %v2865_v43  ;;  %12030 = vmatmul.mubr.msk.f32.gmra.mrb[2].mxu1 %vm1194_vm5, %v14656_v16  ;;  %v2868_v43 = vld [vmem:[#allocation2 + $0x162] sm:$0xff]  ;;  %v14676_v16 = vld [vmem:[#allocation2 + $0x154] sm:$0xff] }
 0x368   : > { %11666 = vmatprep.mubr.msk.f32.mxu0 %vm1194_vm5, %v2866_v0  ;;  %12032 = vmatprep.mubr.msk.f32.mxu1 %vm1194_vm5, %v14661_v18  ;;  %v2869_v0 = vld [vmem:[#allocation2 + $0x16a] sm:$0xff]  ;;  %15777 = vst [vmem:[#allocation28_spill] sm:$0xff] %v14676_v16  ;;  %v14681_v18 = vld [vmem:[#allocation2 + $0x15c] sm:$0xff] }
 0x369   : > { %15778 = vst [vmem:[#allocation29_spill] sm:$0xff] %v14681_v18 }
 0x36b   : > { %11667 = vmatmul.mubr.msk.f32.gmra.mrb[212].mxu0 %vm1194_vm5, %v2867_v49  ;;  %12033 = vmatmul.mubr.msk.f32.gmra.mrb[4].mxu1 %vm1194_vm5, %v14666_v20  ;;  %v2870_v49 = vld [vmem:[#allocation2 + $0x172] sm:$0xff]  ;;  %v14686_v20 = vld [vmem:[#allocation2 + $0x164] sm:$0xff] }
 0x36c   : > { %11669 = vmatprep.mubr.msk.f32.mxu0 %vm1194_vm5, %v2868_v43  ;;  %12035 = vmatprep.mubr.msk.f32.mxu1 %vm1194_vm5, %v14671_v48  ;;  %v2871_v43 = vld [vmem:[#allocation2 + $0x17a] sm:$0xff]  ;;  %15779 = vst [vmem:[#allocation30_spill] sm:$0xff] %v14686_v20  ;;  %v14691_v48 = vld [vmem:[#allocation2 + $0x16c] sm:$0xff] }
 0x36d   : > { %15780 = vst [vmem:[#allocation31_spill] sm:$0xff] %v14691_v48 }
 0x36f   : > { %11670 = vmatmul.mubr.msk.f32.gmra.mrb[214].mxu0 %vm1194_vm5, %v2869_v0  ;;  %12036 = vmatmul.mubr.msk.f32.gmra.mrb[6].mxu1 %vm1194_vm5, %v14676_v16  ;;  %v2872_v0 = vld [vmem:[#allocation2 + $0x182] sm:$0xff]  ;;  %v14696_v16 = vld [vmem:[#allocation2 + $0x174] sm:$0xff] }
 0x370   : > { %11672 = vmatprep.mubr.msk.f32.mxu0 %vm1194_vm5, %v2870_v49  ;;  %12038 = vmatprep.mubr.msk.f32.mxu1 %vm1194_vm5, %v14681_v18  ;;  %v2873_v49 = vld [vmem:[#allocation2 + $0x18a] sm:$0xff]  ;;  %15781 = vst [vmem:[#allocation32_spill] sm:$0xff] %v14696_v16  ;;  %v14701_v18 = vld [vmem:[#allocation2 + $0x17c] sm:$0xff] }
 0x371   : > { %15782 = vst [vmem:[#allocation33_spill] sm:$0xff] %v14701_v18 }
 0x373   : > { %11673 = vmatmul.mubr.msk.f32.gmra.mrb[216].mxu0 %vm1194_vm5, %v2871_v43  ;;  %12039 = vmatmul.mubr.msk.f32.gmra.mrb[8].mxu1 %vm1194_vm5, %v14686_v20  ;;  %v2874_v43 = vld [vmem:[#allocation2 + $0x192] sm:$0xff]  ;;  %v14706_v20 = vld [vmem:[#allocation2 + $0x184] sm:$0xff] }
 0x374   : > { %11675 = vmatprep.mubr.msk.f32.mxu0 %vm1194_vm5, %v2872_v0  ;;  %12041 = vmatprep.mubr.msk.f32.mxu1 %vm1194_vm5, %v14691_v48  ;;  %v2875_v0 = vld [vmem:[#allocation2 + $0x19a] sm:$0xff]  ;;  %15783 = vst [vmem:[#allocation34_spill] sm:$0xff] %v14706_v20  ;;  %v14711_v48 = vld [vmem:[#allocation2 + $0x18c] sm:$0xff] }
 0x375   : > { %15784 = vst [vmem:[#allocation35_spill] sm:$0xff] %v14711_v48 }
 0x377   : > { %11676 = vmatmul.mubr.msk.f32.gmra.mrb[218].mxu0 %vm1194_vm5, %v2873_v49  ;;  %12042 = vmatmul.mubr.msk.f32.gmra.mrb[10].mxu1 %vm1194_vm5, %v14696_v16  ;;  %v2876_v49 = vld [vmem:[#allocation2 + $0x1a2] sm:$0xff]  ;;  %v14716_v16 = vld [vmem:[#allocation2 + $0x194] sm:$0xff] }
 0x378   : > { %11678 = vmatprep.mubr.msk.f32.mxu0 %vm1194_vm5, %v2874_v43  ;;  %12044 = vmatprep.mubr.msk.f32.mxu1 %vm1194_vm5, %v14701_v18  ;;  %v2877_v43 = vld [vmem:[#allocation2 + $0x1aa] sm:$0xff]  ;;  %15785 = vst [vmem:[#allocation36_spill] sm:$0xff] %v14716_v16  ;;  %v14721_v18 = vld [vmem:[#allocation2 + $0x19c] sm:$0xff] }
 0x379   : > { %15786 = vst [vmem:[#allocation37_spill] sm:$0xff] %v14721_v18 }
 0x37b   : > { %11679 = vmatmul.mubr.msk.f32.gmra.mrb[220].mxu0 %vm1194_vm5, %v2875_v0  ;;  %12045 = vmatmul.mubr.msk.f32.gmra.mrb[12].mxu1 %vm1194_vm5, %v14706_v20  ;;  %v2878_v0 = vld [vmem:[#allocation2 + $0x1b2] sm:$0xff]  ;;  %v14726_v20 = vld [vmem:[#allocation2 + $0x1a4] sm:$0xff] }
 0x37c   : > { %11681 = vmatprep.mubr.msk.f32.mxu0 %vm1194_vm5, %v2876_v49  ;;  %12047 = vmatprep.mubr.msk.f32.mxu1 %vm1194_vm5, %v14711_v48  ;;  %v2879_v49 = vld [vmem:[#allocation2 + $0x1ba] sm:$0xff]  ;;  %15787 = vst [vmem:[#allocation38_spill] sm:$0xff] %v14726_v20  ;;  %v14731_v48 = vld [vmem:[#allocation2 + $0x1ac] sm:$0xff] }
 0x37d   : > { %15788 = vst [vmem:[#allocation39_spill] sm:$0xff] %v14731_v48 }
 0x37f   : > { %11682 = vmatmul.mubr.msk.f32.gmra.mrb[222].mxu0 %vm1194_vm5, %v2877_v43  ;;  %12048 = vmatmul.mubr.msk.f32.gmra.mrb[14].mxu1 %vm1194_vm5, %v14716_v16  ;;  %v2880_v43 = vld [vmem:[#allocation2 + $0x1c2] sm:$0xff]  ;;  %v14736_v16 = vld [vmem:[#allocation2 + $0x1b4] sm:$0xff] }
 0x380   : > { %11684 = vmatprep.mubr.msk.f32.mxu0 %vm1194_vm5, %v2878_v0  ;;  %12050 = vmatprep.mubr.msk.f32.mxu1 %vm1194_vm5, %v14721_v18  ;;  %v2881_v0 = vld [vmem:[#allocation2 + $0x1ca] sm:$0xff]  ;;  %15789 = vst [vmem:[#allocation40_spill] sm:$0xff] %v14736_v16  ;;  %v14741_v18 = vld [vmem:[#allocation2 + $0x1bc] sm:$0xff] }
 0x381   : > { %15790 = vst [vmem:[#allocation41_spill] sm:$0xff] %v14741_v18 }
 0x383   : > { %11685 = vmatmul.mubr.msk.f32.gmra.mrb[224].mxu0 %vm1194_vm5, %v2879_v49  ;;  %12051 = vmatmul.mubr.msk.f32.gmra.mrb[16].mxu1 %vm1194_vm5, %v14726_v20  ;;  %v2882_v49 = vld [vmem:[#allocation2 + $0x1d2] sm:$0xff]  ;;  %v14746_v20 = vld [vmem:[#allocation2 + $0x1c4] sm:$0xff] }
 0x384   : > { %11687 = vmatprep.mubr.msk.f32.mxu0 %vm1194_vm5, %v2880_v43  ;;  %12053 = vmatprep.mubr.msk.f32.mxu1 %vm1194_vm5, %v14731_v48  ;;  %v2883_v43 = vld [vmem:[#allocation2 + $0x1da] sm:$0xff]  ;;  %15791 = vst [vmem:[#allocation42_spill] sm:$0xff] %v14746_v20  ;;  %v14751_v48 = vld [vmem:[#allocation2 + $0x1cc] sm:$0xff] }
 0x385   : > { %15792 = vst [vmem:[#allocation43_spill] sm:$0xff] %v14751_v48 }
 0x387   : > { %11688 = vmatmul.mubr.msk.f32.gmra.mrb[226].mxu0 %vm1194_vm5, %v2881_v0  ;;  %12054 = vmatmul.mubr.msk.f32.gmra.mrb[18].mxu1 %vm1194_vm5, %v14736_v16  ;;  %v2884_v0 = vld [vmem:[#allocation2 + $0x1e2] sm:$0xff]  ;;  %v14756_v16 = vld [vmem:[#allocation2 + $0x1d4] sm:$0xff] }
 0x388   : > { %11690 = vmatprep.mubr.msk.f32.mxu0 %vm1194_vm5, %v2882_v49  ;;  %12056 = vmatprep.mubr.msk.f32.mxu1 %vm1194_vm5, %v14741_v18  ;;  %v2885_v49 = vld [vmem:[#allocation2 + $0x1ea] sm:$0xff]  ;;  %15793 = vst [vmem:[#allocation44_spill] sm:$0xff] %v14756_v16  ;;  %v14761_v18 = vld [vmem:[#allocation2 + $0x1dc] sm:$0xff] }
 0x389   : > { %15794 = vst [vmem:[#allocation45_spill] sm:$0xff] %v14761_v18 }
 0x38b   : > { %11691 = vmatmul.mubr.msk.f32.gmra.mrb[228].mxu0 %vm1194_vm5, %v2883_v43  ;;  %12057 = vmatmul.mubr.msk.f32.gmra.mrb[20].mxu1 %vm1194_vm5, %v14746_v20  ;;  %v2886_v43 = vld [vmem:[#allocation2 + $0x1f2] sm:$0xff]  ;;  %v14766_v20 = vld [vmem:[#allocation2 + $0x1e4] sm:$0xff] }
 0x38c   : > { %11693 = vmatprep.mubr.msk.f32.mxu0 %vm1194_vm5, %v2884_v0  ;;  %12059 = vmatprep.mubr.msk.f32.mxu1 %vm1194_vm5, %v14751_v48  ;;  %v2887_v0 = vld [vmem:[#allocation2 + $0x1fa] sm:$0xff]  ;;  %15795 = vst [vmem:[#allocation46_spill] sm:$0xff] %v14766_v20  ;;  %v14771_v48 = vld [vmem:[#allocation2 + $0x1ec] sm:$0xff] }
 0x38d   : > { %15796 = vst [vmem:[#allocation47_spill] sm:$0xff] %v14771_v48 }
 0x38f   : > { %11694 = vmatmul.mubr.msk.f32.gmra.mrb[230].mxu0 %vm1194_vm5, %v2885_v49  ;;  %12060 = vmatmul.mubr.msk.f32.gmra.mrb[22].mxu1 %vm1194_vm5, %v14756_v16  ;;  %v2888_v49 = vld [vmem:[#allocation2 + $0x202] sm:$0xff]  ;;  %v14776_v16 = vld [vmem:[#allocation2 + $0x1f4] sm:$0xff] }
 0x390   : > { %11696 = vmatprep.mubr.msk.f32.mxu0 %vm1194_vm5, %v2886_v43  ;;  %12062 = vmatprep.mubr.msk.f32.mxu1 %vm1194_vm5, %v14761_v18  ;;  %v2889_v43 = vld [vmem:[#allocation2 + $0x20a] sm:$0xff]  ;;  %15797 = vst [vmem:[#allocation48_spill] sm:$0xff] %v14776_v16  ;;  %v14781_v18 = vld [vmem:[#allocation2 + $0x1fc] sm:$0xff] }
 0x391   : > { %15798 = vst [vmem:[#allocation49_spill] sm:$0xff] %v14781_v18 }
 0x393   : > { %11697 = vmatmul.mubr.msk.f32.gmra.mrb[232].mxu0 %vm1194_vm5, %v2887_v0  ;;  %12063 = vmatmul.mubr.msk.f32.gmra.mrb[24].mxu1 %vm1194_vm5, %v14766_v20  ;;  %v2890_v0 = vld [vmem:[#allocation2 + $0x212] sm:$0xff]  ;;  %v14786_v20 = vld [vmem:[#allocation2 + $0x204] sm:$0xff] }
 0x394   : > { %11699 = vmatprep.mubr.msk.f32.mxu0 %vm1194_vm5, %v2888_v49  ;;  %12065 = vmatprep.mubr.msk.f32.mxu1 %vm1194_vm5, %v14771_v48  ;;  %v2891_v49 = vld [vmem:[#allocation2 + $0x21a] sm:$0xff]  ;;  %15799 = vst [vmem:[#allocation50_spill] sm:$0xff] %v14786_v20  ;;  %v14791_v48 = vld [vmem:[#allocation2 + $0x20c] sm:$0xff] }
 0x395   : > { %15800 = vst [vmem:[#allocation51_spill] sm:$0xff] %v14791_v48 }
 0x397   : > { %11700 = vmatmul.mubr.msk.f32.gmra.mrb[234].mxu0 %vm1194_vm5, %v2889_v43  ;;  %12066 = vmatmul.mubr.msk.f32.gmra.mrb[26].mxu1 %vm1194_vm5, %v14776_v16  ;;  %v2892_v43 = vld [vmem:[#allocation2 + $0x222] sm:$0xff]  ;;  %v14796_v16 = vld [vmem:[#allocation2 + $0x214] sm:$0xff] }
 0x398   : > { %11702 = vmatprep.mubr.msk.f32.mxu0 %vm1194_vm5, %v2890_v0  ;;  %12068 = vmatprep.mubr.msk.f32.mxu1 %vm1194_vm5, %v14781_v18  ;;  %v2893_v0 = vld [vmem:[#allocation2 + $0x22a] sm:$0xff]  ;;  %15801 = vst [vmem:[#allocation52_spill] sm:$0xff] %v14796_v16  ;;  %v14801_v18 = vld [vmem:[#allocation2 + $0x21c] sm:$0xff] }
 0x399   : > { %15802 = vst [vmem:[#allocation53_spill] sm:$0xff] %v14801_v18 }
 0x39b   : > { %11703 = vmatmul.mubr.msk.f32.gmra.mrb[236].mxu0 %vm1194_vm5, %v2891_v49  ;;  %12069 = vmatmul.mubr.msk.f32.gmra.mrb[28].mxu1 %vm1194_vm5, %v14786_v20  ;;  %v2894_v49 = vld [vmem:[#allocation2 + $0x232] sm:$0xff]  ;;  %v14806_v20 = vld [vmem:[#allocation2 + $0x224] sm:$0xff] }
 0x39c   : > { %11705 = vmatprep.mubr.msk.f32.mxu0 %vm1194_vm5, %v2892_v43  ;;  %12071 = vmatprep.mubr.msk.f32.mxu1 %vm1194_vm5, %v14791_v48  ;;  %v2895_v43 = vld [vmem:[#allocation2 + $0x23a] sm:$0xff]  ;;  %15803 = vst [vmem:[#allocation54_spill] sm:$0xff] %v14806_v20  ;;  %v14811_v48 = vld [vmem:[#allocation2 + $0x22c] sm:$0xff] }
 0x39d   : > { %15804 = vst [vmem:[#allocation55_spill] sm:$0xff] %v14811_v48 }
 0x39f   : > { %11706 = vmatmul.mubr.msk.f32.gmra.mrb[238].mxu0 %vm1194_vm5, %v2893_v0  ;;  %12072 = vmatmul.mubr.msk.f32.gmra.mrb[30].mxu1 %vm1194_vm5, %v14796_v16  ;;  %v2896_v0 = vld [vmem:[#allocation2 + $0x242] sm:$0xff] }
 0x3a0   : > { %11708 = vmatprep.mubr.msk.f32.mxu0 %vm1194_vm5, %v2894_v49  ;;  %12074 = vmatprep.mubr.msk.f32.mxu1 %vm1194_vm5, %v14801_v18  ;;  %v1100_v49 = vpop.f32.mrb[166].mxu0  ;;  %v13222_v16 = vld [vmem:[#allocation6] ss:$0 sm:$0xff] }
 0x3a1   : > { %v1101_v15 = vadd.f32 %v13222_v16, %v1100_v49  ;;  %v11341_v18 = vpop.f32.mrb[167].mxu0 }
 0x3a3   : > { %11709 = vmatmul.mubr.msk.f32.gmra.mrb[240].mxu0 %vm1194_vm5, %v2895_v43  ;;  %12075 = vmatmul.mubr.msk.f32.gmra.mrb[32].mxu1 %vm1194_vm5, %v14806_v20  ;;  %v2898_v43 = vld [vmem:[#allocation2 + $0x252] sm:$0xff]  ;;  %v14821_v20 = vld [vmem:[#allocation2 + $0x23c] sm:$0xff]  ;;  %v1192_v9 = vmax.f32 %v1101_v15, 0.0 }
 0x3a4   : > { %11711 = vmatprep.mubr.msk.f32.mxu0 %vm1194_vm5, %v2896_v0  ;;  %12077 = vmatprep.mubr.msk.f32.mxu1 %vm1194_vm5, %v14811_v48  ;;  %v1105_v0 = vpop.f32.mrb[168].mxu0  ;;  %v2899_v48 = vld [vmem:[#allocation2 + $0x25a] sm:$0xff]  ;;  %v2900_v15 = vld [vmem:[#allocation2 + $0x262] sm:$0xff] }
 0x3a5   : > { %v1106_v49 = vadd.f32 %v13222_v16, %v1105_v0  ;;  %v11344_v18 = vpop.f32.mrb[169].mxu0  ;;  %1278 = vst.msk [vmem:[#allocation2 + $0x298] sm:$0xff] %vm1194_vm5, %v1192_v9  ;;  %v2901_v9 = vld [vmem:[#allocation2 + $0x26a] sm:$0x3f]  ;;  %v14837_v16 = vld [vmem:[#allocation2 + $0x254] sm:$0xff] }
 0x3a6   : > { %v10074_v0 = vld [vmem:[%s15701_s3 + $0xf0] sm:$0xff] }
 0x3a7   : > { %11712 = vmatmul.mubr.msk.f32.gmra.mrb[242].mxu0 %vm1194_vm5, %v2897_v35  ;;  %12078 = vmatmul.mubr.msk.f32.gmra.mrb[34].mxu1 %vm1194_vm5, %v14816_v12  ;;  %v14827_v35 = vld [vmem:[#allocation2 + $0x244] sm:$0xff]  ;;  %v1193_v7 = vmax.f32 %v1106_v49, 0.0  ;;  %v14832_v12 = vld [vmem:[#allocation2 + $0x24c] sm:$0xff] }
 0x3a8   : > { %11714 = vmatprep.mubr.msk.f32.mxu0 %vm1194_vm5, %v2898_v43  ;;  %12080 = vmatprep.mubr.msk.f32.mxu1 %vm1194_vm5, %v14821_v20  ;;  %v14848_v43 = vld [vmem:[#allocation2 + $0x264] sm:$0xff] }
 0x3a9   : > { %1280 = vst.msk [vmem:[#allocation2 + $0x2a0] sm:$0xf] %vm1279_vm6, %v1193_v7  ;;  %v14854_v7 = vld [vmem:[#allocation2 + $0x26c] sm:$0xff] }
 0x3ab   : > { %11715 = vmatmul.mubr.msk.f32.gmra.mrb[244].mxu0 %vm1194_vm5, %v2899_v48  ;;  %12081 = vmatmul.mubr.msk.f32.gmra.mrb[36].mxu1 %vm1194_vm5, %v14827_v35  ;;  %v14842_v48 = vld [vmem:[#allocation2 + $0x25c] sm:$0xff] }
 0x3ac   : > { %11717 = vmatprep.mubr.msk.f32.mxu0 %vm1194_vm5, %v2900_v15  ;;  %12083 = vmatprep.mubr.msk.f32.mxu1 %vm1194_vm5, %v14832_v12  ;;  %v15846_v15 = vld [vmem:[#allocation51_spill] sm:$0xff] }
 0x3af   : > { %11718 = vmatmul.mubr.msk.f32.gmra.mrb[246].mxu0 %vm1194_vm5, %v2901_v9  ;;  %12084 = vmatmul.mubr.msk.f32.gmra.mrb[38].mxu1 %vm1194_vm5, %v14837_v16  ;;  %v15847_v9 = vld [vmem:[#allocation52_spill] sm:$0xff] }
 0x3b0   : > { %11728 = vmatprep.mubr.msk.f32.mxu0 %vm1194_vm5, %v14370_v8  ;;  %12086 = vmatprep.mubr.msk.f32.mxu1 %vm1194_vm5, %v14842_v48  ;;  %v14860_v8 = vld [vmem:[#allocation2 + $0x274] sm:$0xff] }
 0x3b3   : > { %11729 = vmatmul.mubr.msk.f32.vlgmr.msra.gmra.mrb[170].mxu0 %vm1194_vm5, %v14376_v11  ;;  %12087 = vmatmul.mubr.msk.f32.gmra.mrb[40].mxu1 %vm1194_vm5, %v14848_v43  ;;  %v14866_v11 = vld [vmem:[#allocation2 + $0x27c] sm:$0xff] }
 0x3b4   : > { %11731 = vmatprep.mubr.msk.f32.mxu0 %vm1194_vm5, %v14381_v13  ;;  %12089 = vmatprep.mubr.msk.f32.mxu1 %vm1194_vm5, %v14854_v7  ;;  %v5451_v13 = vld [vmem:[#allocation2 + $0x284] sm:$0x3f] }
 0x3b7   : > { %11732 = vmatmul.mubr.msk.f32.gmra.mrb[172].mxu0 %vm1194_vm5, %v14393_v17  ;;  %12090 = vmatmul.mubr.msk.f32.gmra.mrb[42].mxu1 %vm1194_vm5, %v14860_v8  ;;  %v10075_v17 = vld [vmem:[%s15701_s3 + $0xf8] sm:$0xff] }
 0x3b8   : > { %11734 = vmatprep.mubr.msk.f32.mxu0 %vm1194_vm5, %v14398_v19  ;;  %12092 = vmatprep.mubr.msk.f32.mxu1 %vm1194_vm5, %v14866_v11  ;;  %v12534_v19 = vpack.c.bf16 %v10075_v17, %v10074_v0  ;;  %v15848_v17 = vld [vmem:[#allocation53_spill] sm:$0xff] }
 0x3bb   : > { %11735 = vmatmul.mubr.msk.f32.gmra.mrb[174].mxu0 %vm1194_vm5, %v14403_v21  ;;  %12093 = vmatmul.mubr.msk.f32.gmra.mrb[44].mxu1 %vm1194_vm5, %v5451_v13  ;;  %v10154_v21 = vld [vmem:[%s15701_s3 + $0x100] sm:$0xff] }
 0x3bc   : > { %11737 = vmatprep.mubr.msk.f32.mxu0 %vm1194_vm5, %v14409_v23  ;;  %12103 = vmatprep.mubr.msk.f32.mxu1 %vm1194_vm5, %v14411_v24  ;;  %v10155_v23 = vld [vmem:[%s15701_s3 + $0x108] sm:$0xff] }
 0x3bd   : > { %v14952_v24 = vpack.c.bf16 %v10155_v23, %v10154_v21 }
 0x3bf   : > { %11738 = vmatmul.mubr.msk.f32.gmra.mrb[176].mxu0 %vm1194_vm5, %v14417_v25  ;;  %12104 = vmatmul.mubr.msk.f32.vlgmr.msra.gmra.mrb[46].mxu1 %vm1194_vm5, %v14419_v10  ;;  %v15806_v25 = vld [vmem:[#allocation11_spill] sm:$0xff]  ;;  %v15807_v10 = vld [vmem:[#allocation12_spill] sm:$0xff] }
 0x3c0   : > { %12533 = vmatpush3.bf16.msra.mxu1 %v14511_v50  ;;  %11740 = vmatprep.mubr.msk.f32.mxu0 %vm1194_vm5, %v14425_v26  ;;  %v15808_v26 = vld [vmem:[#allocation13_spill] sm:$0xff] }
 0x3c1   : > { %12106 = vmatprep.mubr.msk.f32.mxu1 %vm1194_vm5, %v14427_v27  ;;  %12535 = vmatprep.subr.bf16.mxu1 %v12534_v19  ;;  %v15809_v27 = vld [vmem:[#allocation14_spill] sm:$0xff]  ;;  %v15828_v50 = vld [vmem:[#allocation33_spill] sm:$0xff] }
 0x3c3   : > { %11741 = vmatmul.mubr.msk.f32.gmra.mrb[178].mxu0 %vm1194_vm5, %v14433_v28  ;;  %12107 = vmatmul.mubr.msk.f32.gmra.mrb[48].mxu1 %vm1194_vm5, %v14435_v29  ;;  %v15810_v28 = vld [vmem:[#allocation15_spill] sm:$0xff]  ;;  %v15811_v29 = vld [vmem:[#allocation16_spill] sm:$0xff] }
 0x3c4   : > { %11743 = vmatprep.mubr.msk.f32.mxu0 %vm1194_vm5, %v14441_v30  ;;  %12109 = vmatprep.mubr.msk.f32.mxu1 %vm1194_vm5, %v14443_v31  ;;  %v15812_v30 = vld [vmem:[#allocation17_spill] sm:$0xff]  ;;  %v15813_v31 = vld [vmem:[#allocation18_spill] sm:$0xff] }
 0x3c5   : > { %12537 = vmatpush3.bf16.msra.mxu1 %v12534_v19  ;;  %v15849_v19 = vld [vmem:[#allocation54_spill] sm:$0xff] }
 0x3c6   : > { %12539 = vmatprep.subr.bf16.mxu1 %v14952_v24 }
 0x3c7   : > { %11744 = vmatmul.mubr.msk.f32.gmra.mrb[180].mxu0 %vm1194_vm5, %v14449_v32  ;;  %12110 = vmatmul.mubr.msk.f32.gmra.mrb[50].mxu1 %vm1194_vm5, %v14451_v33  ;;  %v15814_v32 = vld [vmem:[#allocation19_spill] sm:$0xff]  ;;  %v15815_v33 = vld [vmem:[#allocation20_spill] sm:$0xff] }
 0x3c8   : > { %11746 = vmatprep.mubr.msk.f32.mxu0 %vm1194_vm5, %v14457_v34  ;;  %12112 = vmatprep.mubr.msk.f32.mxu1 %vm1194_vm5, %v14459_v36  ;;  %v15816_v34 = vld [vmem:[#allocation21_spill] sm:$0xff]  ;;  %v15817_v36 = vld [vmem:[#allocation22_spill] sm:$0xff] }
 0x3cb   : > { %11747 = vmatmul.mubr.msk.f32.gmra.mrb[182].mxu0 %vm1194_vm5, %v14465_v37  ;;  %12113 = vmatmul.mubr.msk.f32.gmra.mrb[52].mxu1 %vm1194_vm5, %v14467_v38  ;;  %v15818_v37 = vld [vmem:[#allocation23_spill] sm:$0xff]  ;;  %v15819_v38 = vld [vmem:[#allocation24_spill] sm:$0xff] }
 0x3cc   : > { %11749 = vmatprep.mubr.msk.f32.mxu0 %vm1194_vm5, %v14473_v39  ;;  %12115 = vmatprep.mubr.msk.f32.mxu1 %vm1194_vm5, %v14475_v40  ;;  %v15820_v39 = vld [vmem:[#allocation25_spill] sm:$0xff]  ;;  %v15821_v40 = vld [vmem:[#allocation26_spill] sm:$0xff] }
 0x3cf   : > { %11750 = vmatmul.mubr.msk.f32.gmra.mrb[184].mxu0 %vm1194_vm5, %v14481_v41  ;;  %12116 = vmatmul.mubr.msk.f32.gmra.mrb[54].mxu1 %vm1194_vm5, %v14483_v14  ;;  %v15822_v41 = vld [vmem:[#allocation27_spill] sm:$0xff]  ;;  %v15823_v14 = vld [vmem:[#allocation28_spill] sm:$0xff] }
 0x3d0   : > { %11752 = vmatprep.mubr.msk.f32.mxu0 %vm1194_vm5, %v14489_v42  ;;  %12118 = vmatprep.mubr.msk.f32.mxu1 %vm1194_vm5, %v14491_v44  ;;  %v15824_v42 = vld [vmem:[#allocation29_spill] sm:$0xff]  ;;  %v15825_v44 = vld [vmem:[#allocation30_spill] sm:$0xff] }
 0x3d3   : > { %11753 = vmatmul.mubr.msk.f32.gmra.mrb[186].mxu0 %vm1194_vm5, %v14497_v46  ;;  %12119 = vmatmul.mubr.msk.f32.gmra.mrb[56].mxu1 %vm1194_vm5, %v14499_v47  ;;  %v15826_v46 = vld [vmem:[#allocation31_spill] sm:$0xff]  ;;  %v15827_v47 = vld [vmem:[#allocation32_spill] sm:$0xff] }
 0x3d4   : > { %11755 = vmatprep.mubr.msk.f32.mxu0 %vm1194_vm5, %v14513_v51  ;;  %12121 = vmatprep.mubr.msk.f32.mxu1 %vm1194_vm5, %v14515_v52  ;;  %v15829_v51 = vld [vmem:[#allocation34_spill] sm:$0xff]  ;;  %v15830_v52 = vld [vmem:[#allocation35_spill] sm:$0xff] }
 0x3d7   : > { %11756 = vmatmul.mubr.msk.f32.gmra.mrb[188].mxu0 %vm1194_vm5, %v14521_v1  ;;  %12122 = vmatmul.mubr.msk.f32.gmra.mrb[58].mxu1 %vm1194_vm5, %v14523_v53  ;;  %v15831_v1 = vld [vmem:[#allocation36_spill] sm:$0xff]  ;;  %v15832_v53 = vld [vmem:[#allocation37_spill] sm:$0xff] }
 0x3d8   : > { %11758 = vmatprep.mubr.msk.f32.mxu0 %vm1194_vm5, %v14530_v45  ;;  %12124 = vmatprep.mubr.msk.f32.mxu1 %vm1194_vm5, %v14532_v54  ;;  %v15833_v45 = vld [vmem:[#allocation38_spill] sm:$0xff]  ;;  %v15834_v54 = vld [vmem:[#allocation39_spill] sm:$0xff] }
 0x3db   : > { %11759 = vmatmul.mubr.msk.f32.gmra.mrb[190].mxu0 %vm1194_vm5, %v14538_v55  ;;  %12125 = vmatmul.mubr.msk.f32.gmra.mrb[60].mxu1 %vm1194_vm5, %v14540_v56  ;;  %v15835_v55 = vld [vmem:[#allocation40_spill] sm:$0xff]  ;;  %v15836_v56 = vld [vmem:[#allocation41_spill] sm:$0xff] }
 0x3dc   : > { %11761 = vmatprep.mubr.msk.f32.mxu0 %vm1194_vm5, %v14546_v57  ;;  %12127 = vmatprep.mubr.msk.f32.mxu1 %vm1194_vm5, %v14548_v22  ;;  %v15837_v57 = vld [vmem:[#allocation42_spill] sm:$0xff]  ;;  %v15838_v22 = vld [vmem:[#allocation43_spill] sm:$0xff] }
 0x3df   : > { %11762 = vmatmul.mubr.msk.f32.gmra.mrb[192].mxu0 %vm1194_vm5, %v14554_v58  ;;  %12128 = vmatmul.mubr.msk.f32.gmra.mrb[62].mxu1 %vm1194_vm5, %v14556_v59  ;;  %v15839_v58 = vld [vmem:[#allocation44_spill] sm:$0xff]  ;;  %v15840_v59 = vld [vmem:[#allocation45_spill] sm:$0xff] }
 0x3e0   : > { %11764 = vmatprep.mubr.msk.f32.mxu0 %vm1194_vm5, %v14562_v60  ;;  %12130 = vmatprep.mubr.msk.f32.mxu1 %vm1194_vm5, %v14564_v61  ;;  %v15841_v60 = vld [vmem:[#allocation46_spill] sm:$0xff] }
 0x3e3   : > { %11765 = vmatmul.mubr.msk.f32.gmra.mrb[194].mxu0 %vm1194_vm5, %v14570_v62  ;;  %12131 = vmatmul.mubr.msk.f32.gmra.mrb[64].mxu1 %vm1194_vm5, %v14572_v63  ;;  %v15842_v63 = vld [vmem:[#allocation47_spill] sm:$0xff] }
 0x3e4   : > { %11767 = vmatprep.mubr.msk.f32.mxu0 %vm1194_vm5, %v14578_v2  ;;  %12133 = vmatprep.mubr.msk.f32.mxu1 %vm1194_vm5, %v14580_v3  ;;  %v15843_v2 = vld [vmem:[#allocation48_spill] sm:$0xff] }
 0x3e7   : > { %11768 = vmatmul.mubr.msk.f32.gmra.mrb[196].mxu0 %vm1194_vm5, %v14586_v4  ;;  %12134 = vmatmul.mubr.msk.f32.gmra.mrb[66].mxu1 %vm1194_vm5, %v14588_v5  ;;  %v15844_v5 = vld [vmem:[#allocation49_spill] sm:$0xff] }
 0x3e8   : > { %11770 = vmatprep.mubr.msk.f32.mxu0 %vm1194_vm5, %v14594_v6  ;;  %12136 = vmatprep.mubr.msk.f32.mxu1 %vm1194_vm5, %v15806_v25  ;;  %v15845_v6 = vld [vmem:[#allocation50_spill] sm:$0xff]  ;;  %v15850_v25 = vld [vmem:[#allocation55_spill] sm:$0xff] }
 0x3eb   : > { %11771 = vmatmul.mubr.msk.f32.gmra.mrb[198].mxu0 %vm1194_vm5, %v15807_v10  ;;  %12137 = vmatmul.mubr.msk.f32.gmra.mrb[68].mxu1 %vm1194_vm5, %v15808_v26  ;;  %v15851_v10 = vld [vmem:[#allocation56_spill] sm:$0xff] }
 0x3ec   : > { %11773 = vmatprep.mubr.msk.f32.mxu0 %vm1194_vm5, %v15809_v27  ;;  %12139 = vmatprep.mubr.msk.f32.mxu1 %vm1194_vm5, %v15810_v28 }
 0x3ef   : > { %11774 = vmatmul.mubr.msk.f32.gmra.mrb[200].mxu0 %vm1194_vm5, %v15811_v29  ;;  %12140 = vmatmul.mubr.msk.f32.gmra.mrb[70].mxu1 %vm1194_vm5, %v15812_v30 }
 0x3f0   : > { %12142 = vmatprep.mubr.msk.f32.mxu1 %vm1194_vm5, %v15813_v31 }
 0x3f3   : > { %12143 = vmatmul.mubr.msk.f32.gmra.mrb[72].mxu1 %vm1194_vm5, %v15814_v32  ;;  %v6299_v32 = vld [vmem:[#allocation2 + $0x28c] sm:$0xff] }
 0x3f4   : > { %12145 = vmatprep.mubr.msk.f32.mxu1 %vm1194_vm5, %v15815_v33 }
 0x3f7   : > { %12146 = vmatmul.mubr.msk.f32.gmra.mrb[74].mxu1 %vm1194_vm5, %v15816_v34  ;;  %v6301_v34 = vld [vmem:[#allocation2 + $0x29c] sm:$0x3f] }
 0x3f8   : > { %12148 = vmatprep.mubr.msk.f32.mxu1 %vm1194_vm5, %v15817_v36  ;;  %v10157_v36 = vld [vmem:[%s15701_s3 + $0x118] sm:$0xff] }
 0x3fb   : > { %12149 = vmatmul.mubr.msk.f32.gmra.mrb[76].mxu1 %vm1194_vm5, %v15818_v37 }
 0x3fc   : > { %12151 = vmatprep.mubr.msk.f32.mxu1 %vm1194_vm5, %v15819_v38  ;;  %v7074_v38 = vld [vmem:[#allocation2 + $0x35] sm:$0xff] }
 0x3ff   : > { %12152 = vmatmul.mubr.msk.f32.gmra.mrb[0].mxu1 %vm1194_vm5, %v15820_v39 }
 0x400   : > { %12154 = vmatprep.mubr.msk.f32.mxu1 %vm1194_vm5, %v15821_v40 }
 0x403   : > { %12155 = vmatmul.mubr.msk.f32.gmra.mrb[2].mxu1 %vm1194_vm5, %v15822_v41  ;;  %v7075_v41 = vld [vmem:[#allocation2 + $0x3d] sm:$0xff] }
 0x404   : > { %12157 = vmatprep.mubr.msk.f32.mxu1 %vm1194_vm5, %v15823_v14 }
 0x407   : > { %12158 = vmatmul.mubr.msk.f32.gmra.mrb[4].mxu1 %vm1194_vm5, %v15824_v42  ;;  %v7076_v42 = vld [vmem:[#allocation2 + $0x45] sm:$0xff] }
 0x408   : > { %12160 = vmatprep.mubr.msk.f32.mxu1 %vm1194_vm5, %v15825_v44 }
 0x40b   : > { %12161 = vmatmul.mubr.msk.f32.gmra.mrb[6].mxu1 %vm1194_vm5, %v15826_v46  ;;  %v7077_v46 = vld [vmem:[#allocation2 + $0x4d] sm:$0xff] }
 0x40c   : > { %12163 = vmatprep.mubr.msk.f32.mxu1 %vm1194_vm5, %v15827_v47 }
 0x40f   : > { %12164 = vmatmul.mubr.msk.f32.gmra.mrb[8].mxu1 %vm1194_vm5, %v15828_v50  ;;  %v7078_v50 = vld [vmem:[#allocation2 + $0x55] sm:$0xff] }
 0x410   : > { %12166 = vmatprep.mubr.msk.f32.mxu1 %vm1194_vm5, %v15829_v51 }
 0x413   : > { %12167 = vmatmul.mubr.msk.f32.gmra.mrb[10].mxu1 %vm1194_vm5, %v15830_v52  ;;  %v7079_v52 = vld [vmem:[#allocation2 + $0x5d] sm:$0xff] }
 0x414   : > { %12169 = vmatprep.mubr.msk.f32.mxu1 %vm1194_vm5, %v15831_v1 }
 0x417   : > { %12170 = vmatmul.mubr.msk.f32.gmra.mrb[12].mxu1 %vm1194_vm5, %v15832_v53 }
 0x418   : > { %12172 = vmatprep.mubr.msk.f32.mxu1 %vm1194_vm5, %v15833_v45  ;;  %v7081_v45 = vld [vmem:[#allocation2 + $0x6d] sm:$0xff] }
 0x41b   : > { %12173 = vmatmul.mubr.msk.f32.gmra.mrb[14].mxu1 %vm1194_vm5, %v15834_v54 }
 0x41c   : > { %12175 = vmatprep.mubr.msk.f32.mxu1 %vm1194_vm5, %v15835_v55  ;;  %v7082_v55 = vld [vmem:[#allocation2 + $0x75] sm:$0xff] }
 0x41f   : > { %12176 = vmatmul.mubr.msk.f32.gmra.mrb[16].mxu1 %vm1194_vm5, %v15836_v56 }
 0x420   : > { %12178 = vmatprep.mubr.msk.f32.mxu1 %vm1194_vm5, %v15837_v57  ;;  %v7083_v57 = vld [vmem:[#allocation2 + $0x7d] sm:$0xff] }
 0x423   : > { %12179 = vmatmul.mubr.msk.f32.gmra.mrb[18].mxu1 %vm1194_vm5, %v15838_v22 }
 0x424   : > { %12181 = vmatprep.mubr.msk.f32.mxu1 %vm1194_vm5, %v15839_v58  ;;  %v7084_v58 = vld [vmem:[#allocation2 + $0x85] sm:$0xff] }
 0x427   : > { %12182 = vmatmul.mubr.msk.f32.gmra.mrb[20].mxu1 %vm1194_vm5, %v15840_v59 }
 0x428   : > { %12184 = vmatprep.mubr.msk.f32.mxu1 %vm1194_vm5, %v15841_v60  ;;  %v7085_v60 = vld [vmem:[#allocation2 + $0x8d] sm:$0xff] }
 0x42a   : > { %v15053_v61 = vpop.f32.mrb[202].mxu0 }
 0x42b   : > { %v15055_v62 = vpop.f32.mrb[203].mxu0  ;;  %12185 = vmatmul.mubr.msk.f32.gmra.mrb[22].mxu1 %vm1194_vm5, %v15842_v63 }
 0x42c   : > { %12187 = vmatprep.mubr.msk.f32.mxu1 %vm1194_vm5, %v15843_v2  ;;  %v7086_v2 = vld [vmem:[#allocation2 + $0x95] sm:$0xff] }
 0x42e   : > { %v15061_v3 = vpop.f32.mrb[204].mxu0 }
 0x42f   : > { %v15063_v4 = vpop.f32.mrb[205].mxu0  ;;  %12188 = vmatmul.mubr.msk.f32.gmra.mrb[24].mxu1 %vm1194_vm5, %v15844_v5 }
 0x430   : > { %12190 = vmatprep.mubr.msk.f32.mxu1 %vm1194_vm5, %v15845_v6  ;;  %v7087_v6 = vld [vmem:[#allocation2 + $0x9d] sm:$0xff] }
 0x432   : > { %v15069_v49 = vpop.f32.mrb[206].mxu0 }
 0x433   : > { %v15071_v18 = vpop.f32.mrb[207].mxu0  ;;  %12191 = vmatmul.mubr.msk.f32.gmra.mrb[26].mxu1 %vm1194_vm5, %v15846_v15 }
 0x434   : > { %12193 = vmatprep.mubr.msk.f32.mxu1 %vm1194_vm5, %v15847_v9  ;;  %v7088_v9 = vld [vmem:[#allocation2 + $0xa5] sm:$0xff] }
 0x436   : > { %v15077_v13 = vpop.f32.mrb[208].mxu0 }
 0x437   : > { %v15079_v0 = vpop.f32.mrb[209].mxu0  ;;  %12194 = vmatmul.mubr.msk.f32.gmra.mrb[28].mxu1 %vm1194_vm5, %v15848_v17 }
 0x438   : > { %12196 = vmatprep.mubr.msk.f32.mxu1 %vm1194_vm5, %v15849_v19  ;;  %v7089_v19 = vld [vmem:[#allocation2 + $0xad] sm:$0xff] }
 0x43a   : > { %v15085_v21 = vpop.f32.mrb[210].mxu0 }
 0x43b   : > { %v15087_v23 = vpop.f32.mrb[211].mxu0  ;;  %12197 = vmatmul.mubr.msk.f32.gmra.mrb[30].mxu1 %vm1194_vm5, %v15850_v25 }
 0x43c   : > { %12199 = vmatprep.mubr.msk.f32.mxu1 %vm1194_vm5, %v15851_v10  ;;  %v7090_v10 = vld [vmem:[#allocation2 + $0xb5] sm:$0xff] }
 0x43e   : > { %v15093_v26 = vpop.f32.mrb[212].mxu0 }
 0x43f   : > { %v15095_v27 = vpop.f32.mrb[213].mxu0  ;;  %12200 = vmatmul.mubr.msk.f32.gmra.mrb[32].mxu1 %vm1194_vm5, %v14821_v20 }
 0x440   : > { %12202 = vmatprep.mubr.msk.f32.mxu1 %vm1194_vm5, %v14827_v35 }
 0x442   : > { %v15101_v28 = vpop.f32.mrb[214].mxu0 }
 0x443   : > { %v15103_v29 = vpop.f32.mrb[215].mxu0  ;;  %12203 = vmatmul.mubr.msk.f32.gmra.mrb[34].mxu1 %vm1194_vm5, %v14832_v12 }
 0x444   : > { %12205 = vmatprep.mubr.msk.f32.mxu1 %vm1194_vm5, %v14837_v16 }
 0x446   : > { %v15109_v30 = vpop.f32.mrb[216].mxu0 }
 0x447   : > { %v15111_v31 = vpop.f32.mrb[217].mxu0  ;;  %12206 = vmatmul.mubr.msk.f32.gmra.mrb[36].mxu1 %vm1194_vm5, %v14842_v48  ;;  %v6298_v48 = vld [vmem:[#allocation2 + $0x284] sm:$0xff] }
 0x448   : > { %12208 = vmatprep.mubr.msk.f32.mxu1 %vm1194_vm5, %v14848_v43 }
 0x44a   : > { %v15117_v20 = vpop.f32.mrb[218].mxu0 }
 0x44b   : > { %v15119_v35 = vpop.f32.mrb[219].mxu0  ;;  %12209 = vmatmul.mubr.msk.f32.gmra.mrb[38].mxu1 %vm1194_vm5, %v14854_v7  ;;  %v6300_v7 = vld [vmem:[#allocation2 + $0x294] sm:$0xff] }
 0x44c   : > { %12211 = vmatprep.mubr.msk.f32.mxu1 %vm1194_vm5, %v14860_v8 }
 0x44e   : > { %v15125_v12 = vpop.f32.mrb[220].mxu0 }
 0x44f   : > { %v15127_v16 = vpop.f32.mrb[221].mxu0  ;;  %12212 = vmatmul.mubr.msk.f32.gmra.mrb[40].mxu1 %vm1194_vm5, %v14866_v11  ;;  %v10156_v11 = vld [vmem:[%s15701_s3 + $0x110] sm:$0xff] }
 0x450   : > { %15852 = vst [vmem:[#allocation11_spill] sm:$0xff] %v15127_v16  ;;  %12214 = vmatprep.mubr.msk.f32.mxu1 %vm1194_vm5, %v6298_v48  ;;  %v12542_v39 = vpack.c.bf16 %v10157_v36, %v10156_v11  ;;  %v7093_v36 = vld [vmem:[#allocation2 + $0xcd] sm:$0xff] }
 0x452   : > { %v15132_v43 = vpop.f32.mrb[222].mxu0 }
 0x453   : > { %15853 = vst [vmem:[#allocation12_spill] sm:$0xff] %v15132_v43  ;;  %v15134_v33 = vpop.f32.mrb[223].mxu0  ;;  %12215 = vmatmul.mubr.msk.f32.gmra.mrb[42].mxu1 %vm1194_vm5, %v6299_v32  ;;  %v7091_v32 = vld [vmem:[#allocation2 + $0xbd] sm:$0xff] }
 0x454   : > { %15854 = vst [vmem:[#allocation13_spill] sm:$0xff] %v15134_v33  ;;  %12217 = vmatprep.mubr.msk.f32.mxu1 %vm1194_vm5, %v6300_v7 }
 0x456   : > { %v15138_v8 = vpop.f32.mrb[224].mxu0 }
 0x457   : > { %15855 = vst [vmem:[#allocation14_spill] sm:$0xff] %v15138_v8  ;;  %v15146_v37 = vpop.f32.mrb[225].mxu0  ;;  %12218 = vmatmul.mubr.msk.f32.gmra.mrb[44].mxu1 %vm1194_vm5, %v6301_v34  ;;  %v7092_v34 = vld [vmem:[#allocation2 + $0xc5] sm:$0xff] }
 0x458   : > { %15856 = vst [vmem:[#allocation15_spill] sm:$0xff] %v15146_v37  ;;  %12228 = vmatprep.mubr.msk.f32.mxu1 %vm1194_vm5, %v7074_v38 }
 0x45a   : > { %v15150_v40 = vpop.f32.mrb[226].mxu0 }
 0x45b   : > { %15857 = vst [vmem:[#allocation16_spill] sm:$0xff] %v15150_v40  ;;  %v15152_v14 = vpop.f32.mrb[227].mxu0  ;;  %12229 = vmatmul.mubr.msk.f32.vlgmr.msra.gmra.mrb[46].mxu1 %vm1194_vm5, %v7075_v41  ;;  %v7134_v40 = vld [vmem:[#allocation2 + $0x215] sm:$0xff] }
 0x45c   : > { %15858 = vst [vmem:[#allocation17_spill] sm:$0xff] %v15152_v14  ;;  %12541 = vmatpush3.bf16.msra.mxu1 %v14952_v24  ;;  %12231 = vmatprep.mubr.msk.f32.mxu1 %vm1194_vm5, %v7076_v42  ;;  %v7080_v24 = vld [vmem:[#allocation2 + $0x65] sm:$0xff]  ;;  %v7095_v42 = vld [vmem:[#allocation2 + $0xdd] sm:$0xff]  ;;  %v7133_v14 = vld [vmem:[#allocation2 + $0x20d] sm:$0xff] }
 0x45d   : > { %12543 = vmatprep.subr.bf16.mxu1 %v12542_v39 }
 0x45e   : > { %v15157_v44 = vpop.f32.mrb[228].mxu0 }
 0x45f   : > { %15859 = vst [vmem:[#allocation18_spill] sm:$0xff] %v15157_v44  ;;  %v15159_v47 = vpop.f32.mrb[229].mxu0  ;;  %12232 = vmatmul.mubr.msk.f32.gmra.mrb[48].mxu1 %vm1194_vm5, %v7077_v46  ;;  %v7130_v44 = vld [vmem:[#allocation2 + $0x1f5] sm:$0xff] }
 0x460   : > { %15860 = vst [vmem:[#allocation19_spill] sm:$0xff] %v15159_v47  ;;  %12234 = vmatprep.mubr.msk.f32.mxu1 %vm1194_vm5, %v7078_v50  ;;  %12545 = vmatpush3.bf16.msra.mxu1 %v12542_v39  ;;  %v7094_v39 = vld [vmem:[#allocation2 + $0xd5] sm:$0xff]  ;;  %v7096_v50 = vld [vmem:[#allocation2 + $0xe5] sm:$0xff] }
 0x462   : > { %v15163_v51 = vpop.f32.mrb[230].mxu0 }
 0x463   : > { %15861 = vst [vmem:[#allocation20_spill] sm:$0xff] %v15163_v51  ;;  %v15165_v1 = vpop.f32.mrb[231].mxu0  ;;  %12235 = vmatmul.mubr.msk.f32.gmra.mrb[50].mxu1 %vm1194_vm5, %v7079_v52  ;;  %v7127_v51 = vld [vmem:[#allocation2 + $0x1dd] sm:$0xff] }
 0x464   : > { %15862 = vst [vmem:[#allocation21_spill] sm:$0xff] %v15165_v1  ;;  %12237 = vmatprep.mubr.msk.f32.mxu1 %vm1194_vm5, %v7080_v24  ;;  %v7097_v24 = vld [vmem:[#allocation2 + $0xed] sm:$0xff] }
 0x466   : > { %v15169_v53 = vpop.f32.mrb[232].mxu0 }
 0x467   : > { %15863 = vst [vmem:[#allocation22_spill] sm:$0xff] %v15169_v53  ;;  %v15171_v54 = vpop.f32.mrb[233].mxu0  ;;  %12238 = vmatmul.mubr.msk.f32.gmra.mrb[52].mxu1 %vm1194_vm5, %v7081_v45  ;;  %v7125_v53 = vld [vmem:[#allocation2 + $0x1cd] sm:$0xff] }
 0x468   : > { %15864 = vst [vmem:[#allocation23_spill] sm:$0xff] %v15171_v54  ;;  %12240 = vmatprep.mubr.msk.f32.mxu1 %vm1194_vm5, %v7082_v55  ;;  %v7098_v55 = vld [vmem:[#allocation2 + $0xf5] sm:$0xff] }
 0x46a   : > { %v15175_v56 = vpop.f32.mrb[234].mxu0 }
 0x46b   : > { %15865 = vst [vmem:[#allocation24_spill] sm:$0xff] %v15175_v56  ;;  %v15177_v22 = vpop.f32.mrb[235].mxu0  ;;  %12241 = vmatmul.mubr.msk.f32.gmra.mrb[54].mxu1 %vm1194_vm5, %v7083_v57  ;;  %v7123_v56 = vld [vmem:[#allocation2 + $0x1bd] sm:$0xff] }
 0x46c   : > { %15866 = vst [vmem:[#allocation25_spill] sm:$0xff] %v15177_v22  ;;  %12243 = vmatprep.mubr.msk.f32.mxu1 %vm1194_vm5, %v7084_v58  ;;  %v7099_v58 = vld [vmem:[#allocation2 + $0xfd] sm:$0xff] }
 0x46e   : > { %v15181_v59 = vpop.f32.mrb[236].mxu0 }
 0x46f   : > { %15867 = vst [vmem:[#allocation26_spill] sm:$0xff] %v15181_v59  ;;  %v15183_v63 = vpop.f32.mrb[237].mxu0  ;;  %12244 = vmatmul.mubr.msk.f32.gmra.mrb[56].mxu1 %vm1194_vm5, %v7085_v60  ;;  %v7121_v59 = vld [vmem:[#allocation2 + $0x1ad] sm:$0xff] }
 0x470   : > { %15868 = vst [vmem:[#allocation27_spill] sm:$0xff] %v15183_v63  ;;  %12246 = vmatprep.mubr.msk.f32.mxu1 %vm1194_vm5, %v7086_v2  ;;  %v7100_v2 = vld [vmem:[#allocation2 + $0x105] sm:$0xff] }
 0x472   : > { %v15187_v5 = vpop.f32.mrb[238].mxu0 }
 0x473   : > { %15869 = vst [vmem:[#allocation28_spill] sm:$0xff] %v15187_v5  ;;  %v15189_v15 = vpop.f32.mrb[239].mxu0  ;;  %12247 = vmatmul.mubr.msk.f32.gmra.mrb[58].mxu1 %vm1194_vm5, %v7087_v6  ;;  %v7119_v5 = vld [vmem:[#allocation2 + $0x19d] sm:$0xff] }
 0x474   : > { %15870 = vst [vmem:[#allocation29_spill] sm:$0xff] %v15189_v15  ;;  %12249 = vmatprep.mubr.msk.f32.mxu1 %vm1194_vm5, %v7088_v9  ;;  %v7101_v9 = vld [vmem:[#allocation2 + $0x10d] sm:$0xff] }
 0x476   : > { %v15193_v17 = vpop.f32.mrb[240].mxu0 }
 0x477   : > { %15871 = vst [vmem:[#allocation30_spill] sm:$0xff] %v15193_v17  ;;  %v15195_v25 = vpop.f32.mrb[241].mxu0  ;;  %12250 = vmatmul.mubr.msk.f32.gmra.mrb[60].mxu1 %vm1194_vm5, %v7089_v19  ;;  %v7117_v17 = vld [vmem:[#allocation2 + $0x18d] sm:$0xff] }
 0x478   : > { %15872 = vst [vmem:[#allocation31_spill] sm:$0xff] %v15195_v25  ;;  %12252 = vmatprep.mubr.msk.f32.mxu1 %vm1194_vm5, %v7090_v10  ;;  %v7102_v10 = vld [vmem:[#allocation2 + $0x115] sm:$0xff] }
 0x47a   : > { %v15199_v48 = vpop.f32.mrb[242].mxu0 }
 0x47b   : > { %15873 = vst [vmem:[#allocation32_spill] sm:$0xff] %v15199_v48  ;;  %v15201_v7 = vpop.f32.mrb[243].mxu0  ;;  %12253 = vmatmul.mubr.msk.f32.gmra.mrb[62].mxu1 %vm1194_vm5, %v7091_v32  ;;  %v7115_v48 = vld [vmem:[#allocation2 + $0x17d] sm:$0xff] }
 0x47c   : > { %15874 = vst [vmem:[#allocation33_spill] sm:$0xff] %v15201_v7  ;;  %12255 = vmatprep.mubr.msk.f32.mxu1 %vm1194_vm5, %v7092_v34  ;;  %v7103_v34 = vld [vmem:[#allocation2 + $0x11d] sm:$0xff] }
 0x47e   : > { %v15205_v11 = vpop.f32.mrb[244].mxu0 }
 0x47f   : > { %15875 = vst [vmem:[#allocation34_spill] sm:$0xff] %v15205_v11  ;;  %v15207_v38 = vpop.f32.mrb[245].mxu0  ;;  %12256 = vmatmul.mubr.msk.f32.gmra.mrb[64].mxu1 %vm1194_vm5, %v7093_v36  ;;  %v7113_v11 = vld [vmem:[#allocation2 + $0x16d] sm:$0xff] }
 0x480   : > { %15876 = vst [vmem:[#allocation35_spill] sm:$0xff] %v15207_v38  ;;  %12258 = vmatprep.mubr.msk.f32.mxu1 %vm1194_vm5, %v7094_v39  ;;  %v7104_v39 = vld [vmem:[#allocation2 + $0x125] sm:$0xff] }
 0x482   : > { %v15211_v41 = vpop.f32.mrb[246].mxu0 }
 0x483   : > { %15877 = vst [vmem:[#allocation36_spill] sm:$0xff] %v15211_v41  ;;  %v15213_v46 = vpop.f32.mrb[247].mxu0  ;;  %12259 = vmatmul.mubr.msk.f32.gmra.mrb[66].mxu1 %vm1194_vm5, %v7095_v42  ;;  %v7111_v41 = vld [vmem:[#allocation2 + $0x15d] sm:$0xff] }
 0x484   : > { %15878 = vst [vmem:[#allocation37_spill] sm:$0xff] %v15213_v46  ;;  %12261 = vmatprep.mubr.msk.f32.mxu1 %vm1194_vm5, %v7096_v50  ;;  %v7105_v50 = vld [vmem:[#allocation2 + $0x12d] sm:$0xff] }
 0x486   : > { %v15217_v52 = vpop.f32.mrb[170].mxu0 }
 0x487   : > { %v15219_v45 = vpop.f32.mrb[171].mxu0  ;;  %12262 = vmatmul.mubr.msk.f32.gmra.mrb[68].mxu1 %vm1194_vm5, %v7097_v24 }
 0x488   : > { %12264 = vmatprep.mubr.msk.f32.mxu1 %vm1194_vm5, %v7098_v55  ;;  %v7106_v55 = vld [vmem:[#allocation2 + $0x135] sm:$0xff] }
 0x48a   : > { %v15223_v57 = vpop.f32.mrb[172].mxu0 }
 0x48b   : > { %v15225_v60 = vpop.f32.mrb[173].mxu0  ;;  %12265 = vmatmul.mubr.msk.f32.gmra.mrb[70].mxu1 %vm1194_vm5, %v7099_v58 }
 0x48c   : > { %12267 = vmatprep.mubr.msk.f32.mxu1 %vm1194_vm5, %v7100_v2  ;;  %v7107_v2 = vld [vmem:[#allocation2 + $0x13d] sm:$0xff] }
 0x48e   : > { %v15229_v6 = vpop.f32.mrb[174].mxu0 }
 0x48f   : > { %v15231_v19 = vpop.f32.mrb[175].mxu0  ;;  %12268 = vmatmul.mubr.msk.f32.gmra.mrb[72].mxu1 %vm1194_vm5, %v7101_v9 }
 0x490   : > { %12270 = vmatprep.mubr.msk.f32.mxu1 %vm1194_vm5, %v7102_v10  ;;  %v7108_v10 = vld [vmem:[#allocation2 + $0x145] sm:$0xff] }
 0x492   : > { %v15235_v32 = vpop.f32.mrb[176].mxu0 }
 0x493   : > { %v15237_v36 = vpop.f32.mrb[177].mxu0  ;;  %12271 = vmatmul.mubr.msk.f32.gmra.mrb[74].mxu1 %vm1194_vm5, %v7103_v34 }
 0x494   : > { %12273 = vmatprep.mubr.msk.f32.mxu1 %vm1194_vm5, %v7104_v39  ;;  %v7109_v39 = vld [vmem:[#allocation2 + $0x14d] sm:$0xff] }
 0x496   : > { %v15241_v42 = vpop.f32.mrb[178].mxu0 }
 0x497   : > { %v15243_v24 = vpop.f32.mrb[179].mxu0  ;;  %12274 = vmatmul.mubr.msk.f32.gmra.mrb[76].mxu1 %vm1194_vm5, %v7105_v50  ;;  %v7110_v50 = vld [vmem:[#allocation2 + $0x155] sm:$0xff] }
 0x498   : > { %12276 = vmatprep.mubr.msk.f32.mxu1 %vm1194_vm5, %v7106_v55 }
 0x49a   : > { %v15247_v58 = vpop.f32.mrb[180].mxu0 }
 0x49b   : > { %v15249_v9 = vpop.f32.mrb[181].mxu0  ;;  %12277 = vmatmul.mubr.msk.f32.gmra.mrb[0].mxu1 %vm1194_vm5, %v7107_v2  ;;  %v7112_v2 = vld [vmem:[#allocation2 + $0x165] sm:$0xff] }
 0x49c   : > { %12279 = vmatprep.mubr.msk.f32.mxu1 %vm1194_vm5, %v7108_v10 }
 0x49e   : > { %v15253_v34 = vpop.f32.mrb[182].mxu0 }
 0x49f   : > { %v15255_v46 = vpop.f32.mrb[183].mxu0  ;;  %12280 = vmatmul.mubr.msk.f32.gmra.mrb[2].mxu1 %vm1194_vm5, %v7109_v39  ;;  %v7114_v39 = vld [vmem:[#allocation2 + $0x175] sm:$0xff] }
 0x4a0   : > { %12282 = vmatprep.mubr.msk.f32.mxu1 %vm1194_vm5, %v7110_v50 }
 0x4a2   : > { %v15259_v55 = vpop.f32.mrb[184].mxu0 }
 0x4a3   : > { %v15261_v38 = vpop.f32.mrb[185].mxu0  ;;  %12283 = vmatmul.mubr.msk.f32.gmra.mrb[4].mxu1 %vm1194_vm5, %v7111_v41  ;;  %v7116_v41 = vld [vmem:[#allocation2 + $0x185] sm:$0xff] }
 0x4a4   : > { %12285 = vmatprep.mubr.msk.f32.mxu1 %vm1194_vm5, %v7112_v2 }
 0x4a6   : > { %v15265_v10 = vpop.f32.mrb[186].mxu0 }
 0x4a7   : > { %v15267_v7 = vpop.f32.mrb[187].mxu0  ;;  %12286 = vmatmul.mubr.msk.f32.gmra.mrb[6].mxu1 %vm1194_vm5, %v7113_v11  ;;  %v7118_v11 = vld [vmem:[#allocation2 + $0x195] sm:$0xff] }
 0x4a8   : > { %12288 = vmatprep.mubr.msk.f32.mxu1 %vm1194_vm5, %v7114_v39 }
 0x4aa   : > { %v15271_v50 = vpop.f32.mrb[188].mxu0 }
 0x4ab   : > { %v15273_v25 = vpop.f32.mrb[189].mxu0  ;;  %12289 = vmatmul.mubr.msk.f32.gmra.mrb[8].mxu1 %vm1194_vm5, %v7115_v48  ;;  %v7120_v48 = vld [vmem:[#allocation2 + $0x1a5] sm:$0xff] }
 0x4ac   : > { %12291 = vmatprep.mubr.msk.f32.mxu1 %vm1194_vm5, %v7116_v41 }
 0x4ae   : > { %v15277_v2 = vpop.f32.mrb[190].mxu0 }
 0x4af   : > { %v15279_v15 = vpop.f32.mrb[191].mxu0  ;;  %12292 = vmatmul.mubr.msk.f32.gmra.mrb[10].mxu1 %vm1194_vm5, %v7117_v17  ;;  %v7122_v17 = vld [vmem:[#allocation2 + $0x1b5] sm:$0xff] }
 0x4b0   : > { %12294 = vmatprep.mubr.msk.f32.mxu1 %vm1194_vm5, %v7118_v11 }
 0x4b2   : > { %v15283_v39 = vpop.f32.mrb[192].mxu0 }
 0x4b3   : > { %v15285_v63 = vpop.f32.mrb[193].mxu0  ;;  %12295 = vmatmul.mubr.msk.f32.gmra.mrb[12].mxu1 %vm1194_vm5, %v7119_v5  ;;  %v7124_v5 = vld [vmem:[#allocation2 + $0x1c5] sm:$0xff] }
 0x4b4   : > { %12297 = vmatprep.mubr.msk.f32.mxu1 %vm1194_vm5, %v7120_v48 }
 0x4b6   : > { %v15289_v41 = vpop.f32.mrb[194].mxu0 }
 0x4b7   : > { %v15291_v22 = vpop.f32.mrb[195].mxu0  ;;  %12298 = vmatmul.mubr.msk.f32.gmra.mrb[14].mxu1 %vm1194_vm5, %v7121_v59  ;;  %v7126_v59 = vld [vmem:[#allocation2 + $0x1d5] sm:$0xff] }
 0x4b8   : > { %12300 = vmatprep.mubr.msk.f32.mxu1 %vm1194_vm5, %v7122_v17 }
 0x4ba   : > { %v15295_v11 = vpop.f32.mrb[196].mxu0 }
 0x4bb   : > { %v15297_v54 = vpop.f32.mrb[197].mxu0  ;;  %12301 = vmatmul.mubr.msk.f32.gmra.mrb[16].mxu1 %vm1194_vm5, %v7123_v56  ;;  %v7128_v56 = vld [vmem:[#allocation2 + $0x1e5] sm:$0xff] }
 0x4bc   : > { %12303 = vmatprep.mubr.msk.f32.mxu1 %vm1194_vm5, %v7124_v5  ;;  %v7129_v5 = vld [vmem:[#allocation2 + $0x1ed] sm:$0xff] }
 0x4be   : > { %v15301_v48 = vpop.f32.mrb[198].mxu0 }
 0x4bf   : > { %v15303_v1 = vpop.f32.mrb[199].mxu0  ;;  %12304 = vmatmul.mubr.msk.f32.gmra.mrb[18].mxu1 %vm1194_vm5, %v7125_v53  ;;  %v7131_v53 = vld [vmem:[#allocation2 + $0x1fd] sm:$0xff] }
 0x4c0   : > { %12306 = vmatprep.mubr.msk.f32.mxu1 %vm1194_vm5, %v7126_v59  ;;  %v7132_v59 = vld [vmem:[#allocation2 + $0x205] sm:$0xff] }
 0x4c2   : > { %v15307_v17 = vpop.f32.mrb[200].mxu0 }
 0x4c3   : > { %v15309_v47 = vpop.f32.mrb[201].mxu0  ;;  %12307 = vmatmul.mubr.msk.f32.gmra.mrb[20].mxu1 %vm1194_vm5, %v7127_v51  ;;  %v7135_v51 = vld [vmem:[#allocation2 + $0x21d] sm:$0xff] }
 0x4c4   : > { %12309 = vmatprep.mubr.msk.f32.mxu1 %vm1194_vm5, %v7128_v56  ;;  %v7136_v56 = vld [vmem:[#allocation2 + $0x225] sm:$0xff] }
 0x4c7   : > { %12310 = vmatmul.mubr.msk.f32.gmra.mrb[22].mxu1 %vm1194_vm5, %v7129_v5  ;;  %v7137_v5 = vld [vmem:[#allocation2 + $0x22d] sm:$0xff] }
 0x4c8   : > { %12312 = vmatprep.mubr.msk.f32.mxu1 %vm1194_vm5, %v7130_v44  ;;  %v7138_v44 = vld [vmem:[#allocation2 + $0x235] sm:$0xff] }
 0x4cb   : > { %12313 = vmatmul.mubr.msk.f32.gmra.mrb[24].mxu1 %vm1194_vm5, %v7131_v53  ;;  %v7139_v53 = vld [vmem:[#allocation2 + $0x23d] sm:$0xff] }
 0x4cc   : > { %12315 = vmatprep.mubr.msk.f32.mxu1 %vm1194_vm5, %v7132_v59  ;;  %v7140_v59 = vld [vmem:[#allocation2 + $0x245] sm:$0xff] }
 0x4cf   : > { %12316 = vmatmul.mubr.msk.f32.gmra.mrb[26].mxu1 %vm1194_vm5, %v7133_v14  ;;  %v7141_v14 = vld [vmem:[#allocation2 + $0x24d] sm:$0xff] }
 0x4d0   : > { %12318 = vmatprep.mubr.msk.f32.mxu1 %vm1194_vm5, %v7134_v40  ;;  %v7142_v40 = vld [vmem:[#allocation2 + $0x255] sm:$0xff] }
 0x4d3   : > { %12319 = vmatmul.mubr.msk.f32.gmra.mrb[28].mxu1 %vm1194_vm5, %v7135_v51  ;;  %v7143_v51 = vld [vmem:[#allocation2 + $0x25d] sm:$0xff] }
 0x4d4   : > { %12321 = vmatprep.mubr.msk.f32.mxu1 %vm1194_vm5, %v7136_v56  ;;  %v7144_v56 = vld [vmem:[#allocation2 + $0x265] sm:$0xff] }
 0x4d7   : > { %12322 = vmatmul.mubr.msk.f32.gmra.mrb[30].mxu1 %vm1194_vm5, %v7137_v5  ;;  %v7145_v5 = vld [vmem:[#allocation2 + $0x26d] sm:$0xff] }
 0x4d8   : > { %12324 = vmatprep.mubr.msk.f32.mxu1 %vm1194_vm5, %v7138_v44  ;;  %v7146_v44 = vld [vmem:[#allocation2 + $0x275] sm:$0xff] }
 0x4db   : > { %12325 = vmatmul.mubr.msk.f32.gmra.mrb[32].mxu1 %vm1194_vm5, %v7139_v53  ;;  %v7147_v53 = vld [vmem:[#allocation2 + $0x27d] sm:$0xff] }
 0x4dc   : > { %12327 = vmatprep.mubr.msk.f32.mxu1 %vm1194_vm5, %v7140_v59  ;;  %v7148_v59 = vld [vmem:[#allocation2 + $0x285] sm:$0xff] }
 0x4df   : > { %12328 = vmatmul.mubr.msk.f32.gmra.mrb[34].mxu1 %vm1194_vm5, %v7141_v14  ;;  %v7149_v14 = vld [vmem:[#allocation2 + $0x28d] sm:$0xff] }
 0x4e0   : > { %12330 = vmatprep.mubr.msk.f32.mxu1 %vm1194_vm5, %v7142_v40  ;;  %v7150_v40 = vld [vmem:[#allocation2 + $0x295] sm:$0xff] }
 0x4e3   : > { %12331 = vmatmul.mubr.msk.f32.gmra.mrb[36].mxu1 %vm1194_vm5, %v7143_v51  ;;  %v7151_v51 = vld [vmem:[#allocation2 + $0x29d] sm:$0x3f] }
 0x4e4   : > { %12333 = vmatprep.mubr.msk.f32.mxu1 %vm1194_vm5, %v7144_v56  ;;  %v7924_v56 = vld [vmem:[#allocation2 + $0x36] sm:$0xff] }
 0x4e7   : > { %12334 = vmatmul.mubr.msk.f32.gmra.mrb[38].mxu1 %vm1194_vm5, %v7145_v5  ;;  %v7925_v5 = vld [vmem:[#allocation2 + $0x3e] sm:$0xff] }
 0x4e8   : > { %12336 = vmatprep.mubr.msk.f32.mxu1 %vm1194_vm5, %v7146_v44  ;;  %v7926_v44 = vld [vmem:[#allocation2 + $0x46] sm:$0xff] }
 0x4eb   : > { %12337 = vmatmul.mubr.msk.f32.gmra.mrb[40].mxu1 %vm1194_vm5, %v7147_v53  ;;  %v7927_v53 = vld [vmem:[#allocation2 + $0x4e] sm:$0xff] }
 0x4ec   : > { %12339 = vmatprep.mubr.msk.f32.mxu1 %vm1194_vm5, %v7148_v59  ;;  %v7928_v59 = vld [vmem:[#allocation2 + $0x56] sm:$0xff] }
 0x4ef   : > { %12340 = vmatmul.mubr.msk.f32.gmra.mrb[42].mxu1 %vm1194_vm5, %v7149_v14  ;;  %v7929_v14 = vld [vmem:[#allocation2 + $0x5e] sm:$0xff] }
 0x4f0   : > { %12342 = vmatprep.mubr.msk.f32.mxu1 %vm1194_vm5, %v7150_v40  ;;  %v7930_v40 = vld [vmem:[#allocation2 + $0x66] sm:$0xff] }
 0x4f3   : > { %12343 = vmatmul.mubr.msk.f32.gmra.mrb[44].mxu1 %vm1194_vm5, %v7151_v51  ;;  %v7931_v51 = vld [vmem:[#allocation2 + $0x6e] sm:$0xff] }
 0x4f4   : > { %12353 = vmatprep.mubr.msk.f32.mxu1 %vm1194_vm5, %v7924_v56  ;;  %v7932_v56 = vld [vmem:[#allocation2 + $0x76] sm:$0xff] }
 0x4f7   : > { %12354 = vmatmul.mubr.msk.f32.vlgmr.msra.gmra.mrb[46].mxu1 %vm1194_vm5, %v7925_v5  ;;  %v7933_v5 = vld [vmem:[#allocation2 + $0x7e] sm:$0xff] }
 0x4f8   : > { %12356 = vmatprep.mubr.msk.f32.mxu1 %vm1194_vm5, %v7926_v44  ;;  %v7934_v44 = vld [vmem:[#allocation2 + $0x86] sm:$0xff] }
 0x4fb   : > { %12357 = vmatmul.mubr.msk.f32.gmra.mrb[48].mxu1 %vm1194_vm5, %v7927_v53  ;;  %v7935_v53 = vld [vmem:[#allocation2 + $0x8e] sm:$0xff] }
 0x4fc   : > { %12359 = vmatprep.mubr.msk.f32.mxu1 %vm1194_vm5, %v7928_v59  ;;  %v7936_v59 = vld [vmem:[#allocation2 + $0x96] sm:$0xff] }
 0x4ff   : > { %12360 = vmatmul.mubr.msk.f32.gmra.mrb[50].mxu1 %vm1194_vm5, %v7929_v14  ;;  %v7937_v14 = vld [vmem:[#allocation2 + $0x9e] sm:$0xff] }
 0x500   : > { %12362 = vmatprep.mubr.msk.f32.mxu1 %vm1194_vm5, %v7930_v40  ;;  %v7938_v40 = vld [vmem:[#allocation2 + $0xa6] sm:$0xff] }
 0x503   : > { %12363 = vmatmul.mubr.msk.f32.gmra.mrb[52].mxu1 %vm1194_vm5, %v7931_v51  ;;  %v7939_v51 = vld [vmem:[#allocation2 + $0xae] sm:$0xff] }
 0x504   : > { %12365 = vmatprep.mubr.msk.f32.mxu1 %vm1194_vm5, %v7932_v56  ;;  %v7940_v56 = vld [vmem:[#allocation2 + $0xb6] sm:$0xff] }
 0x507   : > { %12366 = vmatmul.mubr.msk.f32.gmra.mrb[54].mxu1 %vm1194_vm5, %v7933_v5  ;;  %v7941_v5 = vld [vmem:[#allocation2 + $0xbe] sm:$0xff] }
 0x508   : > { %12368 = vmatprep.mubr.msk.f32.mxu1 %vm1194_vm5, %v7934_v44  ;;  %v7942_v44 = vld [vmem:[#allocation2 + $0xc6] sm:$0xff] }
 0x50b   : > { %12369 = vmatmul.mubr.msk.f32.gmra.mrb[56].mxu1 %vm1194_vm5, %v7935_v53  ;;  %v7943_v53 = vld [vmem:[#allocation2 + $0xce] sm:$0xff] }
 0x50c   : > { %12371 = vmatprep.mubr.msk.f32.mxu1 %vm1194_vm5, %v7936_v59  ;;  %v7944_v59 = vld [vmem:[#allocation2 + $0xd6] sm:$0xff] }
 0x50f   : > { %12372 = vmatmul.mubr.msk.f32.gmra.mrb[58].mxu1 %vm1194_vm5, %v7937_v14  ;;  %v7945_v14 = vld [vmem:[#allocation2 + $0xde] sm:$0xff] }
 0x510   : > { %12374 = vmatprep.mubr.msk.f32.mxu1 %vm1194_vm5, %v7938_v40  ;;  %v7946_v40 = vld [vmem:[#allocation2 + $0xe6] sm:$0xff] }
 0x513   : > { %12375 = vmatmul.mubr.msk.f32.gmra.mrb[60].mxu1 %vm1194_vm5, %v7939_v51  ;;  %v7947_v51 = vld [vmem:[#allocation2 + $0xee] sm:$0xff] }
 0x514   : > { %12377 = vmatprep.mubr.msk.f32.mxu1 %vm1194_vm5, %v7940_v56  ;;  %v7948_v56 = vld [vmem:[#allocation2 + $0xf6] sm:$0xff] }
 0x517   : > { %12378 = vmatmul.mubr.msk.f32.gmra.mrb[62].mxu1 %vm1194_vm5, %v7941_v5  ;;  %v7949_v5 = vld [vmem:[#allocation2 + $0xfe] sm:$0xff] }
 0x518   : > { %12380 = vmatprep.mubr.msk.f32.mxu1 %vm1194_vm5, %v7942_v44  ;;  %v7950_v44 = vld [vmem:[#allocation2 + $0x106] sm:$0xff] }
 0x51b   : > { %12381 = vmatmul.mubr.msk.f32.gmra.mrb[64].mxu1 %vm1194_vm5, %v7943_v53  ;;  %v7951_v53 = vld [vmem:[#allocation2 + $0x10e] sm:$0xff] }
 0x51c   : > { %12383 = vmatprep.mubr.msk.f32.mxu1 %vm1194_vm5, %v7944_v59  ;;  %v7952_v59 = vld [vmem:[#allocation2 + $0x116] sm:$0xff] }
 0x51f   : > { %12384 = vmatmul.mubr.msk.f32.gmra.mrb[66].mxu1 %vm1194_vm5, %v7945_v14  ;;  %v7953_v14 = vld [vmem:[#allocation2 + $0x11e] sm:$0xff] }
 0x520   : > { %12386 = vmatprep.mubr.msk.f32.mxu1 %vm1194_vm5, %v7946_v40  ;;  %v7954_v40 = vld [vmem:[#allocation2 + $0x126] sm:$0xff] }
 0x523   : > { %12387 = vmatmul.mubr.msk.f32.gmra.mrb[68].mxu1 %vm1194_vm5, %v7947_v51  ;;  %v7955_v51 = vld [vmem:[#allocation2 + $0x12e] sm:$0xff] }
 0x524   : > { %12389 = vmatprep.mubr.msk.f32.mxu1 %vm1194_vm5, %v7948_v56  ;;  %v7956_v56 = vld [vmem:[#allocation2 + $0x136] sm:$0xff] }
 0x527   : > { %12390 = vmatmul.mubr.msk.f32.gmra.mrb[70].mxu1 %vm1194_vm5, %v7949_v5  ;;  %v7957_v5 = vld [vmem:[#allocation2 + $0x13e] sm:$0xff] }
 0x528   : > { %12392 = vmatprep.mubr.msk.f32.mxu1 %vm1194_vm5, %v7950_v44  ;;  %v7958_v44 = vld [vmem:[#allocation2 + $0x146] sm:$0xff] }
 0x52b   : > { %12393 = vmatmul.mubr.msk.f32.gmra.mrb[72].mxu1 %vm1194_vm5, %v7951_v53  ;;  %v7959_v53 = vld [vmem:[#allocation2 + $0x14e] sm:$0xff] }
 0x52c   : > { %12395 = vmatprep.mubr.msk.f32.mxu1 %vm1194_vm5, %v7952_v59  ;;  %v7960_v59 = vld [vmem:[#allocation2 + $0x156] sm:$0xff] }
 0x52f   : > { %12396 = vmatmul.mubr.msk.f32.gmra.mrb[74].mxu1 %vm1194_vm5, %v7953_v14  ;;  %v7961_v14 = vld [vmem:[#allocation2 + $0x15e] sm:$0xff] }
 0x530   : > { %12398 = vmatprep.mubr.msk.f32.mxu1 %vm1194_vm5, %v7954_v40  ;;  %v7962_v40 = vld [vmem:[#allocation2 + $0x166] sm:$0xff] }
 0x533   : > { %12399 = vmatmul.mubr.msk.f32.gmra.mrb[76].mxu1 %vm1194_vm5, %v7955_v51  ;;  %v7963_v51 = vld [vmem:[#allocation2 + $0x16e] sm:$0xff] }
 0x534   : > { %12401 = vmatprep.mubr.msk.f32.mxu1 %vm1194_vm5, %v7956_v56  ;;  %v7964_v56 = vld [vmem:[#allocation2 + $0x176] sm:$0xff] }
 0x537   : > { %12402 = vmatmul.mubr.msk.f32.gmra.mrb[0].mxu1 %vm1194_vm5, %v7957_v5  ;;  %v7965_v5 = vld [vmem:[#allocation2 + $0x17e] sm:$0xff] }
 0x538   : > { %12404 = vmatprep.mubr.msk.f32.mxu1 %vm1194_vm5, %v7958_v44  ;;  %v7966_v44 = vld [vmem:[#allocation2 + $0x186] sm:$0xff] }
 0x53b   : > { %12405 = vmatmul.mubr.msk.f32.gmra.mrb[2].mxu1 %vm1194_vm5, %v7959_v53  ;;  %v7967_v53 = vld [vmem:[#allocation2 + $0x18e] sm:$0xff] }
 0x53c   : > { %12407 = vmatprep.mubr.msk.f32.mxu1 %vm1194_vm5, %v7960_v59  ;;  %v7968_v59 = vld [vmem:[#allocation2 + $0x196] sm:$0xff] }
 0x53f   : > { %12408 = vmatmul.mubr.msk.f32.gmra.mrb[4].mxu1 %vm1194_vm5, %v7961_v14  ;;  %v7969_v14 = vld [vmem:[#allocation2 + $0x19e] sm:$0xff] }
 0x540   : > { %12410 = vmatprep.mubr.msk.f32.mxu1 %vm1194_vm5, %v7962_v40  ;;  %v7970_v40 = vld [vmem:[#allocation2 + $0x1a6] sm:$0xff] }
 0x543   : > { %12411 = vmatmul.mubr.msk.f32.gmra.mrb[6].mxu1 %vm1194_vm5, %v7963_v51  ;;  %v7971_v51 = vld [vmem:[#allocation2 + $0x1ae] sm:$0xff] }
 0x544   : > { %12413 = vmatprep.mubr.msk.f32.mxu1 %vm1194_vm5, %v7964_v56  ;;  %v7972_v56 = vld [vmem:[#allocation2 + $0x1b6] sm:$0xff] }
 0x547   : > { %12414 = vmatmul.mubr.msk.f32.gmra.mrb[8].mxu1 %vm1194_vm5, %v7965_v5  ;;  %v7973_v5 = vld [vmem:[#allocation2 + $0x1be] sm:$0xff] }
 0x548   : > { %12416 = vmatprep.mubr.msk.f32.mxu1 %vm1194_vm5, %v7966_v44  ;;  %v7974_v44 = vld [vmem:[#allocation2 + $0x1c6] sm:$0xff] }
 0x54b   : > { %12417 = vmatmul.mubr.msk.f32.gmra.mrb[10].mxu1 %vm1194_vm5, %v7967_v53  ;;  %v7975_v53 = vld [vmem:[#allocation2 + $0x1ce] sm:$0xff] }
 0x54c   : > { %12419 = vmatprep.mubr.msk.f32.mxu1 %vm1194_vm5, %v7968_v59  ;;  %v7976_v59 = vld [vmem:[#allocation2 + $0x1d6] sm:$0xff] }
 0x54f   : > { %12420 = vmatmul.mubr.msk.f32.gmra.mrb[12].mxu1 %vm1194_vm5, %v7969_v14  ;;  %v7977_v14 = vld [vmem:[#allocation2 + $0x1de] sm:$0xff] }
 0x550   : > { %12422 = vmatprep.mubr.msk.f32.mxu1 %vm1194_vm5, %v7970_v40  ;;  %v7978_v40 = vld [vmem:[#allocation2 + $0x1e6] sm:$0xff] }
 0x553   : > { %12423 = vmatmul.mubr.msk.f32.gmra.mrb[14].mxu1 %vm1194_vm5, %v7971_v51  ;;  %v7979_v51 = vld [vmem:[#allocation2 + $0x1ee] sm:$0xff] }
 0x554   : > { %12425 = vmatprep.mubr.msk.f32.mxu1 %vm1194_vm5, %v7972_v56  ;;  %v7980_v56 = vld [vmem:[#allocation2 + $0x1f6] sm:$0xff] }
 0x557   : > { %12426 = vmatmul.mubr.msk.f32.gmra.mrb[16].mxu1 %vm1194_vm5, %v7973_v5  ;;  %v7981_v5 = vld [vmem:[#allocation2 + $0x1fe] sm:$0xff] }
 0x558   : > { %12428 = vmatprep.mubr.msk.f32.mxu1 %vm1194_vm5, %v7974_v44  ;;  %v7982_v44 = vld [vmem:[#allocation2 + $0x206] sm:$0xff] }
 0x55b   : > { %12429 = vmatmul.mubr.msk.f32.gmra.mrb[18].mxu1 %vm1194_vm5, %v7975_v53  ;;  %v7983_v53 = vld [vmem:[#allocation2 + $0x20e] sm:$0xff] }
 0x55c   : > { %12431 = vmatprep.mubr.msk.f32.mxu1 %vm1194_vm5, %v7976_v59  ;;  %v7984_v59 = vld [vmem:[#allocation2 + $0x216] sm:$0xff] }
 0x55f   : > { %12432 = vmatmul.mubr.msk.f32.gmra.mrb[20].mxu1 %vm1194_vm5, %v7977_v14  ;;  %v7985_v14 = vld [vmem:[#allocation2 + $0x21e] sm:$0xff] }
 0x560   : > { %12434 = vmatprep.mubr.msk.f32.mxu1 %vm1194_vm5, %v7978_v40  ;;  %v7986_v40 = vld [vmem:[#allocation2 + $0x226] sm:$0xff] }
 0x563   : > { %12435 = vmatmul.mubr.msk.f32.gmra.mrb[22].mxu1 %vm1194_vm5, %v7979_v51  ;;  %v7987_v51 = vld [vmem:[#allocation2 + $0x22e] sm:$0xff] }
 0x564   : > { %12437 = vmatprep.mubr.msk.f32.mxu1 %vm1194_vm5, %v7980_v56  ;;  %v7988_v56 = vld [vmem:[#allocation2 + $0x236] sm:$0xff] }
 0x567   : > { %12438 = vmatmul.mubr.msk.f32.gmra.mrb[24].mxu1 %vm1194_vm5, %v7981_v5  ;;  %v7989_v5 = vld [vmem:[#allocation2 + $0x23e] sm:$0xff] }
 0x568   : > { %12440 = vmatprep.mubr.msk.f32.mxu1 %vm1194_vm5, %v7982_v44  ;;  %v7990_v44 = vld [vmem:[#allocation2 + $0x246] sm:$0xff] }
 0x56b   : > { %12441 = vmatmul.mubr.msk.f32.gmra.mrb[26].mxu1 %vm1194_vm5, %v7983_v53  ;;  %v7991_v53 = vld [vmem:[#allocation2 + $0x24e] sm:$0xff] }
 0x56c   : > { %12443 = vmatprep.mubr.msk.f32.mxu1 %vm1194_vm5, %v7984_v59  ;;  %v7992_v59 = vld [vmem:[#allocation2 + $0x256] sm:$0xff] }
 0x56f   : > { %12444 = vmatmul.mubr.msk.f32.gmra.mrb[28].mxu1 %vm1194_vm5, %v7985_v14  ;;  %v7993_v14 = vld [vmem:[#allocation2 + $0x25e] sm:$0xff] }
 0x570   : > { %12446 = vmatprep.mubr.msk.f32.mxu1 %vm1194_vm5, %v7986_v40  ;;  %v7994_v40 = vld [vmem:[#allocation2 + $0x266] sm:$0xff] }
 0x573   : > { %12447 = vmatmul.mubr.msk.f32.gmra.mrb[30].mxu1 %vm1194_vm5, %v7987_v51  ;;  %v7995_v51 = vld [vmem:[#allocation2 + $0x26e] sm:$0xff] }
 0x574   : > { %12449 = vmatprep.mubr.msk.f32.mxu1 %vm1194_vm5, %v7988_v56  ;;  %v7996_v56 = vld [vmem:[#allocation2 + $0x276] sm:$0xff] }
 0x577   : > { %12450 = vmatmul.mubr.msk.f32.gmra.mrb[32].mxu1 %vm1194_vm5, %v7989_v5  ;;  %v7997_v5 = vld [vmem:[#allocation2 + $0x27e] sm:$0xff] }
 0x578   : > { %12452 = vmatprep.mubr.msk.f32.mxu1 %vm1194_vm5, %v7990_v44  ;;  %v7998_v44 = vld [vmem:[#allocation2 + $0x286] sm:$0xff] }
 0x57b   : > { %12453 = vmatmul.mubr.msk.f32.gmra.mrb[34].mxu1 %vm1194_vm5, %v7991_v53  ;;  %v7999_v53 = vld [vmem:[#allocation2 + $0x28e] sm:$0xff] }
 0x57c   : > { %12455 = vmatprep.mubr.msk.f32.mxu1 %vm1194_vm5, %v7992_v59  ;;  %v8000_v59 = vld [vmem:[#allocation2 + $0x296] sm:$0xff] }
 0x57f   : > { %12456 = vmatmul.mubr.msk.f32.gmra.mrb[36].mxu1 %vm1194_vm5, %v7993_v14  ;;  %v8001_v14 = vld [vmem:[#allocation2 + $0x29e] sm:$0x3f] }
 0x580   : > { %12458 = vmatprep.mubr.msk.f32.mxu1 %vm1194_vm5, %v7994_v40 }
 0x583   : > { %12459 = vmatmul.mubr.msk.f32.gmra.mrb[38].mxu1 %vm1194_vm5, %v7995_v51  ;;  %v15414_v51 = vld [vmem:[#allocation8] ss:$0 sm:$0xff] }
 0x584   : > { %12461 = vmatprep.mubr.msk.f32.mxu1 %vm1194_vm5, %v7996_v56 }
 0x587   : > { %12462 = vmatmul.mubr.msk.f32.gmra.mrb[40].mxu1 %vm1194_vm5, %v7997_v5 }
 0x588   : > { %12464 = vmatprep.mubr.msk.f32.mxu1 %vm1194_vm5, %v7998_v44 }
 0x58b   : > { %12465 = vmatmul.mubr.msk.f32.gmra.mrb[42].mxu1 %vm1194_vm5, %v7999_v53 }
 0x58c   : > { %12467 = vmatprep.mubr.msk.f32.mxu1 %vm1194_vm5, %v8000_v59 }
 0x58f   : > { %12468 = vmatmul.mubr.msk.f32.gmra.mrb[44].mxu1 %vm1194_vm5, %v8001_v14 }
 0x5ca   : > { %v12355_v40 = vpop.f32.mrb[46].mxu1 }
 0x5cb   : > { %v12550_v56 = vadd.f32 %v12355_v40, %v15217_v52  ;;  %v8307_v37 = vpop.f32.mrb[47].mxu1 }
 0x5cc   : > { %v12551_v5 = vadd.f32 %v8307_v37, %v15219_v45 }
 0x5cd   : > { %v8782_v8 = vadd.f32 %v12550_v56, %v15414_v51 }
 0x5ce   : > { %v8781_v44 = vadd.f32 %v12551_v5, %v15414_v51  ;;  %v12358_v53 = vpop.f32.mrb[48].mxu1 }
 0x5cf   : > { %v8860_v33 = vmax.f32 %v8782_v8, 0.0  ;;  %v12552_v59 = vadd.f32 %v12358_v53, %v15223_v57  ;;  %v8317_v43 = vpop.f32.mrb[49].mxu1 }
 0x5d0   : > { %v8859_v16 = vmax.f32 %v8781_v44, 0.0  ;;  %v12553_v14 = vadd.f32 %v8317_v43, %v15225_v60 }
 0x5d1   : > { %8939 = vst.msk [vmem:[#allocation3 + $0x8] sm:$0xff] %vm8937_vm7, %v8860_v33  ;;  %v8784_v52 = vadd.f32 %v12552_v59, %v15414_v51 }
 0x5d2   : > { %8938 = vst.msk [vmem:[#allocation3] sm:$0xff] %vm8937_vm7, %v8859_v16  ;;  %v8783_v37 = vadd.f32 %v12553_v14, %v15414_v51  ;;  %v12361_v45 = vpop.f32.mrb[50].mxu1 }
 0x5d3   : > { %v8862_v40 = vmax.f32 %v8784_v52, 0.0  ;;  %v12554_v56 = vadd.f32 %v12361_v45, %v15229_v6  ;;  %v8327_v5 = vpop.f32.mrb[51].mxu1 }
 0x5d4   : > { %v8861_v8 = vmax.f32 %v8783_v37, 0.0  ;;  %v12555_v57 = vadd.f32 %v8327_v5, %v15231_v19 }
 0x5d5   : > { %8941 = vst.msk [vmem:[#allocation3 + $0x18] sm:$0xff] %vm8937_vm7, %v8862_v40  ;;  %v8786_v43 = vadd.f32 %v12554_v56, %v15414_v51 }
 0x5d6   : > { %8940 = vst.msk [vmem:[#allocation3 + $0x10] sm:$0xff] %vm8937_vm7, %v8861_v8  ;;  %v8785_v33 = vadd.f32 %v12555_v57, %v15414_v51  ;;  %v12364_v60 = vpop.f32.mrb[52].mxu1 }
 0x5d7   : > { %v8864_v16 = vmax.f32 %v8786_v43, 0.0  ;;  %v12556_v44 = vadd.f32 %v12364_v60, %v15235_v32  ;;  %v8337_v53 = vpop.f32.mrb[53].mxu1 }
 0x5d8   : > { %v8863_v59 = vmax.f32 %v8785_v33, 0.0  ;;  %v12557_v6 = vadd.f32 %v8337_v53, %v15237_v36 }
 0x5d9   : > { %8943 = vst.msk [vmem:[#allocation3 + $0x28] sm:$0xff] %vm8937_vm7, %v8864_v16  ;;  %v8788_v19 = vadd.f32 %v12556_v44, %v15414_v51  ;;  %v9017_v57 = vld [vmem:[#allocation3] ss:$2 sm:$0xff]  ;;  %v9021_v43 = vld [vmem:[#allocation3 + $0x1] ss:$2 sm:$0xff] }
 0x5da   : > { %8942 = vst.msk [vmem:[#allocation3 + $0x20] sm:$0xff] %vm8937_vm7, %v8863_v59  ;;  %v8787_v14 = vadd.f32 %v12557_v6, %v15414_v51  ;;  %v12367_v52 = vpop.f32.mrb[54].mxu1  ;;  %v9032_v6 = vmax.f32 %v9017_v57, %v9021_v43 }
 0x5db   : > { %v8866_v37 = vmax.f32 %v8788_v19, 0.0  ;;  %v12558_v45 = vadd.f32 %v12367_v52, %v15241_v42  ;;  %v8347_v40 = vpop.f32.mrb[55].mxu1 }
 0x5dc   : > { %v8865_v56 = vmax.f32 %v8787_v14, 0.0  ;;  %v12559_v32 = vadd.f32 %v8347_v40, %v15243_v24 }
 0x5dd   : > { %8945 = vst.msk [vmem:[#allocation3 + $0x38] sm:$0xff] %vm8937_vm7, %v8866_v37  ;;  %v8790_v36 = vadd.f32 %v12558_v45, %v15414_v51  ;;  %v9019_v19 = vld [vmem:[#allocation3 + $0x10] ss:$2 sm:$0xf] }
 0x5de   : > { %8944 = vst.msk [vmem:[#allocation3 + $0x30] sm:$0xff] %vm8937_vm7, %v8865_v56  ;;  %v8789_v5 = vadd.f32 %v12559_v32, %v15414_v51  ;;  %v12370_v8 = vpop.f32.mrb[56].mxu1  ;;  %v9023_v45 = vld [vmem:[#allocation3 + $0x11] ss:$2 sm:$0xf] }
 0x5df   : > { %v8868_v33 = vmax.f32 %v8790_v36, 0.0  ;;  %v12560_v60 = vadd.f32 %v12370_v8, %v15247_v58  ;;  %v8357_v42 = vpop.f32.mrb[57].mxu1  ;;  %v9033_v43 = vmax.f32 %v9019_v19, %v9023_v45 }
 0x5e0   : > { %v8867_v16 = vmax.f32 %v8789_v5, 0.0  ;;  %v12561_v44 = vadd.f32 %v8357_v42, %v15249_v9 }
 0x5e1   : > { %v9025_v24 = vld [vmem:[#allocation3 + $0x1a] ss:$2 sm:$0xff]  ;;  %v9029_v53 = vld [vmem:[#allocation3 + $0x1b] ss:$2 sm:$0xff]  ;;  %8947 = vst.msk [vmem:[#allocation3 + $0x48] sm:$0xff] %vm8937_vm7, %v8868_v33  ;;  %v8792_v59 = vadd.f32 %v12560_v60, %v15414_v51 }
 0x5e2   : > { %v9034_v14 = vmax.f32 %v9025_v24, %v9029_v53  ;;  %8946 = vst.msk [vmem:[#allocation3 + $0x40] sm:$0xff] %vm8937_vm7, %v8867_v16  ;;  %v8791_v52 = vadd.f32 %v12561_v44, %v15414_v51  ;;  %v12373_v37 = vpop.f32.mrb[58].mxu1 }
 0x5e3   : > { %v8870_v58 = vmax.f32 %v8792_v59, 0.0  ;;  %v12562_v9 = vadd.f32 %v12373_v37, %v15253_v34  ;;  %v8367_v40 = vpop.f32.mrb[59].mxu1 }
 0x5e4   : > { %v9036_v56 = vmax.f32 %v9032_v6, %v9034_v14  ;;  %v8869_v32 = vmax.f32 %v8791_v52, 0.0  ;;  %v12563_v36 = vadd.f32 %v8367_v40, %v15255_v46 }
 0x5e5   : > { %v9027_v5 = vld [vmem:[#allocation3 + $0x2a] ss:$2 sm:$0xf]  ;;  %v9031_v8 = vld [vmem:[#allocation3 + $0x2b] ss:$2 sm:$0xf]  ;;  %v8794_v57 = vadd.f32 %v12562_v9, %v15414_v51 }
 0x5e6   : > { %8949 = vst.msk [vmem:[#allocation3 + $0x58] sm:$0xff] %vm8937_vm7, %v8870_v58  ;;  %9038 = vst.msk [vmem:[%s15454_s30] sm:$0xff] %vm8937_vm7, %v9036_v56  ;;  %v9035_v33 = vmax.f32 %v9027_v5, %v9031_v8  ;;  %v8793_v34 = vadd.f32 %v12563_v36, %v15414_v51  ;;  %v12376_v60 = vpop.f32.mrb[60].mxu1 }
 0x5e7   : > { %8948 = vst.msk [vmem:[#allocation3 + $0x50] sm:$0xff] %vm8937_vm7, %v8869_v32  ;;  %v8872_v42 = vmax.f32 %v8794_v57, 0.0  ;;  %v12564_v46 = vadd.f32 %v12376_v60, %v15259_v55  ;;  %v8377_v16 = vpop.f32.mrb[61].mxu1 }
 0x5e8   : > { %v9037_v44 = vmax.f32 %v9033_v43, %v9035_v33  ;;  %v8871_v24 = vmax.f32 %v8793_v34, 0.0  ;;  %v12565_v53 = vadd.f32 %v8377_v16, %v15261_v38 }
 0x5e9   : > { %8951 = vst.msk [vmem:[#allocation3 + $0x68] sm:$0xff] %vm8937_vm7, %v8872_v42  ;;  %v8796_v59 = vadd.f32 %v12564_v46, %v15414_v51  ;;  %v9042_v14 = vld [vmem:[#allocation3 + $0x34] ss:$2 sm:$0xff]  ;;  %v9046_v52 = vld [vmem:[#allocation3 + $0x35] ss:$2 sm:$0xff] }
 0x5ea   : > { %9040 = vst.msk [vmem:[%s15454_s30 + $0x8] sm:$0xf] %vm9039_vm8, %v9037_v44  ;;  %v8795_v6 = vadd.f32 %v12565_v53, %v15414_v51  ;;  %v12379_v19 = vpop.f32.mrb[62].mxu1  ;;  %v9044_v32 = vld [vmem:[#allocation3 + $0x44] ss:$2 sm:$0xf]  ;;  %v9057_v36 = vmax.f32 %v9042_v14, %v9046_v52 }
 0x5eb   : > { %8950 = vst.msk [vmem:[#allocation3 + $0x60] sm:$0xff] %vm8937_vm7, %v8871_v24  ;;  %v8874_v37 = vmax.f32 %v8796_v59, 0.0  ;;  %v12566_v55 = vadd.f32 %v12379_v19, %v15265_v10  ;;  %v8387_v45 = vpop.f32.mrb[63].mxu1  ;;  %v9048_v10 = vld [vmem:[#allocation3 + $0x45] ss:$2 sm:$0xf] }
 0x5ec   : > { %v8873_v58 = vmax.f32 %v8795_v6, 0.0  ;;  %v12567_v38 = vadd.f32 %v8387_v45, %v15267_v7  ;;  %v9058_v24 = vmax.f32 %v9044_v32, %v9048_v10 }
 0x5ed   : > { %8953 = vst.msk [vmem:[#allocation3 + $0x78] sm:$0xff] %vm8937_vm7, %v8874_v37  ;;  %v8798_v56 = vadd.f32 %v12566_v55, %v15414_v51 }
 0x5ee   : > { %v9050_v9 = vld [vmem:[#allocation3 + $0x4e] ss:$2 sm:$0xff]  ;;  %v9054_v40 = vld [vmem:[#allocation3 + $0x4f] ss:$2 sm:$0xff]  ;;  %8952 = vst.msk [vmem:[#allocation3 + $0x70] sm:$0xff] %vm8937_vm7, %v8873_v58  ;;  %v8797_v8 = vadd.f32 %v12567_v38, %v15414_v51  ;;  %v12382_v57 = vpop.f32.mrb[64].mxu1 }
 0x5ef   : > { %v9059_v5 = vmax.f32 %v9050_v9, %v9054_v40  ;;  %v8876_v43 = vmax.f32 %v8798_v56, 0.0  ;;  %v12568_v33 = vadd.f32 %v12382_v57, %v15271_v50  ;;  %v8397_v7 = vpop.f32.mrb[65].mxu1 }
 0x5f0   : > { %v8875_v60 = vmax.f32 %v8797_v8, 0.0  ;;  %v12569_v42 = vadd.f32 %v8397_v7, %v15273_v25 }
 0x5f1   : > { %v9061_v34 = vmax.f32 %v9057_v36, %v9059_v5  ;;  %8955 = vst.msk [vmem:[#allocation3 + $0x88] sm:$0xff] %vm8937_vm7, %v8876_v43  ;;  %v8800_v44 = vadd.f32 %v12568_v33, %v15414_v51 }
 0x5f2   : > { %v9052_v46 = vld [vmem:[#allocation3 + $0x5e] ss:$2 sm:$0xf]  ;;  %v9056_v16 = vld [vmem:[#allocation3 + $0x5f] ss:$2 sm:$0xf]  ;;  %v8799_v50 = vadd.f32 %v12569_v42, %v15414_v51 }
 0x5f3   : > { %10237 = vst.msk [vmem:[%s15454_s30 + $0x10] sm:$0xff] %vm8937_vm7, %v9061_v34  ;;  %v9060_v53 = vmax.f32 %v9052_v46, %v9056_v16  ;;  %8954 = vst.msk [vmem:[#allocation3 + $0x80] sm:$0xff] %vm8937_vm7, %v8875_v60  ;;  %v12385_v59 = vpop.f32.mrb[66].mxu1  ;;  %v8878_v6 = vmax.f32 %v8800_v44, 0.0 }
 0x5f4   : > { %v12570_v19 = vadd.f32 %v12385_v59, %v15277_v2  ;;  %v8407_v25 = vpop.f32.mrb[67].mxu1  ;;  %v8877_v37 = vmax.f32 %v8799_v50, 0.0  ;;  %v9069_v5 = vld [vmem:[#allocation3 + $0x78] ss:$2 sm:$0xf] }
 0x5f5   : > { %v9062_v14 = vmax.f32 %v9058_v24, %v9060_v53  ;;  %v12571_v52 = vadd.f32 %v8407_v25, %v15279_v15  ;;  %8957 = vst.msk [vmem:[#allocation3 + $0x98] sm:$0xff] %vm8937_vm7, %v8878_v6  ;;  %v9073_v43 = vld [vmem:[#allocation3 + $0x79] ss:$2 sm:$0xf]  ;;  %v9067_v7 = vld [vmem:[#allocation3 + $0x68] ss:$2 sm:$0xff] }
 0x5f6   : > { %v8802_v55 = vadd.f32 %v12570_v19, %v15414_v51  ;;  %v12388_v58 = vpop.f32.mrb[68].mxu1  ;;  %8956 = vst.msk [vmem:[#allocation3 + $0x90] sm:$0xff] %vm8937_vm7, %v8877_v37  ;;  %v9083_v44 = vmax.f32 %v9069_v5, %v9073_v43 }
 0x5f7   : > { %10238 = vst.msk [vmem:[%s15454_s30 + $0x18] sm:$0xf] %vm9039_vm8, %v9062_v14  ;;  %v8801_v45 = vadd.f32 %v12571_v52, %v15414_v51  ;;  %v12572_v9 = vadd.f32 %v12388_v58, %v15283_v39  ;;  %v8417_v2 = vpop.f32.mrb[69].mxu1 }
 0x5f8   : > { %v8880_v38 = vmax.f32 %v8802_v55, 0.0  ;;  %v12573_v56 = vadd.f32 %v8417_v2, %v15285_v63  ;;  %v9071_v63 = vld [vmem:[#allocation3 + $0x69] ss:$2 sm:$0xff] }
 0x5f9   : > { %v8879_v40 = vmax.f32 %v8801_v45, 0.0  ;;  %v8804_v15 = vadd.f32 %v12572_v9, %v15414_v51 }
 0x5fa   : > { %8959 = vst.msk [vmem:[#allocation3 + $0xa8] sm:$0xff] %vm8937_vm7, %v8880_v38  ;;  %v8803_v32 = vadd.f32 %v12573_v56, %v15414_v51  ;;  %v12391_v36 = vpop.f32.mrb[70].mxu1 }
 0x5fb   : > { %8958 = vst.msk [vmem:[#allocation3 + $0xa0] sm:$0xff] %vm8937_vm7, %v8879_v40  ;;  %v8882_v8 = vmax.f32 %v8804_v15, 0.0  ;;  %v12574_v57 = vadd.f32 %v12391_v36, %v15289_v41  ;;  %v8427_v10 = vpop.f32.mrb[71].mxu1 }
 0x5fc   : > { %v8881_v39 = vmax.f32 %v8803_v32, 0.0  ;;  %v12575_v33 = vadd.f32 %v8427_v10, %v15291_v22  ;;  %v9082_v22 = vmax.f32 %v9067_v7, %v9071_v63 }
 0x5fd   : > { %8961 = vst.msk [vmem:[#allocation3 + $0xb8] sm:$0xff] %vm8937_vm7, %v8882_v8  ;;  %v8806_v34 = vadd.f32 %v12574_v57, %v15414_v51  ;;  %v9075_v60 = vld [vmem:[#allocation3 + $0x82] ss:$2 sm:$0xff]  ;;  %v9077_v42 = vld [vmem:[#allocation3 + $0x92] ss:$2 sm:$0xf] }
 0x5fe   : > { %8960 = vst.msk [vmem:[#allocation3 + $0xb0] sm:$0xff] %vm8937_vm7, %v8881_v39  ;;  %v8805_v46 = vadd.f32 %v12575_v33, %v15414_v51  ;;  %v12394_v16 = vpop.f32.mrb[72].mxu1  ;;  %v9079_v41 = vld [vmem:[#allocation3 + $0x83] ss:$2 sm:$0xff] }
 0x5ff   : > { %v9081_v24 = vld [vmem:[#allocation3 + $0x93] ss:$2 sm:$0xf]  ;;  %v8884_v53 = vmax.f32 %v8806_v34, 0.0  ;;  %v12576_v50 = vadd.f32 %v12394_v16, %v15295_v11  ;;  %v9084_v59 = vmax.f32 %v9075_v60, %v9079_v41  ;;  %v8437_v25 = vpop.f32.mrb[73].mxu1 }
 0x600   : > { %v9085_v6 = vmax.f32 %v9077_v42, %v9081_v24  ;;  %v8883_v19 = vmax.f32 %v8805_v46, 0.0  ;;  %v12577_v52 = vadd.f32 %v8437_v25, %v15297_v54 }
 0x601   : > { %8963 = vst.msk [vmem:[#allocation3 + $0xc8] sm:$0xff] %vm8937_vm7, %v8884_v53  ;;  %v8808_v14 = vadd.f32 %v12576_v50, %v15414_v51  ;;  %v9086_v37 = vmax.f32 %v9082_v22, %v9084_v59 }
 0x602   : > { %v9087_v55 = vmax.f32 %v9083_v44, %v9085_v6  ;;  %8962 = vst.msk [vmem:[#allocation3 + $0xc0] sm:$0xff] %vm8937_vm7, %v8883_v19  ;;  %v12397_v45 = vpop.f32.mrb[74].mxu1  ;;  %v8807_v11 = vadd.f32 %v12577_v52, %v15414_v51  ;;  %v9092_v40 = vld [vmem:[#allocation3 + $0x9c] ss:$2 sm:$0xff]  ;;  %v9096_v56 = vld [vmem:[#allocation3 + $0x9d] ss:$2 sm:$0xff] }
 0x603   : > { %v8886_v58 = vmax.f32 %v8808_v14, 0.0  ;;  %v12578_v38 = vadd.f32 %v12397_v45, %v15301_v48  ;;  %v8447_v9 = vpop.f32.mrb[75].mxu1  ;;  %10239 = vst.msk [vmem:[%s15454_s30 + $0x20] sm:$0xff] %vm8937_vm7, %v9086_v37  ;;  %v9107_v63 = vmax.f32 %v9092_v40, %v9096_v56 }
 0x604   : > { %10240 = vst.msk [vmem:[%s15454_s30 + $0x28] sm:$0xf] %vm9039_vm8, %v9087_v55  ;;  %v12579_v2 = vadd.f32 %v8447_v9, %v15303_v1  ;;  %v8885_v32 = vmax.f32 %v8807_v11, 0.0 }
 0x605   : > { %8965 = vst.msk [vmem:[#allocation3 + $0xd8] sm:$0xff] %vm8937_vm7, %v8886_v58  ;;  %v8810_v54 = vadd.f32 %v12578_v38, %v15414_v51  ;;  %v9094_v15 = vld [vmem:[#allocation3 + $0xac] ss:$2 sm:$0xf] }
 0x606   : > { %v8809_v36 = vadd.f32 %v12579_v2, %v15414_v51  ;;  %v12400_v5 = vpop.f32.mrb[76].mxu1  ;;  %v9098_v8 = vld [vmem:[#allocation3 + $0xad] ss:$2 sm:$0xf]  ;;  %8964 = vst.msk [vmem:[#allocation3 + $0xd0] sm:$0xff] %vm8937_vm7, %v8885_v32 }
 0x607   : > { %v8888_v48 = vmax.f32 %v8810_v54, 0.0  ;;  %v12580_v57 = vadd.f32 %v12400_v5, %v15307_v17  ;;  %v8457_v10 = vpop.f32.mrb[77].mxu1  ;;  %v9108_v34 = vmax.f32 %v9094_v15, %v9098_v8 }
 0x608   : > { %v8887_v43 = vmax.f32 %v8809_v36, 0.0  ;;  %v12581_v1 = vadd.f32 %v8457_v10, %v15309_v47 }
 0x609   : > { %v9100_v39 = vld [vmem:[#allocation3 + $0xb6] ss:$2 sm:$0xff]  ;;  %v9102_v33 = vld [vmem:[#allocation3 + $0xc6] ss:$2 sm:$0xf]  ;;  %8967 = vst.msk [vmem:[#allocation3 + $0xe8] sm:$0xff] %vm8937_vm7, %v8888_v48  ;;  %v8812_v7 = vadd.f32 %v12580_v57, %v15414_v51 }
 0x60a   : > { %v9104_v60 = vld [vmem:[#allocation3 + $0xb7] ss:$2 sm:$0xff]  ;;  %v9106_v42 = vld [vmem:[#allocation3 + $0xc7] ss:$2 sm:$0xf]  ;;  %8966 = vst.msk [vmem:[#allocation3 + $0xe0] sm:$0xff] %vm8937_vm7, %v8887_v43  ;;  %v8811_v17 = vadd.f32 %v12581_v1, %v15414_v51 }
 0x60b   : > { %v12403_v46 = vpop.f32.mrb[0].mxu1  ;;  %v9109_v16 = vmax.f32 %v9100_v39, %v9104_v60  ;;  %v9110_v44 = vmax.f32 %v9102_v33, %v9106_v42  ;;  %v8890_v47 = vmax.f32 %v8812_v7, 0.0 }
 0x60c   : > { %v12582_v41 = vadd.f32 %v12403_v46, %v15053_v61  ;;  %v8467_v24 = vpop.f32.mrb[1].mxu1  ;;  %v8889_v53 = vmax.f32 %v8811_v17, 0.0 }
 0x60d   : > { %v12583_v50 = vadd.f32 %v8467_v24, %v15055_v62  ;;  %v9111_v22 = vmax.f32 %v9107_v63, %v9109_v16  ;;  %v9112_v59 = vmax.f32 %v9108_v34, %v9110_v44  ;;  %8969 = vst.msk [vmem:[#allocation3 + $0xf8] sm:$0xff] %vm8937_vm7, %v8890_v47  ;;  %v9117_v11 = vld [vmem:[#allocation3 + $0xd0] ss:$2 sm:$0xff]  ;;  %v9121_v38 = vld [vmem:[#allocation3 + $0xd1] ss:$2 sm:$0xff] }
 0x60e   : > { %v8814_v6 = vadd.f32 %v12582_v41, %v15414_v51  ;;  %8968 = vst.msk [vmem:[#allocation3 + $0xf0] sm:$0xff] %vm8937_vm7, %v8889_v53  ;;  %v12406_v25 = vpop.f32.mrb[2].mxu1  ;;  %v9132_v32 = vmax.f32 %v9117_v11, %v9121_v38 }
 0x60f   : > { %v8813_v19 = vadd.f32 %v12583_v50, %v15414_v51  ;;  %10241 = vst.msk [vmem:[%s15454_s30 + $0x30] sm:$0xff] %vm8937_vm7, %v9111_v22  ;;  %v12584_v14 = vadd.f32 %v12406_v25, %v15061_v3  ;;  %v8477_v52 = vpop.f32.mrb[3].mxu1 }
 0x610   : > { %10242 = vst.msk [vmem:[%s15454_s30 + $0x38] sm:$0xf] %vm9039_vm8, %v9112_v59  ;;  %v8892_v61 = vmax.f32 %v8814_v6, 0.0  ;;  %v12585_v37 = vadd.f32 %v8477_v52, %v15063_v4 }
 0x611   : > { %v8891_v62 = vmax.f32 %v8813_v19, 0.0  ;;  %v8816_v55 = vadd.f32 %v12584_v14, %v15414_v51  ;;  %v9119_v36 = vld [vmem:[#allocation3 + $0xe0] ss:$2 sm:$0xf] }
 0x612   : > { %8971 = vst.msk [vmem:[#allocation3 + $0x108] sm:$0xff] %vm8937_vm7, %v8892_v61  ;;  %v8815_v45 = vadd.f32 %v12585_v37, %v15414_v51  ;;  %v12409_v58 = vpop.f32.mrb[4].mxu1 }
 0x613   : > { %8970 = vst.msk [vmem:[#allocation3 + $0x100] sm:$0xff] %vm8937_vm7, %v8891_v62  ;;  %v8894_v9 = vmax.f32 %v8816_v55, 0.0  ;;  %v12586_v2 = vadd.f32 %v12409_v58, %v15069_v49  ;;  %v8487_v40 = vpop.f32.mrb[5].mxu1  ;;  %v9123_v49 = vld [vmem:[#allocation3 + $0xe1] ss:$2 sm:$0xf] }
 0x614   : > { %v8893_v3 = vmax.f32 %v8815_v45, 0.0  ;;  %v12587_v56 = vadd.f32 %v8487_v40, %v15071_v18  ;;  %v9133_v34 = vmax.f32 %v9119_v36, %v9123_v49 }
 0x615   : > { %v9125_v54 = vld [vmem:[#allocation3 + $0xea] ss:$2 sm:$0xff]  ;;  %v9129_v4 = vld [vmem:[#allocation3 + $0xeb] ss:$2 sm:$0xff]  ;;  %8973 = vst.msk [vmem:[#allocation3 + $0x118] sm:$0xff] %vm8937_vm7, %v8894_v9  ;;  %v8818_v15 = vadd.f32 %v12586_v2, %v15414_v51 }
 0x616   : > { %v9134_v5 = vmax.f32 %v9125_v54, %v9129_v4  ;;  %8972 = vst.msk [vmem:[#allocation3 + $0x110] sm:$0xff] %vm8937_vm7, %v8893_v3  ;;  %v8817_v8 = vadd.f32 %v12587_v56, %v15414_v51  ;;  %v12412_v48 = vpop.f32.mrb[6].mxu1 }
 0x617   : > { %v8896_v57 = vmax.f32 %v8818_v15, 0.0  ;;  %v12588_v10 = vadd.f32 %v12412_v48, %v15077_v13  ;;  %v8497_v18 = vpop.f32.mrb[7].mxu1 }
 0x618   : > { %v9136_v43 = vmax.f32 %v9132_v32, %v9134_v5  ;;  %v8895_v1 = vmax.f32 %v8817_v8, 0.0  ;;  %v12589_v39 = vadd.f32 %v8497_v18, %v15079_v0 }
 0x619   : > { %8975 = vst.msk [vmem:[#allocation3 + $0x128] sm:$0xff] %vm8937_vm7, %v8896_v57  ;;  %v8820_v63 = vadd.f32 %v12588_v10, %v15414_v51 }
 0x61a   : > { %v9127_v33 = vld [vmem:[#allocation3 + $0xfa] ss:$2 sm:$0xf]  ;;  %v9131_v7 = vld [vmem:[#allocation3 + $0xfb] ss:$2 sm:$0xf]  ;;  %v8819_v13 = vadd.f32 %v12589_v39, %v15414_v51 }
 0x61b   : > { %10243 = vst.msk [vmem:[%s15454_s30 + $0x40] sm:$0xff] %vm8937_vm7, %v9136_v43  ;;  %v9135_v60 = vmax.f32 %v9127_v33, %v9131_v7  ;;  %8974 = vst.msk [vmem:[#allocation3 + $0x120] sm:$0xff] %vm8937_vm7, %v8895_v1  ;;  %v12415_v42 = vpop.f32.mrb[8].mxu1  ;;  %v8898_v17 = vmax.f32 %v8820_v63, 0.0 }
 0x61c   : > { %v12590_v46 = vadd.f32 %v12415_v42, %v15085_v21  ;;  %v8507_v0 = vpop.f32.mrb[9].mxu1  ;;  %v8897_v44 = vmax.f32 %v8819_v13, 0.0 }
 0x61d   : > { %v9137_v16 = vmax.f32 %v9133_v34, %v9135_v60  ;;  %v12591_v47 = vadd.f32 %v8507_v0, %v15087_v23  ;;  %8977 = vst.msk [vmem:[#allocation3 + $0x138] sm:$0xff] %vm8937_vm7, %v8898_v17  ;;  %v9142_v50 = vld [vmem:[#allocation3 + $0x104] ss:$2 sm:$0xff]  ;;  %v9146_v22 = vld [vmem:[#allocation3 + $0x105] ss:$2 sm:$0xff] }
 0x61e   : > { %v8822_v41 = vadd.f32 %v12590_v46, %v15414_v51  ;;  %8976 = vst.msk [vmem:[#allocation3 + $0x130] sm:$0xff] %vm8937_vm7, %v8897_v44  ;;  %v12418_v53 = vpop.f32.mrb[10].mxu1  ;;  %v9144_v52 = vld [vmem:[#allocation3 + $0x114] ss:$2 sm:$0xf]  ;;  %v9157_v62 = vmax.f32 %v9142_v50, %v9146_v22  ;;  %v15879_v17 = vld [vmem:[#allocation11_spill] sm:$0xff] }
 0x61f   : > { %10244 = vst.msk [vmem:[%s15454_s30 + $0x48] sm:$0xf] %vm9039_vm8, %v9137_v16  ;;  %v8821_v24 = vadd.f32 %v12591_v47, %v15414_v51  ;;  %v12592_v21 = vadd.f32 %v12418_v53, %v15093_v26  ;;  %v8517_v6 = vpop.f32.mrb[11].mxu1  ;;  %v9148_v26 = vld [vmem:[#allocation3 + $0x115] ss:$2 sm:$0xf] }
 0x620   : > { %v8900_v59 = vmax.f32 %v8822_v41, 0.0  ;;  %v12593_v23 = vadd.f32 %v8517_v6, %v15095_v27  ;;  %v9158_v54 = vmax.f32 %v9144_v52, %v9148_v26  ;;  %v15881_v52 = vld [vmem:[#allocation13_spill] sm:$0xff] }
 0x621   : > { %v8899_v19 = vmax.f32 %v8821_v24, 0.0  ;;  %v8824_v14 = vadd.f32 %v12592_v21, %v15414_v51 }
 0x622   : > { %v9150_v25 = vld [vmem:[#allocation3 + $0x11e] ss:$2 sm:$0xff]  ;;  %v9154_v61 = vld [vmem:[#allocation3 + $0x11f] ss:$2 sm:$0xff]  ;;  %8979 = vst.msk [vmem:[#allocation3 + $0x148] sm:$0xff] %vm8937_vm7, %v8900_v59  ;;  %v8823_v55 = vadd.f32 %v12593_v23, %v15414_v51  ;;  %v12421_v45 = vpop.f32.mrb[12].mxu1 }
 0x623   : > { %v9159_v37 = vmax.f32 %v9150_v25, %v9154_v61  ;;  %8978 = vst.msk [vmem:[#allocation3 + $0x140] sm:$0xff] %vm8937_vm7, %v8899_v19  ;;  %v8902_v58 = vmax.f32 %v8824_v14, 0.0  ;;  %v12594_v11 = vadd.f32 %v12421_v45, %v15101_v28  ;;  %v8527_v27 = vpop.f32.mrb[13].mxu1  ;;  %v15880_v59 = vld [vmem:[#allocation12_spill] sm:$0xff] }
 0x624   : > { %v8901_v9 = vmax.f32 %v8823_v55, 0.0  ;;  %v12595_v2 = vadd.f32 %v8527_v27, %v15103_v29 }
 0x625   : > { %v9161_v38 = vmax.f32 %v9157_v62, %v9159_v37  ;;  %v9152_v40 = vld [vmem:[#allocation3 + $0x12e] ss:$2 sm:$0xf]  ;;  %v9156_v3 = vld [vmem:[#allocation3 + $0x12f] ss:$2 sm:$0xf]  ;;  %v8826_v56 = vadd.f32 %v12594_v11, %v15414_v51 }
 0x626   : > { %8981 = vst.msk [vmem:[#allocation3 + $0x158] sm:$0xff] %vm8937_vm7, %v8902_v58  ;;  %v9160_v4 = vmax.f32 %v9152_v40, %v9156_v3  ;;  %8980 = vst.msk [vmem:[#allocation3 + $0x150] sm:$0xff] %vm8937_vm7, %v8901_v9  ;;  %v8825_v28 = vadd.f32 %v12595_v2, %v15414_v51  ;;  %v12424_v15 = vpop.f32.mrb[14].mxu1  ;;  %v15882_v11 = vld [vmem:[#allocation14_spill] sm:$0xff]  ;;  %v15883_v9 = vld [vmem:[#allocation15_spill] sm:$0xff] }
 0x627   : > { %10245 = vst.msk [vmem:[%s15454_s30 + $0x50] sm:$0xff] %vm8937_vm7, %v9161_v38  ;;  %v8904_v32 = vmax.f32 %v8826_v56, 0.0  ;;  %v12596_v36 = vadd.f32 %v12424_v15, %v15109_v30  ;;  %v8537_v29 = vpop.f32.mrb[15].mxu1 }
 0x628   : > { %v9162_v5 = vmax.f32 %v9158_v54, %v9160_v4  ;;  %v12597_v8 = vadd.f32 %v8537_v29, %v15111_v31  ;;  %v8903_v48 = vmax.f32 %v8825_v28, 0.0  ;;  %v15884_v29 = vld [vmem:[#allocation16_spill] sm:$0xff] }
 0x629   : > { %8983 = vst.msk [vmem:[#allocation3 + $0x168] sm:$0xff] %vm8937_vm7, %v8904_v32  ;;  %v8828_v49 = vadd.f32 %v12596_v36, %v15414_v51  ;;  %v9169_v63 = vld [vmem:[#allocation3 + $0x148] ss:$2 sm:$0xf] }
 0x62a   : > { %10246 = vst.msk [vmem:[%s15454_s30 + $0x58] sm:$0xf] %vm9039_vm8, %v9162_v5  ;;  %v8827_v57 = vadd.f32 %v12597_v8, %v15414_v51  ;;  %v12427_v10 = vpop.f32.mrb[16].mxu1  ;;  %v9173_v42 = vld [vmem:[#allocation3 + $0x149] ss:$2 sm:$0xf] }
 0x62b   : > { %8982 = vst.msk [vmem:[#allocation3 + $0x160] sm:$0xff] %vm8937_vm7, %v8903_v48  ;;  %v8906_v18 = vmax.f32 %v8828_v49, 0.0  ;;  %v12598_v43 = vadd.f32 %v12427_v10, %v15117_v20  ;;  %v8547_v30 = vpop.f32.mrb[17].mxu1  ;;  %v9167_v0 = vld [vmem:[#allocation3 + $0x138] ss:$2 sm:$0xff]  ;;  %v9183_v53 = vmax.f32 %v9169_v63, %v9173_v42 }
 0x62c   : > { %v8905_v1 = vmax.f32 %v8827_v57, 0.0  ;;  %v12599_v39 = vadd.f32 %v8547_v30, %v15119_v35  ;;  %v9171_v35 = vld [vmem:[#allocation3 + $0x139] ss:$2 sm:$0xff] }
 0x62d   : > { %8985 = vst.msk [vmem:[#allocation3 + $0x178] sm:$0xff] %vm8937_vm7, %v8906_v18  ;;  %v8830_v31 = vadd.f32 %v12598_v43, %v15414_v51  ;;  %v9182_v6 = vmax.f32 %v9167_v0, %v9171_v35  ;;  %v15885_v49 = vld [vmem:[#allocation17_spill] sm:$0xff] }
 0x62e   : > { %8984 = vst.msk [vmem:[#allocation3 + $0x170] sm:$0xff] %vm8937_vm7, %v8905_v1  ;;  %v8829_v33 = vadd.f32 %v12599_v39, %v15414_v51  ;;  %v12430_v7 = vpop.f32.mrb[18].mxu1 }
 0x62f   : > { %v8908_v34 = vmax.f32 %v8830_v31, 0.0  ;;  %v12600_v60 = vadd.f32 %v12430_v7, %v15125_v12  ;;  %v8557_v13 = vpop.f32.mrb[19].mxu1 }
 0x630   : > { %v8907_v20 = vmax.f32 %v8829_v33, 0.0  ;;  %v12601_v46 = vadd.f32 %v8557_v13, %v15879_v17  ;;  %v15886_v13 = vld [vmem:[#allocation18_spill] sm:$0xff] }
 0x631   : > { %8987 = vst.msk [vmem:[#allocation3 + $0x188] sm:$0xff] %vm8937_vm7, %v8908_v34  ;;  %v8832_v16 = vadd.f32 %v12600_v60, %v15414_v51 }
 0x632   : > { %v9175_v44 = vld [vmem:[#allocation3 + $0x152] ss:$2 sm:$0xff]  ;;  %v9177_v47 = vld [vmem:[#allocation3 + $0x162] ss:$2 sm:$0xf]  ;;  %8986 = vst.msk [vmem:[#allocation3 + $0x180] sm:$0xff] %vm8937_vm7, %v8907_v20  ;;  %v8831_v41 = vadd.f32 %v12601_v46, %v15414_v51 }
 0x633   : > { %v12433_v24 = vpop.f32.mrb[20].mxu1  ;;  %v9179_v12 = vld [vmem:[#allocation3 + $0x153] ss:$2 sm:$0xff]  ;;  %v9181_v50 = vld [vmem:[#allocation3 + $0x163] ss:$2 sm:$0xf] }
 0x634   : > { %v8910_v22 = vmax.f32 %v8832_v16, 0.0  ;;  %v12602_v21 = vadd.f32 %v12433_v24, %v15880_v59  ;;  %v9184_v19 = vmax.f32 %v9175_v44, %v9179_v12  ;;  %v9185_v23 = vmax.f32 %v9177_v47, %v9181_v50  ;;  %v8567_v61 = vpop.f32.mrb[21].mxu1  ;;  %v15887_v46 = vld [vmem:[#allocation19_spill] sm:$0xff]  ;;  %v15889_v59 = vld [vmem:[#allocation21_spill] sm:$0xff] }
 0x635   : > { %v8909_v25 = vmax.f32 %v8831_v41, 0.0  ;;  %v12603_v62 = vadd.f32 %v8567_v61, %v15881_v52  ;;  %v9192_v40 = vld [vmem:[#allocation3 + $0x16c] ss:$2 sm:$0xff]  ;;  %v9196_v3 = vld [vmem:[#allocation3 + $0x16d] ss:$2 sm:$0xff]  ;;  %v15890_v52 = vld [vmem:[#allocation22_spill] sm:$0xff] }
 0x636   : > { %8989 = vst.msk [vmem:[#allocation3 + $0x198] sm:$0xff] %vm8937_vm7, %v8910_v22  ;;  %v8834_v14 = vadd.f32 %v12602_v21, %v15414_v51  ;;  %v9186_v37 = vmax.f32 %v9182_v6, %v9184_v19  ;;  %v9187_v55 = vmax.f32 %v9183_v53, %v9185_v23  ;;  %v12436_v45 = vpop.f32.mrb[22].mxu1  ;;  %v9207_v30 = vmax.f32 %v9192_v40, %v9196_v3  ;;  %v15888_v53 = vld [vmem:[#allocation20_spill] sm:$0xff] }
 0x637   : > { %8988 = vst.msk [vmem:[#allocation3 + $0x190] sm:$0xff] %vm8937_vm7, %v8909_v25  ;;  %v8833_v58 = vadd.f32 %v12603_v62, %v15414_v51  ;;  %v12604_v27 = vadd.f32 %v12436_v45, %v15882_v11  ;;  %v8577_v38 = vpop.f32.mrb[23].mxu1  ;;  %v15891_v45 = vld [vmem:[#allocation23_spill] sm:$0xff] }
 0x638   : > { %v8912_v26 = vmax.f32 %v8834_v14, 0.0  ;;  %10247 = vst.msk [vmem:[%s15454_s30 + $0x60] sm:$0xff] %vm8937_vm7, %v9186_v37  ;;  %v12605_v2 = vadd.f32 %v8577_v38, %v15883_v9 }
 0x639   : > { %10248 = vst.msk [vmem:[%s15454_s30 + $0x68] sm:$0xf] %vm9039_vm8, %v9187_v55  ;;  %v8836_v56 = vadd.f32 %v12604_v27, %v15414_v51  ;;  %v9194_v54 = vld [vmem:[#allocation3 + $0x17c] ss:$2 sm:$0xf]  ;;  %v8911_v4 = vmax.f32 %v8833_v58, 0.0 }
 0x63a   : > { %8991 = vst.msk [vmem:[#allocation3 + $0x1a8] sm:$0xff] %vm8937_vm7, %v8912_v26  ;;  %v8835_v28 = vadd.f32 %v12605_v2, %v15414_v51  ;;  %v12439_v15 = vpop.f32.mrb[24].mxu1  ;;  %v9198_v32 = vld [vmem:[#allocation3 + $0x17d] ss:$2 sm:$0xf] }
 0x63b   : > { %v8914_v36 = vmax.f32 %v8836_v56, 0.0  ;;  %v12606_v5 = vadd.f32 %v12439_v15, %v15884_v29  ;;  %v8587_v8 = vpop.f32.mrb[25].mxu1  ;;  %8990 = vst.msk [vmem:[#allocation3 + $0x1a0] sm:$0xff] %vm8937_vm7, %v8911_v4  ;;  %v9208_v1 = vmax.f32 %v9194_v54, %v9198_v32  ;;  %v15892_v4 = vld [vmem:[#allocation24_spill] sm:$0xff]  ;;  %v15893_v29 = vld [vmem:[#allocation25_spill] sm:$0xff] }
 0x63c   : > { %v8913_v48 = vmax.f32 %v8835_v28, 0.0  ;;  %v12607_v57 = vadd.f32 %v8587_v8, %v15885_v49 }
 0x63d   : > { %8993 = vst.msk [vmem:[#allocation3 + $0x1b8] sm:$0xff] %vm8937_vm7, %v8914_v36  ;;  %v8838_v43 = vadd.f32 %v12606_v5, %v15414_v51 }
 0x63e   : > { %v9200_v10 = vld [vmem:[#allocation3 + $0x186] ss:$2 sm:$0xff]  ;;  %v9202_v18 = vld [vmem:[#allocation3 + $0x196] ss:$2 sm:$0xf]  ;;  %8992 = vst.msk [vmem:[#allocation3 + $0x1b0] sm:$0xff] %vm8937_vm7, %v8913_v48  ;;  %v8837_v33 = vadd.f32 %v12607_v57, %v15414_v51 }
 0x63f   : > { %v9204_v39 = vld [vmem:[#allocation3 + $0x187] ss:$2 sm:$0xff]  ;;  %v9206_v31 = vld [vmem:[#allocation3 + $0x197] ss:$2 sm:$0xf]  ;;  %v12442_v7 = vpop.f32.mrb[26].mxu1 }
 0x640   : > { %v9209_v63 = vmax.f32 %v9200_v10, %v9204_v39  ;;  %v9210_v34 = vmax.f32 %v9202_v18, %v9206_v31  ;;  %v8916_v60 = vmax.f32 %v8838_v43, 0.0  ;;  %v12608_v42 = vadd.f32 %v12442_v7, %v15886_v13  ;;  %v8597_v20 = vpop.f32.mrb[27].mxu1 }
 0x641   : > { %v8915_v17 = vmax.f32 %v8837_v33, 0.0  ;;  %v12609_v0 = vadd.f32 %v8597_v20, %v15887_v46 }
 0x642   : > { %v9211_v35 = vmax.f32 %v9207_v30, %v9209_v63  ;;  %v9212_v16 = vmax.f32 %v9208_v1, %v9210_v34  ;;  %8995 = vst.msk [vmem:[#allocation3 + $0x1c8] sm:$0xff] %vm8937_vm7, %v8916_v60  ;;  %v8840_v44 = vadd.f32 %v12608_v42, %v15414_v51  ;;  %v12445_v41 = vpop.f32.mrb[28].mxu1  ;;  %v9217_v25 = vld [vmem:[#allocation3 + $0x1a0] ss:$2 sm:$0xff]  ;;  %v9221_v61 = vld [vmem:[#allocation3 + $0x1a1] ss:$2 sm:$0xff] }
 0x643   : > { %8994 = vst.msk [vmem:[#allocation3 + $0x1c0] sm:$0xff] %vm8937_vm7, %v8915_v17  ;;  %v8839_v47 = vadd.f32 %v12609_v0, %v15414_v51  ;;  %v12610_v12 = vadd.f32 %v12445_v41, %v15888_v53  ;;  %v8607_v50 = vpop.f32.mrb[29].mxu1  ;;  %v9232_v38 = vmax.f32 %v9217_v25, %v9221_v61  ;;  %v15894_v1 = vld [vmem:[#allocation26_spill] sm:$0xff]  ;;  %v15895_v63 = vld [vmem:[#allocation27_spill] sm:$0xff]  ;;  %v15896_v0 = vld [vmem:[#allocation28_spill] sm:$0xff] }
 0x644   : > { %10249 = vst.msk [vmem:[%s15454_s30 + $0x70] sm:$0xff] %vm8937_vm7, %v9211_v35  ;;  %v8918_v24 = vmax.f32 %v8840_v44, 0.0  ;;  %v12611_v21 = vadd.f32 %v8607_v50, %v15889_v59  ;;  %v15898_v25 = vld [vmem:[#allocation30_spill] sm:$0xff] }
 0x645   : > { %10250 = vst.msk [vmem:[%s15454_s30 + $0x78] sm:$0xf] %vm9039_vm8, %v9212_v16  ;;  %v8917_v22 = vmax.f32 %v8839_v47, 0.0  ;;  %v8842_v6 = vadd.f32 %v12610_v12, %v15414_v51  ;;  %v9219_v9 = vld [vmem:[#allocation3 + $0x1b0] ss:$2 sm:$0xf] }
 0x646   : > { %8997 = vst.msk [vmem:[#allocation3 + $0x1d8] sm:$0xff] %vm8937_vm7, %v8918_v24  ;;  %v8841_v19 = vadd.f32 %v12611_v21, %v15414_v51  ;;  %v12448_v23 = vpop.f32.mrb[30].mxu1  ;;  %v9223_v56 = vld [vmem:[#allocation3 + $0x1b1] ss:$2 sm:$0xf] }
 0x647   : > { %8996 = vst.msk [vmem:[#allocation3 + $0x1d0] sm:$0xff] %vm8937_vm7, %v8917_v22  ;;  %v8920_v14 = vmax.f32 %v8842_v6, 0.0  ;;  %v12612_v62 = vadd.f32 %v12448_v23, %v15890_v52  ;;  %v8617_v37 = vpop.f32.mrb[31].mxu1  ;;  %v9233_v57 = vmax.f32 %v9219_v9, %v9223_v56  ;;  %v15897_v47 = vld [vmem:[#allocation29_spill] sm:$0xff] }
 0x648   : > { %v8919_v55 = vmax.f32 %v8841_v19, 0.0  ;;  %v12613_v26 = vadd.f32 %v8617_v37, %v15891_v45  ;;  %v15899_v37 = vld [vmem:[#allocation31_spill] sm:$0xff] }
 0x649   : > { %8999 = vst.msk [vmem:[#allocation3 + $0x1e8] sm:$0xff] %vm8937_vm7, %v8920_v14  ;;  %v8844_v27 = vadd.f32 %v12612_v62, %v15414_v51 }
 0x64a   : > { %v9225_v58 = vld [vmem:[#allocation3 + $0x1ba] ss:$2 sm:$0xff]  ;;  %v9229_v11 = vld [vmem:[#allocation3 + $0x1bb] ss:$2 sm:$0xff]  ;;  %8998 = vst.msk [vmem:[#allocation3 + $0x1e0] sm:$0xff] %vm8937_vm7, %v8919_v55  ;;  %v8843_v40 = vadd.f32 %v12613_v26, %v15414_v51  ;;  %v12451_v3 = vpop.f32.mrb[32].mxu1 }
 0x64b   : > { %v9234_v2 = vmax.f32 %v9225_v58, %v9229_v11  ;;  %v8922_v54 = vmax.f32 %v8844_v27, 0.0  ;;  %v12614_v28 = vadd.f32 %v12451_v3, %v15892_v4  ;;  %v8627_v15 = vpop.f32.mrb[33].mxu1  ;;  %v13223_v58 = vld [vmem:[#allocation8] ss:$0 sm:$0xff]  ;;  %v15901_v4 = vld [vmem:[#allocation33_spill] sm:$0xff] }
 0x64c   : > { %v8921_v36 = vmax.f32 %v8843_v40, 0.0  ;;  %v12615_v5 = vadd.f32 %v8627_v15, %v15893_v29  ;;  %v15900_v40 = vld [vmem:[#allocation32_spill] sm:$0xff] }
 0x64d   : > { %v9236_v32 = vmax.f32 %v9232_v38, %v9234_v2  ;;  %9001 = vst.msk [vmem:[#allocation3 + $0x1f8] sm:$0xff] %vm8937_vm7, %v8922_v54  ;;  %v8846_v49 = vadd.f32 %v12614_v28, %v15414_v51 }
 0x64e   : > { %v9227_v8 = vld [vmem:[#allocation3 + $0x1ca] ss:$2 sm:$0xf]  ;;  %v9231_v48 = vld [vmem:[#allocation3 + $0x1cb] ss:$2 sm:$0xf]  ;;  %v8845_v18 = vadd.f32 %v12615_v5, %v15414_v51 }
 0x64f   : > { %10251 = vst.msk [vmem:[%s15454_s30 + $0x80] sm:$0xff] %vm8937_vm7, %v9236_v32  ;;  %v9235_v10 = vmax.f32 %v9227_v8, %v9231_v48  ;;  %9000 = vst.msk [vmem:[#allocation3 + $0x1f0] sm:$0xff] %vm8937_vm7, %v8921_v36  ;;  %v12454_v43 = vpop.f32.mrb[34].mxu1  ;;  %v8924_v30 = vmax.f32 %v8846_v49, 0.0  ;;  %v15902_v8 = vld [vmem:[#allocation34_spill] sm:$0xff] }
 0x650   : > { %v12616_v39 = vadd.f32 %v12454_v43, %v15894_v1  ;;  %v8637_v31 = vpop.f32.mrb[35].mxu1  ;;  %v8923_v7 = vmax.f32 %v8845_v18, 0.0 }
 0x651   : > { %v9237_v33 = vmax.f32 %v9233_v57, %v9235_v10  ;;  %v12617_v34 = vadd.f32 %v8637_v31, %v15895_v63  ;;  %9003 = vst.msk [vmem:[#allocation3 + $0x208] sm:$0xff] %vm8937_vm7, %v8924_v30  ;;  %v9242_v20 = vld [vmem:[#allocation3 + $0x1d4] ss:$2 sm:$0xff]  ;;  %v9246_v17 = vld [vmem:[#allocation3 + $0x1d5] ss:$2 sm:$0xff]  ;;  %v15903_v10 = vld [vmem:[#allocation35_spill] sm:$0xff] }
 0x652   : > { %v8848_v60 = vadd.f32 %v12616_v39, %v15414_v51  ;;  %9002 = vst.msk [vmem:[#allocation3 + $0x200] sm:$0xff] %vm8937_vm7, %v8923_v7  ;;  %v12457_v42 = vpop.f32.mrb[36].mxu1  ;;  %v9244_v50 = vld [vmem:[#allocation3 + $0x1e4] ss:$2 sm:$0xf]  ;;  %v9257_v22 = vmax.f32 %v9242_v20, %v9246_v17 }
 0x653   : > { %10252 = vst.msk [vmem:[%s15454_s30 + $0x88] sm:$0xf] %vm9039_vm8, %v9237_v33  ;;  %v8847_v13 = vadd.f32 %v12617_v34, %v15414_v51  ;;  %v12618_v35 = vadd.f32 %v12457_v42, %v15896_v0  ;;  %v8647_v16 = vpop.f32.mrb[37].mxu1  ;;  %v9248_v19 = vld [vmem:[#allocation3 + $0x1e5] ss:$2 sm:$0xf] }
 0x654   : > { %v8926_v46 = vmax.f32 %v8848_v60, 0.0  ;;  %v12619_v41 = vadd.f32 %v8647_v16, %v15897_v47  ;;  %v9258_v27 = vmax.f32 %v9244_v50, %v9248_v19  ;;  %v15904_v33 = vld [vmem:[#allocation36_spill] sm:$0xff] }
 0x655   : > { %v8925_v44 = vmax.f32 %v8847_v13, 0.0  ;;  %v8850_v12 = vadd.f32 %v12618_v35, %v15414_v51  ;;  %v15905_v13 = vld [vmem:[#allocation37_spill] sm:$0xff] }
 0x656   : > { %v9250_v24 = vld [vmem:[#allocation3 + $0x1ee] ss:$2 sm:$0xff]  ;;  %v9254_v53 = vld [vmem:[#allocation3 + $0x1ef] ss:$2 sm:$0xff]  ;;  %9005 = vst.msk [vmem:[#allocation3 + $0x218] sm:$0xff] %vm8937_vm7, %v8926_v46  ;;  %v8849_v21 = vadd.f32 %v12619_v41, %v15414_v51  ;;  %v12460_v6 = vpop.f32.mrb[38].mxu1 }
 0x657   : > { %v9259_v59 = vmax.f32 %v9250_v24, %v9254_v53  ;;  %9004 = vst.msk [vmem:[#allocation3 + $0x210] sm:$0xff] %vm8937_vm7, %v8925_v44  ;;  %v8928_v23 = vmax.f32 %v8850_v12, 0.0  ;;  %v12620_v61 = vadd.f32 %v12460_v6, %v15898_v25  ;;  %v8657_v14 = vpop.f32.mrb[39].mxu1 }
 0x658   : > { %v8927_v62 = vmax.f32 %v8849_v21, 0.0  ;;  %v12621_v55 = vadd.f32 %v8657_v14, %v15899_v37 }
 0x659   : > { %v9261_v52 = vmax.f32 %v9257_v22, %v9259_v59  ;;  %v9252_v45 = vld [vmem:[#allocation3 + $0x1fe] ss:$2 sm:$0xf]  ;;  %v9256_v26 = vld [vmem:[#allocation3 + $0x1ff] ss:$2 sm:$0xf]  ;;  %v8852_v11 = vadd.f32 %v13223_v58, %v12620_v61 }
 0x65a   : > { %9007 = vst.msk [vmem:[#allocation3 + $0x228] sm:$0xff] %vm8937_vm7, %v8928_v23  ;;  %v9260_v51 = vmax.f32 %v9252_v45, %v9256_v26  ;;  %9006 = vst.msk [vmem:[#allocation3 + $0x220] sm:$0xff] %vm8937_vm7, %v8927_v62  ;;  %v8851_v38 = vadd.f32 %v13223_v58, %v12621_v55  ;;  %v12463_v9 = vpop.f32.mrb[40].mxu1 }
 0x65b   : > { %10253 = vst.msk [vmem:[%s15454_s30 + $0x90] sm:$0xff] %vm8937_vm7, %v9261_v52  ;;  %v8930_v2 = vmax.f32 %v8852_v11, 0.0  ;;  %v12622_v3 = vadd.f32 %v12463_v9, %v15900_v40  ;;  %v8667_v56 = vpop.f32.mrb[41].mxu1 }
 0x65c   : > { %v9262_v54 = vmax.f32 %v9258_v27, %v9260_v51  ;;  %v12623_v28 = vadd.f32 %v8667_v56, %v15901_v4  ;;  %v8929_v15 = vmax.f32 %v8851_v38, 0.0 }
 0x65d   : > { %9009 = vst.msk [vmem:[#allocation3 + $0x238] sm:$0xff] %vm8937_vm7, %v8930_v2  ;;  %v8854_v32 = vadd.f32 %v13223_v58, %v12622_v3  ;;  %v9269_v39 = vld [vmem:[#allocation3 + $0x218] ss:$2 sm:$0xf] }
 0x65e   : > { %10254 = vst.msk [vmem:[%s15454_s30 + $0x98] sm:$0xf] %vm9039_vm8, %v9262_v54  ;;  %v8853_v36 = vadd.f32 %v13223_v58, %v12623_v28  ;;  %v12466_v29 = vpop.f32.mrb[42].mxu1  ;;  %v9273_v34 = vld [vmem:[#allocation3 + $0x219] ss:$2 sm:$0xf] }
 0x65f   : > { %9008 = vst.msk [vmem:[#allocation3 + $0x230] sm:$0xff] %vm8937_vm7, %v8929_v15  ;;  %v8932_v5 = vmax.f32 %v8854_v32, 0.0  ;;  %v12624_v48 = vadd.f32 %v12466_v29, %v15902_v8  ;;  %v8677_v49 = vpop.f32.mrb[43].mxu1  ;;  %v9267_v20 = vld [vmem:[#allocation3 + $0x208] ss:$2 sm:$0xff]  ;;  %v9283_v44 = vmax.f32 %v9269_v39, %v9273_v34 }
 0x660   : > { %v8931_v57 = vmax.f32 %v8853_v36, 0.0  ;;  %v12625_v18 = vadd.f32 %v8677_v49, %v15903_v10  ;;  %v9271_v17 = vld [vmem:[#allocation3 + $0x209] ss:$2 sm:$0xff] }
 0x661   : > { %9011 = vst.msk [vmem:[#allocation3 + $0x248] sm:$0xff] %vm8937_vm7, %v8932_v5  ;;  %v8856_v43 = vadd.f32 %v13223_v58, %v12624_v48  ;;  %v9282_v53 = vmax.f32 %v9267_v20, %v9271_v17 }
 0x662   : > { %9010 = vst.msk [vmem:[#allocation3 + $0x240] sm:$0xff] %vm8937_vm7, %v8931_v57  ;;  %v8855_v30 = vadd.f32 %v13223_v58, %v12625_v18  ;;  %v12469_v1 = vpop.f32.mrb[44].mxu1 }
 0x663   : > { %v8934_v31 = vmax.f32 %v8856_v43, 0.0  ;;  %v12626_v7 = vadd.f32 %v12469_v1, %v15904_v33  ;;  %v8687_v63 = vpop.f32.mrb[45].mxu1 }
 0x664   : > { %v8933_v60 = vmax.f32 %v8855_v30, 0.0  ;;  %v12627_v42 = vadd.f32 %v8687_v63, %v15905_v13 }
 0x665   : > { %9013 = vst.msk [vmem:[#allocation3 + $0x258] sm:$0xff] %vm8937_vm7, %v8934_v31  ;;  %v8858_v46 = vadd.f32 %v13223_v58, %v12626_v7 }
 0x666   : > { %v9275_v0 = vld [vmem:[#allocation3 + $0x222] ss:$2 sm:$0xff]  ;;  %v9277_v35 = vld [vmem:[#allocation3 + $0x232] ss:$2 sm:$0xf]  ;;  %9012 = vst.msk [vmem:[#allocation3 + $0x250] sm:$0xff] %vm8937_vm7, %v8933_v60  ;;  %v8857_v16 = vadd.f32 %v13223_v58, %v12627_v42 }
 0x667   : > { %v9279_v47 = vld [vmem:[#allocation3 + $0x223] ss:$2 sm:$0xff]  ;;  %v9281_v41 = vld [vmem:[#allocation3 + $0x233] ss:$2 sm:$0xf]  ;;  %v8936_v24 = vmax.f32 %v8858_v46, 0.0 }
 0x668   : > { %v9284_v12 = vmax.f32 %v9275_v0, %v9279_v47  ;;  %v9285_v50 = vmax.f32 %v9277_v35, %v9281_v41  ;;  %v8935_v22 = vmax.f32 %v8857_v16, 0.0 }
 0x669   : > { %9016 = vst.msk [vmem:[#allocation3 + $0x268] sm:$0x3f] %vm9015_vm9, %v8936_v24  ;;  %v9292_v6 = vld [vmem:[#allocation3 + $0x23c] ss:$2 sm:$0xff]  ;;  %v9296_v19 = vld [vmem:[#allocation3 + $0x23d] ss:$2 sm:$0xff] }
 0x66a   : > { %v9286_v59 = vmax.f32 %v9282_v53, %v9284_v12  ;;  %v9287_v21 = vmax.f32 %v9283_v44, %v9285_v50  ;;  %9014 = vst.msk [vmem:[#allocation3 + $0x260] sm:$0xff] %vm8937_vm7, %v8935_v22  ;;  %v9307_v37 = vmax.f32 %v9292_v6, %v9296_v19 }
 0x66c   : > { %10255 = vst.msk [vmem:[%s15454_s30 + $0xa0] sm:$0xff] %vm8937_vm7, %v9286_v59 }
 0x66d   : > { %10256 = vst.msk [vmem:[%s15454_s30 + $0xa8] sm:$0xf] %vm9039_vm8, %v9287_v21  ;;  %v9294_v23 = vld [vmem:[#allocation3 + $0x24c] ss:$2 sm:$0xf] }
 0x66e   : > { %v9298_v25 = vld [vmem:[#allocation3 + $0x24d] ss:$2 sm:$0xf] }
 0x66f   : > { %v9308_v55 = vmax.f32 %v9294_v23, %v9298_v25 }
 0x671   : > { %v9300_v61 = vld [vmem:[#allocation3 + $0x256] ss:$2 sm:$0xff]  ;;  %v9302_v14 = vld [vmem:[#allocation3 + $0x266] ss:$2 sm:$0xf] }
 0x672   : > { %v9304_v52 = vld [vmem:[#allocation3 + $0x257] ss:$2 sm:$0xff]  ;;  %v9306_v62 = vld [vmem:[#allocation3 + $0x267] ss:$2 sm:$0xf] }
 0x673   : > { %v9309_v45 = vmax.f32 %v9300_v61, %v9304_v52  ;;  %v9310_v26 = vmax.f32 %v9302_v14, %v9306_v62 }
 0x675   : > { %v9311_v58 = vmax.f32 %v9307_v37, %v9309_v45  ;;  %v9312_v11 = vmax.f32 %v9308_v55, %v9310_v26 }
 0x677   : > { %10257 = vst.msk [vmem:[%s15454_s30 + $0xb0] sm:$0xff] %vm8937_vm7, %v9311_v58 }
 0x678   : > { %10258 = vst.msk [vmem:[%s15454_s30 + $0xb8] sm:$0xf] %vm9039_vm8, %v9312_v11 }
 0x679 PF: > { %s17_s18 = sadd.s32 1, %s13322_s18  }
 0x67a   : > { %p14_p3 = scmp.ge.s32.totalorder %s17_s18, 4  }
 0x67c   :  { %16 = sbr.rel (!%p14_p3) target bundleno = 2 (0x2), region = 197 }
 0x683   :  { %9337 = vsyncpa [#allocation5], 1 }
 0x684   :  { %9339 = vsyncpa [#allocation5 + $0x1], 1 }
 0x685   :  { %9340 = vsyncpa [#allocation7], 1 }

// kernel: net_forward.3
= control target key start
LH: loop header
LB: loop body
LE: loop exit
PB: predicated region body
PF: predicated region fallthrough
CT: control target
= control target key end

     0   :  { %v62_v28 = vlaneseq  ;;  %v8758_v36 = vmov 1983009808   ;;  %s10712_s0 = inlined_call_operand.vmem [shape: f32[2,9216], index: 0, kind: input, shape index: {}]   ;;  %s10713_s1 = inlined_call_operand.vmem [shape: bf16[9216,128], index: 1, kind: input, shape index: {}]   ;;  %s10714_s2 = inlined_call_operand.vmem [shape: f32[1,128], index: 2, kind: input, shape index: {}]   ;;  %s10715_s3 = inlined_call_operand.vmem [shape: f32[128,10], index: 3, kind: input, shape index: {}]   ;;  %s10716_s4 = inlined_call_operand.vmem [shape: f32[1,10], index: 4, kind: input, shape index: {}]   ;;  %s10717_s5 = inlined_call_operand.hbm [shape: f32[2,10], index: 5, kind: output, shape index: {}]  }
   0x1   :  { %v8136_v0 = vld [vmem:[%s10713_s1 + $0x40] sm:$0xff]   ;;  %v8140_v4 = vld [vmem:[%s10713_s1 + $0x48] sm:$0xff]   ;;  %v8144_v8 = vld [vmem:[%s10713_s1 + $0x50] sm:$0xff]   ;;  %v60_v37 = vunpack.c.l.s4 %v8758_v36 }
   0x2   :  { %v8137_v1 = vld [vmem:[%s10713_s1 + $0xc0] sm:$0xff]   ;;  %7263 = vmatprep.subr.bf16.mxu0 %v8136_v0  ;;  %v8141_v5 = vld [vmem:[%s10713_s1 + $0xc8] sm:$0xff]   ;;  %v8145_v9 = vld [vmem:[%s10713_s1 + $0xd0] sm:$0xff]   ;;  %v63_v33 = vshrl.u32 %v62_v28, 7 }
   0x3   :  { %v8138_v2 = vld [vmem:[%s10713_s1] sm:$0xff]   ;;  %7285 = vmatprep.subr.bf16.mxu1 %v8137_v1  ;;  %v8142_v6 = vld [vmem:[%s10713_s1 + $0x8] sm:$0xff]   ;;  %v8146_v10 = vld [vmem:[%s10713_s1 + $0x10] sm:$0xff]   ;;  %v61_v39 = vunpack.c.0.s8 %v60_v37 }
   0x4   :  { %v8139_v3 = vld [vmem:[%s10713_s1 + $0x80] sm:$0xff]   ;;  %7264 = vmatpush3.bf16.msra.mxu0 %v8138_v2  ;;  %v8143_v7 = vld [vmem:[%s10713_s1 + $0x88] sm:$0xff]   ;;  %v8147_v11 = vld [vmem:[%s10713_s1 + $0x90] sm:$0xff]  }
   0x5   :  { %7286 = vmatpush3.bf16.msra.mxu1 %v8139_v3  ;;  %7265 = vmatprep.subr.bf16.mxu0 %v8140_v4  ;;  %v8148_v12 = vld [vmem:[%s10713_s1 + $0x58] sm:$0xff]   ;;  %v8152_v16 = vld [vmem:[%s10713_s1 + $0x60] sm:$0xff]   ;;  %v8156_v20 = vld [vmem:[%s10713_s1 + $0x68] sm:$0xff]   ;;  %v8898_v41 = vsub.s32 %v61_v39, %v63_v33 }
   0x6   :  { %7287 = vmatprep.subr.bf16.mxu1 %v8141_v5  ;;  %v8149_v13 = vld [vmem:[%s10713_s1 + $0xd8] sm:$0xff]   ;;  %v8153_v17 = vld [vmem:[%s10713_s1 + $0xe0] sm:$0xff]   ;;  %v8157_v21 = vld [vmem:[%s10713_s1 + $0xe8] sm:$0xff]  }
   0x7   :  { %v8150_v14 = vld [vmem:[%s10713_s1 + $0x18] sm:$0xff]   ;;  %v8154_v18 = vld [vmem:[%s10713_s1 + $0x20] sm:$0xff]   ;;  %v8158_v22 = vld [vmem:[%s10713_s1 + $0x28] sm:$0xff]  }
   0x8   :  { %7266 = vmatpush3.bf16.msra.mxu0 %v8142_v6  ;;  %v8151_v15 = vld [vmem:[%s10713_s1 + $0x98] sm:$0xff]   ;;  %v8155_v19 = vld [vmem:[%s10713_s1 + $0xa0] sm:$0xff]   ;;  %v8159_v23 = vld [vmem:[%s10713_s1 + $0xa8] sm:$0xff]  }
   0x9   :  { %7288 = vmatpush3.bf16.msra.mxu1 %v8143_v7  ;;  %7267 = vmatprep.subr.bf16.mxu0 %v8144_v8  ;;  %v8160_v24 = vld [vmem:[%s10713_s1 + $0x70] sm:$0xff]   ;;  %v8164_v29 = vld [vmem:[%s10713_s1 + $0x78] sm:$0xff]   ;;  %v22_v34 = vld [vmem:[%s10712_s0] sm:$0xff] }
   0xa   :  { %7289 = vmatprep.subr.bf16.mxu1 %v8145_v9  ;;  %v8161_v25 = vld [vmem:[%s10713_s1 + $0xf0] sm:$0xff]   ;;  %v8165_v30 = vld [vmem:[%s10713_s1 + $0xf8] sm:$0xff]   ;;  %v8169_v35 = vld [vmem:[%s10713_s1 + $0x140] sm:$0xff]   ;;  %v58_v40 = vcombine.high %v22_v34, %v22_v34  ;;  %v65_v42 = vrot.slane %v22_v34, %v8898_v41 }
   0xb   :  { %v8162_v26 = vld [vmem:[%s10713_s1 + $0x30] sm:$0xff]   ;;  %v8166_v31 = vld [vmem:[%s10713_s1 + $0x38] sm:$0xff]   ;;  %v8170_v38 = vld [vmem:[%s10713_s1 + $0x1c0] sm:$0xff]  }
   0xc   :  { %7268 = vmatpush3.bf16.msra.mxu0 %v8146_v10  ;;  %v8163_v27 = vld [vmem:[%s10713_s1 + $0xb0] sm:$0xff]   ;;  %v8167_v32 = vld [vmem:[%s10713_s1 + $0xb8] sm:$0xff]   ;;  %v72_v43 = vrot.slane %v58_v40, %v8898_v41  ;;  %v73_v44 = vcombine.high %v65_v42, %v65_v42  ;;  %v8171_v46 = vld [vmem:[%s10713_s1 + $0x100] sm:$0xff]   ;;  %v436_v47 = vpack.c.bf16 %v65_v42, %v65_v42 }
   0xd   :  { %7290 = vmatpush3.bf16.msra.mxu1 %v8147_v11  ;;  %7269 = vmatprep.subr.bf16.mxu0 %v8148_v12  ;;  %v8172_v49 = vld [vmem:[%s10713_s1 + $0x180] sm:$0xff]   ;;  %v8173_v52 = vld [vmem:[%s10713_s1 + $0x148] sm:$0xff]   ;;  %v8177_v56 = vld [vmem:[%s10713_s1 + $0x150] sm:$0xff]  }
   0xe   :  { %7291 = vmatprep.subr.bf16.mxu1 %v8149_v13  ;;  %v74_v45 = vcombine.high %v72_v43, %v72_v43  ;;  %v438_v48 = vpack.c.bf16 %v72_v43, %v72_v43  ;;  %v437_v50 = vpack.c.bf16 %v73_v44, %v73_v44  ;;  %v8174_v53 = vld [vmem:[%s10713_s1 + $0x1c8] sm:$0xff]   ;;  %v8178_v57 = vld [vmem:[%s10713_s1 + $0x1d0] sm:$0xff]   ;;  %v8181_v60 = vld [vmem:[%s10713_s1 + $0x158] sm:$0xff]  }
   0xf   :  { %v8175_v54 = vld [vmem:[%s10713_s1 + $0x108] sm:$0xff]   ;;  %v8179_v58 = vld [vmem:[%s10713_s1 + $0x110] sm:$0xff]   ;;  %v8182_v61 = vld [vmem:[%s10713_s1 + $0x1d8] sm:$0xff]  }
  0x10   :  { %7270 = vmatpush3.bf16.msra.mxu0 %v8150_v14  ;;  %v439_v51 = vpack.c.bf16 %v74_v45, %v74_v45  ;;  %5155 = vmatprep.mubr.bf16.mxu0 %v437_v50  ;;  %v8176_v55 = vld [vmem:[%s10713_s1 + $0x188] sm:$0xff]   ;;  %v8180_v59 = vld [vmem:[%s10713_s1 + $0x190] sm:$0xff]   ;;  %v8183_v62 = vld [vmem:[%s10713_s1 + $0x118] sm:$0xff]  }
  0x11   :  { %7292 = vmatpush3.bf16.msra.mxu1 %v8151_v15  ;;  %7271 = vmatprep.subr.bf16.mxu0 %v8152_v16  ;;  %v8184_v63 = vld [vmem:[%s10713_s1 + $0x198] sm:$0xff]   ;;  %v8185_v0 = vld [vmem:[%s10713_s1 + $0x160] sm:$0xff]   ;;  %v8189_v4 = vld [vmem:[%s10713_s1 + $0x168] sm:$0xff]  }
  0x12   :  { %7293 = vmatprep.subr.bf16.mxu1 %v8153_v17  ;;  %5195 = vmatprep.mubr.bf16.mxu1 %v439_v51  ;;  %v8186_v1 = vld [vmem:[%s10713_s1 + $0x1e0] sm:$0xff]   ;;  %v8190_v5 = vld [vmem:[%s10713_s1 + $0x1e8] sm:$0xff]   ;;  %v8193_v8 = vld [vmem:[%s10713_s1 + $0x170] sm:$0xff]  }
  0x13   :  { %v8187_v2 = vld [vmem:[%s10713_s1 + $0x120] sm:$0xff]   ;;  %v8191_v6 = vld [vmem:[%s10713_s1 + $0x128] sm:$0xff]   ;;  %v8194_v9 = vld [vmem:[%s10713_s1 + $0x1f0] sm:$0xff]  }
  0x14   :  { %7272 = vmatpush3.bf16.msra.mxu0 %v8154_v18  ;;  %v8188_v3 = vld [vmem:[%s10713_s1 + $0x1a0] sm:$0xff]   ;;  %v8192_v7 = vld [vmem:[%s10713_s1 + $0x1a8] sm:$0xff]   ;;  %v8195_v11 = vld [vmem:[%s10713_s1 + $0x130] sm:$0xff]  }
  0x15   :  { %7294 = vmatpush3.bf16.msra.mxu1 %v8155_v19  ;;  %7273 = vmatprep.subr.bf16.mxu0 %v8156_v20  ;;  %v23_v10 = vld [vmem:[%s10712_s0 + $0x8] sm:$0xff]  ;;  %v8196_v14 = vld [vmem:[%s10713_s1 + $0x1b0] sm:$0xff]   ;;  %v8197_v15 = vld [vmem:[%s10713_s1 + $0x178] sm:$0xff]  }
  0x16   :  { %7295 = vmatprep.subr.bf16.mxu1 %v8157_v21  ;;  %v82_v12 = vrot.slane %v23_v10, %v8898_v41  ;;  %v75_v13 = vcombine.high %v23_v10, %v23_v10  ;;  %v8198_v18 = vld [vmem:[%s10713_s1 + $0x1f8] sm:$0xff]   ;;  %v8209_v33 = vld [vmem:[%s10713_s1 + $0x288] sm:$0xff]   ;;  %v8210_v34 = vld [vmem:[%s10713_s1 + $0x250] sm:$0xff]  }
  0x17   :  { %v8199_v19 = vld [vmem:[%s10713_s1 + $0x138] sm:$0xff]   ;;  %v8212_v36 = vld [vmem:[%s10713_s1 + $0x210] sm:$0xff]   ;;  %v8218_v43 = vld [vmem:[%s10713_s1 + $0x260] sm:$0xff]  }
  0x18   :  { %7274 = vmatpush3.bf16.msra.mxu0 %v8158_v22  ;;  %v90_v16 = vcombine.high %v82_v12, %v82_v12  ;;  %v89_v17 = vrot.slane %v75_v13, %v8898_v41  ;;  %v8200_v22 = vld [vmem:[%s10713_s1 + $0x1b8] sm:$0xff]   ;;  %v8213_v37 = vld [vmem:[%s10713_s1 + $0x290] sm:$0xff]   ;;  %v8219_v44 = vld [vmem:[%s10713_s1 + $0x2e0] sm:$0xff]  }
  0x19   :  { %7296 = vmatpush3.bf16.msra.mxu1 %v8159_v23  ;;  %7275 = vmatprep.subr.bf16.mxu0 %v8160_v24  ;;  %v8202_v24 = vld [vmem:[%s10713_s1 + $0x240] sm:$0xff]   ;;  %v8215_v39 = vld [vmem:[%s10713_s1 + $0x2d8] sm:$0xff]   ;;  %v8225_v50 = vld [vmem:[%s10713_s1 + $0x2a8] sm:$0xff]  }
  0x1a   :  { %7297 = vmatprep.subr.bf16.mxu1 %v8161_v25  ;;  %v441_v20 = vpack.c.bf16 %v90_v16, %v90_v16  ;;  %v91_v21 = vcombine.high %v89_v17, %v89_v17  ;;  %v8203_v25 = vld [vmem:[%s10713_s1 + $0x2c0] sm:$0xff]   ;;  %v442_v28 = vpack.c.bf16 %v89_v17, %v89_v17  ;;  %v8216_v40 = vld [vmem:[%s10713_s1 + $0x218] sm:$0xff]   ;;  %v8226_v51 = vld [vmem:[%s10713_s1 + $0x270] sm:$0xff]  }
  0x1b   :  { %v8217_v42 = vld [vmem:[%s10713_s1 + $0x298] sm:$0xff]   ;;  %v8220_v45 = vld [vmem:[%s10713_s1 + $0x220] sm:$0xff]   ;;  %v8240_v10 = vld [vmem:[%s10713_s1 + $0x3c8] sm:$0xff]  }
  0x1c   :  { %7276 = vmatpush3.bf16.msra.mxu0 %v8162_v26  ;;  %v443_v23 = vpack.c.bf16 %v91_v21, %v91_v21  ;;  %v8204_v26 = vld [vmem:[%s10713_s1 + $0x200] sm:$0xff]   ;;  %v8243_v13 = vld [vmem:[%s10713_s1 + $0x350] sm:$0xff]   ;;  %v8247_v17 = vld [vmem:[%s10713_s1 + $0x358] sm:$0xff]  }
  0x1d   :  { %7298 = vmatpush3.bf16.msra.mxu1 %v8163_v27  ;;  %7277 = vmatprep.subr.bf16.mxu0 %v8164_v29  ;;  %v440_v27 = vpack.c.bf16 %v82_v12, %v82_v12  ;;  %v8205_v29 = vld [vmem:[%s10713_s1 + $0x280] sm:$0xff]   ;;  %v8242_v12 = vld [vmem:[%s10713_s1 + $0x388] sm:$0xff]   ;;  %v8246_v16 = vld [vmem:[%s10713_s1 + $0x390] sm:$0xff]  }
  0x1e   :  { %7299 = vmatprep.subr.bf16.mxu1 %v8165_v30  ;;  %v8206_v30 = vld [vmem:[%s10713_s1 + $0x248] sm:$0xff]   ;;  %v8251_v21 = vld [vmem:[%s10713_s1 + $0x360] sm:$0xff]  }
  0x20   :  { %7278 = vmatpush3.bf16.msra.mxu0 %v8166_v31  ;;  %v8207_v31 = vld [vmem:[%s10713_s1 + $0x2c8] sm:$0xff]  }
  0x21   :  { %7300 = vmatpush3.bf16.msra.mxu1 %v8167_v32  ;;  %7307 = vmatprep.subr.bf16.mxu0 %v8169_v35  ;;  %v8208_v32 = vld [vmem:[%s10713_s1 + $0x208] sm:$0xff]   ;;  %v8211_v35 = vld [vmem:[%s10713_s1 + $0x2d0] sm:$0xff]  }
  0x22   :  { %7329 = vmatprep.subr.bf16.mxu1 %v8170_v38  ;;  %v8214_v38 = vld [vmem:[%s10713_s1 + $0x258] sm:$0xff]  }
  0x23   :  { %5156 = vmatmul.mubr.bf16.vlgmr.msra.gmra.mrb[0].mxu0 %v436_v47  ;;  %v8222_v47 = vld [vmem:[%s10713_s1 + $0x268] sm:$0xff]  }
  0x24   :  { %5196 = vmatmul.mubr.bf16.vlgmr.msra.gmra.mrb[0].mxu1 %v438_v48  ;;  %7308 = vmatpush3.bf16.msra.mxu0 %v8171_v46  ;;  %v8221_v46 = vld [vmem:[%s10713_s1 + $0x2a0] sm:$0xff]   ;;  %v8223_v48 = vld [vmem:[%s10713_s1 + $0x2e8] sm:$0xff]  }
  0x25   :  { %7330 = vmatpush3.bf16.msra.mxu1 %v8172_v49  ;;  %7309 = vmatprep.subr.bf16.mxu0 %v8173_v52  ;;  %v8224_v49 = vld [vmem:[%s10713_s1 + $0x228] sm:$0xff]   ;;  %v8227_v52 = vld [vmem:[%s10713_s1 + $0x2f0] sm:$0xff]  }
  0x26   :  { %7331 = vmatprep.subr.bf16.mxu1 %v8174_v53  ;;  %5235 = vmatprep.mubr.bf16.mxu0 %v441_v20  ;;  %v24_v53 = vld [vmem:[%s10712_s0 + $0x10] sm:$0xff]  ;;  %v8250_v20 = vld [vmem:[%s10713_s1 + $0x398] sm:$0xff]  }
  0x27   :  { %5275 = vmatprep.mubr.bf16.mxu1 %v443_v23  ;;  %v8253_v23 = vld [vmem:[%s10713_s1 + $0x320] sm:$0xff]  }
  0x28   :  { %7310 = vmatpush3.bf16.msra.mxu0 %v8175_v54  ;;  %v8228_v54 = vld [vmem:[%s10713_s1 + $0x230] sm:$0xff]  }
  0x29   :  { %7332 = vmatpush3.bf16.msra.mxu1 %v8176_v55  ;;  %7311 = vmatprep.subr.bf16.mxu0 %v8177_v56  ;;  %v99_v55 = vrot.slane %v24_v53, %v8898_v41  ;;  %v92_v56 = vcombine.high %v24_v53, %v24_v53  ;;  %v8273_v53 = vld [vmem:[%s10713_s1 + $0x4c8] sm:$0xff]  }
  0x2a   :  { %7333 = vmatprep.subr.bf16.mxu1 %v8178_v57  ;;  %v8229_v57 = vld [vmem:[%s10713_s1 + $0x2b0] sm:$0xff]  }
  0x2c   :  { %7312 = vmatpush3.bf16.msra.mxu0 %v8179_v58  ;;  %v8230_v58 = vld [vmem:[%s10713_s1 + $0x278] sm:$0xff]  }
  0x2d   :  { %7334 = vmatpush3.bf16.msra.mxu1 %v8180_v59  ;;  %7313 = vmatprep.subr.bf16.mxu0 %v8181_v60  ;;  %v107_v59 = vcombine.high %v99_v55, %v99_v55  ;;  %v106_v60 = vrot.slane %v92_v56, %v8898_v41  ;;  %v8276_v56 = vld [vmem:[%s10713_s1 + $0x450] sm:$0xff]  }
  0x2e   :  { %7335 = vmatprep.subr.bf16.mxu1 %v8182_v61  ;;  %v8231_v61 = vld [vmem:[%s10713_s1 + $0x2f8] sm:$0xff]  }
  0x30   :  { %7314 = vmatpush3.bf16.msra.mxu0 %v8183_v62  ;;  %v8232_v62 = vld [vmem:[%s10713_s1 + $0x238] sm:$0xff]  }
  0x31   :  { %7336 = vmatpush3.bf16.msra.mxu1 %v8184_v63  ;;  %7315 = vmatprep.subr.bf16.mxu0 %v8185_v0  ;;  %v445_v63 = vpack.c.bf16 %v107_v59, %v107_v59  ;;  %v108_v0 = vcombine.high %v106_v60, %v106_v60  ;;  %v8279_v59 = vld [vmem:[%s10713_s1 + $0x490] sm:$0xff]  }
  0x32   :  { %7337 = vmatprep.subr.bf16.mxu1 %v8186_v1  ;;  %v8233_v1 = vld [vmem:[%s10713_s1 + $0x2b8] sm:$0xff]  }
  0x34   :  { %7316 = vmatpush3.bf16.msra.mxu0 %v8187_v2  ;;  %v447_v2 = vpack.c.bf16 %v108_v0, %v108_v0  ;;  %v8284_v0 = vld [vmem:[%s10713_s1 + $0x460] sm:$0xff]  }
  0x35   :  { %7338 = vmatpush3.bf16.msra.mxu1 %v8188_v3  ;;  %7317 = vmatprep.subr.bf16.mxu0 %v8189_v4  ;;  %v8235_v3 = vld [vmem:[%s10713_s1 + $0x340] sm:$0xff]  }
  0x36   :  { %7339 = vmatprep.subr.bf16.mxu1 %v8190_v5  ;;  %v8236_v4 = vld [vmem:[%s10713_s1 + $0x3c0] sm:$0xff]  }
  0x37   :  { %v8237_v5 = vld [vmem:[%s10713_s1 + $0x300] sm:$0xff]  }
  0x38   :  { %7318 = vmatpush3.bf16.msra.mxu0 %v8191_v6  ;;  %v444_v6 = vpack.c.bf16 %v99_v55, %v99_v55  ;;  %v8275_v55 = vld [vmem:[%s10713_s1 + $0x488] sm:$0xff]  }
  0x39   :  { %7340 = vmatpush3.bf16.msra.mxu1 %v8192_v7  ;;  %7319 = vmatprep.subr.bf16.mxu0 %v8193_v8  ;;  %v446_v7 = vpack.c.bf16 %v106_v60, %v106_v60  ;;  %v8238_v8 = vld [vmem:[%s10713_s1 + $0x380] sm:$0xff]   ;;  %v8280_v60 = vld [vmem:[%s10713_s1 + $0x458] sm:$0xff]  }
  0x3a   :  { %7341 = vmatprep.subr.bf16.mxu1 %v8194_v9  ;;  %v8239_v9 = vld [vmem:[%s10713_s1 + $0x348] sm:$0xff]  }
  0x3c   :  { %7320 = vmatpush3.bf16.msra.mxu0 %v8195_v11  ;;  %v8241_v11 = vld [vmem:[%s10713_s1 + $0x308] sm:$0xff]  }
  0x3d   :  { %7342 = vmatpush3.bf16.msra.mxu1 %v8196_v14  ;;  %7321 = vmatprep.subr.bf16.mxu0 %v8197_v15  ;;  %v8244_v14 = vld [vmem:[%s10713_s1 + $0x3d0] sm:$0xff]  }
  0x3e   :  { %7343 = vmatprep.subr.bf16.mxu1 %v8198_v18  ;;  %v8245_v15 = vld [vmem:[%s10713_s1 + $0x310] sm:$0xff]   ;;  %v8248_v18 = vld [vmem:[%s10713_s1 + $0x3d8] sm:$0xff]  }
  0x40   :  { %7322 = vmatpush3.bf16.msra.mxu0 %v8199_v19  ;;  %v8249_v19 = vld [vmem:[%s10713_s1 + $0x318] sm:$0xff]  }
  0x41   :  { %7344 = vmatpush3.bf16.msra.mxu1 %v8200_v22  ;;  %7351 = vmatprep.subr.bf16.mxu0 %v8202_v24  ;;  %v8252_v22 = vld [vmem:[%s10713_s1 + $0x3e0] sm:$0xff]  }
  0x42   :  { %7373 = vmatprep.subr.bf16.mxu1 %v8203_v25  ;;  %v8254_v24 = vld [vmem:[%s10713_s1 + $0x3a0] sm:$0xff]   ;;  %v8255_v25 = vld [vmem:[%s10713_s1 + $0x368] sm:$0xff]  }
  0x43   :  { %5236 = vmatmul.mubr.bf16.vlgmr.msra.gmra.mrb[4].mxu0 %v440_v27  ;;  %v8257_v27 = vld [vmem:[%s10713_s1 + $0x328] sm:$0xff]  }
  0x44   :  { %5276 = vmatmul.mubr.bf16.vlgmr.msra.gmra.mrb[4].mxu1 %v442_v28  ;;  %7352 = vmatpush3.bf16.msra.mxu0 %v8204_v26  ;;  %v8256_v26 = vld [vmem:[%s10713_s1 + $0x3e8] sm:$0xff]  }
  0x45   :  { %7374 = vmatpush3.bf16.msra.mxu1 %v8205_v29  ;;  %7353 = vmatprep.subr.bf16.mxu0 %v8206_v30  ;;  %v8258_v28 = vld [vmem:[%s10713_s1 + $0x3a8] sm:$0xff]   ;;  %v8259_v29 = vld [vmem:[%s10713_s1 + $0x370] sm:$0xff]  }
  0x46   :  { %7375 = vmatprep.subr.bf16.mxu1 %v8207_v31  ;;  %5315 = vmatprep.mubr.bf16.mxu0 %v445_v63  ;;  %v8260_v30 = vld [vmem:[%s10713_s1 + $0x3f0] sm:$0xff]   ;;  %v8283_v63 = vld [vmem:[%s10713_s1 + $0x498] sm:$0xff]  }
  0x47   :  { %5355 = vmatprep.mubr.bf16.mxu1 %v447_v2  ;;  %v8261_v31 = vld [vmem:[%s10713_s1 + $0x330] sm:$0xff]   ;;  %v8286_v2 = vld [vmem:[%s10713_s1 + $0x420] sm:$0xff]  }
  0x48   :  { %7354 = vmatpush3.bf16.msra.mxu0 %v8208_v32  ;;  %v25_v32 = vld [vmem:[%s10712_s0 + $0x18] sm:$0xff] }
  0x49   :  { %7376 = vmatpush3.bf16.msra.mxu1 %v8209_v33  ;;  %7355 = vmatprep.subr.bf16.mxu0 %v8210_v34  ;;  %v8262_v33 = vld [vmem:[%s10713_s1 + $0x3b0] sm:$0xff]   ;;  %v116_v34 = vrot.slane %v25_v32, %v8898_v41 }
  0x4a   :  { %7377 = vmatprep.subr.bf16.mxu1 %v8211_v35  ;;  %v109_v35 = vcombine.high %v25_v32, %v25_v32  ;;  %v8307_v32 = vld [vmem:[%s10713_s1 + $0x508] sm:$0xff]  }
  0x4c   :  { %7356 = vmatpush3.bf16.msra.mxu0 %v8212_v36  ;;  %v8263_v36 = vld [vmem:[%s10713_s1 + $0x378] sm:$0xff]  }
  0x4d   :  { %7378 = vmatpush3.bf16.msra.mxu1 %v8213_v37  ;;  %7357 = vmatprep.subr.bf16.mxu0 %v8214_v38  ;;  %v8264_v37 = vld [vmem:[%s10713_s1 + $0x3f8] sm:$0xff]   ;;  %v124_v38 = vcombine.high %v116_v34, %v116_v34 }
  0x4e   :  { %7379 = vmatprep.subr.bf16.mxu1 %v8215_v39  ;;  %v123_v39 = vrot.slane %v109_v35, %v8898_v41  ;;  %v8310_v35 = vld [vmem:[%s10713_s1 + $0x5d0] sm:$0xff]  }
  0x50   :  { %7358 = vmatpush3.bf16.msra.mxu0 %v8216_v40  ;;  %v8265_v40 = vld [vmem:[%s10713_s1 + $0x338] sm:$0xff]  }
  0x51   :  { %7380 = vmatpush3.bf16.msra.mxu1 %v8217_v42  ;;  %7359 = vmatprep.subr.bf16.mxu0 %v8218_v43  ;;  %v8266_v42 = vld [vmem:[%s10713_s1 + $0x3b8] sm:$0xff]   ;;  %v449_v43 = vpack.c.bf16 %v124_v38, %v124_v38 }
  0x52   :  { %7381 = vmatprep.subr.bf16.mxu1 %v8219_v44  ;;  %v125_v44 = vcombine.high %v123_v39, %v123_v39  ;;  %v8313_v38 = vld [vmem:[%s10713_s1 + $0x558] sm:$0xff]  }
  0x54   :  { %7360 = vmatpush3.bf16.msra.mxu0 %v8220_v45  ;;  %v8268_v45 = vld [vmem:[%s10713_s1 + $0x440] sm:$0xff]  }
  0x55   :  { %7382 = vmatpush3.bf16.msra.mxu1 %v8221_v46  ;;  %7361 = vmatprep.subr.bf16.mxu0 %v8222_v47  ;;  %v451_v46 = vpack.c.bf16 %v125_v44, %v125_v44  ;;  %v8269_v47 = vld [vmem:[%s10713_s1 + $0x4c0] sm:$0xff]  }
  0x56   :  { %7383 = vmatprep.subr.bf16.mxu1 %v8223_v48  ;;  %v8270_v48 = vld [vmem:[%s10713_s1 + $0x400] sm:$0xff]  }
  0x57   :  { %v8318_v44 = vld [vmem:[%s10713_s1 + $0x5e0] sm:$0xff]  }
  0x58   :  { %7362 = vmatpush3.bf16.msra.mxu0 %v8224_v49  ;;  %v448_v49 = vpack.c.bf16 %v116_v34, %v116_v34  ;;  %v8309_v34 = vld [vmem:[%s10713_s1 + $0x550] sm:$0xff]  }
  0x59   :  { %7384 = vmatpush3.bf16.msra.mxu1 %v8225_v50  ;;  %7363 = vmatprep.subr.bf16.mxu0 %v8226_v51  ;;  %v450_v50 = vpack.c.bf16 %v123_v39, %v123_v39  ;;  %v8271_v51 = vld [vmem:[%s10713_s1 + $0x480] sm:$0xff]   ;;  %v8314_v39 = vld [vmem:[%s10713_s1 + $0x5d8] sm:$0xff]  }
  0x5a   :  { %7385 = vmatprep.subr.bf16.mxu1 %v8227_v52  ;;  %v8272_v52 = vld [vmem:[%s10713_s1 + $0x448] sm:$0xff]  }
  0x5c   :  { %7364 = vmatpush3.bf16.msra.mxu0 %v8228_v54  ;;  %v8274_v54 = vld [vmem:[%s10713_s1 + $0x408] sm:$0xff]  }
  0x5d   :  { %7386 = vmatpush3.bf16.msra.mxu1 %v8229_v57  ;;  %7365 = vmatprep.subr.bf16.mxu0 %v8230_v58  ;;  %v8277_v57 = vld [vmem:[%s10713_s1 + $0x4d0] sm:$0xff]  }
  0x5e   :  { %7387 = vmatprep.subr.bf16.mxu1 %v8231_v61  ;;  %v8278_v58 = vld [vmem:[%s10713_s1 + $0x410] sm:$0xff]   ;;  %v8281_v61 = vld [vmem:[%s10713_s1 + $0x4d8] sm:$0xff]  }
  0x60   :  { %7366 = vmatpush3.bf16.msra.mxu0 %v8232_v62  ;;  %v8282_v62 = vld [vmem:[%s10713_s1 + $0x418] sm:$0xff]  }
  0x61   :  { %7388 = vmatpush3.bf16.msra.mxu1 %v8233_v1  ;;  %7395 = vmatprep.subr.bf16.mxu0 %v8235_v3  ;;  %v8285_v1 = vld [vmem:[%s10713_s1 + $0x4e0] sm:$0xff]  }
  0x62   :  { %7417 = vmatprep.subr.bf16.mxu1 %v8236_v4  ;;  %v8287_v3 = vld [vmem:[%s10713_s1 + $0x4a0] sm:$0xff]   ;;  %v8288_v4 = vld [vmem:[%s10713_s1 + $0x468] sm:$0xff]  }
  0x63   :  { %5316 = vmatmul.mubr.bf16.vlgmr.msra.gmra.mrb[8].mxu0 %v444_v6  ;;  %v8290_v6 = vld [vmem:[%s10713_s1 + $0x428] sm:$0xff]  }
  0x64   :  { %5356 = vmatmul.mubr.bf16.vlgmr.msra.gmra.mrb[8].mxu1 %v446_v7  ;;  %7396 = vmatpush3.bf16.msra.mxu0 %v8237_v5  ;;  %v8289_v5 = vld [vmem:[%s10713_s1 + $0x4e8] sm:$0xff]  }
  0x65   :  { %7418 = vmatpush3.bf16.msra.mxu1 %v8238_v8  ;;  %7397 = vmatprep.subr.bf16.mxu0 %v8239_v9  ;;  %v8291_v7 = vld [vmem:[%s10713_s1 + $0x4a8] sm:$0xff]   ;;  %v8292_v8 = vld [vmem:[%s10713_s1 + $0x470] sm:$0xff]  }
  0x66   :  { %7419 = vmatprep.subr.bf16.mxu1 %v8240_v10  ;;  %5395 = vmatprep.mubr.bf16.mxu0 %v449_v43  ;;  %v8293_v9 = vld [vmem:[%s10713_s1 + $0x4f0] sm:$0xff]   ;;  %v8317_v43 = vld [vmem:[%s10713_s1 + $0x560] sm:$0xff]  }
  0x67   :  { %5435 = vmatprep.mubr.bf16.mxu1 %v451_v46  ;;  %v8294_v10 = vld [vmem:[%s10713_s1 + $0x430] sm:$0xff]   ;;  %v8320_v46 = vld [vmem:[%s10713_s1 + $0x5a0] sm:$0xff]  }
  0x68   :  { %7398 = vmatpush3.bf16.msra.mxu0 %v8241_v11  ;;  %v26_v11 = vld [vmem:[%s10712_s0 + $0x20] sm:$0xff] }
  0x69   :  { %7420 = vmatpush3.bf16.msra.mxu1 %v8242_v12  ;;  %7399 = vmatprep.subr.bf16.mxu0 %v8243_v13  ;;  %v8295_v12 = vld [vmem:[%s10713_s1 + $0x4b0] sm:$0xff]   ;;  %v133_v13 = vrot.slane %v26_v11, %v8898_v41 }
  0x6a   :  { %7421 = vmatprep.subr.bf16.mxu1 %v8244_v14  ;;  %v126_v14 = vcombine.high %v26_v11, %v26_v11  ;;  %v8340_v11 = vld [vmem:[%s10713_s1 + $0x608] sm:$0xff]  }
  0x6c   :  { %7400 = vmatpush3.bf16.msra.mxu0 %v8245_v15  ;;  %v8296_v15 = vld [vmem:[%s10713_s1 + $0x478] sm:$0xff]  }
  0x6d   :  { %7422 = vmatpush3.bf16.msra.mxu1 %v8246_v16  ;;  %7401 = vmatprep.subr.bf16.mxu0 %v8247_v17  ;;  %v8297_v16 = vld [vmem:[%s10713_s1 + $0x4f8] sm:$0xff]   ;;  %v141_v17 = vcombine.high %v133_v13, %v133_v13 }
  0x6e   :  { %7423 = vmatprep.subr.bf16.mxu1 %v8248_v18  ;;  %v140_v18 = vrot.slane %v126_v14, %v8898_v41  ;;  %v8343_v14 = vld [vmem:[%s10713_s1 + $0x6d0] sm:$0xff]  }
  0x70   :  { %7402 = vmatpush3.bf16.msra.mxu0 %v8249_v19  ;;  %v8298_v19 = vld [vmem:[%s10713_s1 + $0x438] sm:$0xff]  }
  0x71   :  { %7424 = vmatpush3.bf16.msra.mxu1 %v8250_v20  ;;  %7403 = vmatprep.subr.bf16.mxu0 %v8251_v21  ;;  %v8299_v20 = vld [vmem:[%s10713_s1 + $0x4b8] sm:$0xff]   ;;  %v453_v21 = vpack.c.bf16 %v141_v17, %v141_v17 }
  0x72   :  { %7425 = vmatprep.subr.bf16.mxu1 %v8252_v22  ;;  %v142_v22 = vcombine.high %v140_v18, %v140_v18  ;;  %v8346_v17 = vld [vmem:[%s10713_s1 + $0x658] sm:$0xff]  }
  0x74   :  { %7404 = vmatpush3.bf16.msra.mxu0 %v8253_v23  ;;  %v8301_v23 = vld [vmem:[%s10713_s1 + $0x540] sm:$0xff]  }
  0x75   :  { %7426 = vmatpush3.bf16.msra.mxu1 %v8254_v24  ;;  %7405 = vmatprep.subr.bf16.mxu0 %v8255_v25  ;;  %v455_v24 = vpack.c.bf16 %v142_v22, %v142_v22  ;;  %v8302_v25 = vld [vmem:[%s10713_s1 + $0x5c0] sm:$0xff]  }
  0x76   :  { %7427 = vmatprep.subr.bf16.mxu1 %v8256_v26  ;;  %v8303_v26 = vld [vmem:[%s10713_s1 + $0x500] sm:$0xff]  }
  0x77   :  { %v8351_v22 = vld [vmem:[%s10713_s1 + $0x6e0] sm:$0xff]  }
  0x78   :  { %7406 = vmatpush3.bf16.msra.mxu0 %v8257_v27  ;;  %v452_v27 = vpack.c.bf16 %v133_v13, %v133_v13  ;;  %v8342_v13 = vld [vmem:[%s10713_s1 + $0x650] sm:$0xff]  }
  0x79   :  { %7428 = vmatpush3.bf16.msra.mxu1 %v8258_v28  ;;  %7407 = vmatprep.subr.bf16.mxu0 %v8259_v29  ;;  %v454_v28 = vpack.c.bf16 %v140_v18, %v140_v18  ;;  %v8304_v29 = vld [vmem:[%s10713_s1 + $0x580] sm:$0xff]   ;;  %v8347_v18 = vld [vmem:[%s10713_s1 + $0x6d8] sm:$0xff]  }
  0x7a   :  { %7429 = vmatprep.subr.bf16.mxu1 %v8260_v30  ;;  %v8305_v30 = vld [vmem:[%s10713_s1 + $0x548] sm:$0xff]  }
  0x7c   :  { %7408 = vmatpush3.bf16.msra.mxu0 %v8261_v31  ;;  %v8306_v31 = vld [vmem:[%s10713_s1 + $0x5c8] sm:$0xff]  }
  0x7d   :  { %7430 = vmatpush3.bf16.msra.mxu1 %v8262_v33  ;;  %7409 = vmatprep.subr.bf16.mxu0 %v8263_v36  ;;  %v8308_v33 = vld [vmem:[%s10713_s1 + $0x588] sm:$0xff]   ;;  %v8311_v36 = vld [vmem:[%s10713_s1 + $0x510] sm:$0xff]  }
  0x7e   :  { %7431 = vmatprep.subr.bf16.mxu1 %v8264_v37  ;;  %v8312_v37 = vld [vmem:[%s10713_s1 + $0x590] sm:$0xff]  }
  0x80   :  { %7410 = vmatpush3.bf16.msra.mxu0 %v8265_v40  ;;  %v8315_v40 = vld [vmem:[%s10713_s1 + $0x518] sm:$0xff]  }
  0x81   :  { %7432 = vmatpush3.bf16.msra.mxu1 %v8266_v42  ;;  %7439 = vmatprep.subr.bf16.mxu0 %v8268_v45  ;;  %v8316_v42 = vld [vmem:[%s10713_s1 + $0x598] sm:$0xff]   ;;  %v8319_v45 = vld [vmem:[%s10713_s1 + $0x520] sm:$0xff]  }
  0x82   :  { %7461 = vmatprep.subr.bf16.mxu1 %v8269_v47  ;;  %v8321_v47 = vld [vmem:[%s10713_s1 + $0x568] sm:$0xff]  }
  0x83   :  { %5396 = vmatmul.mubr.bf16.vlgmr.msra.gmra.mrb[12].mxu0 %v448_v49  ;;  %v8323_v49 = vld [vmem:[%s10713_s1 + $0x528] sm:$0xff]  }
  0x84   :  { %5436 = vmatmul.mubr.bf16.vlgmr.msra.gmra.mrb[12].mxu1 %v450_v50  ;;  %7440 = vmatpush3.bf16.msra.mxu0 %v8270_v48  ;;  %v8322_v48 = vld [vmem:[%s10713_s1 + $0x5e8] sm:$0xff]  }
  0x85   :  { %7462 = vmatpush3.bf16.msra.mxu1 %v8271_v51  ;;  %7441 = vmatprep.subr.bf16.mxu0 %v8272_v52  ;;  %v8324_v50 = vld [vmem:[%s10713_s1 + $0x5a8] sm:$0xff]   ;;  %v8325_v51 = vld [vmem:[%s10713_s1 + $0x570] sm:$0xff]  }
  0x86   :  { %7463 = vmatprep.subr.bf16.mxu1 %v8273_v53  ;;  %5475 = vmatprep.mubr.bf16.mxu0 %v453_v21  ;;  %v8326_v52 = vld [vmem:[%s10713_s1 + $0x5f0] sm:$0xff]   ;;  %v8350_v21 = vld [vmem:[%s10713_s1 + $0x660] sm:$0xff]  }
  0x87   :  { %5515 = vmatprep.mubr.bf16.mxu1 %v455_v24  ;;  %v8327_v53 = vld [vmem:[%s10713_s1 + $0x530] sm:$0xff]   ;;  %v8353_v24 = vld [vmem:[%s10713_s1 + $0x6a0] sm:$0xff]  }
  0x88   :  { %7442 = vmatpush3.bf16.msra.mxu0 %v8274_v54  ;;  %v27_v54 = vld [vmem:[%s10712_s0 + $0x28] sm:$0xff] }
  0x89   :  { %7464 = vmatpush3.bf16.msra.mxu1 %v8275_v55  ;;  %7443 = vmatprep.subr.bf16.mxu0 %v8276_v56  ;;  %v8328_v55 = vld [vmem:[%s10713_s1 + $0x5b0] sm:$0xff]   ;;  %v150_v56 = vrot.slane %v27_v54, %v8898_v41 }
  0x8a   :  { %7465 = vmatprep.subr.bf16.mxu1 %v8277_v57  ;;  %v143_v57 = vcombine.high %v27_v54, %v27_v54  ;;  %v8373_v54 = vld [vmem:[%s10713_s1 + $0x708] sm:$0xff]  }
  0x8c   :  { %7444 = vmatpush3.bf16.msra.mxu0 %v8278_v58  ;;  %v8329_v58 = vld [vmem:[%s10713_s1 + $0x578] sm:$0xff]  }
  0x8d   :  { %7466 = vmatpush3.bf16.msra.mxu1 %v8279_v59  ;;  %7445 = vmatprep.subr.bf16.mxu0 %v8280_v60  ;;  %v8330_v59 = vld [vmem:[%s10713_s1 + $0x5f8] sm:$0xff]   ;;  %v158_v60 = vcombine.high %v150_v56, %v150_v56 }
  0x8e   :  { %7467 = vmatprep.subr.bf16.mxu1 %v8281_v61  ;;  %v157_v61 = vrot.slane %v143_v57, %v8898_v41  ;;  %v8376_v57 = vld [vmem:[%s10713_s1 + $0x7d0] sm:$0xff]  }
  0x90   :  { %7446 = vmatpush3.bf16.msra.mxu0 %v8282_v62  ;;  %v8331_v62 = vld [vmem:[%s10713_s1 + $0x538] sm:$0xff]  }
  0x91   :  { %7468 = vmatpush3.bf16.msra.mxu1 %v8283_v63  ;;  %7447 = vmatprep.subr.bf16.mxu0 %v8284_v0  ;;  %v8332_v63 = vld [vmem:[%s10713_s1 + $0x5b8] sm:$0xff]   ;;  %v457_v0 = vpack.c.bf16 %v158_v60, %v158_v60 }
  0x92   :  { %7469 = vmatprep.subr.bf16.mxu1 %v8285_v1  ;;  %v159_v1 = vcombine.high %v157_v61, %v157_v61  ;;  %v8379_v60 = vld [vmem:[%s10713_s1 + $0x758] sm:$0xff]  }
  0x94   :  { %7448 = vmatpush3.bf16.msra.mxu0 %v8286_v2  ;;  %v8334_v2 = vld [vmem:[%s10713_s1 + $0x640] sm:$0xff]  }
  0x95   :  { %7470 = vmatpush3.bf16.msra.mxu1 %v8287_v3  ;;  %7449 = vmatprep.subr.bf16.mxu0 %v8288_v4  ;;  %v459_v3 = vpack.c.bf16 %v159_v1, %v159_v1  ;;  %v8335_v4 = vld [vmem:[%s10713_s1 + $0x6c0] sm:$0xff]  }
  0x96   :  { %7471 = vmatprep.subr.bf16.mxu1 %v8289_v5  ;;  %v8336_v5 = vld [vmem:[%s10713_s1 + $0x600] sm:$0xff]  }
  0x97   :  { %v8384_v1 = vld [vmem:[%s10713_s1 + $0x7e0] sm:$0xff]  }
  0x98   :  { %7450 = vmatpush3.bf16.msra.mxu0 %v8290_v6  ;;  %v456_v6 = vpack.c.bf16 %v150_v56, %v150_v56  ;;  %v8375_v56 = vld [vmem:[%s10713_s1 + $0x750] sm:$0xff]  }
  0x99   :  { %7472 = vmatpush3.bf16.msra.mxu1 %v8291_v7  ;;  %7451 = vmatprep.subr.bf16.mxu0 %v8292_v8  ;;  %v458_v7 = vpack.c.bf16 %v157_v61, %v157_v61  ;;  %v8337_v8 = vld [vmem:[%s10713_s1 + $0x680] sm:$0xff]   ;;  %v8380_v61 = vld [vmem:[%s10713_s1 + $0x7d8] sm:$0xff]  }
  0x9a   :  { %7473 = vmatprep.subr.bf16.mxu1 %v8293_v9  ;;  %v8338_v9 = vld [vmem:[%s10713_s1 + $0x648] sm:$0xff]  }
  0x9c   :  { %7452 = vmatpush3.bf16.msra.mxu0 %v8294_v10  ;;  %v8339_v10 = vld [vmem:[%s10713_s1 + $0x6c8] sm:$0xff]  }
  0x9d   :  { %7474 = vmatpush3.bf16.msra.mxu1 %v8295_v12  ;;  %7453 = vmatprep.subr.bf16.mxu0 %v8296_v15  ;;  %v8341_v12 = vld [vmem:[%s10713_s1 + $0x688] sm:$0xff]   ;;  %v8344_v15 = vld [vmem:[%s10713_s1 + $0x610] sm:$0xff]  }
  0x9e   :  { %7475 = vmatprep.subr.bf16.mxu1 %v8297_v16  ;;  %v8345_v16 = vld [vmem:[%s10713_s1 + $0x690] sm:$0xff]  }
  0xa0   :  { %7454 = vmatpush3.bf16.msra.mxu0 %v8298_v19  ;;  %v8348_v19 = vld [vmem:[%s10713_s1 + $0x618] sm:$0xff]  }
  0xa1   :  { %7476 = vmatpush3.bf16.msra.mxu1 %v8299_v20  ;;  %7483 = vmatprep.subr.bf16.mxu0 %v8301_v23  ;;  %v8349_v20 = vld [vmem:[%s10713_s1 + $0x698] sm:$0xff]   ;;  %v8352_v23 = vld [vmem:[%s10713_s1 + $0x620] sm:$0xff]  }
  0xa2   :  { %7505 = vmatprep.subr.bf16.mxu1 %v8302_v25  ;;  %v8354_v25 = vld [vmem:[%s10713_s1 + $0x668] sm:$0xff]  }
  0xa3   :  { %5476 = vmatmul.mubr.bf16.vlgmr.msra.gmra.mrb[16].mxu0 %v452_v27  ;;  %v8356_v27 = vld [vmem:[%s10713_s1 + $0x628] sm:$0xff]  }
  0xa4   :  { %5516 = vmatmul.mubr.bf16.vlgmr.msra.gmra.mrb[16].mxu1 %v454_v28  ;;  %7484 = vmatpush3.bf16.msra.mxu0 %v8303_v26  ;;  %v8355_v26 = vld [vmem:[%s10713_s1 + $0x6e8] sm:$0xff]  }
  0xa5   :  { %7506 = vmatpush3.bf16.msra.mxu1 %v8304_v29  ;;  %7485 = vmatprep.subr.bf16.mxu0 %v8305_v30  ;;  %v8357_v28 = vld [vmem:[%s10713_s1 + $0x6a8] sm:$0xff]   ;;  %v8358_v29 = vld [vmem:[%s10713_s1 + $0x670] sm:$0xff]  }
  0xa6   :  { %7507 = vmatprep.subr.bf16.mxu1 %v8306_v31  ;;  %5555 = vmatprep.mubr.bf16.mxu0 %v457_v0  ;;  %v8359_v30 = vld [vmem:[%s10713_s1 + $0x6f0] sm:$0xff]   ;;  %v8383_v0 = vld [vmem:[%s10713_s1 + $0x760] sm:$0xff]  }
  0xa7   :  { %5595 = vmatprep.mubr.bf16.mxu1 %v459_v3  ;;  %v8360_v31 = vld [vmem:[%s10713_s1 + $0x630] sm:$0xff]   ;;  %v8386_v3 = vld [vmem:[%s10713_s1 + $0x7a0] sm:$0xff]  }
  0xa8   :  { %7486 = vmatpush3.bf16.msra.mxu0 %v8307_v32  ;;  %v8361_v32 = vld [vmem:[%s10713_s1 + $0x6b0] sm:$0xff]  }
  0xa9   :  { %7508 = vmatpush3.bf16.msra.mxu1 %v8308_v33  ;;  %7487 = vmatprep.subr.bf16.mxu0 %v8309_v34  ;;  %v28_v33 = vld [vmem:[%s10712_s0 + $0x30] sm:$0xff]  ;;  %v8362_v34 = vld [vmem:[%s10713_s1 + $0x678] sm:$0xff]  }
  0xaa   :  { %7509 = vmatprep.subr.bf16.mxu1 %v8310_v35  ;;  %v167_v35 = vrot.slane %v28_v33, %v8898_v41 }
  0xac   :  { %7488 = vmatpush3.bf16.msra.mxu0 %v8311_v36  ;;  %v160_v36 = vcombine.high %v28_v33, %v28_v33 }
  0xad   :  { %7510 = vmatpush3.bf16.msra.mxu1 %v8312_v37  ;;  %7489 = vmatprep.subr.bf16.mxu0 %v8313_v38  ;;  %v8363_v37 = vld [vmem:[%s10713_s1 + $0x6f8] sm:$0xff]  }
  0xae   :  { %7511 = vmatprep.subr.bf16.mxu1 %v8314_v39  ;;  %v8364_v38 = vld [vmem:[%s10713_s1 + $0x638] sm:$0xff]   ;;  %v175_v39 = vcombine.high %v167_v35, %v167_v35 }
  0xb0   :  { %7490 = vmatpush3.bf16.msra.mxu0 %v8315_v40  ;;  %v174_v40 = vrot.slane %v160_v36, %v8898_v41 }
  0xb1   :  { %7512 = vmatpush3.bf16.msra.mxu1 %v8316_v42  ;;  %7491 = vmatprep.subr.bf16.mxu0 %v8317_v43  ;;  %v8365_v42 = vld [vmem:[%s10713_s1 + $0x6b8] sm:$0xff]   ;;  %v461_v43 = vpack.c.bf16 %v175_v39, %v175_v39 }
  0xb2   :  { %7513 = vmatprep.subr.bf16.mxu1 %v8318_v44  ;;  %v176_v44 = vcombine.high %v174_v40, %v174_v40 }
  0xb4   :  { %7492 = vmatpush3.bf16.msra.mxu0 %v8319_v45  ;;  %v8367_v45 = vld [vmem:[%s10713_s1 + $0x740] sm:$0xff]  }
  0xb5   :  { %7514 = vmatpush3.bf16.msra.mxu1 %v8320_v46  ;;  %7493 = vmatprep.subr.bf16.mxu0 %v8321_v47  ;;  %v8368_v46 = vld [vmem:[%s10713_s1 + $0x7c0] sm:$0xff]   ;;  %v463_v47 = vpack.c.bf16 %v176_v44, %v176_v44  ;;  %v8404_v44 = vld [vmem:[%s10713_s1 + $0x848] sm:$0xff]  }
  0xb6   :  { %7515 = vmatprep.subr.bf16.mxu1 %v8322_v48  ;;  %v8369_v48 = vld [vmem:[%s10713_s1 + $0x700] sm:$0xff]  }
  0xb8   :  { %7494 = vmatpush3.bf16.msra.mxu0 %v8323_v49  ;;  %v460_v49 = vpack.c.bf16 %v167_v35, %v167_v35 }
  0xb9   :  { %7516 = vmatpush3.bf16.msra.mxu1 %v8324_v50  ;;  %7495 = vmatprep.subr.bf16.mxu0 %v8325_v51  ;;  %v462_v50 = vpack.c.bf16 %v174_v40, %v174_v40  ;;  %v8370_v51 = vld [vmem:[%s10713_s1 + $0x780] sm:$0xff]  }
  0xba   :  { %7517 = vmatprep.subr.bf16.mxu1 %v8326_v52  ;;  %v8371_v52 = vld [vmem:[%s10713_s1 + $0x748] sm:$0xff]  }
  0xbc   :  { %7496 = vmatpush3.bf16.msra.mxu0 %v8327_v53  ;;  %v8372_v53 = vld [vmem:[%s10713_s1 + $0x7c8] sm:$0xff]  }
  0xbd   :  { %7518 = vmatpush3.bf16.msra.mxu1 %v8328_v55  ;;  %7497 = vmatprep.subr.bf16.mxu0 %v8329_v58  ;;  %v8374_v55 = vld [vmem:[%s10713_s1 + $0x788] sm:$0xff]   ;;  %v8377_v58 = vld [vmem:[%s10713_s1 + $0x710] sm:$0xff]  }
  0xbe   :  { %7519 = vmatprep.subr.bf16.mxu1 %v8330_v59  ;;  %v8378_v59 = vld [vmem:[%s10713_s1 + $0x790] sm:$0xff]  }
  0xc0   :  { %7498 = vmatpush3.bf16.msra.mxu0 %v8331_v62  ;;  %v8381_v62 = vld [vmem:[%s10713_s1 + $0x718] sm:$0xff]  }
  0xc1   :  { %7520 = vmatpush3.bf16.msra.mxu1 %v8332_v63  ;;  %7527 = vmatprep.subr.bf16.mxu0 %v8334_v2  ;;  %v8382_v63 = vld [vmem:[%s10713_s1 + $0x798] sm:$0xff]   ;;  %v8385_v2 = vld [vmem:[%s10713_s1 + $0x720] sm:$0xff]  }
  0xc2   :  { %7549 = vmatprep.subr.bf16.mxu1 %v8335_v4  ;;  %v8387_v4 = vld [vmem:[%s10713_s1 + $0x768] sm:$0xff]  }
  0xc3   :  { %5556 = vmatmul.mubr.bf16.vlgmr.msra.gmra.mrb[20].mxu0 %v456_v6  ;;  %v8389_v6 = vld [vmem:[%s10713_s1 + $0x728] sm:$0xff]  }
  0xc4   :  { %5596 = vmatmul.mubr.bf16.vlgmr.msra.gmra.mrb[20].mxu1 %v458_v7  ;;  %7528 = vmatpush3.bf16.msra.mxu0 %v8336_v5  ;;  %v8388_v5 = vld [vmem:[%s10713_s1 + $0x7e8] sm:$0xff]  }
  0xc5   :  { %7550 = vmatpush3.bf16.msra.mxu1 %v8337_v8  ;;  %7529 = vmatprep.subr.bf16.mxu0 %v8338_v9  ;;  %v8390_v7 = vld [vmem:[%s10713_s1 + $0x7a8] sm:$0xff]   ;;  %v8391_v8 = vld [vmem:[%s10713_s1 + $0x770] sm:$0xff]   ;;  %v6685_v9 = vld [vmem:[%s10714_s2] ss:$0 sm:$0xff] }
  0xc6   :  { %7551 = vmatprep.subr.bf16.mxu1 %v8339_v10  ;;  %5635 = vmatprep.mubr.bf16.mxu0 %v461_v43  ;;  %v8392_v10 = vld [vmem:[%s10713_s1 + $0x7f0] sm:$0xff]   ;;  %v8403_v43 = vld [vmem:[%s10713_s1 + $0x880] sm:$0xff]  }
  0xc7   :  { %5675 = vmatprep.mubr.bf16.mxu1 %v463_v47  ;;  %v8407_v47 = vld [vmem:[%s10713_s1 + $0x888] sm:$0xff]  }
  0xc8   :  { %7530 = vmatpush3.bf16.msra.mxu0 %v8340_v11 }
  0xc9   :  { %7552 = vmatpush3.bf16.msra.mxu1 %v8341_v12  ;;  %7531 = vmatprep.subr.bf16.mxu0 %v8342_v13  ;;  %v8393_v13 = vld [vmem:[%s10713_s1 + $0x730] sm:$0xff]  }
  0xca   :  { %7553 = vmatprep.subr.bf16.mxu1 %v8343_v14  ;;  %v8394_v14 = vld [vmem:[%s10713_s1 + $0x7b0] sm:$0xff]  }
  0xcc   :  { %7532 = vmatpush3.bf16.msra.mxu0 %v8344_v15 }
  0xcd   :  { %7554 = vmatpush3.bf16.msra.mxu1 %v8345_v16  ;;  %7533 = vmatprep.subr.bf16.mxu0 %v8346_v17  ;;  %v8395_v17 = vld [vmem:[%s10713_s1 + $0x778] sm:$0xff]  }
  0xce   :  { %7555 = vmatprep.subr.bf16.mxu1 %v8347_v18 }
  0xd0   :  { %7534 = vmatpush3.bf16.msra.mxu0 %v8348_v19 }
  0xd1   :  { %7556 = vmatpush3.bf16.msra.mxu1 %v8349_v20  ;;  %7535 = vmatprep.subr.bf16.mxu0 %v8350_v21 }
  0xd2   :  { %7557 = vmatprep.subr.bf16.mxu1 %v8351_v22  ;;  %v8396_v22 = vld [vmem:[%s10713_s1 + $0x7f8] sm:$0xff]  }
  0xd4   :  { %7536 = vmatpush3.bf16.msra.mxu0 %v8352_v23  ;;  %v29_v23 = vld [vmem:[%s10712_s0 + $0x38] sm:$0xff] }
  0xd5   :  { %7558 = vmatpush3.bf16.msra.mxu1 %v8353_v24  ;;  %7537 = vmatprep.subr.bf16.mxu0 %v8354_v25 }
  0xd6   :  { %7559 = vmatprep.subr.bf16.mxu1 %v8355_v26  ;;  %v184_v26 = vrot.slane %v29_v23, %v8898_v41 }
  0xd8   :  { %7538 = vmatpush3.bf16.msra.mxu0 %v8356_v27  ;;  %v177_v27 = vcombine.high %v29_v23, %v29_v23  ;;  %v464_v40 = vpack.c.bf16 %v184_v26, %v184_v26 }
  0xd9   :  { %7560 = vmatpush3.bf16.msra.mxu1 %v8357_v28  ;;  %7539 = vmatprep.subr.bf16.mxu0 %v8358_v29  ;;  %v8397_v29 = vld [vmem:[%s10713_s1 + $0x738] sm:$0xff]  }
  0xda   :  { %7561 = vmatprep.subr.bf16.mxu1 %v8359_v30  ;;  %v8398_v30 = vld [vmem:[%s10713_s1 + $0x7b8] sm:$0xff]  }
  0xdc   :  { %7540 = vmatpush3.bf16.msra.mxu0 %v8360_v31  ;;  %v192_v31 = vcombine.high %v184_v26, %v184_v26  ;;  %v8434_v26 = vld [vmem:[%s10713_s1 + $0x9c0] sm:$0xff]  }
  0xdd   :  { %7562 = vmatpush3.bf16.msra.mxu1 %v8361_v32  ;;  %7541 = vmatprep.subr.bf16.mxu0 %v8362_v34  ;;  %v191_v32 = vrot.slane %v177_v27, %v8898_v41  ;;  %v8400_v34 = vld [vmem:[%s10713_s1 + $0x840] sm:$0xff]  }
  0xde   :  { %7563 = vmatprep.subr.bf16.mxu1 %v8363_v37  ;;  %v465_v35 = vpack.c.bf16 %v192_v31, %v192_v31  ;;  %v8401_v37 = vld [vmem:[%s10713_s1 + $0x8c0] sm:$0xff]  }
  0xdf   :  { %v193_v36 = vcombine.high %v191_v32, %v191_v32 }
  0xe0   :  { %7542 = vmatpush3.bf16.msra.mxu0 %v8364_v38  ;;  %v8402_v38 = vld [vmem:[%s10713_s1 + $0x800] sm:$0xff]  }
  0xe1   :  { %7564 = vmatpush3.bf16.msra.mxu1 %v8365_v42  ;;  %7571 = vmatprep.subr.bf16.mxu0 %v8367_v45  ;;  %v467_v39 = vpack.c.bf16 %v193_v36, %v193_v36  ;;  %v466_v42 = vpack.c.bf16 %v191_v32, %v191_v32  ;;  %v8405_v45 = vld [vmem:[%s10713_s1 + $0x8c8] sm:$0xff]   ;;  %v8436_v32 = vld [vmem:[%s10713_s1 + $0x980] sm:$0xff]  }
  0xe2   :  { %7593 = vmatprep.subr.bf16.mxu1 %v8368_v46  ;;  %v8406_v46 = vld [vmem:[%s10713_s1 + $0x808] sm:$0xff]  }
  0xe3   :  { %5636 = vmatmul.mubr.bf16.vlgmr.msra.gmra.mrb[24].mxu0 %v460_v49  ;;  %v8409_v49 = vld [vmem:[%s10713_s1 + $0x8d0] sm:$0xff]   ;;  %v8439_v36 = vld [vmem:[%s10713_s1 + $0x908] sm:$0xff]  }
  0xe4   :  { %5676 = vmatmul.mubr.bf16.vlgmr.msra.gmra.mrb[24].mxu1 %v462_v50  ;;  %7572 = vmatpush3.bf16.msra.mxu0 %v8369_v48  ;;  %v8408_v48 = vld [vmem:[%s10713_s1 + $0x850] sm:$0xff]  }
  0xe5   :  { %7594 = vmatpush3.bf16.msra.mxu1 %v8370_v51  ;;  %7573 = vmatprep.subr.bf16.mxu0 %v8371_v52  ;;  %v8410_v50 = vld [vmem:[%s10713_s1 + $0x810] sm:$0xff]   ;;  %v8412_v52 = vld [vmem:[%s10713_s1 + $0x858] sm:$0xff]  }
  0xe6   :  { %7595 = vmatprep.subr.bf16.mxu1 %v8372_v53  ;;  %5715 = vmatprep.mubr.bf16.mxu0 %v465_v35  ;;  %v8411_v51 = vld [vmem:[%s10713_s1 + $0x890] sm:$0xff]   ;;  %v8413_v53 = vld [vmem:[%s10713_s1 + $0x8d8] sm:$0xff]   ;;  %v8438_v35 = vld [vmem:[%s10713_s1 + $0x9c8] sm:$0xff]  }
  0xe7   :  { %5755 = vmatprep.mubr.bf16.mxu1 %v467_v39  ;;  %v8442_v39 = vld [vmem:[%s10713_s1 + $0x9d0] sm:$0xff]  }
  0xe8   :  { %7574 = vmatpush3.bf16.msra.mxu0 %v8373_v54  ;;  %v8414_v54 = vld [vmem:[%s10713_s1 + $0x818] sm:$0xff]  }
  0xe9   :  { %7596 = vmatpush3.bf16.msra.mxu1 %v8374_v55  ;;  %7575 = vmatprep.subr.bf16.mxu0 %v8375_v56  ;;  %v8415_v55 = vld [vmem:[%s10713_s1 + $0x898] sm:$0xff]   ;;  %v8416_v56 = vld [vmem:[%s10713_s1 + $0x860] sm:$0xff]  }
  0xea   :  { %7597 = vmatprep.subr.bf16.mxu1 %v8376_v57  ;;  %v8417_v57 = vld [vmem:[%s10713_s1 + $0x8e0] sm:$0xff]  }
  0xec   :  { %7576 = vmatpush3.bf16.msra.mxu0 %v8377_v58  ;;  %v8418_v58 = vld [vmem:[%s10713_s1 + $0x820] sm:$0xff]  }
  0xed   :  { %7598 = vmatpush3.bf16.msra.mxu1 %v8378_v59  ;;  %7577 = vmatprep.subr.bf16.mxu0 %v8379_v60  ;;  %v8419_v59 = vld [vmem:[%s10713_s1 + $0x8a0] sm:$0xff]   ;;  %v8420_v60 = vld [vmem:[%s10713_s1 + $0x868] sm:$0xff]  }
  0xee   :  { %7599 = vmatprep.subr.bf16.mxu1 %v8380_v61  ;;  %v8421_v61 = vld [vmem:[%s10713_s1 + $0x8e8] sm:$0xff]  }
  0xf0   :  { %7578 = vmatpush3.bf16.msra.mxu0 %v8381_v62  ;;  %v8422_v62 = vld [vmem:[%s10713_s1 + $0x828] sm:$0xff]  }
  0xf1   :  { %7600 = vmatpush3.bf16.msra.mxu1 %v8382_v63  ;;  %7579 = vmatprep.subr.bf16.mxu0 %v8383_v0  ;;  %v8423_v63 = vld [vmem:[%s10713_s1 + $0x8a8] sm:$0xff]   ;;  %v8424_v0 = vld [vmem:[%s10713_s1 + $0x870] sm:$0xff]  }
  0xf2   :  { %7601 = vmatprep.subr.bf16.mxu1 %v8384_v1  ;;  %v8425_v1 = vld [vmem:[%s10713_s1 + $0x8f0] sm:$0xff]  }
  0xf4   :  { %7580 = vmatpush3.bf16.msra.mxu0 %v8385_v2 }
  0xf5   :  { %7602 = vmatpush3.bf16.msra.mxu1 %v8386_v3  ;;  %7581 = vmatprep.subr.bf16.mxu0 %v8387_v4  ;;  %v8426_v4 = vld [vmem:[%s10713_s1 + $0x830] sm:$0xff]  }
  0xf6   :  { %7603 = vmatprep.subr.bf16.mxu1 %v8388_v5  ;;  %v7279_v11 = vpop.f32.mrb[0].mxu0  ;;  %v8427_v5 = vld [vmem:[%s10713_s1 + $0x8b0] sm:$0xff]  }
  0xf7   :  { %v7301_v12 = vpop.f32.mrb[0].mxu1  ;;  %v7280_v15 = vpop.f32.mrb[1].mxu0 }
  0xf8   :  { %v7302_v16 = vpop.f32.mrb[1].mxu1  ;;  %v7281_v18 = vadd.f32 %v7280_v15, %v7279_v11  ;;  %v7282_v20 = vpop.f32.mrb[2].mxu0  ;;  %7582 = vmatpush3.bf16.msra.mxu0 %v8389_v6  ;;  %v8429_v15 = vld [vmem:[%s10713_s1 + $0x8f8] sm:$0xff]  }
  0xf9   :  { %v7303_v19 = vadd.f32 %v7302_v16, %v7301_v12  ;;  %v7304_v21 = vpop.f32.mrb[2].mxu1  ;;  %7604 = vmatpush3.bf16.msra.mxu1 %v8390_v7  ;;  %v7283_v24 = vpop.f32.mrb[3].mxu0  ;;  %7583 = vmatprep.subr.bf16.mxu0 %v8391_v8  ;;  %v8428_v8 = vld [vmem:[%s10713_s1 + $0x878] sm:$0xff]   ;;  %v30_v16 = vld [vmem:[%s10712_s0 + $0x40] sm:$0xff] }
  0xfa   :  { %v7305_v25 = vpop.f32.mrb[3].mxu1  ;;  %7605 = vmatprep.subr.bf16.mxu1 %v8392_v10  ;;  %v5158_v28 = vadd.f32 %v7281_v18, %v6685_v9  ;;  %v8430_v18 = vld [vmem:[%s10713_s1 + $0x838] sm:$0xff]   ;;  %v194_v20 = vcombine.high %v30_v16, %v30_v16 }
  0xfb   :  { %v8431_v21 = vld [vmem:[%s10713_s1 + $0x8b8] sm:$0xff]   ;;  %v8433_v25 = vld [vmem:[%s10713_s1 + $0x940] sm:$0xff]  }
  0xfc   :  { %v9606_v33 = vadd.f32 %v7303_v19, %v5158_v28  ;;  %7584 = vmatpush3.bf16.msra.mxu0 %v8393_v13  ;;  %v201_v19 = vrot.slane %v30_v16, %v8898_v41  ;;  %v208_v24 = vrot.slane %v194_v20, %v8898_v41  ;;  %v8466_v16 = vld [vmem:[%s10713_s1 + $0xa40] sm:$0xff]  }
  0xfd   :  { %7606 = vmatpush3.bf16.msra.mxu1 %v8394_v14  ;;  %7585 = vmatprep.subr.bf16.mxu0 %v8395_v17 }
  0xfe   :  { %7607 = vmatprep.subr.bf16.mxu1 %v8396_v22  ;;  %v209_v23 = vcombine.high %v201_v19, %v201_v19  ;;  %v210_v28 = vcombine.high %v208_v24, %v208_v24  ;;  %v470_v31 = vpack.c.bf16 %v208_v24, %v208_v24 }
 0x100   :  { %7586 = vmatpush3.bf16.msra.mxu0 %v8397_v29  ;;  %v469_v27 = vpack.c.bf16 %v209_v23, %v209_v23  ;;  %v8435_v29 = vld [vmem:[%s10713_s1 + $0x900] sm:$0xff]  }
 0x101   :  { %7608 = vmatpush3.bf16.msra.mxu1 %v8398_v30  ;;  %7615 = vmatprep.subr.bf16.mxu0 %v8400_v34  ;;  %v468_v30 = vpack.c.bf16 %v201_v19, %v201_v19  ;;  %v8437_v34 = vld [vmem:[%s10713_s1 + $0x948] sm:$0xff]   ;;  %v8469_v23 = vld [vmem:[%s10713_s1 + $0xa80] sm:$0xff]  }
 0x102   :  { %7637 = vmatprep.subr.bf16.mxu1 %v8401_v37  ;;  %v8440_v37 = vld [vmem:[%s10713_s1 + $0x988] sm:$0xff]  }
 0x103   :  { %5716 = vmatmul.mubr.bf16.vlgmr.msra.gmra.mrb[28].mxu0 %v464_v40  ;;  %v8443_v40 = vld [vmem:[%s10713_s1 + $0x910] sm:$0xff]  }
 0x104   :  { %5756 = vmatmul.mubr.bf16.vlgmr.msra.gmra.mrb[28].mxu1 %v466_v42  ;;  %7616 = vmatpush3.bf16.msra.mxu0 %v8402_v38  ;;  %v8441_v38 = vld [vmem:[%s10713_s1 + $0x950] sm:$0xff]  }
 0x105   :  { %7638 = vmatpush3.bf16.msra.mxu1 %v8403_v43  ;;  %7617 = vmatprep.subr.bf16.mxu0 %v8404_v44  ;;  %v8444_v42 = vld [vmem:[%s10713_s1 + $0x990] sm:$0xff]   ;;  %v8445_v43 = vld [vmem:[%s10713_s1 + $0x958] sm:$0xff]  }
 0x106   :  { %7639 = vmatprep.subr.bf16.mxu1 %v8405_v45  ;;  %5795 = vmatprep.mubr.bf16.mxu0 %v469_v27  ;;  %v8446_v44 = vld [vmem:[%s10713_s1 + $0x9d8] sm:$0xff]   ;;  %v8472_v27 = vld [vmem:[%s10713_s1 + $0xa08] sm:$0xff]  }
 0x107   :  { %v8447_v45 = vld [vmem:[%s10713_s1 + $0x918] sm:$0xff]  }
 0x108   :  { %7618 = vmatpush3.bf16.msra.mxu0 %v8406_v46  ;;  %v8448_v46 = vld [vmem:[%s10713_s1 + $0x998] sm:$0xff]  }
 0x109   :  { %7640 = vmatpush3.bf16.msra.mxu1 %v8407_v47  ;;  %7619 = vmatprep.subr.bf16.mxu0 %v8408_v48  ;;  %v8449_v47 = vld [vmem:[%s10713_s1 + $0x960] sm:$0xff]  }
 0x10a   :  { %7641 = vmatprep.subr.bf16.mxu1 %v8409_v49  ;;  %v8450_v48 = vld [vmem:[%s10713_s1 + $0x9e0] sm:$0xff]  }
 0x10b   :  { %v8451_v49 = vld [vmem:[%s10713_s1 + $0x920] sm:$0xff]  }
 0x10c   :  { %7620 = vmatpush3.bf16.msra.mxu0 %v8410_v50  ;;  %v8452_v50 = vld [vmem:[%s10713_s1 + $0x9a0] sm:$0xff]  }
 0x10d   :  { %7642 = vmatpush3.bf16.msra.mxu1 %v8411_v51  ;;  %7621 = vmatprep.subr.bf16.mxu0 %v8412_v52  ;;  %v8453_v51 = vld [vmem:[%s10713_s1 + $0x968] sm:$0xff]  }
 0x10e   :  { %7643 = vmatprep.subr.bf16.mxu1 %v8413_v53  ;;  %v8454_v52 = vld [vmem:[%s10713_s1 + $0x9e8] sm:$0xff]  }
 0x10f   :  { %v8455_v53 = vld [vmem:[%s10713_s1 + $0x928] sm:$0xff]  }
 0x110   :  { %7622 = vmatpush3.bf16.msra.mxu0 %v8414_v54  ;;  %v8456_v54 = vld [vmem:[%s10713_s1 + $0x9a8] sm:$0xff]  }
 0x111   :  { %7644 = vmatpush3.bf16.msra.mxu1 %v8415_v55  ;;  %7623 = vmatprep.subr.bf16.mxu0 %v8416_v56  ;;  %v8457_v55 = vld [vmem:[%s10713_s1 + $0x970] sm:$0xff]  }
 0x112   :  { %7645 = vmatprep.subr.bf16.mxu1 %v8417_v57  ;;  %v8458_v56 = vld [vmem:[%s10713_s1 + $0x9f0] sm:$0xff]  }
 0x114   :  { %7624 = vmatpush3.bf16.msra.mxu0 %v8418_v58 }
 0x115   :  { %7646 = vmatpush3.bf16.msra.mxu1 %v8419_v59  ;;  %7625 = vmatprep.subr.bf16.mxu0 %v8420_v60  ;;  %v8459_v59 = vld [vmem:[%s10713_s1 + $0x930] sm:$0xff]  }
 0x116   :  { %7647 = vmatprep.subr.bf16.mxu1 %v8421_v61  ;;  %v7323_v2 = vpop.f32.mrb[4].mxu0  ;;  %v8460_v60 = vld [vmem:[%s10713_s1 + $0x9b0] sm:$0xff]  }
 0x117   :  { %v7345_v3 = vpop.f32.mrb[4].mxu1  ;;  %v7324_v6 = vpop.f32.mrb[5].mxu0 }
 0x118   :  { %v7346_v7 = vpop.f32.mrb[5].mxu1  ;;  %v7325_v9 = vadd.f32 %v7324_v6, %v7323_v2  ;;  %v7326_v11 = vpop.f32.mrb[6].mxu0  ;;  %7626 = vmatpush3.bf16.msra.mxu0 %v8422_v62  ;;  %v8462_v6 = vld [vmem:[%s10713_s1 + $0x9f8] sm:$0xff]  }
 0x119   :  { %v7347_v10 = vadd.f32 %v7346_v7, %v7345_v3  ;;  %v7348_v12 = vpop.f32.mrb[6].mxu1  ;;  %7648 = vmatpush3.bf16.msra.mxu1 %v8423_v63  ;;  %v7327_v13 = vpop.f32.mrb[7].mxu0  ;;  %7627 = vmatprep.subr.bf16.mxu0 %v8424_v0 }
 0x11a   :  { %v7349_v14 = vpop.f32.mrb[7].mxu1  ;;  %7649 = vmatprep.subr.bf16.mxu1 %v8425_v1  ;;  %v5238_v17 = vadd.f32 %v7325_v9, %v9606_v33  ;;  %v471_v33 = vpack.c.bf16 %v210_v28, %v210_v28  ;;  %v8463_v9 = vld [vmem:[%s10713_s1 + $0x938] sm:$0xff]   ;;  %v8473_v28 = vld [vmem:[%s10713_s1 + $0xa88] sm:$0xff]  }
 0x11b   :  { %v8464_v13 = vld [vmem:[%s10713_s1 + $0x9b8] sm:$0xff]  }
 0x11c   :  { %v9709_v22 = vadd.f32 %v7347_v10, %v5238_v17  ;;  %7628 = vmatpush3.bf16.msra.mxu0 %v8426_v4  ;;  %5835 = vmatprep.mubr.bf16.mxu1 %v471_v33  ;;  %v8467_v17 = vld [vmem:[%s10713_s1 + $0xac0] sm:$0xff]   ;;  %v8478_v33 = vld [vmem:[%s10713_s1 + $0xa58] sm:$0xff]  }
 0x11d   :  { %7650 = vmatpush3.bf16.msra.mxu1 %v8427_v5  ;;  %7629 = vmatprep.subr.bf16.mxu0 %v8428_v8  ;;  %v8461_v5 = vld [vmem:[%s10713_s1 + $0x978] sm:$0xff]   ;;  %v31_v8 = vld [vmem:[%s10712_s0 + $0x48] sm:$0xff] }
 0x11e   :  { %7651 = vmatprep.subr.bf16.mxu1 %v8429_v15  ;;  %v218_v10 = vrot.slane %v31_v8, %v8898_v41  ;;  %v211_v11 = vcombine.high %v31_v8, %v31_v8  ;;  %v8500_v8 = vld [vmem:[%s10713_s1 + $0xbc0] sm:$0xff]  }
 0x120   :  { %7630 = vmatpush3.bf16.msra.mxu0 %v8430_v18  ;;  %v226_v14 = vcombine.high %v218_v10, %v218_v10  ;;  %v225_v15 = vrot.slane %v211_v11, %v8898_v41  ;;  %v472_v20 = vpack.c.bf16 %v218_v10, %v218_v10  ;;  %v8501_v10 = vld [vmem:[%s10713_s1 + $0xb00] sm:$0xff]  }
 0x121   :  { %7652 = vmatpush3.bf16.msra.mxu1 %v8431_v21  ;;  %7659 = vmatprep.subr.bf16.mxu0 %v8433_v25  ;;  %v8468_v21 = vld [vmem:[%s10713_s1 + $0xa00] sm:$0xff]   ;;  %v8470_v25 = vld [vmem:[%s10713_s1 + $0xa48] sm:$0xff]  }
 0x122   :  { %7681 = vmatprep.subr.bf16.mxu1 %v8434_v26  ;;  %v473_v18 = vpack.c.bf16 %v226_v14, %v226_v14  ;;  %v227_v19 = vcombine.high %v225_v15, %v225_v15  ;;  %v8471_v26 = vld [vmem:[%s10713_s1 + $0xac8] sm:$0xff]  }
 0x123   :  { %5796 = vmatmul.mubr.bf16.vlgmr.msra.gmra.mrb[32].mxu0 %v468_v30  ;;  %v8475_v30 = vld [vmem:[%s10713_s1 + $0xad0] sm:$0xff]  }
 0x124   :  { %5836 = vmatmul.mubr.bf16.vlgmr.msra.gmra.mrb[32].mxu1 %v470_v31  ;;  %7660 = vmatpush3.bf16.msra.mxu0 %v8435_v29  ;;  %v475_v24 = vpack.c.bf16 %v227_v19, %v227_v19  ;;  %v8474_v29 = vld [vmem:[%s10713_s1 + $0xa50] sm:$0xff]   ;;  %v8506_v19 = vld [vmem:[%s10713_s1 + $0xb88] sm:$0xff]  }
 0x125   :  { %7682 = vmatpush3.bf16.msra.mxu1 %v8436_v32  ;;  %7661 = vmatprep.subr.bf16.mxu0 %v8437_v34  ;;  %v8476_v31 = vld [vmem:[%s10713_s1 + $0xa10] sm:$0xff]   ;;  %v8479_v34 = vld [vmem:[%s10713_s1 + $0xad8] sm:$0xff]  }
 0x126   :  { %7683 = vmatprep.subr.bf16.mxu1 %v8438_v35  ;;  %5875 = vmatprep.mubr.bf16.mxu0 %v473_v18  ;;  %v8477_v32 = vld [vmem:[%s10713_s1 + $0xa90] sm:$0xff]   ;;  %v8480_v35 = vld [vmem:[%s10713_s1 + $0xa18] sm:$0xff]   ;;  %v8505_v18 = vld [vmem:[%s10713_s1 + $0xb08] sm:$0xff]  }
 0x127   :  { %5915 = vmatprep.mubr.bf16.mxu1 %v475_v24  ;;  %v8511_v24 = vld [vmem:[%s10713_s1 + $0xb58] sm:$0xff]  }
 0x128   :  { %7662 = vmatpush3.bf16.msra.mxu0 %v8439_v36  ;;  %v8481_v36 = vld [vmem:[%s10713_s1 + $0xa98] sm:$0xff]  }
 0x129   :  { %7684 = vmatpush3.bf16.msra.mxu1 %v8440_v37  ;;  %7663 = vmatprep.subr.bf16.mxu0 %v8441_v38  ;;  %v8482_v37 = vld [vmem:[%s10713_s1 + $0xa60] sm:$0xff]  }
 0x12a   :  { %7685 = vmatprep.subr.bf16.mxu1 %v8442_v39  ;;  %v8483_v38 = vld [vmem:[%s10713_s1 + $0xae0] sm:$0xff]  }
 0x12b   :  { %v8484_v39 = vld [vmem:[%s10713_s1 + $0xa20] sm:$0xff]  }
 0x12c   :  { %7664 = vmatpush3.bf16.msra.mxu0 %v8443_v40  ;;  %v8485_v40 = vld [vmem:[%s10713_s1 + $0xaa0] sm:$0xff]  }
 0x12d   :  { %7686 = vmatpush3.bf16.msra.mxu1 %v8444_v42  ;;  %7665 = vmatprep.subr.bf16.mxu0 %v8445_v43  ;;  %v8486_v42 = vld [vmem:[%s10713_s1 + $0xa68] sm:$0xff]  }
 0x12e   :  { %7687 = vmatprep.subr.bf16.mxu1 %v8446_v44  ;;  %v8487_v43 = vld [vmem:[%s10713_s1 + $0xae8] sm:$0xff]  }
 0x12f   :  { %v8488_v44 = vld [vmem:[%s10713_s1 + $0xa28] sm:$0xff]  }
 0x130   :  { %7666 = vmatpush3.bf16.msra.mxu0 %v8447_v45  ;;  %v8489_v45 = vld [vmem:[%s10713_s1 + $0xaa8] sm:$0xff]  }
 0x131   :  { %7688 = vmatpush3.bf16.msra.mxu1 %v8448_v46  ;;  %7667 = vmatprep.subr.bf16.mxu0 %v8449_v47  ;;  %v8490_v46 = vld [vmem:[%s10713_s1 + $0xa70] sm:$0xff]  }
 0x132   :  { %7689 = vmatprep.subr.bf16.mxu1 %v8450_v48 }
 0x134   :  { %7668 = vmatpush3.bf16.msra.mxu0 %v8451_v49  ;;  %v8491_v49 = vld [vmem:[%s10713_s1 + $0xaf0] sm:$0xff]  }
 0x135   :  { %7690 = vmatpush3.bf16.msra.mxu1 %v8452_v50  ;;  %7669 = vmatprep.subr.bf16.mxu0 %v8453_v51  ;;  %v8492_v50 = vld [vmem:[%s10713_s1 + $0xa30] sm:$0xff]  }
 0x136   :  { %7691 = vmatprep.subr.bf16.mxu1 %v8454_v52  ;;  %v7367_v57 = vpop.f32.mrb[8].mxu0 }
 0x137   :  { %v7389_v58 = vpop.f32.mrb[8].mxu1  ;;  %v7368_v61 = vpop.f32.mrb[9].mxu0 }
 0x138   :  { %v7390_v62 = vpop.f32.mrb[9].mxu1  ;;  %v7369_v63 = vadd.f32 %v7368_v61, %v7367_v57  ;;  %v7370_v1 = vpop.f32.mrb[10].mxu0  ;;  %7670 = vmatpush3.bf16.msra.mxu0 %v8455_v53  ;;  %v8493_v53 = vld [vmem:[%s10713_s1 + $0xab0] sm:$0xff]   ;;  %v8495_v61 = vld [vmem:[%s10713_s1 + $0xaf8] sm:$0xff]  }
 0x139   :  { %v7391_v0 = vadd.f32 %v7390_v62, %v7389_v58  ;;  %v7392_v2 = vpop.f32.mrb[10].mxu1  ;;  %7692 = vmatpush3.bf16.msra.mxu1 %v8456_v54  ;;  %v7371_v3 = vpop.f32.mrb[11].mxu0  ;;  %7671 = vmatprep.subr.bf16.mxu0 %v8457_v55 }
 0x13a   :  { %v7393_v4 = vpop.f32.mrb[11].mxu1  ;;  %7693 = vmatprep.subr.bf16.mxu1 %v8458_v56  ;;  %v5318_v7 = vadd.f32 %v7369_v63, %v9709_v22  ;;  %v474_v22 = vpack.c.bf16 %v225_v15, %v225_v15  ;;  %v8496_v63 = vld [vmem:[%s10713_s1 + $0xa38] sm:$0xff]   ;;  %v8503_v15 = vld [vmem:[%s10713_s1 + $0xb48] sm:$0xff]  }
 0x13b   :  { %v8497_v2 = vld [vmem:[%s10713_s1 + $0xab8] sm:$0xff]  }
 0x13c   :  { %v9810_v12 = vadd.f32 %v7391_v0, %v5318_v7  ;;  %7672 = vmatpush3.bf16.msra.mxu0 %v8459_v59  ;;  %v32_v0 = vld [vmem:[%s10712_s0 + $0x50] sm:$0xff] }
 0x13d   :  { %7694 = vmatpush3.bf16.msra.mxu1 %v8460_v60  ;;  %7673 = vmatprep.subr.bf16.mxu0 %v8461_v5  ;;  %v8494_v60 = vld [vmem:[%s10713_s1 + $0xa78] sm:$0xff]   ;;  %v235_v3 = vrot.slane %v32_v0, %v8898_v41  ;;  %v228_v4 = vcombine.high %v32_v0, %v32_v0  ;;  %v8499_v5 = vld [vmem:[%s10713_s1 + $0xb40] sm:$0xff]  }
 0x13e   :  { %7695 = vmatprep.subr.bf16.mxu1 %v8462_v6 }
 0x13f   :  { %v243_v6 = vcombine.high %v235_v3, %v235_v3  ;;  %v242_v7 = vrot.slane %v228_v4, %v8898_v41  ;;  %v8535_v4 = vld [vmem:[%s10713_s1 + $0xc80] sm:$0xff]  }
 0x140   :  { %7674 = vmatpush3.bf16.msra.mxu0 %v8463_v9  ;;  %v476_v9 = vpack.c.bf16 %v235_v3, %v235_v3 }
 0x141   :  { %7696 = vmatpush3.bf16.msra.mxu1 %v8464_v13  ;;  %7703 = vmatprep.subr.bf16.mxu0 %v8466_v16  ;;  %v477_v11 = vpack.c.bf16 %v243_v6, %v243_v6  ;;  %v8502_v13 = vld [vmem:[%s10713_s1 + $0xb80] sm:$0xff]   ;;  %v478_v14 = vpack.c.bf16 %v242_v7, %v242_v7  ;;  %v8536_v6 = vld [vmem:[%s10713_s1 + $0xc48] sm:$0xff]  }
 0x142   :  { %7725 = vmatprep.subr.bf16.mxu1 %v8467_v17  ;;  %v8504_v17 = vld [vmem:[%s10713_s1 + $0xbc8] sm:$0xff]  }
 0x143   :  { %5876 = vmatmul.mubr.bf16.vlgmr.msra.gmra.mrb[36].mxu0 %v472_v20  ;;  %v8507_v20 = vld [vmem:[%s10713_s1 + $0xb50] sm:$0xff]  }
 0x144   :  { %5916 = vmatmul.mubr.bf16.vlgmr.msra.gmra.mrb[36].mxu1 %v474_v22  ;;  %7704 = vmatpush3.bf16.msra.mxu0 %v8468_v21  ;;  %v8508_v21 = vld [vmem:[%s10713_s1 + $0xbd0] sm:$0xff]  }
 0x145   :  { %7726 = vmatpush3.bf16.msra.mxu1 %v8469_v23  ;;  %7705 = vmatprep.subr.bf16.mxu0 %v8470_v25  ;;  %v8509_v22 = vld [vmem:[%s10713_s1 + $0xb10] sm:$0xff]   ;;  %v8512_v25 = vld [vmem:[%s10713_s1 + $0xbd8] sm:$0xff]  }
 0x146   :  { %7727 = vmatprep.subr.bf16.mxu1 %v8471_v26  ;;  %5955 = vmatprep.mubr.bf16.mxu0 %v477_v11  ;;  %v8510_v23 = vld [vmem:[%s10713_s1 + $0xb90] sm:$0xff]   ;;  %v8513_v26 = vld [vmem:[%s10713_s1 + $0xb18] sm:$0xff]  }
 0x147   :  { %v8540_v11 = vld [vmem:[%s10713_s1 + $0xc50] sm:$0xff]  }
 0x148   :  { %7706 = vmatpush3.bf16.msra.mxu0 %v8472_v27  ;;  %v8514_v27 = vld [vmem:[%s10713_s1 + $0xb98] sm:$0xff]  }
 0x149   :  { %7728 = vmatpush3.bf16.msra.mxu1 %v8473_v28  ;;  %7707 = vmatprep.subr.bf16.mxu0 %v8474_v29  ;;  %v8515_v28 = vld [vmem:[%s10713_s1 + $0xb60] sm:$0xff]  }
 0x14a   :  { %7729 = vmatprep.subr.bf16.mxu1 %v8475_v30  ;;  %v8516_v29 = vld [vmem:[%s10713_s1 + $0xbe0] sm:$0xff]  }
 0x14b   :  { %v8517_v30 = vld [vmem:[%s10713_s1 + $0xb20] sm:$0xff]  }
 0x14c   :  { %7708 = vmatpush3.bf16.msra.mxu0 %v8476_v31  ;;  %v8518_v31 = vld [vmem:[%s10713_s1 + $0xba0] sm:$0xff]  }
 0x14d   :  { %7730 = vmatpush3.bf16.msra.mxu1 %v8477_v32  ;;  %7709 = vmatprep.subr.bf16.mxu0 %v8478_v33  ;;  %v8519_v32 = vld [vmem:[%s10713_s1 + $0xb68] sm:$0xff]  }
 0x14e   :  { %7731 = vmatprep.subr.bf16.mxu1 %v8479_v34  ;;  %v8520_v33 = vld [vmem:[%s10713_s1 + $0xbe8] sm:$0xff]  }
 0x14f   :  { %v8521_v34 = vld [vmem:[%s10713_s1 + $0xb28] sm:$0xff]  }
 0x150   :  { %7710 = vmatpush3.bf16.msra.mxu0 %v8480_v35  ;;  %v8522_v35 = vld [vmem:[%s10713_s1 + $0xba8] sm:$0xff]  }
 0x151   :  { %7732 = vmatpush3.bf16.msra.mxu1 %v8481_v36  ;;  %7711 = vmatprep.subr.bf16.mxu0 %v8482_v37  ;;  %v8523_v36 = vld [vmem:[%s10713_s1 + $0xb70] sm:$0xff]  }
 0x152   :  { %7733 = vmatprep.subr.bf16.mxu1 %v8483_v38 }
 0x154   :  { %7712 = vmatpush3.bf16.msra.mxu0 %v8484_v39  ;;  %v8524_v39 = vld [vmem:[%s10713_s1 + $0xbf0] sm:$0xff]  }
 0x155   :  { %7734 = vmatpush3.bf16.msra.mxu1 %v8485_v40  ;;  %7713 = vmatprep.subr.bf16.mxu0 %v8486_v42  ;;  %v8525_v40 = vld [vmem:[%s10713_s1 + $0xb30] sm:$0xff]  }
 0x156   :  { %v7411_v47 = vpop.f32.mrb[12].mxu0  ;;  %7735 = vmatprep.subr.bf16.mxu1 %v8487_v43 }
 0x157   :  { %v7433_v48 = vpop.f32.mrb[12].mxu1  ;;  %v7412_v51 = vpop.f32.mrb[13].mxu0 }
 0x158   :  { %v7434_v52 = vpop.f32.mrb[13].mxu1  ;;  %v7413_v54 = vadd.f32 %v7412_v51, %v7411_v47  ;;  %v7414_v56 = vpop.f32.mrb[14].mxu0  ;;  %7714 = vmatpush3.bf16.msra.mxu0 %v8488_v44  ;;  %v8527_v51 = vld [vmem:[%s10713_s1 + $0xb78] sm:$0xff]  }
 0x159   :  { %v7435_v55 = vadd.f32 %v7434_v52, %v7433_v48  ;;  %v7436_v57 = vpop.f32.mrb[14].mxu1  ;;  %7736 = vmatpush3.bf16.msra.mxu1 %v8489_v45  ;;  %v7415_v58 = vpop.f32.mrb[15].mxu0  ;;  %7715 = vmatprep.subr.bf16.mxu0 %v8490_v46  ;;  %v33_v56 = vld [vmem:[%s10712_s0 + $0x58] sm:$0xff] }
 0x15a   :  { %v7437_v59 = vpop.f32.mrb[15].mxu1  ;;  %v5398_v62 = vadd.f32 %v7413_v54, %v9810_v12  ;;  %7737 = vmatprep.subr.bf16.mxu1 %v8491_v49  ;;  %v244_v12 = vcombine.high %v242_v7, %v242_v7  ;;  %v252_v57 = vrot.slane %v33_v56, %v8898_v41  ;;  %v245_v58 = vcombine.high %v33_v56, %v33_v56  ;;  %v8567_v56 = vld [vmem:[%s10713_s1 + $0xd00] sm:$0xff]  }
 0x15b   :  { %v8532_v59 = vld [vmem:[%s10713_s1 + $0xc40] sm:$0xff]  }
 0x15c   :  { %v9913_v1 = vadd.f32 %v7435_v55, %v5398_v62  ;;  %7716 = vmatpush3.bf16.msra.mxu0 %v8492_v50  ;;  %v479_v16 = vpack.c.bf16 %v244_v12, %v244_v12  ;;  %v8526_v50 = vld [vmem:[%s10713_s1 + $0xbb0] sm:$0xff]   ;;  %v8529_v55 = vld [vmem:[%s10713_s1 + $0xb38] sm:$0xff]   ;;  %v259_v62 = vrot.slane %v245_v58, %v8898_v41  ;;  %v480_v0 = vpack.c.bf16 %v252_v57, %v252_v57 }
 0x15d   :  { %7738 = vmatpush3.bf16.msra.mxu1 %v8493_v53  ;;  %7717 = vmatprep.subr.bf16.mxu0 %v8494_v60  ;;  %v8528_v53 = vld [vmem:[%s10713_s1 + $0xbf8] sm:$0xff]   ;;  %v8541_v12 = vld [vmem:[%s10713_s1 + $0xcd0] sm:$0xff]  }
 0x15e   :  { %7739 = vmatprep.subr.bf16.mxu1 %v8495_v61  ;;  %5995 = vmatprep.mubr.bf16.mxu1 %v479_v16  ;;  %v8530_v60 = vld [vmem:[%s10713_s1 + $0xbb8] sm:$0xff]   ;;  %v260_v61 = vcombine.high %v252_v57, %v252_v57  ;;  %v261_v3 = vcombine.high %v259_v62, %v259_v62 }
 0x15f   :  { %v8545_v16 = vld [vmem:[%s10713_s1 + $0xcd8] sm:$0xff]  }
 0x160   :  { %7718 = vmatpush3.bf16.msra.mxu0 %v8496_v63  ;;  %v8533_v63 = vld [vmem:[%s10713_s1 + $0xcc0] sm:$0xff]   ;;  %v483_v7 = vpack.c.bf16 %v261_v3, %v261_v3  ;;  %v8574_v3 = vld [vmem:[%s10713_s1 + $0xdd0] sm:$0xff]  }
 0x161   :  { %7740 = vmatpush3.bf16.msra.mxu1 %v8497_v2  ;;  %7747 = vmatprep.subr.bf16.mxu0 %v8499_v5  ;;  %v481_v2 = vpack.c.bf16 %v260_v61, %v260_v61  ;;  %v482_v5 = vpack.c.bf16 %v259_v62, %v259_v62  ;;  %v8569_v61 = vld [vmem:[%s10713_s1 + $0xd48] sm:$0xff]  }
 0x162   :  { %7769 = vmatprep.subr.bf16.mxu1 %v8500_v8  ;;  %v8537_v8 = vld [vmem:[%s10713_s1 + $0xcc8] sm:$0xff]  }
 0x163   :  { %5956 = vmatmul.mubr.bf16.vlgmr.msra.gmra.mrb[40].mxu0 %v476_v9  ;;  %v8538_v9 = vld [vmem:[%s10713_s1 + $0xc08] sm:$0xff]  }
 0x164   :  { %7748 = vmatpush3.bf16.msra.mxu0 %v8501_v10  ;;  %5996 = vmatmul.mubr.bf16.vlgmr.msra.gmra.mrb[40].mxu1 %v478_v14  ;;  %v8539_v10 = vld [vmem:[%s10713_s1 + $0xc88] sm:$0xff]   ;;  %v8543_v14 = vld [vmem:[%s10713_s1 + $0xc90] sm:$0xff]  }
 0x165   :  { %7749 = vmatprep.subr.bf16.mxu0 %v8503_v15  ;;  %7770 = vmatpush3.bf16.msra.mxu1 %v8502_v13  ;;  %v8542_v13 = vld [vmem:[%s10713_s1 + $0xc10] sm:$0xff]   ;;  %v8544_v15 = vld [vmem:[%s10713_s1 + $0xc58] sm:$0xff]  }
 0x166   :  { %7771 = vmatprep.subr.bf16.mxu1 %v8504_v17  ;;  %6035 = vmatprep.mubr.bf16.mxu0 %v481_v2  ;;  %v8546_v17 = vld [vmem:[%s10713_s1 + $0xc18] sm:$0xff]   ;;  %v8573_v2 = vld [vmem:[%s10713_s1 + $0xd50] sm:$0xff]  }
 0x167   :  { %6075 = vmatprep.mubr.bf16.mxu1 %v483_v7  ;;  %v8578_v7 = vld [vmem:[%s10713_s1 + $0xdd8] sm:$0xff]  }
 0x168   :  { %7750 = vmatpush3.bf16.msra.mxu0 %v8505_v18  ;;  %v8547_v18 = vld [vmem:[%s10713_s1 + $0xc98] sm:$0xff]  }
 0x169   :  { %7751 = vmatprep.subr.bf16.mxu0 %v8507_v20  ;;  %7772 = vmatpush3.bf16.msra.mxu1 %v8506_v19  ;;  %v8548_v19 = vld [vmem:[%s10713_s1 + $0xc60] sm:$0xff]  }
 0x16a   :  { %7773 = vmatprep.subr.bf16.mxu1 %v8508_v21  ;;  %v8549_v20 = vld [vmem:[%s10713_s1 + $0xce0] sm:$0xff]  }
 0x16b   :  { %v8550_v21 = vld [vmem:[%s10713_s1 + $0xc20] sm:$0xff]  }
 0x16c   :  { %7752 = vmatpush3.bf16.msra.mxu0 %v8509_v22  ;;  %v8551_v22 = vld [vmem:[%s10713_s1 + $0xca0] sm:$0xff]  }
 0x16d   :  { %7753 = vmatprep.subr.bf16.mxu0 %v8511_v24  ;;  %7774 = vmatpush3.bf16.msra.mxu1 %v8510_v23  ;;  %v8552_v23 = vld [vmem:[%s10713_s1 + $0xc68] sm:$0xff]  }
 0x16e   :  { %7775 = vmatprep.subr.bf16.mxu1 %v8512_v25  ;;  %v8553_v24 = vld [vmem:[%s10713_s1 + $0xce8] sm:$0xff]  }
 0x16f   :  { %v8554_v25 = vld [vmem:[%s10713_s1 + $0xc28] sm:$0xff]  }
 0x170   :  { %7754 = vmatpush3.bf16.msra.mxu0 %v8513_v26  ;;  %v8555_v26 = vld [vmem:[%s10713_s1 + $0xca8] sm:$0xff]  }
 0x171   :  { %7755 = vmatprep.subr.bf16.mxu0 %v8515_v28  ;;  %7776 = vmatpush3.bf16.msra.mxu1 %v8514_v27 }
 0x172   :  { %7777 = vmatprep.subr.bf16.mxu1 %v8516_v29  ;;  %v8556_v29 = vld [vmem:[%s10713_s1 + $0xc70] sm:$0xff]  }
 0x174   :  { %7756 = vmatpush3.bf16.msra.mxu0 %v8517_v30  ;;  %v8557_v30 = vld [vmem:[%s10713_s1 + $0xcf0] sm:$0xff]  }
 0x175   :  { %7757 = vmatprep.subr.bf16.mxu0 %v8519_v32  ;;  %7778 = vmatpush3.bf16.msra.mxu1 %v8518_v31 }
 0x176   :  { %v7455_v37 = vpop.f32.mrb[16].mxu0  ;;  %7779 = vmatprep.subr.bf16.mxu1 %v8520_v33 }
 0x177   :  { %v7477_v38 = vpop.f32.mrb[16].mxu1  ;;  %v7456_v42 = vpop.f32.mrb[17].mxu0 }
 0x178   :  { %v7478_v43 = vpop.f32.mrb[17].mxu1  ;;  %v7457_v44 = vadd.f32 %v7456_v42, %v7455_v37  ;;  %v7458_v46 = vpop.f32.mrb[18].mxu0  ;;  %7758 = vmatpush3.bf16.msra.mxu0 %v8521_v34 }
 0x179   :  { %v7479_v45 = vadd.f32 %v7478_v43, %v7477_v38  ;;  %v7480_v47 = vpop.f32.mrb[18].mxu1  ;;  %v7459_v48 = vpop.f32.mrb[19].mxu0  ;;  %7759 = vmatprep.subr.bf16.mxu0 %v8523_v36  ;;  %7780 = vmatpush3.bf16.msra.mxu1 %v8522_v35  ;;  %v8559_v43 = vld [vmem:[%s10713_s1 + $0xcb0] sm:$0xff]   ;;  %v8562_v46 = vld [vmem:[%s10713_s1 + $0xc38] sm:$0xff]  }
 0x17a   :  { %v7481_v49 = vpop.f32.mrb[19].mxu1  ;;  %v5478_v52 = vadd.f32 %v7457_v44, %v9913_v1  ;;  %7781 = vmatprep.subr.bf16.mxu1 %v8524_v39  ;;  %v8534_v1 = vld [vmem:[%s10713_s1 + $0xc00] sm:$0xff]   ;;  %v8558_v39 = vld [vmem:[%s10713_s1 + $0xc30] sm:$0xff]  }
 0x17b   :  { %v34_v47 = vld [vmem:[%s10712_s0 + $0x60] sm:$0xff] }
 0x17c   :  { %v10011_v54 = vadd.f32 %v7479_v45, %v5478_v52  ;;  %7760 = vmatpush3.bf16.msra.mxu0 %v8525_v40  ;;  %v8560_v40 = vld [vmem:[%s10713_s1 + $0xc78] sm:$0xff]   ;;  %v269_v48 = vrot.slane %v34_v47, %v8898_v41  ;;  %v262_v49 = vcombine.high %v34_v47, %v34_v47  ;;  %v8600_v47 = vld [vmem:[%s10713_s1 + $0xe00] sm:$0xff]  }
 0x17d   :  { %7761 = vmatprep.subr.bf16.mxu0 %v8527_v51  ;;  %7782 = vmatpush3.bf16.msra.mxu1 %v8526_v50  ;;  %v8561_v45 = vld [vmem:[%s10713_s1 + $0xcf8] sm:$0xff]   ;;  %v8565_v50 = vld [vmem:[%s10713_s1 + $0xd40] sm:$0xff]  }
 0x17e   :  { %7783 = vmatprep.subr.bf16.mxu1 %v8528_v53  ;;  %v8563_v51 = vld [vmem:[%s10713_s1 + $0xcb8] sm:$0xff]   ;;  %v277_v52 = vcombine.high %v269_v48, %v269_v48  ;;  %v276_v53 = vrot.slane %v262_v49, %v8898_v41 }
 0x180   :  { %7762 = vmatpush3.bf16.msra.mxu0 %v8529_v55  ;;  %v484_v55 = vpack.c.bf16 %v269_v48, %v269_v48  ;;  %v485_v57 = vpack.c.bf16 %v277_v52, %v277_v52  ;;  %v278_v58 = vcombine.high %v276_v53, %v276_v53  ;;  %v8602_v52 = vld [vmem:[%s10713_s1 + $0xe48] sm:$0xff]  }
 0x181   :  { %7791 = vmatprep.subr.bf16.mxu0 %v8532_v59  ;;  %7784 = vmatpush3.bf16.msra.mxu1 %v8530_v60  ;;  %v8568_v59 = vld [vmem:[%s10713_s1 + $0xd80] sm:$0xff]   ;;  %v486_v60 = vpack.c.bf16 %v276_v53, %v276_v53 }
 0x182   :  { %7813 = vmatprep.subr.bf16.mxu1 %v8533_v63  ;;  %v487_v62 = vpack.c.bf16 %v278_v58, %v278_v58  ;;  %v8570_v63 = vld [vmem:[%s10713_s1 + $0xdc8] sm:$0xff]   ;;  %v8607_v58 = vld [vmem:[%s10713_s1 + $0xed0] sm:$0xff]  }
 0x183   :  { %6036 = vmatmul.mubr.bf16.vlgmr.msra.gmra.mrb[44].mxu0 %v480_v0  ;;  %v8571_v0 = vld [vmem:[%s10713_s1 + $0xd08] sm:$0xff]  }
 0x184   :  { %7792 = vmatpush3.bf16.msra.mxu0 %v8534_v1  ;;  %6076 = vmatmul.mubr.bf16.vlgmr.msra.gmra.mrb[44].mxu1 %v482_v5  ;;  %v8572_v1 = vld [vmem:[%s10713_s1 + $0xd88] sm:$0xff]   ;;  %v8576_v5 = vld [vmem:[%s10713_s1 + $0xd90] sm:$0xff]  }
 0x185   :  { %7793 = vmatprep.subr.bf16.mxu0 %v8536_v6  ;;  %7814 = vmatpush3.bf16.msra.mxu1 %v8535_v4  ;;  %v8575_v4 = vld [vmem:[%s10713_s1 + $0xd10] sm:$0xff]   ;;  %v8577_v6 = vld [vmem:[%s10713_s1 + $0xd58] sm:$0xff]  }
 0x186   :  { %7815 = vmatprep.subr.bf16.mxu1 %v8537_v8  ;;  %6115 = vmatprep.mubr.bf16.mxu0 %v485_v57  ;;  %v8579_v8 = vld [vmem:[%s10713_s1 + $0xd18] sm:$0xff]   ;;  %v8606_v57 = vld [vmem:[%s10713_s1 + $0xe50] sm:$0xff]  }
 0x187   :  { %6155 = vmatprep.mubr.bf16.mxu1 %v487_v62  ;;  %v8611_v62 = vld [vmem:[%s10713_s1 + $0xed8] sm:$0xff]  }
 0x188   :  { %7794 = vmatpush3.bf16.msra.mxu0 %v8538_v9  ;;  %v8580_v9 = vld [vmem:[%s10713_s1 + $0xd98] sm:$0xff]  }
 0x189   :  { %7795 = vmatprep.subr.bf16.mxu0 %v8540_v11  ;;  %7816 = vmatpush3.bf16.msra.mxu1 %v8539_v10  ;;  %v8581_v10 = vld [vmem:[%s10713_s1 + $0xd60] sm:$0xff]  }
 0x18a   :  { %7817 = vmatprep.subr.bf16.mxu1 %v8541_v12  ;;  %v8582_v11 = vld [vmem:[%s10713_s1 + $0xde0] sm:$0xff]  }
 0x18b   :  { %v8583_v12 = vld [vmem:[%s10713_s1 + $0xd20] sm:$0xff]  }
 0x18c   :  { %7796 = vmatpush3.bf16.msra.mxu0 %v8542_v13  ;;  %v8584_v13 = vld [vmem:[%s10713_s1 + $0xda0] sm:$0xff]  }
 0x18d   :  { %7797 = vmatprep.subr.bf16.mxu0 %v8544_v15  ;;  %7818 = vmatpush3.bf16.msra.mxu1 %v8543_v14  ;;  %v8585_v14 = vld [vmem:[%s10713_s1 + $0xd68] sm:$0xff]  }
 0x18e   :  { %7819 = vmatprep.subr.bf16.mxu1 %v8545_v16  ;;  %v8586_v15 = vld [vmem:[%s10713_s1 + $0xde8] sm:$0xff]  }
 0x18f   :  { %v8587_v16 = vld [vmem:[%s10713_s1 + $0xd28] sm:$0xff]  }
 0x190   :  { %7798 = vmatpush3.bf16.msra.mxu0 %v8546_v17 }
 0x191   :  { %7799 = vmatprep.subr.bf16.mxu0 %v8548_v19  ;;  %7820 = vmatpush3.bf16.msra.mxu1 %v8547_v18  ;;  %v8588_v19 = vld [vmem:[%s10713_s1 + $0xda8] sm:$0xff]  }
 0x192   :  { %7821 = vmatprep.subr.bf16.mxu1 %v8549_v20  ;;  %v8589_v20 = vld [vmem:[%s10713_s1 + $0xd70] sm:$0xff]  }
 0x194   :  { %7800 = vmatpush3.bf16.msra.mxu0 %v8550_v21 }
 0x195   :  { %7801 = vmatprep.subr.bf16.mxu0 %v8552_v23  ;;  %7822 = vmatpush3.bf16.msra.mxu1 %v8551_v22 }
 0x196   :  { %v7499_v27 = vpop.f32.mrb[20].mxu0  ;;  %7823 = vmatprep.subr.bf16.mxu1 %v8553_v24 }
 0x197   :  { %v7521_v28 = vpop.f32.mrb[20].mxu1  ;;  %v7500_v31 = vpop.f32.mrb[21].mxu0 }
 0x198   :  { %v7522_v32 = vpop.f32.mrb[21].mxu1  ;;  %v7501_v33 = vadd.f32 %v7500_v31, %v7499_v27  ;;  %v7502_v35 = vpop.f32.mrb[22].mxu0  ;;  %7802 = vmatpush3.bf16.msra.mxu0 %v8554_v25 }
 0x199   :  { %v7523_v34 = vadd.f32 %v7522_v32, %v7521_v28  ;;  %v7524_v36 = vpop.f32.mrb[22].mxu1  ;;  %v7503_v37 = vpop.f32.mrb[23].mxu0  ;;  %7803 = vmatprep.subr.bf16.mxu0 %v8556_v29  ;;  %7824 = vmatpush3.bf16.msra.mxu1 %v8555_v26  ;;  %v8590_v29 = vld [vmem:[%s10713_s1 + $0xdf0] sm:$0xff]   ;;  %v8593_v32 = vld [vmem:[%s10713_s1 + $0xd78] sm:$0xff]  }
 0x19a   :  { %v7525_v38 = vpop.f32.mrb[23].mxu1  ;;  %v5558_v42 = vadd.f32 %v7501_v33, %v10011_v54  ;;  %7825 = vmatprep.subr.bf16.mxu1 %v8557_v30  ;;  %v8566_v54 = vld [vmem:[%s10713_s1 + $0xdc0] sm:$0xff]   ;;  %v8591_v30 = vld [vmem:[%s10713_s1 + $0xd30] sm:$0xff]   ;;  %v8594_v35 = vld [vmem:[%s10713_s1 + $0xdf8] sm:$0xff]  }
 0x19b   :  { %v8595_v36 = vld [vmem:[%s10713_s1 + $0xd38] sm:$0xff]   ;;  %v35_v37 = vld [vmem:[%s10712_s0 + $0x68] sm:$0xff] }
 0x19c   :  { %v10112_v44 = vadd.f32 %v7523_v34, %v5558_v42  ;;  %7804 = vmatpush3.bf16.msra.mxu0 %v8558_v39  ;;  %v8592_v34 = vld [vmem:[%s10713_s1 + $0xdb0] sm:$0xff]   ;;  %v286_v38 = vrot.slane %v35_v37, %v8898_v41  ;;  %v279_v39 = vcombine.high %v35_v37, %v35_v37  ;;  %v8596_v42 = vld [vmem:[%s10713_s1 + $0xdb8] sm:$0xff]   ;;  %v8633_v37 = vld [vmem:[%s10713_s1 + $0xf00] sm:$0xff]  }
 0x19d   :  { %7805 = vmatprep.subr.bf16.mxu0 %v8560_v40  ;;  %7826 = vmatpush3.bf16.msra.mxu1 %v8559_v43  ;;  %v8598_v40 = vld [vmem:[%s10713_s1 + $0xe40] sm:$0xff]  }
 0x19e   :  { %7827 = vmatprep.subr.bf16.mxu1 %v8561_v45  ;;  %v294_v43 = vcombine.high %v286_v38, %v286_v38  ;;  %v8599_v45 = vld [vmem:[%s10713_s1 + $0xec0] sm:$0xff]  }
 0x1a0   :  { %7806 = vmatpush3.bf16.msra.mxu0 %v8562_v46  ;;  %v488_v46 = vpack.c.bf16 %v286_v38, %v286_v38  ;;  %v489_v48 = vpack.c.bf16 %v294_v43, %v294_v43  ;;  %v8635_v43 = vld [vmem:[%s10713_s1 + $0xf48] sm:$0xff]  }
 0x1a1   :  { %7835 = vmatprep.subr.bf16.mxu0 %v8565_v50  ;;  %7828 = vmatpush3.bf16.msra.mxu1 %v8563_v51  ;;  %v8601_v50 = vld [vmem:[%s10713_s1 + $0xe80] sm:$0xff]  }
 0x1a2   :  { %7857 = vmatprep.subr.bf16.mxu1 %v8566_v54  ;;  %v8603_v54 = vld [vmem:[%s10713_s1 + $0xec8] sm:$0xff]  }
 0x1a3   :  { %6116 = vmatmul.mubr.bf16.vlgmr.msra.gmra.mrb[48].mxu0 %v484_v55  ;;  %v8604_v55 = vld [vmem:[%s10713_s1 + $0xe08] sm:$0xff]  }
 0x1a4   :  { %7836 = vmatpush3.bf16.msra.mxu0 %v8567_v56  ;;  %6156 = vmatmul.mubr.bf16.vlgmr.msra.gmra.mrb[48].mxu1 %v486_v60  ;;  %v8605_v56 = vld [vmem:[%s10713_s1 + $0xe88] sm:$0xff]   ;;  %v8609_v60 = vld [vmem:[%s10713_s1 + $0xe90] sm:$0xff]  }
 0x1a5   :  { %7837 = vmatprep.subr.bf16.mxu0 %v8569_v61  ;;  %7858 = vmatpush3.bf16.msra.mxu1 %v8568_v59  ;;  %v8608_v59 = vld [vmem:[%s10713_s1 + $0xe10] sm:$0xff]   ;;  %v8610_v61 = vld [vmem:[%s10713_s1 + $0xe58] sm:$0xff]  }
 0x1a6   :  { %7859 = vmatprep.subr.bf16.mxu1 %v8570_v63  ;;  %6195 = vmatprep.mubr.bf16.mxu0 %v489_v48  ;;  %v8612_v63 = vld [vmem:[%s10713_s1 + $0xe18] sm:$0xff]   ;;  %v8639_v48 = vld [vmem:[%s10713_s1 + $0xf50] sm:$0xff]  }
 0x1a8   :  { %7838 = vmatpush3.bf16.msra.mxu0 %v8571_v0  ;;  %v8613_v0 = vld [vmem:[%s10713_s1 + $0xe98] sm:$0xff]  }
 0x1a9   :  { %7839 = vmatprep.subr.bf16.mxu0 %v8573_v2  ;;  %7860 = vmatpush3.bf16.msra.mxu1 %v8572_v1  ;;  %v8614_v1 = vld [vmem:[%s10713_s1 + $0xe60] sm:$0xff]  }
 0x1aa   :  { %7861 = vmatprep.subr.bf16.mxu1 %v8574_v3  ;;  %v8615_v2 = vld [vmem:[%s10713_s1 + $0xee0] sm:$0xff]  }
 0x1ab   :  { %v8616_v3 = vld [vmem:[%s10713_s1 + $0xe20] sm:$0xff]  }
 0x1ac   :  { %7840 = vmatpush3.bf16.msra.mxu0 %v8575_v4  ;;  %v8617_v4 = vld [vmem:[%s10713_s1 + $0xea0] sm:$0xff]  }
 0x1ad   :  { %7841 = vmatprep.subr.bf16.mxu0 %v8577_v6  ;;  %7862 = vmatpush3.bf16.msra.mxu1 %v8576_v5  ;;  %v8618_v5 = vld [vmem:[%s10713_s1 + $0xe68] sm:$0xff]  }
 0x1ae   :  { %7863 = vmatprep.subr.bf16.mxu1 %v8578_v7  ;;  %v8619_v6 = vld [vmem:[%s10713_s1 + $0xee8] sm:$0xff]  }
 0x1b0   :  { %7842 = vmatpush3.bf16.msra.mxu0 %v8579_v8 }
 0x1b1   :  { %7843 = vmatprep.subr.bf16.mxu0 %v8581_v10  ;;  %7864 = vmatpush3.bf16.msra.mxu1 %v8580_v9  ;;  %v8620_v9 = vld [vmem:[%s10713_s1 + $0xe28] sm:$0xff]   ;;  %v8622_v10 = vld [vmem:[%s10713_s1 + $0xe70] sm:$0xff]  }
 0x1b2   :  { %7865 = vmatprep.subr.bf16.mxu1 %v8582_v11 }
 0x1b4   :  { %7844 = vmatpush3.bf16.msra.mxu0 %v8583_v12 }
 0x1b5   :  { %7845 = vmatprep.subr.bf16.mxu0 %v8585_v14  ;;  %7866 = vmatpush3.bf16.msra.mxu1 %v8584_v13 }
 0x1b6   :  { %v7543_v17 = vpop.f32.mrb[24].mxu0  ;;  %7867 = vmatprep.subr.bf16.mxu1 %v8586_v15 }
 0x1b7   :  { %v7565_v18 = vpop.f32.mrb[24].mxu1  ;;  %v7544_v21 = vpop.f32.mrb[25].mxu0 }
 0x1b8   :  { %v7566_v22 = vpop.f32.mrb[25].mxu1  ;;  %v7545_v23 = vadd.f32 %v7544_v21, %v7543_v17  ;;  %v7546_v25 = vpop.f32.mrb[26].mxu0  ;;  %7846 = vmatpush3.bf16.msra.mxu0 %v8587_v16  ;;  %v8621_v17 = vld [vmem:[%s10713_s1 + $0xea8] sm:$0xff]  }
 0x1b9   :  { %v7567_v24 = vadd.f32 %v7566_v22, %v7565_v18  ;;  %v7568_v26 = vpop.f32.mrb[26].mxu1  ;;  %v7547_v27 = vpop.f32.mrb[27].mxu0  ;;  %7847 = vmatprep.subr.bf16.mxu0 %v8589_v20  ;;  %7868 = vmatpush3.bf16.msra.mxu1 %v8588_v19  ;;  %v8623_v20 = vld [vmem:[%s10713_s1 + $0xef0] sm:$0xff]  }
 0x1ba   :  { %v7569_v28 = vpop.f32.mrb[27].mxu1  ;;  %v5638_v31 = vadd.f32 %v7545_v23, %v10112_v44  ;;  %7869 = vmatprep.subr.bf16.mxu1 %v8590_v29  ;;  %v293_v44 = vrot.slane %v279_v39, %v8898_v41  ;;  %v8624_v22 = vld [vmem:[%s10713_s1 + $0xe30] sm:$0xff]   ;;  %v8627_v26 = vld [vmem:[%s10713_s1 + $0xef8] sm:$0xff]  }
 0x1bb   :  { %v8625_v25 = vld [vmem:[%s10713_s1 + $0xeb0] sm:$0xff]   ;;  %v8628_v27 = vld [vmem:[%s10713_s1 + $0xe38] sm:$0xff]  }
 0x1bc   :  { %v10213_v33 = vadd.f32 %v7567_v24, %v5638_v31  ;;  %7848 = vmatpush3.bf16.msra.mxu0 %v8591_v30  ;;  %v295_v49 = vcombine.high %v293_v44, %v293_v44  ;;  %v490_v51 = vpack.c.bf16 %v293_v44, %v293_v44  ;;  %v8626_v24 = vld [vmem:[%s10713_s1 + $0xe78] sm:$0xff]   ;;  %v36_v28 = vld [vmem:[%s10712_s0 + $0x70] sm:$0xff]  ;;  %v8631_v31 = vld [vmem:[%s10713_s1 + $0xf40] sm:$0xff]  }
 0x1bd   :  { %7849 = vmatprep.subr.bf16.mxu0 %v8593_v32  ;;  %7870 = vmatpush3.bf16.msra.mxu1 %v8592_v34  ;;  %v303_v29 = vrot.slane %v36_v28, %v8898_v41  ;;  %v296_v30 = vcombine.high %v36_v28, %v36_v28  ;;  %v8629_v32 = vld [vmem:[%s10713_s1 + $0xeb8] sm:$0xff]   ;;  %v8666_v28 = vld [vmem:[%s10713_s1 + $0x1000] sm:$0xff]  }
 0x1be   :  { %7871 = vmatprep.subr.bf16.mxu1 %v8594_v35  ;;  %v491_v53 = vpack.c.bf16 %v295_v49, %v295_v49  ;;  %v8632_v35 = vld [vmem:[%s10713_s1 + $0xfc0] sm:$0xff]   ;;  %v8640_v49 = vld [vmem:[%s10713_s1 + $0xfd0] sm:$0xff]  }
 0x1bf   :  { %v310_v34 = vrot.slane %v296_v30, %v8898_v41 }
 0x1c0   :  { %7850 = vmatpush3.bf16.msra.mxu0 %v8595_v36  ;;  %6235 = vmatprep.mubr.bf16.mxu1 %v491_v53  ;;  %v492_v36 = vpack.c.bf16 %v303_v29, %v303_v29  ;;  %v8644_v53 = vld [vmem:[%s10713_s1 + $0xfd8] sm:$0xff]  }
 0x1c1   :  { %7879 = vmatprep.subr.bf16.mxu0 %v8598_v40  ;;  %7872 = vmatpush3.bf16.msra.mxu1 %v8596_v42  ;;  %v312_v39 = vcombine.high %v310_v34, %v310_v34  ;;  %v8634_v40 = vld [vmem:[%s10713_s1 + $0xf80] sm:$0xff]   ;;  %v494_v42 = vpack.c.bf16 %v310_v34, %v310_v34 }
 0x1c2   :  { %7901 = vmatprep.subr.bf16.mxu1 %v8599_v45  ;;  %v8636_v45 = vld [vmem:[%s10713_s1 + $0xfc8] sm:$0xff]  }
 0x1c3   :  { %6196 = vmatmul.mubr.bf16.vlgmr.msra.gmra.mrb[52].mxu0 %v488_v46  ;;  %v495_v44 = vpack.c.bf16 %v312_v39, %v312_v39  ;;  %v8637_v46 = vld [vmem:[%s10713_s1 + $0xf08] sm:$0xff]   ;;  %v8673_v39 = vld [vmem:[%s10713_s1 + $0x10d0] sm:$0xff]  }
 0x1c4   :  { %7880 = vmatpush3.bf16.msra.mxu0 %v8600_v47  ;;  %6236 = vmatmul.mubr.bf16.vlgmr.msra.gmra.mrb[52].mxu1 %v490_v51  ;;  %v8638_v47 = vld [vmem:[%s10713_s1 + $0xf88] sm:$0xff]   ;;  %v8642_v51 = vld [vmem:[%s10713_s1 + $0xf90] sm:$0xff]  }
 0x1c5   :  { %7881 = vmatprep.subr.bf16.mxu0 %v8602_v52  ;;  %7902 = vmatpush3.bf16.msra.mxu1 %v8601_v50  ;;  %v8641_v50 = vld [vmem:[%s10713_s1 + $0xf10] sm:$0xff]   ;;  %v8643_v52 = vld [vmem:[%s10713_s1 + $0xf58] sm:$0xff]  }
 0x1c6   :  { %7903 = vmatprep.subr.bf16.mxu1 %v8603_v54  ;;  %6315 = vmatprep.mubr.bf16.mxu1 %v495_v44  ;;  %v8645_v54 = vld [vmem:[%s10713_s1 + $0xf18] sm:$0xff]  }
 0x1c7   :  { %v8677_v44 = vld [vmem:[%s10713_s1 + $0x10d8] sm:$0xff]  }
 0x1c8   :  { %7882 = vmatpush3.bf16.msra.mxu0 %v8604_v55  ;;  %v8646_v55 = vld [vmem:[%s10713_s1 + $0xf98] sm:$0xff]  }
 0x1c9   :  { %7883 = vmatprep.subr.bf16.mxu0 %v8606_v57  ;;  %7904 = vmatpush3.bf16.msra.mxu1 %v8605_v56  ;;  %v8647_v56 = vld [vmem:[%s10713_s1 + $0xf60] sm:$0xff]  }
 0x1ca   :  { %7905 = vmatprep.subr.bf16.mxu1 %v8607_v58  ;;  %v8648_v57 = vld [vmem:[%s10713_s1 + $0xfe0] sm:$0xff]  }
 0x1cb   :  { %v8649_v58 = vld [vmem:[%s10713_s1 + $0xf20] sm:$0xff]  }
 0x1cc   :  { %7884 = vmatpush3.bf16.msra.mxu0 %v8608_v59  ;;  %v8650_v59 = vld [vmem:[%s10713_s1 + $0xfa0] sm:$0xff]  }
 0x1cd   :  { %7885 = vmatprep.subr.bf16.mxu0 %v8610_v61  ;;  %7906 = vmatpush3.bf16.msra.mxu1 %v8609_v60  ;;  %v8651_v60 = vld [vmem:[%s10713_s1 + $0xf68] sm:$0xff]  }
 0x1ce   :  { %7907 = vmatprep.subr.bf16.mxu1 %v8611_v62 }
 0x1d0   :  { %7886 = vmatpush3.bf16.msra.mxu0 %v8612_v63  ;;  %v8652_v63 = vld [vmem:[%s10713_s1 + $0xfe8] sm:$0xff]  }
 0x1d1   :  { %7887 = vmatprep.subr.bf16.mxu0 %v8614_v1  ;;  %7908 = vmatpush3.bf16.msra.mxu1 %v8613_v0  ;;  %v8653_v0 = vld [vmem:[%s10713_s1 + $0xf28] sm:$0xff]  }
 0x1d2   :  { %7909 = vmatprep.subr.bf16.mxu1 %v8615_v2 }
 0x1d4   :  { %7888 = vmatpush3.bf16.msra.mxu0 %v8616_v3 }
 0x1d5   :  { %7889 = vmatprep.subr.bf16.mxu0 %v8618_v5  ;;  %7910 = vmatpush3.bf16.msra.mxu1 %v8617_v4 }
 0x1d6   :  { %v7587_v7 = vpop.f32.mrb[28].mxu0  ;;  %7911 = vmatprep.subr.bf16.mxu1 %v8619_v6 }
 0x1d7   :  { %v7609_v8 = vpop.f32.mrb[28].mxu1  ;;  %v7588_v11 = vpop.f32.mrb[29].mxu0 }
 0x1d8   :  { %v7610_v12 = vpop.f32.mrb[29].mxu1  ;;  %v7589_v13 = vadd.f32 %v7588_v11, %v7587_v7  ;;  %v7590_v15 = vpop.f32.mrb[30].mxu0  ;;  %7890 = vmatpush3.bf16.msra.mxu0 %v8620_v9  ;;  %v8654_v7 = vld [vmem:[%s10713_s1 + $0xfa8] sm:$0xff]  }
 0x1d9   :  { %v7611_v14 = vadd.f32 %v7610_v12, %v7609_v8  ;;  %v7612_v16 = vpop.f32.mrb[30].mxu1  ;;  %v7591_v18 = vpop.f32.mrb[31].mxu0  ;;  %7891 = vmatprep.subr.bf16.mxu0 %v8622_v10  ;;  %7912 = vmatpush3.bf16.msra.mxu1 %v8621_v17  ;;  %v8655_v10 = vld [vmem:[%s10713_s1 + $0xf70] sm:$0xff]   ;;  %v8659_v15 = vld [vmem:[%s10713_s1 + $0xf78] sm:$0xff]  }
 0x1da   :  { %v7613_v19 = vpop.f32.mrb[31].mxu1  ;;  %v5718_v21 = vadd.f32 %v7589_v13, %v10213_v33  ;;  %7913 = vmatprep.subr.bf16.mxu1 %v8623_v20  ;;  %v311_v33 = vcombine.high %v303_v29, %v303_v29  ;;  %v8656_v12 = vld [vmem:[%s10713_s1 + $0xff0] sm:$0xff]   ;;  %v8660_v17 = vld [vmem:[%s10713_s1 + $0xff8] sm:$0xff]  }
 0x1db   :  { %v8658_v16 = vld [vmem:[%s10713_s1 + $0xfb0] sm:$0xff]   ;;  %v8661_v18 = vld [vmem:[%s10713_s1 + $0xf38] sm:$0xff]  }
 0x1dc   :  { %v10314_v23 = vadd.f32 %v7611_v14, %v5718_v21  ;;  %7892 = vmatpush3.bf16.msra.mxu0 %v8624_v22  ;;  %v493_v38 = vpack.c.bf16 %v311_v33, %v311_v33  ;;  %v8657_v14 = vld [vmem:[%s10713_s1 + $0xf30] sm:$0xff]   ;;  %v37_v19 = vld [vmem:[%s10712_s0 + $0x78] sm:$0xff]  ;;  %v8664_v22 = vld [vmem:[%s10713_s1 + $0x1040] sm:$0xff]  }
 0x1dd   :  { %7893 = vmatprep.subr.bf16.mxu0 %v8626_v24  ;;  %7914 = vmatpush3.bf16.msra.mxu1 %v8625_v25  ;;  %v320_v20 = vrot.slane %v37_v19, %v8898_v41  ;;  %v313_v21 = vcombine.high %v37_v19, %v37_v19  ;;  %v8668_v33 = vld [vmem:[%s10713_s1 + $0x1048] sm:$0xff]  }
 0x1de   :  { %7915 = vmatprep.subr.bf16.mxu1 %v8627_v26  ;;  %6275 = vmatprep.mubr.bf16.mxu0 %v493_v38  ;;  %v8665_v26 = vld [vmem:[%s10713_s1 + $0x10c0] sm:$0xff]   ;;  %v8672_v38 = vld [vmem:[%s10713_s1 + $0x1050] sm:$0xff]  }
 0x1df   :  { %v328_v24 = vcombine.high %v320_v20, %v320_v20  ;;  %v327_v25 = vrot.slane %v313_v21, %v8898_v41  ;;  %v8699_v21 = vld [vmem:[%s10713_s1 + $0x1100] sm:$0xff]  }
 0x1e0   :  { %7894 = vmatpush3.bf16.msra.mxu0 %v8628_v27  ;;  %v496_v27 = vpack.c.bf16 %v320_v20, %v320_v20 }
 0x1e1   :  { %7923 = vmatprep.subr.bf16.mxu0 %v8631_v31  ;;  %7916 = vmatpush3.bf16.msra.mxu1 %v8629_v32  ;;  %v497_v29 = vpack.c.bf16 %v328_v24, %v328_v24  ;;  %v329_v30 = vcombine.high %v327_v25, %v327_v25  ;;  %v8667_v31 = vld [vmem:[%s10713_s1 + $0x1080] sm:$0xff]   ;;  %v498_v32 = vpack.c.bf16 %v327_v25, %v327_v25 }
 0x1e2   :  { %7945 = vmatprep.subr.bf16.mxu1 %v8632_v35  ;;  %v8669_v35 = vld [vmem:[%s10713_s1 + $0x10c8] sm:$0xff]   ;;  %v8700_v25 = vld [vmem:[%s10713_s1 + $0x1180] sm:$0xff]  }
 0x1e3   :  { %6276 = vmatmul.mubr.bf16.vlgmr.msra.gmra.mrb[56].mxu0 %v492_v36  ;;  %v499_v34 = vpack.c.bf16 %v329_v30, %v329_v30  ;;  %v8670_v36 = vld [vmem:[%s10713_s1 + $0x1008] sm:$0xff]   ;;  %v8706_v30 = vld [vmem:[%s10713_s1 + $0x11d0] sm:$0xff]  }
 0x1e4   :  { %7924 = vmatpush3.bf16.msra.mxu0 %v8633_v37  ;;  %6316 = vmatmul.mubr.bf16.vlgmr.msra.gmra.mrb[56].mxu1 %v494_v42  ;;  %v8671_v37 = vld [vmem:[%s10713_s1 + $0x1088] sm:$0xff]   ;;  %v8675_v42 = vld [vmem:[%s10713_s1 + $0x1090] sm:$0xff]  }
 0x1e5   :  { %7925 = vmatprep.subr.bf16.mxu0 %v8635_v43  ;;  %7946 = vmatpush3.bf16.msra.mxu1 %v8634_v40  ;;  %v8674_v40 = vld [vmem:[%s10713_s1 + $0x1010] sm:$0xff]   ;;  %v8676_v43 = vld [vmem:[%s10713_s1 + $0x1058] sm:$0xff]  }
 0x1e6   :  { %7947 = vmatprep.subr.bf16.mxu1 %v8636_v45  ;;  %6355 = vmatprep.mubr.bf16.mxu0 %v497_v29  ;;  %v8678_v45 = vld [vmem:[%s10713_s1 + $0x1018] sm:$0xff]   ;;  %v8704_v29 = vld [vmem:[%s10713_s1 + $0x1188] sm:$0xff]  }
 0x1e7   :  { %6395 = vmatprep.mubr.bf16.mxu1 %v499_v34  ;;  %v8710_v34 = vld [vmem:[%s10713_s1 + $0x11d8] sm:$0xff]  }
 0x1e8   :  { %7926 = vmatpush3.bf16.msra.mxu0 %v8637_v46  ;;  %v8679_v46 = vld [vmem:[%s10713_s1 + $0x1098] sm:$0xff]  }
 0x1e9   :  { %7927 = vmatprep.subr.bf16.mxu0 %v8639_v48  ;;  %7948 = vmatpush3.bf16.msra.mxu1 %v8638_v47  ;;  %v8680_v47 = vld [vmem:[%s10713_s1 + $0x1060] sm:$0xff]  }
 0x1ea   :  { %7949 = vmatprep.subr.bf16.mxu1 %v8640_v49  ;;  %v8681_v48 = vld [vmem:[%s10713_s1 + $0x10e0] sm:$0xff]  }
 0x1eb   :  { %v8682_v49 = vld [vmem:[%s10713_s1 + $0x1020] sm:$0xff]  }
 0x1ec   :  { %7928 = vmatpush3.bf16.msra.mxu0 %v8641_v50  ;;  %v8683_v50 = vld [vmem:[%s10713_s1 + $0x10a0] sm:$0xff]  }
 0x1ed   :  { %7929 = vmatprep.subr.bf16.mxu0 %v8643_v52  ;;  %7950 = vmatpush3.bf16.msra.mxu1 %v8642_v51  ;;  %v8684_v52 = vld [vmem:[%s10713_s1 + $0x1068] sm:$0xff]  }
 0x1ee   :  { %7951 = vmatprep.subr.bf16.mxu1 %v8644_v53 }
 0x1f0   :  { %7930 = vmatpush3.bf16.msra.mxu0 %v8645_v54 }
 0x1f1   :  { %7931 = vmatprep.subr.bf16.mxu0 %v8647_v56  ;;  %7952 = vmatpush3.bf16.msra.mxu1 %v8646_v55  ;;  %v8685_v55 = vld [vmem:[%s10713_s1 + $0x10e8] sm:$0xff]  }
 0x1f2   :  { %7953 = vmatprep.subr.bf16.mxu1 %v8648_v57  ;;  %v8686_v56 = vld [vmem:[%s10713_s1 + $0x1028] sm:$0xff]  }
 0x1f4   :  { %7932 = vmatpush3.bf16.msra.mxu0 %v8649_v58 }
 0x1f5   :  { %7933 = vmatprep.subr.bf16.mxu0 %v8651_v60  ;;  %7954 = vmatpush3.bf16.msra.mxu1 %v8650_v59 }
 0x1f6   :  { %v7631_v61 = vpop.f32.mrb[32].mxu0  ;;  %7955 = vmatprep.subr.bf16.mxu1 %v8652_v63 }
 0x1f7   :  { %v7653_v62 = vpop.f32.mrb[32].mxu1  ;;  %v7632_v1 = vpop.f32.mrb[33].mxu0 }
 0x1f8   :  { %v7654_v2 = vpop.f32.mrb[33].mxu1  ;;  %v7633_v3 = vadd.f32 %v7632_v1, %v7631_v61  ;;  %v7634_v5 = vpop.f32.mrb[34].mxu0  ;;  %7934 = vmatpush3.bf16.msra.mxu0 %v8653_v0  ;;  %v8688_v1 = vld [vmem:[%s10713_s1 + $0x1070] sm:$0xff]  }
 0x1f9   :  { %v7655_v4 = vadd.f32 %v7654_v2, %v7653_v62  ;;  %v7656_v6 = vpop.f32.mrb[34].mxu1  ;;  %v7635_v8 = vpop.f32.mrb[35].mxu0  ;;  %7935 = vmatprep.subr.bf16.mxu0 %v8655_v10  ;;  %7956 = vmatpush3.bf16.msra.mxu1 %v8654_v7  ;;  %v8687_v2 = vld [vmem:[%s10713_s1 + $0x10a8] sm:$0xff]   ;;  %v8690_v5 = vld [vmem:[%s10713_s1 + $0x1030] sm:$0xff]   ;;  %v38_v10 = vld [vmem:[%s10712_s0 + $0x80] sm:$0xff] }
 0x1fa   :  { %v7657_v9 = vpop.f32.mrb[35].mxu1  ;;  %v5798_v11 = vadd.f32 %v7633_v3, %v10314_v23  ;;  %7957 = vmatprep.subr.bf16.mxu1 %v8656_v12  ;;  %v8662_v23 = vld [vmem:[%s10713_s1 + $0xfb8] sm:$0xff]   ;;  %v8691_v7 = vld [vmem:[%s10713_s1 + $0x10b0] sm:$0xff]   ;;  %v330_v12 = vcombine.high %v38_v10, %v38_v10 }
 0x1fb   :  { %v8692_v6 = vld [vmem:[%s10713_s1 + $0x1078] sm:$0xff]  }
 0x1fc   :  { %v10415_v13 = vadd.f32 %v7655_v4, %v5798_v11  ;;  %7936 = vmatpush3.bf16.msra.mxu0 %v8657_v14  ;;  %v8689_v4 = vld [vmem:[%s10713_s1 + $0x10f0] sm:$0xff]   ;;  %v8693_v8 = vld [vmem:[%s10713_s1 + $0x10f8] sm:$0xff]   ;;  %v337_v11 = vrot.slane %v38_v10, %v8898_v41 }
 0x1fd   :  { %7937 = vmatprep.subr.bf16.mxu0 %v8659_v15  ;;  %7958 = vmatpush3.bf16.msra.mxu1 %v8658_v16  ;;  %v8694_v9 = vld [vmem:[%s10713_s1 + $0x1038] sm:$0xff]   ;;  %v344_v16 = vrot.slane %v330_v12, %v8898_v41 }
 0x1fe   :  { %7959 = vmatprep.subr.bf16.mxu1 %v8660_v17  ;;  %v8695_v14 = vld [vmem:[%s10713_s1 + $0x10b8] sm:$0xff]   ;;  %v345_v15 = vcombine.high %v337_v11, %v337_v11  ;;  %v8698_v17 = vld [vmem:[%s10713_s1 + $0x11c0] sm:$0xff]  }
 0x1ff   :  { %v346_v20 = vcombine.high %v344_v16, %v344_v16 }
 0x200   :  { %7938 = vmatpush3.bf16.msra.mxu0 %v8661_v18  ;;  %v500_v18 = vpack.c.bf16 %v337_v11, %v337_v11  ;;  %v501_v19 = vpack.c.bf16 %v345_v15, %v345_v15 }
 0x201   :  { %7967 = vmatprep.subr.bf16.mxu0 %v8664_v22  ;;  %7960 = vmatpush3.bf16.msra.mxu1 %v8662_v23  ;;  %v502_v22 = vpack.c.bf16 %v344_v16, %v344_v16  ;;  %v8701_v23 = vld [vmem:[%s10713_s1 + $0x1148] sm:$0xff]   ;;  %v503_v24 = vpack.c.bf16 %v346_v20, %v346_v20 }
 0x202   :  { %7989 = vmatprep.subr.bf16.mxu1 %v8665_v26  ;;  %v8702_v26 = vld [vmem:[%s10713_s1 + $0x11c8] sm:$0xff]  }
 0x203   :  { %6356 = vmatmul.mubr.bf16.vlgmr.msra.gmra.mrb[60].mxu0 %v496_v27  ;;  %v8703_v27 = vld [vmem:[%s10713_s1 + $0x1108] sm:$0xff]  }
 0x204   :  { %7968 = vmatpush3.bf16.msra.mxu0 %v8666_v28  ;;  %6396 = vmatmul.mubr.bf16.vlgmr.msra.gmra.mrb[60].mxu1 %v498_v32  ;;  %v8705_v28 = vld [vmem:[%s10713_s1 + $0x1150] sm:$0xff]   ;;  %v8709_v32 = vld [vmem:[%s10713_s1 + $0x1158] sm:$0xff]  }
 0x205   :  { %7969 = vmatprep.subr.bf16.mxu0 %v8668_v33  ;;  %7990 = vmatpush3.bf16.msra.mxu1 %v8667_v31  ;;  %v8707_v31 = vld [vmem:[%s10713_s1 + $0x1110] sm:$0xff]  }
 0x206   :  { %7991 = vmatprep.subr.bf16.mxu1 %v8669_v35  ;;  %6435 = vmatprep.mubr.bf16.mxu0 %v501_v19  ;;  %v8708_v33 = vld [vmem:[%s10713_s1 + $0x1190] sm:$0xff]   ;;  %v8711_v35 = vld [vmem:[%s10713_s1 + $0x1118] sm:$0xff]  }
 0x207   :  { %6475 = vmatprep.mubr.bf16.mxu1 %v503_v24 }
 0x208   :  { %7970 = vmatpush3.bf16.msra.mxu0 %v8670_v36  ;;  %v8713_v36 = vld [vmem:[%s10713_s1 + $0x1160] sm:$0xff]  }
 0x209   :  { %7971 = vmatprep.subr.bf16.mxu0 %v8672_v38  ;;  %7992 = vmatpush3.bf16.msra.mxu1 %v8671_v37  ;;  %v8712_v37 = vld [vmem:[%s10713_s1 + $0x1198] sm:$0xff]   ;;  %v8714_v38 = vld [vmem:[%s10713_s1 + $0x11e0] sm:$0xff]  }
 0x20a   :  { %7993 = vmatprep.subr.bf16.mxu1 %v8673_v39  ;;  %v8715_v39 = vld [vmem:[%s10713_s1 + $0x1120] sm:$0xff]  }
 0x20c   :  { %7972 = vmatpush3.bf16.msra.mxu0 %v8674_v40 }
 0x20d   :  { %7973 = vmatprep.subr.bf16.mxu0 %v8676_v43  ;;  %7994 = vmatpush3.bf16.msra.mxu1 %v8675_v42  ;;  %v8717_v43 = vld [vmem:[%s10713_s1 + $0x1168] sm:$0xff]  }
 0x20e   :  { %7995 = vmatprep.subr.bf16.mxu1 %v8677_v44  ;;  %v8716_v44 = vld [vmem:[%s10713_s1 + $0x11a0] sm:$0xff]  }
 0x210   :  { %7974 = vmatpush3.bf16.msra.mxu0 %v8678_v45 }
 0x211   :  { %7975 = vmatprep.subr.bf16.mxu0 %v8680_v47  ;;  %7996 = vmatpush3.bf16.msra.mxu1 %v8679_v46  ;;  %v8718_v47 = vld [vmem:[%s10713_s1 + $0x11e8] sm:$0xff]  }
 0x212   :  { %7997 = vmatprep.subr.bf16.mxu1 %v8681_v48 }
 0x214   :  { %7976 = vmatpush3.bf16.msra.mxu0 %v8682_v49 }
 0x215   :  { %7977 = vmatprep.subr.bf16.mxu0 %v8684_v52  ;;  %7998 = vmatpush3.bf16.msra.mxu1 %v8683_v50 }
 0x216   :  { %v7675_v51 = vpop.f32.mrb[36].mxu0  ;;  %7999 = vmatprep.subr.bf16.mxu1 %v8685_v55 }
 0x217   :  { %v7697_v53 = vpop.f32.mrb[36].mxu1  ;;  %v7676_v54 = vpop.f32.mrb[37].mxu0 }
 0x218   :  { %v7677_v57 = vadd.f32 %v7676_v54, %v7675_v51  ;;  %v7698_v58 = vpop.f32.mrb[37].mxu1  ;;  %v7678_v59 = vpop.f32.mrb[38].mxu0  ;;  %7978 = vmatpush3.bf16.msra.mxu0 %v8686_v56  ;;  %v8719_v54 = vld [vmem:[%s10713_s1 + $0x1128] sm:$0xff]   ;;  %v8721_v56 = vld [vmem:[%s10713_s1 + $0x1170] sm:$0xff]  }
 0x219   :  { %v7699_v60 = vadd.f32 %v7698_v58, %v7697_v53  ;;  %v7700_v61 = vpop.f32.mrb[38].mxu1  ;;  %v7679_v62 = vpop.f32.mrb[39].mxu0  ;;  %7979 = vmatprep.subr.bf16.mxu0 %v8688_v1  ;;  %8000 = vmatpush3.bf16.msra.mxu1 %v8687_v2  ;;  %v8720_v58 = vld [vmem:[%s10713_s1 + $0x11a8] sm:$0xff]   ;;  %v8722_v59 = vld [vmem:[%s10713_s1 + $0x11f0] sm:$0xff]  }
 0x21a   :  { %v5878_v63 = vadd.f32 %v7677_v57, %v10415_v13  ;;  %v7701_v0 = vpop.f32.mrb[39].mxu1  ;;  %8001 = vmatprep.subr.bf16.mxu1 %v8689_v4  ;;  %v8697_v13 = vld [vmem:[%s10713_s1 + $0x1140] sm:$0xff]   ;;  %v8725_v61 = vld [vmem:[%s10713_s1 + $0x1178] sm:$0xff]   ;;  %v8724_v62 = vld [vmem:[%s10713_s1 + $0x11b0] sm:$0xff]  }
 0x21b   :  { %v8727_v0 = vld [vmem:[%s10713_s1 + $0x1138] sm:$0xff]   ;;  %v39_v1 = vld [vmem:[%s10712_s0 + $0x88] sm:$0xff] }
 0x21c   :  { %v10516_v3 = vadd.f32 %v7699_v60, %v5878_v63  ;;  %7980 = vmatpush3.bf16.msra.mxu0 %v8690_v5  ;;  %v8723_v60 = vld [vmem:[%s10713_s1 + $0x1130] sm:$0xff]   ;;  %v8726_v63 = vld [vmem:[%s10713_s1 + $0x11f8] sm:$0xff]  }
 0x21d   :  { %7981 = vmatprep.subr.bf16.mxu0 %v8692_v6  ;;  %8002 = vmatpush3.bf16.msra.mxu1 %v8691_v7 }
 0x21e   :  { %8003 = vmatprep.subr.bf16.mxu1 %v8693_v8 }
 0x220   :  { %7982 = vmatpush3.bf16.msra.mxu0 %v8694_v9 }
 0x221   :  { %8011 = vmatprep.subr.bf16.mxu0 %v8697_v13  ;;  %8004 = vmatpush3.bf16.msra.mxu1 %v8695_v14 }
 0x222   :  { %8033 = vmatprep.subr.bf16.mxu1 %v8698_v17 }
 0x223   :  { %6436 = vmatmul.mubr.bf16.vlgmr.msra.gmra.mrb[64].mxu0 %v500_v18 }
 0x224   :  { %8012 = vmatpush3.bf16.msra.mxu0 %v8699_v21  ;;  %6476 = vmatmul.mubr.bf16.vlgmr.msra.gmra.mrb[64].mxu1 %v502_v22 }
 0x225   :  { %8013 = vmatprep.subr.bf16.mxu0 %v8701_v23  ;;  %8034 = vmatpush3.bf16.msra.mxu1 %v8700_v25 }
 0x226   :  { %8035 = vmatprep.subr.bf16.mxu1 %v8702_v26 }
 0x228   :  { %8014 = vmatpush3.bf16.msra.mxu0 %v8703_v27 }
 0x229   :  { %8015 = vmatprep.subr.bf16.mxu0 %v8705_v28  ;;  %8036 = vmatpush3.bf16.msra.mxu1 %v8704_v29 }
 0x22a   :  { %8037 = vmatprep.subr.bf16.mxu1 %v8706_v30 }
 0x22c   :  { %8016 = vmatpush3.bf16.msra.mxu0 %v8707_v31 }
 0x22d   :  { %8017 = vmatprep.subr.bf16.mxu0 %v8709_v32  ;;  %8038 = vmatpush3.bf16.msra.mxu1 %v8708_v33 }
 0x22e   :  { %8039 = vmatprep.subr.bf16.mxu1 %v8710_v34 }
 0x230   :  { %8018 = vmatpush3.bf16.msra.mxu0 %v8711_v35 }
 0x231   :  { %8019 = vmatprep.subr.bf16.mxu0 %v8713_v36  ;;  %8040 = vmatpush3.bf16.msra.mxu1 %v8712_v37 }
 0x232   :  { %8041 = vmatprep.subr.bf16.mxu1 %v8714_v38 }
 0x234   :  { %8020 = vmatpush3.bf16.msra.mxu0 %v8715_v39 }
 0x235   :  { %8021 = vmatprep.subr.bf16.mxu0 %v8717_v43  ;;  %8042 = vmatpush3.bf16.msra.mxu1 %v8716_v44 }
 0x236   :  { %v7719_v40 = vpop.f32.mrb[40].mxu0  ;;  %8043 = vmatprep.subr.bf16.mxu1 %v8718_v47 }
 0x237   :  { %v7720_v42 = vpop.f32.mrb[41].mxu0  ;;  %v7741_v45 = vpop.f32.mrb[40].mxu1 }
 0x238   :  { %v7721_v46 = vadd.f32 %v7720_v42, %v7719_v40  ;;  %v7722_v48 = vpop.f32.mrb[42].mxu0  ;;  %v7742_v49 = vpop.f32.mrb[41].mxu1  ;;  %8022 = vmatpush3.bf16.msra.mxu0 %v8719_v54 }
 0x239   :  { %v7723_v50 = vpop.f32.mrb[43].mxu0  ;;  %v7743_v52 = vadd.f32 %v7742_v49, %v7741_v45  ;;  %v7744_v53 = vpop.f32.mrb[42].mxu1  ;;  %8023 = vmatprep.subr.bf16.mxu0 %v8721_v56  ;;  %8044 = vmatpush3.bf16.msra.mxu1 %v8720_v58 }
 0x23a   :  { %v5958_v51 = vadd.f32 %v7721_v46, %v10516_v3  ;;  %v7745_v55 = vpop.f32.mrb[43].mxu1  ;;  %8045 = vmatprep.subr.bf16.mxu1 %v8722_v59 }
 0x23c   :  { %v5998_v57 = vadd.f32 %v7743_v52, %v5958_v51  ;;  %8024 = vmatpush3.bf16.msra.mxu0 %v8723_v60 }
 0x23d   :  { %10 = vsyncpa [#allocation3], 0  ;;  %8025 = vmatprep.subr.bf16.mxu0 %v8725_v61  ;;  %v354_v2 = vrot.slane %v39_v1, %v8898_v41  ;;  %v347_v3 = vcombine.high %v39_v1, %v39_v1  ;;  %8046 = vmatpush3.bf16.msra.mxu1 %v8724_v62  ;;  %v8728_v4 = vld [vmem:[%s10713_s1 + $0x11b8] sm:$0xff]   ;;  %v6564_v35 = vld [vmem:[%s10715_s3] sm:$0xff]  ;;  %v8759_v38 = vmov 0.0|0.0   ;;  %vm8760_vm0 = vmmov 0  }
 0x23e   :  { %8047 = vmatprep.subr.bf16.mxu1 %v8726_v63  ;;  %v6565_v36 = vld [vmem:[%s10715_s3 + $0x8] sm:$0xff]  ;;  %v6566_v37 = vld [vmem:[%s10715_s3 + $0x10] sm:$0xff]  ;;  %v6567_v40 = vld [vmem:[%s10715_s3 + $0x18] sm:$0xff]  ;;  %vm6657_vm1 = vcmask 74752   ;;  %s8762_s10 = smov [#allocation2]  }
 0x23f   :  { %v362_v5 = vcombine.high %v354_v2, %v354_v2  ;;  %v361_v6 = vrot.slane %v347_v3, %v8898_v41  ;;  %v504_v7 = vpack.c.bf16 %v354_v2, %v354_v2  ;;  %v8108_v39 = vpack.c.bf16 %v6565_v36, %v6564_v35  ;;  %v6568_v43 = vld [vmem:[%s10715_s3 + $0x20] sm:$0xff]  ;;  %v6569_v44 = vld [vmem:[%s10715_s3 + $0x28] sm:$0xff]  ;;  %v6570_v46 = vld [vmem:[%s10715_s3 + $0x30] sm:$0xff] }
 0x240   :  { %8026 = vmatpush3.bf16.msra.mxu0 %v8727_v0  ;;  %v8111_v42 = vpack.c.bf16 %v6567_v40, %v6566_v37  ;;  %v8114_v45 = vpack.c.bf16 %v6569_v44, %v6568_v43  ;;  %v6571_v47 = vld [vmem:[%s10715_s3 + $0x38] sm:$0xff]  ;;  %v6572_v49 = vld [vmem:[%s10715_s3 + $0x40] sm:$0xff]  ;;  %v6573_v50 = vld [vmem:[%s10715_s3 + $0x48] sm:$0xff] }
 0x241   :  { %v505_v8 = vpack.c.bf16 %v362_v5, %v362_v5  ;;  %v363_v9 = vcombine.high %v361_v6, %v361_v6  ;;  %8048 = vmatpush3.bf16.msra.mxu1 %v8728_v4  ;;  %v506_v10 = vpack.c.bf16 %v361_v6, %v361_v6  ;;  %8107 = vmatprep.subr.bf16.mxu0 %v8759_v38  ;;  %v6574_v52 = vld [vmem:[%s10715_s3 + $0x50] sm:$0xff]  ;;  %v6575_v53 = vld [vmem:[%s10715_s3 + $0x58] sm:$0xff]  ;;  %v6576_v3 = vld [vmem:[%s10715_s3 + $0x60] sm:$0xff] }
 0x242   :  { %v8117_v48 = vpack.c.bf16 %v6571_v47, %v6570_v46  ;;  %v8120_v51 = vpack.c.bf16 %v6573_v50, %v6572_v49  ;;  %v8123_v54 = vpack.c.bf16 %v6575_v53, %v6574_v52  ;;  %v6577_v4 = vld [vmem:[%s10715_s3 + $0x68] sm:$0xff]  ;;  %v6578_v6 = vld [vmem:[%s10715_s3 + $0x70] sm:$0xff] }
 0x243   :  { %6515 = vmatprep.mubr.bf16.mxu0 %v505_v8  ;;  %v507_v11 = vpack.c.bf16 %v363_v9, %v363_v9  ;;  %v8126_v5 = vpack.c.bf16 %v6577_v4, %v6576_v3  ;;  %v8761_v9 = vmov 0.0  }
 0x244   :  { %6516 = vmatmul.mubr.bf16.vlgmr.msra.gmra.mrb[68].mxu0 %v504_v7  ;;  %v6579_v7 = vld [vmem:[%s10715_s3 + $0x78] sm:$0xff] }
 0x245   :  { %6555 = vmatprep.mubr.bf16.mxu1 %v507_v11  ;;  %8109 = vmatpush3.bf16.msra.mxu0 %v8108_v39  ;;  %v8129_v8 = vpack.c.bf16 %v6579_v7, %v6578_v6 }
 0x246   :  { %6556 = vmatmul.mubr.bf16.vlgmr.msra.gmra.mrb[68].mxu1 %v506_v10  ;;  %8110 = vmatprep.subr.bf16.mxu0 %v8759_v38 }
 0x247   :  { %8104 = vmatprep.mubr.msk.f32.mxu0 %vm8760_vm0, %v8761_v9 }
 0x249   :  { %8112 = vmatpush3.bf16.msra.mxu0 %v8111_v42 }
 0x24a   :  { %8113 = vmatprep.subr.bf16.mxu0 %v8759_v38 }
 0x24d   :  { %8115 = vmatpush3.bf16.msra.mxu0 %v8114_v45 }
 0x24e   :  { %8116 = vmatprep.subr.bf16.mxu0 %v8759_v38 }
 0x251   :  { %8118 = vmatpush3.bf16.msra.mxu0 %v8117_v48 }
 0x252   :  { %8119 = vmatprep.subr.bf16.mxu0 %v8759_v38 }
 0x255   :  { %8121 = vmatpush3.bf16.msra.mxu0 %v8120_v51 }
 0x256   :  { %v7763_v12 = vpop.f32.mrb[44].mxu0  ;;  %8122 = vmatprep.subr.bf16.mxu0 %v8759_v38 }
 0x257   :  { %v7764_v13 = vpop.f32.mrb[45].mxu0  ;;  %v7785_v14 = vpop.f32.mrb[44].mxu1 }
 0x258   :  { %v7765_v15 = vadd.f32 %v7764_v13, %v7763_v12  ;;  %v7766_v16 = vpop.f32.mrb[46].mxu0  ;;  %v7786_v17 = vpop.f32.mrb[45].mxu1 }
 0x259   :  { %v7767_v18 = vpop.f32.mrb[47].mxu0  ;;  %v7787_v41 = vadd.f32 %v7786_v17, %v7785_v14  ;;  %v7788_v20 = vpop.f32.mrb[46].mxu1  ;;  %8124 = vmatpush3.bf16.msra.mxu0 %v8123_v54 }
 0x25a   :  { %v6038_v19 = vadd.f32 %v7765_v15, %v5998_v57  ;;  %v7789_v21 = vpop.f32.mrb[47].mxu1  ;;  %8125 = vmatprep.subr.bf16.mxu0 %v8759_v38 }
 0x25c   :  { %v6078_v22 = vadd.f32 %v7787_v41, %v6038_v19 }
 0x25d   :  { %8127 = vmatpush3.bf16.msra.mxu0 %v8126_v5 }
 0x25e   :  { %8128 = vmatprep.subr.bf16.mxu0 %v8759_v38 }
 0x261   :  { %8130 = vmatpush3.bf16.msra.mxu0 %v8129_v8 }
 0x276   :  { %v7807_v23 = vpop.f32.mrb[48].mxu0 }
 0x277   :  { %v7808_v24 = vpop.f32.mrb[49].mxu0  ;;  %v7829_v25 = vpop.f32.mrb[48].mxu1 }
 0x278   :  { %v7809_v26 = vadd.f32 %v7808_v24, %v7807_v23  ;;  %v7810_v27 = vpop.f32.mrb[50].mxu0  ;;  %v7830_v28 = vpop.f32.mrb[49].mxu1 }
 0x279   :  { %v7811_v29 = vpop.f32.mrb[51].mxu0  ;;  %v7831_v31 = vadd.f32 %v7830_v28, %v7829_v25  ;;  %v7832_v32 = vpop.f32.mrb[50].mxu1 }
 0x27a   :  { %v6118_v30 = vadd.f32 %v7809_v26, %v6078_v22  ;;  %v7833_v33 = vpop.f32.mrb[51].mxu1 }
 0x27c   :  { %v6158_v34 = vadd.f32 %v7831_v31, %v6118_v30 }
 0x296   :  { %v7851_v55 = vpop.f32.mrb[52].mxu0 }
 0x297   :  { %v7852_v56 = vpop.f32.mrb[53].mxu0  ;;  %v7873_v57 = vpop.f32.mrb[52].mxu1 }
 0x298   :  { %v7853_v58 = vadd.f32 %v7852_v56, %v7851_v55  ;;  %v7854_v59 = vpop.f32.mrb[54].mxu0  ;;  %v7874_v60 = vpop.f32.mrb[53].mxu1 }
 0x299   :  { %v7855_v61 = vpop.f32.mrb[55].mxu0  ;;  %v7875_v63 = vadd.f32 %v7874_v60, %v7873_v57  ;;  %v7876_v0 = vpop.f32.mrb[54].mxu1  ;;  %v7262_v59 = vld [vmem:[%s10716_s4] ss:$0 sm:$0xff]  ;;  %s6677_s4 = sshll.u32 %s8762_s10, 4  ;;  %s6678_s4 = int_to_ptr.vmem [resolvable:$true] %s6677_s4 }
 0x29a   :  { %v6198_v62 = vadd.f32 %v7853_v58, %v6158_v34  ;;  %v7877_v1 = vpop.f32.mrb[55].mxu1  ;;  %s8734_s11 = scalar_lea.vmem %s6678_s4, 32  ;;  %p8739_p1 = scmp.lt.s32.totalorder %s6678_s4, %s6678_s4 }
 0x29b   :  { %p8735_p0 = scmp.ne.s32.totalorder %s6678_s4, %s8734_s11  ;;  %p8740_p2 = scmp.lt.s32.totalorder %s8734_s11, %s8734_s11 }
 0x29c   :  { %v6238_v2 = vadd.f32 %v7875_v63, %v6198_v62 }
 0x29d   :  { %p8741_p3 = por %p8740_p2, %p8739_p1 }
 0x29f   :  { %p8742_p4 = pnand %p8741_p3, %p8735_p0 }
 0x2b6   :  { %v7895_v10 = vpop.f32.mrb[56].mxu0 }
 0x2b7   :  { %v7896_v11 = vpop.f32.mrb[57].mxu0  ;;  %v7917_v12 = vpop.f32.mrb[56].mxu1 }
 0x2b8   :  { %v7897_v13 = vadd.f32 %v7896_v11, %v7895_v10  ;;  %v7898_v14 = vpop.f32.mrb[58].mxu0  ;;  %v7918_v15 = vpop.f32.mrb[57].mxu1 }
 0x2b9   :  { %v7899_v16 = vpop.f32.mrb[59].mxu0  ;;  %v7919_v18 = vadd.f32 %v7918_v15, %v7917_v12  ;;  %v7920_v19 = vpop.f32.mrb[58].mxu1 }
 0x2ba   :  { %v6278_v17 = vadd.f32 %v7897_v13, %v6238_v2  ;;  %v7921_v41 = vpop.f32.mrb[59].mxu1 }
 0x2bc   :  { %v6318_v20 = vadd.f32 %v7919_v18, %v6278_v17 }
 0x2d6   :  { %v7939_v21 = vpop.f32.mrb[60].mxu0 }
 0x2d7   :  { %v7940_v22 = vpop.f32.mrb[61].mxu0  ;;  %v7961_v23 = vpop.f32.mrb[60].mxu1 }
 0x2d8   :  { %v7941_v24 = vadd.f32 %v7940_v22, %v7939_v21  ;;  %v7942_v25 = vpop.f32.mrb[62].mxu0  ;;  %v7962_v26 = vpop.f32.mrb[61].mxu1 }
 0x2d9   :  { %v7943_v27 = vpop.f32.mrb[63].mxu0  ;;  %v7963_v29 = vadd.f32 %v7962_v26, %v7961_v23  ;;  %v7964_v30 = vpop.f32.mrb[62].mxu1 }
 0x2da   :  { %v6358_v28 = vadd.f32 %v7941_v24, %v6318_v20  ;;  %v7965_v31 = vpop.f32.mrb[63].mxu1 }
 0x2dc   :  { %v6398_v32 = vadd.f32 %v7963_v29, %v6358_v28 }
 0x2f6   :  { %v7983_v33 = vpop.f32.mrb[64].mxu0 }
 0x2f7   :  { %v7984_v34 = vpop.f32.mrb[65].mxu0  ;;  %v8005_v35 = vpop.f32.mrb[64].mxu1 }
 0x2f8   :  { %v7985_v36 = vadd.f32 %v7984_v34, %v7983_v33  ;;  %v7986_v37 = vpop.f32.mrb[66].mxu0  ;;  %v8006_v38 = vpop.f32.mrb[65].mxu1 }
 0x2f9   :  { %v7987_v39 = vpop.f32.mrb[67].mxu0  ;;  %v8007_v42 = vadd.f32 %v8006_v38, %v8005_v35  ;;  %v8008_v43 = vpop.f32.mrb[66].mxu1 }
 0x2fa   :  { %v6438_v40 = vadd.f32 %v7985_v36, %v6398_v32  ;;  %v8009_v44 = vpop.f32.mrb[67].mxu1 }
 0x2fc   :  { %v6478_v45 = vadd.f32 %v8007_v42, %v6438_v40 }
 0x317   :  { %v8027_v46 = vpop.f32.mrb[68].mxu0 }
 0x318   :  { %v8028_v47 = vpop.f32.mrb[69].mxu0 }
 0x319   :  { %v8049_v48 = vpop.f32.mrb[68].mxu1  ;;  %v8029_v49 = vadd.f32 %v8028_v47, %v8027_v46  ;;  %v8030_v50 = vpop.f32.mrb[70].mxu0 }
 0x31a   :  { %v8050_v51 = vpop.f32.mrb[69].mxu1  ;;  %v8031_v52 = vpop.f32.mrb[71].mxu0 }
 0x31b   :  { %v6518_v53 = vadd.f32 %v8029_v49, %v6478_v45  ;;  %v8051_v54 = vadd.f32 %v8050_v51, %v8049_v48  ;;  %v8052_v55 = vpop.f32.mrb[70].mxu1 }
 0x31c   :  { %v8053_v56 = vpop.f32.mrb[71].mxu1 }
 0x31d   :  { %v6558_v57 = vadd.f32 %v8051_v54, %v6518_v53 }
 0x31f   :  { %v6563_v58 = vmax.f32 %v6558_v57, 0.0 }
 0x321   :  { %8105 = vmatmul.mubr.f32.vlgmr.msra.gmra.mrb[72].mxu0 %v6563_v58 }
 0x3f4   :  { %v6653_v60 = vpop.f32.mrb[72].mxu0 }
 0x3f5   :  { %v6654_v61 = vadd.f32 %v7262_v59, %v6653_v60  ;;  %v8106_v62 = vpop.f32.mrb[73].mxu0 }
 0x3f7   :  { %v6658_v63 = vsel %vm6657_vm1, %v6654_v61, -inf }
 0x3f8   :  { %6659 = vmax.xlane.f32.xlu0 %v6658_v63 }
 0x485   :  { %v6660_v0 = vpop.xlane.xlu0 %6659 }
 0x486   :  { %v6661_v1 = vsub.f32 %v6654_v61, %v6660_v0 }
 0x488   :  { %v6662_v2 = vmul.f32 1.442695, %v6661_v1 }
 0x48a   :  { %8730 = vpow2.f32 %v6662_v2 }
 0x494   :  { %v8731_v3 = vpop.eup %8730 }
 0x495   :  { %v6664_v4 = vsel %vm6657_vm1, %v8731_v3, 0.0 }
 0x496   :  { %6665 = vadd.xlane.f32.xlu0 %v6664_v4 }
 0x523   :  { %v6666_v5 = vpop.xlane.xlu0 %6665 }
 0x524   :  { %8732 = vlog2.f32 %v6666_v5 }
 0x52e   :  { %v8733_v6 = vpop.eup %8732 }
 0x52f   :  { %v6668_v7 = vmul.f32 0.6931472, %v8733_v6 }
 0x531   :  { %v6669_v8 = vsub.f32 %v6661_v1, %v6668_v7 }
 0x533   :  { %6670 = vst.msk [vmem:[#allocation2] sm:$0x3] %vm6657_vm1, %v6669_v8 }
 0x534   :  { %8745 = shalt.err (!%p8742_p4)
}
 0x535   :  { %s8746_s2 = scalar_lea.hbm %s10717_s5, 32 }
 0x536   :  { %p8747_p5 = scmp.ne.s32.totalorder %s10717_s5, %s8746_s2  ;;  %p8750_p6 = scmp.lt.u32.totalorder %s8746_s2, %s10717_s5 }
 0x538   :  { %p8752_p7 = pnand %p8750_p6, %p8747_p5 }
 0x53a   :  { %8755 = shalt.err (!%p8752_p7)
}
 0x53b   :  { %6680 = dma.vmem_to_hbm [thread:$0]  %s6678_s4, 32, %s10717_s5, [#allocation3]  }
 0x53c   :  { %8756 = dma.done.wait [#allocation3], 32  }
 0x53d   :  { %8757 = vsyncadd [#allocation3], 4294967264 }
 0x53e   :  { %6684 = vsyncpa [#allocation3], 1 }

</bundles_post_ra>
